<compile_context>
chip_gen: v6e
topology: v6e:2x2x1
jax: 0.10.0
libtpu: 0.0.40
codegen_flags: <defaults>
</compile_context>

<pallas_src>
import jax
import jax.numpy as jnp
from jax.experimental import pallas as pl
from jax.experimental.pallas import tpu as pltpu


# ----------------------------------------------------------------------------
# Pallas kernel 1: weighted per-batch channel sum, chunked over HW.
# grid = (B, HW//thw). The (Bpad, C) output block is VMEM-resident (constant
# block index); each batch writes its row on its last HW tile. Weights are a
# (HW, 1) column (uniform 1/HW for x2; exact bilinear-adjoint / HW2 for x3/x4).
# ----------------------------------------------------------------------------
def _wsum_kernel(w_ref, x_ref, out_ref, acc_ref):
    b = pl.program_id(0)
    t = pl.program_id(1)

    @pl.when(jnp.logical_and(b == 0, t == 0))
    def _():
        out_ref[...] = jnp.zeros_like(out_ref)   # also zeroes padded batch rows

    @pl.when(t == 0)
    def _():
        acc_ref[...] = jnp.zeros_like(acc_ref)

    # (thw, C) * (thw, 1) -> reduce over sublanes -> (1, C)
    acc_ref[...] += jnp.sum(x_ref[0] * w_ref[...], axis=0, keepdims=True)

    @pl.when(t == pl.num_programs(1) - 1)
    def _():
        out_ref[pl.ds(b, 1), :] = acc_ref[...]


def _pick_hw_tile(hw, c, max_bytes=2 << 20):
    """Largest multiple-of-8 divisor of hw whose (thw, c) f32 tile fits max_bytes."""
    max_tile = max(8, min(512, (max_bytes // (c * 4)) // 8 * 8))
    if hw <= max_tile:
        return hw
    for t in range(max_tile, 7, -8):
        if hw % t == 0:
            return t
    return hw                                   # fallback: full slab (correct)


def weighted_channel_sum(x_r, w_col, b_pad):
    """x_r: (B, HW, C) f32; w_col: (HW, 1) f32 -> (b_pad, C) weighted sums."""
    B, HW, C = x_r.shape
    thw = _pick_hw_tile(HW, C)
    n_t = HW // thw
    return pl.pallas_call(
        _wsum_kernel,
        out_shape=jax.ShapeDtypeStruct((b_pad, C), jnp.float32),
        grid_spec=pltpu.PrefetchScalarGridSpec(
            num_scalar_prefetch=0,
            grid=(B, n_t),
            in_specs=[
                pl.BlockSpec((thw, 1), lambda b, t: (t, 0)),
                pl.BlockSpec((1, thw, C), lambda b, t: (b, t, 0)),
            ],
            out_specs=pl.BlockSpec((b_pad, C), lambda b, t: (0, 0)),
            scratch_shapes=[pltpu.VMEM((1, C), jnp.float32)],
        ),
        compiler_params=pltpu.CompilerParams(
            dimension_semantics=("arbitrary", "arbitrary")),
    )(w_col, x_r)


# ----------------------------------------------------------------------------
# Pallas kernel 2: fused head on (Bpad, Cin) channel means.
#   - K-tiled matmul with W_fuse^T (bf16 operands, f32 accumulator scratch)
#   - SE: fc(C->C/16, no bias) -> ReLU -> fc(C/16->C, no bias) -> sigmoid
#   - pooled = m_fused * y  (== GAP of the excited map, exact identity)
#   - classifier Linear(C -> NC), NC padded to 128 for lane-dense stores
#   - Dropout(0.25) is identity at inference
# ----------------------------------------------------------------------------
def _head_kernel(mcat_ref, wf_ref, w1_ref, w2_ref, wc_ref, bc_ref,
                 out_ref, acc_ref):
    k = pl.program_id(0)

    @pl.when(k == 0)
    def _():
        acc_ref[...] = jnp.zeros_like(acc_ref)

    acc_ref[...] += jnp.dot(mcat_ref[...].astype(jnp.bfloat16), wf_ref[...],
                            preferred_element_type=jnp.float32)

    @pl.when(k == pl.num_programs(0) - 1)
    def _():
        m_fused = acc_ref[...]                                       # (Bpad, CF)
        h = jnp.maximum(
            jnp.dot(m_fused, w1_ref[...], preferred_element_type=jnp.float32),
            0.0)
        y = jax.nn.sigmoid(
            jnp.dot(h, w2_ref[...], preferred_element_type=jnp.float32))
        pooled = m_fused * y                                         # SE scale
        out_ref[...] = (jnp.dot(pooled, wc_ref[...],
                                preferred_element_type=jnp.float32)
                        + bc_ref[...])


def fused_head(mcat_pad, wf_bf16, w1t, w2t, wct_pad, bc_pad, *, tk=512):
    Bpad, Cin = mcat_pad.shape
    CF = wf_bf16.shape[1]
    CR = w1t.shape[1]
    NCpad = wct_pad.shape[1]
    if Cin % tk != 0:
        tk = 128 if Cin % 128 == 0 else Cin
    n_k = Cin // tk
    return pl.pallas_call(
        _head_kernel,
        out_shape=jax.ShapeDtypeStruct((Bpad, NCpad), jnp.float32),
        grid_spec=pltpu.PrefetchScalarGridSpec(
            num_scalar_prefetch=0,
            grid=(n_k,),
            in_specs=[
                pl.BlockSpec((Bpad, tk), lambda k: (0, k)),
                pl.BlockSpec((tk, CF), lambda k: (k, 0)),
                pl.BlockSpec((CF, CR), lambda k: (0, 0)),
                pl.BlockSpec((CR, CF), lambda k: (0, 0)),
                pl.BlockSpec((CF, NCpad), lambda k: (0, 0)),
                pl.BlockSpec((1, NCpad), lambda k: (0, 0)),
            ],
            out_specs=pl.BlockSpec((Bpad, NCpad), lambda k: (0, 0)),
            scratch_shapes=[pltpu.VMEM((Bpad, CF), jnp.float32)],
        ),
        compiler_params=pltpu.CompilerParams(
            dimension_semantics=("arbitrary",)),
    )(mcat_pad, wf_bf16, w1t, w2t, wct_pad, bc_pad)


# ----------------------------------------------------------------------------
# Glue: synthetic backbone feature pyramid + exact upsample-mean weights
# ----------------------------------------------------------------------------
def synthetic_backbone_features(x_nchw, params):
    # Shape-faithful stand-in for the ResNeSt-101e stages (avg-pool + 1x1 proj).
    x = jnp.transpose(x_nchw, (0, 2, 3, 1))  # NCHW -> NHWC

    def pool(z, k):
        B, H, W, C = z.shape
        return z.reshape(B, H // k, k, W // k, k, C).mean(axis=(2, 4))

    x2 = jax.nn.relu(pool(x, 8) @ params["p2"])    # (B, H/8,  W/8,  512)
    x3 = jax.nn.relu(pool(x, 16) @ params["p3"])   # (B, H/16, W/16, 1024)
    x4 = jax.nn.relu(pool(x, 32) @ params["p4"])   # (B, H/32, W/32, 2048)
    return x2, x3, x4


def _upsample_mean_weights(h_in, w_in, h_out, w_out):
    """Per-input-pixel weights s.t. mean_HW(bilinear_resize(x)) == sum_p w[p] x[p].
    Exact: adjoint of the (linear) resize applied to a ones cotangent, / (Hout*Wout)."""
    def up(z):
        return jax.image.resize(z, (h_out, w_out), method="bilinear")
    _, vjp_fn = jax.vjp(up, jnp.zeros((h_in, w_in), jnp.float32))
    (w,) = vjp_fn(jnp.ones((h_out, w_out), jnp.float32))
    return w / (h_out * w_out)


@jax.jit
def multiscale_resnest_se_forward(x_nchw, params):
    x2, x3, x4 = synthetic_backbone_features(x_nchw, params)
    B, H2, W2, C2 = x2.shape
    _, H3, W3, C3 = x3.shape
    _, H4, W4, C4 = x4.shape
    b_pad = ((B + 7) // 8) * 8

    # Exact mean-of-upsampled weights (uniform for the native-resolution level).
    w2m = jnp.full((H2 * W2, 1), 1.0 / (H2 * W2), jnp.float32)
    w3m = _upsample_mean_weights(H3, W3, H2, W2).reshape(H3 * W3, 1)
    w4m = _upsample_mean_weights(H4, W4, H2, W2).reshape(H4 * W4, 1)

    # Kernel 1 (x3): per-batch weighted channel sums; x3_up/x4_up/x_cat never built.
    m2 = weighted_channel_sum(x2.reshape(B, H2 * W2, C2), w2m, b_pad)
    m3 = weighted_channel_sum(x3.reshape(B, H3 * W3, C3), w3m, b_pad)
    m4 = weighted_channel_sum(x4.reshape(B, H4 * W4, C4), w4m, b_pad)
    mcat_pad = jnp.concatenate([m2, m3, m4], axis=-1)        # (Bpad, 3584)

    # Pad classifier to a lane-dense 128-wide output; slice after the kernel.
    NC = params["wc_t"].shape[1]
    nc_pad = ((NC + 127) // 128) * 128
    wct_pad = jnp.pad(params["wc_t"], ((0, 0), (0, nc_pad - NC)))
    bc_pad = jnp.pad(params["bc"], ((0, 0), (0, nc_pad - NC)))

    # Kernel 2: fuse-conv (on means) + SE + classifier, batched over B.
    logits_pad = fused_head(mcat_pad, params["w_fuse_t_bf16"],
                            params["w1_t"], params["w2_t"],
                            wct_pad, bc_pad)                  # (Bpad, 128)
    return logits_pad[:B, :NC]


@jax.jit
def reference_forward(x_nchw, params):
    """Pure-JAX f32 reference of the original (unsimplified) forward math."""
    x2, x3, x4 = synthetic_backbone_features(x_nchw, params)
    B, H2, W2, _ = x2.shape
    x3_up = jax.image.resize(x3, (B, H2, W2, x3.shape[-1]), method="bilinear")
    x4_up = jax.image.resize(x4, (B, H2, W2, x4.shape[-1]), method="bilinear")
    x_cat = jnp.concatenate([x2, x3_up, x4_up], axis=-1)      # (B, H2, W2, 3584)
    x_flat = x_cat.reshape(B * H2 * W2, x_cat.shape[-1])
    fused = (x_flat @ params["w_fuse_t"]).reshape(B, H2 * W2, -1)
    m = fused.mean(axis=1)                                    # SE squeeze
    y = jax.nn.sigmoid(jax.nn.relu(m @ params["w1_t"]) @ params["w2_t"])
    x_se = fused * y[:, None, :]
    pooled = x_se.mean(axis=1)                                # GAP
    return pooled @ params["wc_t"] + params["bc"]             # classifier


def init_params(key, num_classes=100):
    C2, C3, C4 = 512, 1024, 2048
    CIN = C2 + C3 + C4            # 3584
    CF = 2048                     # fuse_conv output channels
    CR = CF // 16                 # SE reduction
    ks = jax.random.split(key, 8)
    s = 0.05
    w_fuse_t = jax.random.normal(ks[3], (CIN, CF), jnp.float32) * (s / 8)
    return dict(
        p2=jax.random.normal(ks[0], (3, C2), jnp.float32) * s,
        p3=jax.random.normal(ks[1], (3, C3), jnp.float32) * s,
        p4=jax.random.normal(ks[2], (3, C4), jnp.float32) * s,
        # Conv2d(3584, 2048, 1, bias=False) weight, stored transposed (Cin, Cout)
        w_fuse_t=w_fuse_t,
        w_fuse_t_bf16=w_fuse_t.astype(jnp.bfloat16),   # bf16 MXU operand
        # SE fc weights, stored transposed for row-vector matmuls
        w1_t=jax.random.normal(ks[4], (CF, CR), jnp.float32) * s,
        w2_t=jax.random.normal(ks[5], (CR, CF), jnp.float32) * s,
        # classifier Linear(2048, num_classes) weight^T and bias (as (1, NC))
        wc_t=jax.random.normal(ks[6], (CF, num_classes), jnp.float32) * s,
        bc=jax.random.normal(ks[7], (1, num_classes), jnp.float32) * s,
    )


if __name__ == "__main__":
    key = jax.random.PRNGKey(0)
    kx, kp = jax.random.split(key)
    # NCHW input (spatial must be a multiple of 32 for the /32 pyramid level).
    x = jax.random.normal(kx, (2, 3, 64, 64), jnp.float32)
    params = init_params(kp, num_classes=100)

    logits = multiscale_resnest_se_forward(x, params)
    logits = jax.block_until_ready(logits)
    assert logits.shape == (2, 100), logits.shape

    ref = jax.block_until_ready(reference_forward(x, params))
    assert jnp.allclose(logits, ref, rtol=1e-2, atol=1e-2), "mismatch vs reference"

    print("KERNEL_OK")
</pallas_src>

<mosaic_0001>
module attributes {stable_mosaic.version = 11 : i64} {
  func.func @_wsum_kernel(%arg0: i32, %arg1: i32, %arg2: memref<4x1xf32, #tpu.memory_space<vmem>>, %arg3: memref<1x4x2048xf32, #tpu.memory_space<vmem>>, %arg4: memref<8x2048xf32, #tpu.memory_space<vmem>>, %arg5: memref<1x2048xf32, #tpu.memory_space<vmem>>) attributes {dimension_semantics = [#tpu.dimension_semantics<arbitrary>, #tpu.dimension_semantics<arbitrary>], iteration_bounds = array<i64: 2, 1>, scalar_prefetch = 0 : i64, scratch_operands = 1 : i64, tpu.core_type = #tpu.core_type<tc>, window_params = [{transform_indices = @transform_0, window_bounds = array<i64: 4, 1>}, {transform_indices = @transform_1, window_bounds = array<i64: 1, 4, 2048>}, {pipeline_mode = #tpu.pipeline_mode<synchronous>, transform_indices = @transform_2, window_bounds = array<i64: 8, 2048>}]} {
    %c0_i32 = arith.constant 0 : i32
    %0 = arith.cmpi eq, %arg0, %c0_i32 : i32
    %c0_i32_0 = arith.constant 0 : i32
    %1 = arith.cmpi eq, %arg1, %c0_i32_0 : i32
    %2 = arith.andi %0, %1 : i1
    %3 = arith.extui %2 : i1 to i32
    %c0_i32_1 = arith.constant 0 : i32
    %4 = arith.cmpi ne, %3, %c0_i32_1 : i32
    scf.if %4 {
      %cst_14 = arith.constant 0.000000e+00 : f32
      %21 = vector.broadcast %cst_14 : f32 to vector<8x2048xf32>
      %c0_15 = arith.constant 0 : index
      %c0_16 = arith.constant 0 : index
      %22 = vector.load %arg4[%c0_15, %c0_16] : memref<8x2048xf32, #tpu.memory_space<vmem>>, vector<8x2048xf32>
      tpu.vector_store %arg4[%c0_15, %c0_16], %21 {strides = array<i32>} : memref<8x2048xf32, #tpu.memory_space<vmem>>, vector<8x2048xf32>,
    } else {
    }
    %c0_i32_2 = arith.constant 0 : i32
    %5 = arith.cmpi eq, %arg1, %c0_i32_2 : i32
    %6 = arith.extui %5 : i1 to i32
    %c0_i32_3 = arith.constant 0 : i32
    %7 = arith.cmpi ne, %6, %c0_i32_3 : i32
    scf.if %7 {
      %cst_14 = arith.constant 0.000000e+00 : f32
      %21 = vector.broadcast %cst_14 : f32 to vector<1x2048xf32>
      %c0_15 = arith.constant 0 : index
      %c0_16 = arith.constant 0 : index
      %22 = vector.load %arg5[%c0_15, %c0_16] : memref<1x2048xf32, #tpu.memory_space<vmem>>, vector<1x2048xf32>
      tpu.vector_store %arg5[%c0_15, %c0_16], %21 {strides = array<i32>} : memref<1x2048xf32, #tpu.memory_space<vmem>>, vector<1x2048xf32>,
    } else {
    }
    %c0 = arith.constant 0 : index
    %c0_4 = arith.constant 0 : index
    %8 = vector.load %arg5[%c0, %c0_4] : memref<1x2048xf32, #tpu.memory_space<vmem>>, vector<1x2048xf32>
    %c0_5 = arith.constant 0 : index
    %c0_6 = arith.constant 0 : index
    %c0_7 = arith.constant 0 : index
    %9 = vector.load %arg3[%c0_5, %c0_6, %c0_7] : memref<1x4x2048xf32, #tpu.memory_space<vmem>>, vector<1x4x2048xf32>
    %10 = vector.shape_cast %9 : vector<1x4x2048xf32> to vector<4x2048xf32>
    %c0_8 = arith.constant 0 : index
    %c0_9 = arith.constant 0 : index
    %11 = vector.load %arg2[%c0_8, %c0_9] : memref<4x1xf32, #tpu.memory_space<vmem>>, vector<4x1xf32>
    %12 = vector.broadcast %11 : vector<4x1xf32> to vector<4x2048xf32>
    %13 = arith.mulf %10, %12 : vector<4x2048xf32>
    %cst = arith.constant dense<0.000000e+00> : vector<2048xf32>
    %14 = vector.multi_reduction <add>, %13, %cst [0] : vector<4x2048xf32> to vector<2048xf32>
    %15 = vector.shape_cast %14 : vector<2048xf32> to vector<1x2048xf32>
    %16 = arith.addf %8, %15 : vector<1x2048xf32>
    %c0_10 = arith.constant 0 : index
    %c0_11 = arith.constant 0 : index
    %17 = vector.load %arg5[%c0_10, %c0_11] : memref<1x2048xf32, #tpu.memory_space<vmem>>, vector<1x2048xf32>
    tpu.vector_store %arg5[%c0_10, %c0_11], %16 {strides = array<i32>} : memref<1x2048xf32, #tpu.memory_space<vmem>>, vector<1x2048xf32>,
    %c0_i32_12 = arith.constant 0 : i32
    %18 = arith.cmpi eq, %arg1, %c0_i32_12 : i32
    %19 = arith.extui %18 : i1 to i32
    %c0_i32_13 = arith.constant 0 : i32
    %20 = arith.cmpi ne, %19, %c0_i32_13 : i32
    scf.if %20 {
      %c0_14 = arith.constant 0 : index
      %c0_15 = arith.constant 0 : index
      %21 = vector.load %arg5[%c0_14, %c0_15] : memref<1x2048xf32, #tpu.memory_space<vmem>>, vector<1x2048xf32>
      %22 = arith.index_cast %arg0 : i32 to index
      %c0_16 = arith.constant 0 : index
      %23 = vector.load %arg4[%22, %c0_16] : memref<8x2048xf32, #tpu.memory_space<vmem>>, vector<1x2048xf32>
      tpu.vector_store %arg4[%22, %c0_16], %21 {strides = array<i32>} : memref<8x2048xf32, #tpu.memory_space<vmem>>, vector<1x2048xf32>,
    } else {
    }
    return
  }
  func.func @transform_0(%arg0: i32, %arg1: i32) -> (i32, i32) {
    %c0_i32 = arith.constant 0 : i32
    %c0_i32_0 = arith.constant 0 : i32
    return %arg1, %c0_i32 : i32, i32
  }
  func.func @transform_1(%arg0: i32, %arg1: i32) -> (i32, i32, i32) {
    %c0_i32 = arith.constant 0 : i32
    %c0_i32_0 = arith.constant 0 : i32
    return %arg0, %arg1, %c0_i32 : i32, i32, i32
  }
  func.func @transform_2(%arg0: i32, %arg1: i32) -> (i32, i32) {
    %c0_i32 = arith.constant 0 : i32
    %c0_i32_0 = arith.constant 0 : i32
    %c0_i32_1 = arith.constant 0 : i32
    return %c0_i32, %c0_i32_0 : i32, i32
  }
}

module attributes {stable_mosaic.version = 11 : i64} {
  func.func @_wsum_kernel(%arg0: i32, %arg1: i32, %arg2: memref<16x1xf32, #tpu.memory_space<vmem>>, %arg3: memref<1x16x1024xf32, #tpu.memory_space<vmem>>, %arg4: memref<8x1024xf32, #tpu.memory_space<vmem>>, %arg5: memref<1x1024xf32, #tpu.memory_space<vmem>>) attributes {dimension_semantics = [#tpu.dimension_semantics<arbitrary>, #tpu.dimension_semantics<arbitrary>], iteration_bounds = array<i64: 2, 1>, scalar_prefetch = 0 : i64, scratch_operands = 1 : i64, tpu.core_type = #tpu.core_type<tc>, window_params = [{transform_indices = @transform_0, window_bounds = array<i64: 16, 1>}, {transform_indices = @transform_1, window_bounds = array<i64: 1, 16, 1024>}, {pipeline_mode = #tpu.pipeline_mode<synchronous>, transform_indices = @transform_2, window_bounds = array<i64: 8, 1024>}]} {
    %c0_i32 = arith.constant 0 : i32
    %0 = arith.cmpi eq, %arg0, %c0_i32 : i32
    %c0_i32_0 = arith.constant 0 : i32
    %1 = arith.cmpi eq, %arg1, %c0_i32_0 : i32
    %2 = arith.andi %0, %1 : i1
    %3 = arith.extui %2 : i1 to i32
    %c0_i32_1 = arith.constant 0 : i32
    %4 = arith.cmpi ne, %3, %c0_i32_1 : i32
    scf.if %4 {
      %cst_14 = arith.constant 0.000000e+00 : f32
      %21 = vector.broadcast %cst_14 : f32 to vector<8x1024xf32>
      %c0_15 = arith.constant 0 : index
      %c0_16 = arith.constant 0 : index
      %22 = vector.load %arg4[%c0_15, %c0_16] : memref<8x1024xf32, #tpu.memory_space<vmem>>, vector<8x1024xf32>
      tpu.vector_store %arg4[%c0_15, %c0_16], %21 {strides = array<i32>} : memref<8x1024xf32, #tpu.memory_space<vmem>>, vector<8x1024xf32>,
    } else {
    }
    %c0_i32_2 = arith.constant 0 : i32
    %5 = arith.cmpi eq, %arg1, %c0_i32_2 : i32
    %6 = arith.extui %5 : i1 to i32
    %c0_i32_3 = arith.constant 0 : i32
    %7 = arith.cmpi ne, %6, %c0_i32_3 : i32
    scf.if %7 {
      %cst_14 = arith.constant 0.000000e+00 : f32
      %21 = vector.broadcast %cst_14 : f32 to vector<1x1024xf32>
      %c0_15 = arith.constant 0 : index
      %c0_16 = arith.constant 0 : index
      %22 = vector.load %arg5[%c0_15, %c0_16] : memref<1x1024xf32, #tpu.memory_space<vmem>>, vector<1x1024xf32>
      tpu.vector_store %arg5[%c0_15, %c0_16], %21 {strides = array<i32>} : memref<1x1024xf32, #tpu.memory_space<vmem>>, vector<1x1024xf32>,
    } else {
    }
    %c0 = arith.constant 0 : index
    %c0_4 = arith.constant 0 : index
    %8 = vector.load %arg5[%c0, %c0_4] : memref<1x1024xf32, #tpu.memory_space<vmem>>, vector<1x1024xf32>
    %c0_5 = arith.constant 0 : index
    %c0_6 = arith.constant 0 : index
    %c0_7 = arith.constant 0 : index
    %9 = vector.load %arg3[%c0_5, %c0_6, %c0_7] : memref<1x16x1024xf32, #tpu.memory_space<vmem>>, vector<1x16x1024xf32>
    %10 = vector.shape_cast %9 : vector<1x16x1024xf32> to vector<16x1024xf32>
    %c0_8 = arith.constant 0 : index
    %c0_9 = arith.constant 0 : index
    %11 = vector.load %arg2[%c0_8, %c0_9] : memref<16x1xf32, #tpu.memory_space<vmem>>, vector<16x1xf32>
    %12 = vector.broadcast %11 : vector<16x1xf32> to vector<16x1024xf32>
    %13 = arith.mulf %10, %12 : vector<16x1024xf32>
    %cst = arith.constant dense<0.000000e+00> : vector<1024xf32>
    %14 = vector.multi_reduction <add>, %13, %cst [0] : vector<16x1024xf32> to vector<1024xf32>
    %15 = vector.shape_cast %14 : vector<1024xf32> to vector<1x1024xf32>
    %16 = arith.addf %8, %15 : vector<1x1024xf32>
    %c0_10 = arith.constant 0 : index
    %c0_11 = arith.constant 0 : index
    %17 = vector.load %arg5[%c0_10, %c0_11] : memref<1x1024xf32, #tpu.memory_space<vmem>>, vector<1x1024xf32>
    tpu.vector_store %arg5[%c0_10, %c0_11], %16 {strides = array<i32>} : memref<1x1024xf32, #tpu.memory_space<vmem>>, vector<1x1024xf32>,
    %c0_i32_12 = arith.constant 0 : i32
    %18 = arith.cmpi eq, %arg1, %c0_i32_12 : i32
    %19 = arith.extui %18 : i1 to i32
    %c0_i32_13 = arith.constant 0 : i32
    %20 = arith.cmpi ne, %19, %c0_i32_13 : i32
    scf.if %20 {
      %c0_14 = arith.constant 0 : index
      %c0_15 = arith.constant 0 : index
      %21 = vector.load %arg5[%c0_14, %c0_15] : memref<1x1024xf32, #tpu.memory_space<vmem>>, vector<1x1024xf32>
      %22 = arith.index_cast %arg0 : i32 to index
      %c0_16 = arith.constant 0 : index
      %23 = vector.load %arg4[%22, %c0_16] : memref<8x1024xf32, #tpu.memory_space<vmem>>, vector<1x1024xf32>
      tpu.vector_store %arg4[%22, %c0_16], %21 {strides = array<i32>} : memref<8x1024xf32, #tpu.memory_space<vmem>>, vector<1x1024xf32>,
    } else {
    }
    return
  }
  func.func @transform_0(%arg0: i32, %arg1: i32) -> (i32, i32) {
    %c0_i32 = arith.constant 0 : i32
    %c0_i32_0 = arith.constant 0 : i32
    return %arg1, %c0_i32 : i32, i32
  }
  func.func @transform_1(%arg0: i32, %arg1: i32) -> (i32, i32, i32) {
    %c0_i32 = arith.constant 0 : i32
    %c0_i32_0 = arith.constant 0 : i32
    return %arg0, %arg1, %c0_i32 : i32, i32, i32
  }
  func.func @transform_2(%arg0: i32, %arg1: i32) -> (i32, i32) {
    %c0_i32 = arith.constant 0 : i32
    %c0_i32_0 = arith.constant 0 : i32
    %c0_i32_1 = arith.constant 0 : i32
    return %c0_i32, %c0_i32_0 : i32, i32
  }
}

module attributes {stable_mosaic.version = 11 : i64} {
  func.func @_wsum_kernel(%arg0: i32, %arg1: i32, %arg2: memref<64x1xf32, #tpu.memory_space<vmem>>, %arg3: memref<1x64x512xf32, #tpu.memory_space<vmem>>, %arg4: memref<8x512xf32, #tpu.memory_space<vmem>>, %arg5: memref<1x512xf32, #tpu.memory_space<vmem>>) attributes {dimension_semantics = [#tpu.dimension_semantics<arbitrary>, #tpu.dimension_semantics<arbitrary>], iteration_bounds = array<i64: 2, 1>, scalar_prefetch = 0 : i64, scratch_operands = 1 : i64, tpu.core_type = #tpu.core_type<tc>, window_params = [{transform_indices = @transform_0, window_bounds = array<i64: 64, 1>}, {transform_indices = @transform_1, window_bounds = array<i64: 1, 64, 512>}, {pipeline_mode = #tpu.pipeline_mode<synchronous>, transform_indices = @transform_2, window_bounds = array<i64: 8, 512>}]} {
    %c0_i32 = arith.constant 0 : i32
    %0 = arith.cmpi eq, %arg0, %c0_i32 : i32
    %c0_i32_0 = arith.constant 0 : i32
    %1 = arith.cmpi eq, %arg1, %c0_i32_0 : i32
    %2 = arith.andi %0, %1 : i1
    %3 = arith.extui %2 : i1 to i32
    %c0_i32_1 = arith.constant 0 : i32
    %4 = arith.cmpi ne, %3, %c0_i32_1 : i32
    scf.if %4 {
      %cst_14 = arith.constant 0.000000e+00 : f32
      %21 = vector.broadcast %cst_14 : f32 to vector<8x512xf32>
      %c0_15 = arith.constant 0 : index
      %c0_16 = arith.constant 0 : index
      %22 = vector.load %arg4[%c0_15, %c0_16] : memref<8x512xf32, #tpu.memory_space<vmem>>, vector<8x512xf32>
      tpu.vector_store %arg4[%c0_15, %c0_16], %21 {strides = array<i32>} : memref<8x512xf32, #tpu.memory_space<vmem>>, vector<8x512xf32>,
    } else {
    }
    %c0_i32_2 = arith.constant 0 : i32
    %5 = arith.cmpi eq, %arg1, %c0_i32_2 : i32
    %6 = arith.extui %5 : i1 to i32
    %c0_i32_3 = arith.constant 0 : i32
    %7 = arith.cmpi ne, %6, %c0_i32_3 : i32
    scf.if %7 {
      %cst_14 = arith.constant 0.000000e+00 : f32
      %21 = vector.broadcast %cst_14 : f32 to vector<1x512xf32>
      %c0_15 = arith.constant 0 : index
      %c0_16 = arith.constant 0 : index
      %22 = vector.load %arg5[%c0_15, %c0_16] : memref<1x512xf32, #tpu.memory_space<vmem>>, vector<1x512xf32>
      tpu.vector_store %arg5[%c0_15, %c0_16], %21 {strides = array<i32>} : memref<1x512xf32, #tpu.memory_space<vmem>>, vector<1x512xf32>,
    } else {
    }
    %c0 = arith.constant 0 : index
    %c0_4 = arith.constant 0 : index
    %8 = vector.load %arg5[%c0, %c0_4] : memref<1x512xf32, #tpu.memory_space<vmem>>, vector<1x512xf32>
    %c0_5 = arith.constant 0 : index
    %c0_6 = arith.constant 0 : index
    %c0_7 = arith.constant 0 : index
    %9 = vector.load %arg3[%c0_5, %c0_6, %c0_7] : memref<1x64x512xf32, #tpu.memory_space<vmem>>, vector<1x64x512xf32>
    %10 = vector.shape_cast %9 : vector<1x64x512xf32> to vector<64x512xf32>
    %c0_8 = arith.constant 0 : index
    %c0_9 = arith.constant 0 : index
    %11 = vector.load %arg2[%c0_8, %c0_9] : memref<64x1xf32, #tpu.memory_space<vmem>>, vector<64x1xf32>
    %12 = vector.broadcast %11 : vector<64x1xf32> to vector<64x512xf32>
    %13 = arith.mulf %10, %12 : vector<64x512xf32>
    %cst = arith.constant dense<0.000000e+00> : vector<512xf32>
    %14 = vector.multi_reduction <add>, %13, %cst [0] : vector<64x512xf32> to vector<512xf32>
    %15 = vector.shape_cast %14 : vector<512xf32> to vector<1x512xf32>
    %16 = arith.addf %8, %15 : vector<1x512xf32>
    %c0_10 = arith.constant 0 : index
    %c0_11 = arith.constant 0 : index
    %17 = vector.load %arg5[%c0_10, %c0_11] : memref<1x512xf32, #tpu.memory_space<vmem>>, vector<1x512xf32>
    tpu.vector_store %arg5[%c0_10, %c0_11], %16 {strides = array<i32>} : memref<1x512xf32, #tpu.memory_space<vmem>>, vector<1x512xf32>,
    %c0_i32_12 = arith.constant 0 : i32
    %18 = arith.cmpi eq, %arg1, %c0_i32_12 : i32
    %19 = arith.extui %18 : i1 to i32
    %c0_i32_13 = arith.constant 0 : i32
    %20 = arith.cmpi ne, %19, %c0_i32_13 : i32
    scf.if %20 {
      %c0_14 = arith.constant 0 : index
      %c0_15 = arith.constant 0 : index
      %21 = vector.load %arg5[%c0_14, %c0_15] : memref<1x512xf32, #tpu.memory_space<vmem>>, vector<1x512xf32>
      %22 = arith.index_cast %arg0 : i32 to index
      %c0_16 = arith.constant 0 : index
      %23 = vector.load %arg4[%22, %c0_16] : memref<8x512xf32, #tpu.memory_space<vmem>>, vector<1x512xf32>
      tpu.vector_store %arg4[%22, %c0_16], %21 {strides = array<i32>} : memref<8x512xf32, #tpu.memory_space<vmem>>, vector<1x512xf32>,
    } else {
    }
    return
  }
  func.func @transform_0(%arg0: i32, %arg1: i32) -> (i32, i32) {
    %c0_i32 = arith.constant 0 : i32
    %c0_i32_0 = arith.constant 0 : i32
    return %arg1, %c0_i32 : i32, i32
  }
  func.func @transform_1(%arg0: i32, %arg1: i32) -> (i32, i32, i32) {
    %c0_i32 = arith.constant 0 : i32
    %c0_i32_0 = arith.constant 0 : i32
    return %arg0, %arg1, %c0_i32 : i32, i32, i32
  }
  func.func @transform_2(%arg0: i32, %arg1: i32) -> (i32, i32) {
    %c0_i32 = arith.constant 0 : i32
    %c0_i32_0 = arith.constant 0 : i32
    %c0_i32_1 = arith.constant 0 : i32
    return %c0_i32, %c0_i32_0 : i32, i32
  }
}

module attributes {stable_mosaic.version = 11 : i64} {
  func.func @_head_kernel(%arg0: i32, %arg1: memref<8x512xf32, #tpu.memory_space<vmem>>, %arg2: memref<512x2048xbf16, #tpu.memory_space<vmem>>, %arg3: memref<2048x128xf32, #tpu.memory_space<vmem>>, %arg4: memref<128x2048xf32, #tpu.memory_space<vmem>>, %arg5: memref<2048x128xf32, #tpu.memory_space<vmem>>, %arg6: memref<1x128xf32, #tpu.memory_space<vmem>>, %arg7: memref<8x128xf32, #tpu.memory_space<vmem>>, %arg8: memref<8x2048xf32, #tpu.memory_space<vmem>>) attributes {dimension_semantics = [#tpu.dimension_semantics<arbitrary>], iteration_bounds = array<i64: 7>, scalar_prefetch = 0 : i64, scratch_operands = 1 : i64, tpu.core_type = #tpu.core_type<tc>, window_params = [{transform_indices = @transform_0, window_bounds = array<i64: 8, 512>}, {transform_indices = @transform_1, window_bounds = array<i64: 512, 2048>}, {pipeline_mode = #tpu.pipeline_mode<synchronous>, transform_indices = @transform_2, window_bounds = array<i64: 2048, 128>}, {pipeline_mode = #tpu.pipeline_mode<synchronous>, transform_indices = @transform_3, window_bounds = array<i64: 128, 2048>}, {pipeline_mode = #tpu.pipeline_mode<synchronous>, transform_indices = @transform_4, window_bounds = array<i64: 2048, 128>}, {pipeline_mode = #tpu.pipeline_mode<synchronous>, transform_indices = @transform_5, window_bounds = array<i64: 1, 128>}, {pipeline_mode = #tpu.pipeline_mode<synchronous>, transform_indices = @transform_6, window_bounds = array<i64: 8, 128>}]} {
    %c0_i32 = arith.constant 0 : i32
    %0 = arith.cmpi eq, %arg0, %c0_i32 : i32
    %1 = arith.extui %0 : i1 to i32
    %c0_i32_0 = arith.constant 0 : i32
    %2 = arith.cmpi ne, %1, %c0_i32_0 : i32
    scf.if %2 {
      %cst_9 = arith.constant 0.000000e+00 : f32
      %13 = vector.broadcast %cst_9 : f32 to vector<8x2048xf32>
      %c0_10 = arith.constant 0 : index
      %c0_11 = arith.constant 0 : index
      %14 = vector.load %arg8[%c0_10, %c0_11] : memref<8x2048xf32, #tpu.memory_space<vmem>>, vector<8x2048xf32>
      tpu.vector_store %arg8[%c0_10, %c0_11], %13 {strides = array<i32>} : memref<8x2048xf32, #tpu.memory_space<vmem>>, vector<8x2048xf32>,
    } else {
    }
    %c0 = arith.constant 0 : index
    %c0_1 = arith.constant 0 : index
    %3 = vector.load %arg8[%c0, %c0_1] : memref<8x2048xf32, #tpu.memory_space<vmem>>, vector<8x2048xf32>
    %c0_2 = arith.constant 0 : index
    %c0_3 = arith.constant 0 : index
    %4 = vector.load %arg1[%c0_2, %c0_3] : memref<8x512xf32, #tpu.memory_space<vmem>>, vector<8x512xf32>
    %5 = arith.truncf %4 : vector<8x512xf32> to vector<8x512xbf16>
    %c0_4 = arith.constant 0 : index
    %c0_5 = arith.constant 0 : index
    %6 = vector.load %arg2[%c0_4, %c0_5] : memref<512x2048xbf16, #tpu.memory_space<vmem>>, vector<512x2048xbf16>
    %cst = arith.constant dense<0.000000e+00> : vector<8x2048xf32>
    %7 = tpu.matmul %5, %6, %cst {dimension_numbers = #tpu.dot_dimension_numbers<[1], [0], [0], [1], [0, 0, 1, 1], [], []>} : vector<8x512xbf16>, vector<512x2048xbf16>, vector<8x2048xf32> -> vector<8x2048xf32>
    %8 = arith.addf %3, %7 : vector<8x2048xf32>
    %c0_6 = arith.constant 0 : index
    %c0_7 = arith.constant 0 : index
    %9 = vector.load %arg8[%c0_6, %c0_7] : memref<8x2048xf32, #tpu.memory_space<vmem>>, vector<8x2048xf32>
    tpu.vector_store %arg8[%c0_6, %c0_7], %8 {strides = array<i32>} : memref<8x2048xf32, #tpu.memory_space<vmem>>, vector<8x2048xf32>,
    %c6_i32 = arith.constant 6 : i32
    %10 = arith.cmpi eq, %arg0, %c6_i32 : i32
    %11 = arith.extui %10 : i1 to i32
    %c0_i32_8 = arith.constant 0 : i32
    %12 = arith.cmpi ne, %11, %c0_i32_8 : i32
    scf.if %12 {
      %c0_9 = arith.constant 0 : index
      %c0_10 = arith.constant 0 : index
      %13 = vector.load %arg8[%c0_9, %c0_10] : memref<8x2048xf32, #tpu.memory_space<vmem>>, vector<8x2048xf32>
      %c0_11 = arith.constant 0 : index
      %c0_12 = arith.constant 0 : index
      %14 = vector.load %arg3[%c0_11, %c0_12] : memref<2048x128xf32, #tpu.memory_space<vmem>>, vector<2048x128xf32>
      %cst_13 = arith.constant dense<0.000000e+00> : vector<8x128xf32>
      %15 = tpu.matmul %13, %14, %cst_13 {dimension_numbers = #tpu.dot_dimension_numbers<[1], [0], [0], [1], [0, 0, 1, 1], [], []>} : vector<8x2048xf32>, vector<2048x128xf32>, vector<8x128xf32> -> vector<8x128xf32>
      %cst_14 = arith.constant 0.000000e+00 : f32
      %16 = vector.broadcast %cst_14 : f32 to vector<8x128xf32>
      %17 = arith.maximumf %15, %16 : vector<8x128xf32>
      %c0_15 = arith.constant 0 : index
      %c0_16 = arith.constant 0 : index
      %18 = vector.load %arg4[%c0_15, %c0_16] : memref<128x2048xf32, #tpu.memory_space<vmem>>, vector<128x2048xf32>
      %cst_17 = arith.constant dense<0.000000e+00> : vector<8x2048xf32>
      %19 = tpu.matmul %17, %18, %cst_17 {dimension_numbers = #tpu.dot_dimension_numbers<[1], [0], [0], [1], [0, 0, 1, 1], [], []>} : vector<8x128xf32>, vector<128x2048xf32>, vector<8x2048xf32> -> vector<8x2048xf32>
      %20 = arith.negf %19 : vector<8x2048xf32>
      %21 = math.exp %20 : vector<8x2048xf32>
      %cst_18 = arith.constant 1.000000e+00 : f32
      %22 = vector.broadcast %cst_18 : f32 to vector<8x2048xf32>
      %23 = arith.addf %22, %21 : vector<8x2048xf32>
      %24 = arith.divf %22, %23 : vector<8x2048xf32>
      %25 = arith.mulf %13, %24 : vector<8x2048xf32>
      %c0_19 = arith.constant 0 : index
      %c0_20 = arith.constant 0 : index
      %26 = vector.load %arg5[%c0_19, %c0_20] : memref<2048x128xf32, #tpu.memory_space<vmem>>, vector<2048x128xf32>
      %cst_21 = arith.constant dense<0.000000e+00> : vector<8x128xf32>
      %27 = tpu.matmul %25, %26, %cst_21 {dimension_numbers = #tpu.dot_dimension_numbers<[1], [0], [0], [1], [0, 0, 1, 1], [], []>} : vector<8x2048xf32>, vector<2048x128xf32>, vector<8x128xf32> -> vector<8x128xf32>
      %c0_22 = arith.constant 0 : index
      %c0_23 = arith.constant 0 : index
      %28 = vector.load %arg6[%c0_22, %c0_23] : memref<1x128xf32, #tpu.memory_space<vmem>>, vector<1x128xf32>
      %29 = vector.broadcast %28 : vector<1x128xf32> to vector<8x128xf32>
      %30 = arith.addf %27, %29 : vector<8x128xf32>
      %c0_24 = arith.constant 0 : index
      %c0_25 = arith.constant 0 : index
      %31 = vector.load %arg7[%c0_24, %c0_25] : memref<8x128xf32, #tpu.memory_space<vmem>>, vector<8x128xf32>
      tpu.vector_store %arg7[%c0_24, %c0_25], %30 {strides = array<i32>} : memref<8x128xf32, #tpu.memory_space<vmem>>, vector<8x128xf32>,
    } else {
    }
    return
  }
  func.func @transform_0(%arg0: i32) -> (i32, i32) {
    %c0_i32 = arith.constant 0 : i32
    %c0_i32_0 = arith.constant 0 : i32
    return %c0_i32, %arg0 : i32, i32
  }
  func.func @transform_1(%arg0: i32) -> (i32, i32) {
    %c0_i32 = arith.constant 0 : i32
    %c0_i32_0 = arith.constant 0 : i32
    return %arg0, %c0_i32 : i32, i32
  }
  func.func @transform_2(%arg0: i32) -> (i32, i32) {
    %c0_i32 = arith.constant 0 : i32
    %c0_i32_0 = arith.constant 0 : i32
    %c0_i32_1 = arith.constant 0 : i32
    return %c0_i32, %c0_i32_0 : i32, i32
  }
  func.func @transform_3(%arg0: i32) -> (i32, i32) {
    %c0_i32 = arith.constant 0 : i32
    %c0_i32_0 = arith.constant 0 : i32
    %c0_i32_1 = arith.constant 0 : i32
    return %c0_i32, %c0_i32_0 : i32, i32
  }
  func.func @transform_4(%arg0: i32) -> (i32, i32) {
    %c0_i32 = arith.constant 0 : i32
    %c0_i32_0 = arith.constant 0 : i32
    %c0_i32_1 = arith.constant 0 : i32
    return %c0_i32, %c0_i32_0 : i32, i32
  }
  func.func @transform_5(%arg0: i32) -> (i32, i32) {
    %c0_i32 = arith.constant 0 : i32
    %c0_i32_0 = arith.constant 0 : i32
    %c0_i32_1 = arith.constant 0 : i32
    return %c0_i32, %c0_i32_0 : i32, i32
  }
  func.func @transform_6(%arg0: i32) -> (i32, i32) {
    %c0_i32 = arith.constant 0 : i32
    %c0_i32_0 = arith.constant 0 : i32
    %c0_i32_1 = arith.constant 0 : i32
    return %c0_i32, %c0_i32_0 : i32, i32
  }
}

</mosaic_0001>

<bundles_post_ra>
// kernel: multiscale_resnest_se_forward.5
= control target key start
LH: loop header
LB: loop body
LE: loop exit
PB: predicated region body
PF: predicated region fallthrough
CT: control target
= control target key end

     0   :  { %s524_s9 = smov 0   ;;  %s526_s10 = smov 0   ;;  %s620_s0 = inlined_call_operand.vmem [shape: f32[16,1], index: 0, kind: input, shape index: {}]   ;;  %s621_s1 = inlined_call_operand.vmem [shape: f32[2,16,1024], index: 1, kind: input, shape index: {}]   ;;  %s622_s2 = inlined_call_operand.vmem [shape: f32[8,1024], index: 2, kind: output, shape index: {}]  }
   0x1   :  { %s528_s11 = smov 0  }
   0x2 LB: > { %s24_s12 = sadd.s32 1, %s500_s10  ;;  %p443_p0 = scmp.ge.s32.totalorder %s504_s11, 1  ;;  %s504_s11 = sphi %s528_s11, %s12_s11   ;;  %s500_s10 = sphi %s526_s10, %s624_s10   ;;  %s496_s9 = sphi %s524_s9, %s623_s9  }
   0x3   : > { %p26_p1 = scmp.ge.s32.totalorder %s24_s12, 2  ;;  %p138_p2 = scmp.lt.s32.totalorder %s504_s11, 3 }
   0x5   : > { %s626_s12 = smov (%p26_p1, %s24_s12), 0  ;;  %p139_p3 = pnand %p443_p0, %p138_p2 }
   0x6   : > { %p172_p4 = scmp.lt.s32.totalorder (!%p139_p3), %s496_s9, 1  ;;  %p182_p5 = scmp.eq.s32.totalorder (!%p139_p3), %s496_s9, 0 }
   0x7   : > { %142 = sbr.rel (%p139_p3) target bundleno = 176 (0xb0), region = 28 }
   0xc   : > { %s173_s13 = scalar_select %p172_p4, %s496_s9, 1  ;;  %v506_v0 = vmov (%p182_p5), 0.0  }
   0xd   : > { %187 = sbr.rel (!%p182_p5) target bundleno = 18 (0x12), region = 32  ;;  %188 = vst [vmem:[%s622_s2] sm:$0xff] (%p182_p5), %v506_v0  ;;  %189 = vst [vmem:[%s622_s2 + $0x8] sm:$0xff] (%p182_p5), %v506_v0 }
   0xe   : > { %s451_s14 = sshll.u32 %s173_s13, 7  ;;  %190 = vst [vmem:[%s622_s2 + $0x10] sm:$0xff] (%p182_p5), %v506_v0  ;;  %191 = vst [vmem:[%s622_s2 + $0x18] sm:$0xff] (%p182_p5), %v506_v0 }
   0xf   : > { %s550_s17 = scalar_lea.vmem %s621_s1, %s451_s14  ;;  %192 = vst [vmem:[%s622_s2 + $0x20] sm:$0xff] (%p182_p5), %v506_v0  ;;  %193 = vst [vmem:[%s622_s2 + $0x28] sm:$0xff] (%p182_p5), %v506_v0 }
  0x10   : > { %194 = vst [vmem:[%s622_s2 + $0x30] sm:$0xff] (%p182_p5), %v506_v0  ;;  %195 = vst [vmem:[%s622_s2 + $0x38] sm:$0xff] (%p182_p5), %v506_v0 }
  0x12 PF: > { %v217_v1 = vld [vmem:[%s620_s0] sm:$0xff]  ;;  %v507_v2 = vmov 0   ;;  %v218_v3 = vld [vmem:[%s620_s0 + $0x8] sm:$0xff]  ;;  %v508_v4 = vmov 1966171168   ;;  %v316_v6 = vlaneseq  ;;  %v203_v11 = vld [vmem:[%s550_s17 + $0x10] sm:$0xff] }
  0x13   : > { %481 = vset.pattern.permute.xlu0 %v507_v2  ;;  %v314_v5 = vunpack.c.l.s4 %v508_v4  ;;  %v201_v9 = vld [vmem:[%s550_s17] sm:$0xff]  ;;  %v202_v10 = vld [vmem:[%s550_s17 + $0x8] sm:$0xff]  ;;  %v204_v12 = vld [vmem:[%s550_s17 + $0x18] sm:$0xff]  ;;  %s365_s14 = sshra.s32 %s496_s9, 3  ;;  %s368_s15 = sand.u32 7, %s496_s9 }
  0x14   : > { %221 = vperm.xlu0 %481, %v217_v1   ;;  %v317_v8 = vshrl.u32 %v316_v6, 7  ;;  %v205_v14 = vld [vmem:[%s550_s17 + $0x20] sm:$0xff]  ;;  %v206_v15 = vld [vmem:[%s550_s17 + $0x28] sm:$0xff]  ;;  %v207_v16 = vld [vmem:[%s550_s17 + $0x30] sm:$0xff]  ;;  %s453_s16 = sshll.u32 %s365_s14, 6 }
  0x15   : > { %v315_v7 = vunpack.c.0.s8 %v314_v5  ;;  %v208_v17 = vld [vmem:[%s550_s17 + $0x38] sm:$0xff]  ;;  %v209_v18 = vld [vmem:[%s550_s17 + $0x40] sm:$0xff]  ;;  %v210_v19 = vld [vmem:[%s550_s17 + $0x48] sm:$0xff] }
  0x16   : > { %v211_v21 = vld [vmem:[%s550_s17 + $0x50] sm:$0xff]  ;;  %v212_v22 = vld [vmem:[%s550_s17 + $0x58] sm:$0xff]  ;;  %v213_v23 = vld [vmem:[%s550_s17 + $0x60] sm:$0xff] }
  0x17   : > { %v592_v20 = vsub.s32 %v315_v7, %v317_v8  ;;  %v214_v24 = vld [vmem:[%s550_s17 + $0x68] sm:$0xff]  ;;  %v215_v25 = vld [vmem:[%s550_s17 + $0x70] sm:$0xff]  ;;  %v216_v26 = vld [vmem:[%s550_s17 + $0x78] sm:$0xff]  ;;  %s371_s17 = sadd.s32 %s453_s16, %s368_s15 }
  0x18   : > { %226 = vperm.xlu0 %481, %v218_v3   ;;  %s372_s9 = scalar_lea.vmem %s622_s2, %s371_s17 }
  0x8f   : > { %v222_v13 = vpop.permute.xlu0 %221 }
  0x90   : > { %v229_v27 = vmul.f32 %v222_v13, %v201_v9  ;;  %v230_v28 = vmul.f32 %v222_v13, %v202_v10  ;;  %v231_v29 = vmul.f32 %v222_v13, %v203_v11  ;;  %v232_v30 = vmul.f32 %v222_v13, %v204_v12 }
  0x91   : > { %v233_v32 = vmul.f32 %v222_v13, %v205_v14  ;;  %v234_v33 = vmul.f32 %v222_v13, %v206_v15  ;;  %v235_v34 = vmul.f32 %v222_v13, %v207_v16  ;;  %v236_v35 = vmul.f32 %v222_v13, %v208_v17 }
  0x93   : > { %v227_v31 = vpop.permute.xlu0 %226 }
  0x94   : > { %v237_v36 = vmul.f32 %v227_v31, %v209_v18  ;;  %v238_v37 = vmul.f32 %v227_v31, %v210_v19  ;;  %v239_v38 = vmul.f32 %v227_v31, %v211_v21  ;;  %v240_v39 = vmul.f32 %v227_v31, %v212_v22 }
  0x95   : > { %v241_v40 = vmul.f32 %v227_v31, %v213_v23  ;;  %v242_v41 = vmul.f32 %v227_v31, %v214_v24  ;;  %v243_v42 = vmul.f32 %v227_v31, %v215_v25  ;;  %v244_v43 = vmul.f32 %v227_v31, %v216_v26 }
  0x96   : > { %v245_v44 = vadd.f32 %v237_v36, %v229_v27  ;;  %v252_v45 = vadd.f32 %v238_v37, %v230_v28  ;;  %v259_v46 = vadd.f32 %v239_v38, %v231_v29  ;;  %v266_v47 = vadd.f32 %v240_v39, %v232_v30 }
  0x97   : > { %v273_v48 = vadd.f32 %v241_v40, %v233_v32  ;;  %v280_v49 = vadd.f32 %v242_v41, %v234_v33  ;;  %v287_v50 = vadd.f32 %v243_v42, %v235_v34  ;;  %v294_v51 = vadd.f32 %v244_v43, %v236_v35 }
  0x98   : > { %v246_v52 = vrot.slane %v245_v44, 4  ;;  %v253_v53 = vrot.slane %v252_v45, 4  ;;  %v260_v54 = vrot.slane %v259_v46, 4  ;;  %v267_v55 = vrot.slane %v266_v47, 4 }
  0x99   : > { %v274_v56 = vrot.slane %v273_v48, 4  ;;  %v281_v57 = vrot.slane %v280_v49, 4  ;;  %v288_v58 = vrot.slane %v287_v50, 4  ;;  %v295_v59 = vrot.slane %v294_v51, 4 }
  0x9a   : > { %v247_v60 = vadd.f32 %v246_v52, %v245_v44  ;;  %v254_v61 = vadd.f32 %v253_v53, %v252_v45  ;;  %v261_v62 = vadd.f32 %v260_v54, %v259_v46  ;;  %v268_v63 = vadd.f32 %v267_v55, %v266_v47 }
  0x9b   : > { %v275_v0 = vadd.f32 %v274_v56, %v273_v48  ;;  %v282_v1 = vadd.f32 %v281_v57, %v280_v49  ;;  %v289_v2 = vadd.f32 %v288_v58, %v287_v50  ;;  %v296_v3 = vadd.f32 %v295_v59, %v294_v51 }
  0x9c   : > { %v248_v4 = vrot.slane %v247_v60, 2  ;;  %v255_v5 = vrot.slane %v254_v61, 2  ;;  %v262_v6 = vrot.slane %v261_v62, 2  ;;  %v269_v7 = vrot.slane %v268_v63, 2 }
  0x9d   : > { %v276_v8 = vrot.slane %v275_v0, 2  ;;  %v283_v9 = vrot.slane %v282_v1, 2  ;;  %v290_v10 = vrot.slane %v289_v2, 2  ;;  %v297_v11 = vrot.slane %v296_v3, 2 }
  0x9e   : > { %v249_v12 = vadd.f32 %v248_v4, %v247_v60  ;;  %v256_v13 = vadd.f32 %v255_v5, %v254_v61  ;;  %v263_v14 = vadd.f32 %v262_v6, %v261_v62  ;;  %v270_v15 = vadd.f32 %v269_v7, %v268_v63 }
  0x9f   : > { %v277_v16 = vadd.f32 %v276_v8, %v275_v0  ;;  %v284_v17 = vadd.f32 %v283_v9, %v282_v1  ;;  %v291_v18 = vadd.f32 %v290_v10, %v289_v2  ;;  %v298_v19 = vadd.f32 %v297_v11, %v296_v3 }
  0xa0   : > { %v250_v21 = vrot.slane %v249_v12, 1  ;;  %v257_v22 = vrot.slane %v256_v13, 1  ;;  %v264_v23 = vrot.slane %v263_v14, 1  ;;  %v271_v24 = vrot.slane %v270_v15, 1 }
  0xa1   : > { %v278_v25 = vrot.slane %v277_v16, 1  ;;  %v285_v26 = vrot.slane %v284_v17, 1  ;;  %v292_v27 = vrot.slane %v291_v18, 1  ;;  %v299_v28 = vrot.slane %v298_v19, 1 }
  0xa2   : > { %v251_v29 = vadd.f32 %v250_v21, %v249_v12  ;;  %v258_v30 = vadd.f32 %v257_v22, %v256_v13  ;;  %v265_v31 = vadd.f32 %v264_v23, %v263_v14  ;;  %v272_v32 = vadd.f32 %v271_v24, %v270_v15 }
  0xa3   : > { %v279_v33 = vadd.f32 %v278_v25, %v277_v16  ;;  %v286_v34 = vadd.f32 %v285_v26, %v284_v17  ;;  %v293_v35 = vadd.f32 %v292_v27, %v291_v18  ;;  %v300_v36 = vadd.f32 %v299_v28, %v298_v19 }
  0xa4   : > { %v309_v37 = vcombine.low %v251_v29, %v258_v30  ;;  %v310_v38 = vcombine.low %v265_v31, %v272_v32 }
  0xa5   : > { %v311_v39 = vcombine.low %v279_v33, %v286_v34  ;;  %v312_v40 = vcombine.low %v293_v35, %v300_v36 }
  0xa6   : > { %v319_v41 = vrot.slane %v309_v37, %v592_v20  ;;  %v326_v42 = vrot.slane %v310_v38, %v592_v20 }
  0xa7   : > { %v333_v43 = vrot.slane %v311_v39, %v592_v20  ;;  %v340_v44 = vrot.slane %v312_v40, %v592_v20 }
  0xa8   : > { %v341_v45 = vcombine.low %v319_v41, %v326_v42 }
  0xa9   : > { %v342_v46 = vcombine.low %v333_v43, %v340_v44 }
  0xaa   : > { %v349_v47 = vrot.slane %v341_v45, %v592_v20 }
  0xab   : > { %v356_v48 = vrot.slane %v342_v46, %v592_v20 }
  0xad   : > { %v357_v49 = vcombine.low %v349_v47, %v356_v48 }
  0xaf   : > { %373 = vst [vmem:[%s372_s9] ss:$8 sm:$0xf] %v357_v49  ;;  %374 = vst [vmem:[%s372_s9] ss:$8 sm:$0xf0] %v357_v49 }
  0xb0 PF: > { %s12_s11 = sadd.s32 1, %s504_s11   ;;  %s623_s9 = smov %s500_s10 }
  0xb1   : > { %p9_p6 = scmp.ge.s32.totalorder %s12_s11, 4   ;;  %s624_s10 = smov %s626_s12 }
  0xb3   :  { %11 = sbr.rel (!%p9_p6) target bundleno = 2 (0x2), region = 70 }

// kernel: multiscale_resnest_se_forward.6
= control target key start
LH: loop header
LB: loop body
LE: loop exit
PB: predicated region body
PF: predicated region fallthrough
CT: control target
= control target key end

     0   :  { %s669_s9 = smov 0   ;;  %s671_s10 = smov 0   ;;  %s850_s0 = inlined_call_operand.vmem [shape: f32[4,1], index: 0, kind: input, shape index: {}]   ;;  %s851_s1 = inlined_call_operand.vmem [shape: f32[2,4,2048], index: 1, kind: input, shape index: {}]   ;;  %s852_s2 = inlined_call_operand.vmem [shape: f32[8,2048], index: 2, kind: output, shape index: {}]  }
   0x1   :  { %s673_s11 = smov 0  }
   0x2 LB: > { %s24_s12 = sadd.s32 1, %s644_s10  ;;  %p581_p0 = scmp.ge.s32.totalorder %s648_s11, 1  ;;  %s648_s11 = sphi %s673_s11, %s12_s11   ;;  %s644_s10 = sphi %s671_s10, %s854_s10   ;;  %s640_s9 = sphi %s669_s9, %s853_s9  }
   0x3   : > { %p26_p1 = scmp.ge.s32.totalorder %s24_s12, 2  ;;  %p134_p2 = scmp.lt.s32.totalorder %s648_s11, 3 }
   0x5   : > { %s856_s12 = smov (%p26_p1, %s24_s12), 0  ;;  %p135_p3 = pnand %p581_p0, %p134_p2 }
   0x6   : > { %p163_p4 = scmp.lt.s32.totalorder (!%p135_p3), %s640_s9, 1  ;;  %p172_p5 = scmp.eq.s32.totalorder (!%p135_p3), %s640_s9, 0 }
   0x7   : > { %138 = sbr.rel (%p135_p3) target bundleno = 194 (0xc2), region = 28 }
   0xc   : > { %s164_s13 = scalar_select %p163_p4, %s640_s9, 1  ;;  %v650_v0 = vmov (%p172_p5), 0.0  }
   0xd   : > { %177 = sbr.rel (!%p172_p5) target bundleno = 21 (0x15), region = 32  ;;  %178 = vst [vmem:[%s852_s2] sm:$0xff] (%p172_p5), %v650_v0  ;;  %179 = vst [vmem:[%s852_s2 + $0x8] sm:$0xff] (%p172_p5), %v650_v0 }
   0xe   : > { %s593_s14 = sshll.u32 %s164_s13, 6  ;;  %180 = vst [vmem:[%s852_s2 + $0x10] sm:$0xff] (%p172_p5), %v650_v0  ;;  %181 = vst [vmem:[%s852_s2 + $0x18] sm:$0xff] (%p172_p5), %v650_v0 }
   0xf   : > { %s695_s17 = scalar_lea.vmem %s851_s1, %s593_s14  ;;  %182 = vst [vmem:[%s852_s2 + $0x20] sm:$0xff] (%p172_p5), %v650_v0  ;;  %183 = vst [vmem:[%s852_s2 + $0x28] sm:$0xff] (%p172_p5), %v650_v0 }
  0x10   : > { %184 = vst [vmem:[%s852_s2 + $0x30] sm:$0xff] (%p172_p5), %v650_v0  ;;  %185 = vst [vmem:[%s852_s2 + $0x38] sm:$0xff] (%p172_p5), %v650_v0 }
  0x11   : > { %186 = vst [vmem:[%s852_s2 + $0x40] sm:$0xff] (%p172_p5), %v650_v0  ;;  %187 = vst [vmem:[%s852_s2 + $0x48] sm:$0xff] (%p172_p5), %v650_v0 }
  0x12   : > { %188 = vst [vmem:[%s852_s2 + $0x50] sm:$0xff] %v650_v0  ;;  %189 = vst [vmem:[%s852_s2 + $0x58] sm:$0xff] %v650_v0 }
  0x13   : > { %190 = vst [vmem:[%s852_s2 + $0x60] sm:$0xff] %v650_v0  ;;  %191 = vst [vmem:[%s852_s2 + $0x68] sm:$0xff] %v650_v0 }
  0x14   : > { %192 = vst [vmem:[%s852_s2 + $0x70] sm:$0xff] %v650_v0  ;;  %193 = vst [vmem:[%s852_s2 + $0x78] sm:$0xff] %v650_v0 }
  0x15 PF: > { %v209_v1 = vld [vmem:[%s850_s0] sm:$0xf]  ;;  %v651_v2 = vmov 0   ;;  %v652_v3 = vmov 839922192   ;;  %v217_v5 = vlaneseq  ;;  %v202_v13 = vld [vmem:[%s695_s17 + $0x8] sm:$0xff] }
  0x16   : > { %625 = vset.pattern.permute.xlu0 %v651_v2  ;;  %v215_v4 = vunpack.c.l.s4 %v652_v3  ;;  %v653_v8 = vmov 1966171168   ;;  %v201_v12 = vld [vmem:[%s695_s17] sm:$0xff]  ;;  %v203_v15 = vld [vmem:[%s695_s17 + $0x10] sm:$0xff]  ;;  %v204_v16 = vld [vmem:[%s695_s17 + $0x18] sm:$0xff]  ;;  %vm254_vm0 = vcmask 1043456  }
  0x17   : > { %212 = vperm.xlu0 %625, %v209_v1   ;;  %v218_v7 = vshrl.u32 %v217_v5, 7  ;;  %v388_v9 = vunpack.c.l.s4 %v653_v8  ;;  %v205_v17 = vld [vmem:[%s695_s17 + $0x20] sm:$0xff]  ;;  %v206_v18 = vld [vmem:[%s695_s17 + $0x28] sm:$0xff]  ;;  %v207_v19 = vld [vmem:[%s695_s17 + $0x30] sm:$0xff]  ;;  %s495_s29 = sand.u32 7, %s640_s9 }
  0x18   : > { %v216_v6 = vunpack.c.0.s8 %v215_v4  ;;  %v208_v20 = vld [vmem:[%s695_s17 + $0x38] sm:$0xff]  ;;  %s492_s17 = sshra.s32 %s640_s9, 3 }
  0x19   : > { %v389_v11 = vunpack.c.0.s8 %v388_v9  ;;  %s595_s30 = sshll.u32 %s492_s17, 7 }
  0x1a   : > { %v219_v10 = vsub.s32 %v216_v6, %v218_v7  ;;  %s498_s3 = sadd.s32 %s595_s30, %s495_s29 }
  0x1b   : > { %v756_v22 = vsub.s32 %v389_v11, %v218_v7  ;;  %s499_s5 = scalar_lea.vmem %s852_s2, %s498_s3 }
  0x92   : > { %v213_v14 = vpop.permute.xlu0 %212 }
  0x93   : > { %v220_v21 = vrot.slane %v213_v14, %v219_v10 }
  0x95   : > { %v222_v23 = vmul.f32 %v220_v21, %v201_v12  ;;  %v223_v24 = vmul.f32 %v220_v21, %v202_v13  ;;  %v224_v25 = vmul.f32 %v220_v21, %v203_v15  ;;  %v225_v26 = vmul.f32 %v220_v21, %v204_v16 }
  0x96   : > { %v758_v27 = vmul.f32 %v220_v21, %v205_v17  ;;  %v760_v28 = vmul.f32 %v220_v21, %v206_v18  ;;  %v762_v29 = vmul.f32 %v220_v21, %v207_v19  ;;  %v764_v30 = vmul.f32 %v220_v21, %v208_v20 }
  0x97   : > { %v238_v31 = vcombine.high %v222_v23, %v222_v23  ;;  %v239_v32 = vcombine.high %v223_v24, %v223_v24  ;;  %v240_v33 = vcombine.high %v224_v25, %v224_v25  ;;  %v241_v34 = vcombine.high %v225_v26, %v225_v26 }
  0x98   : > { %v242_v35 = vcombine.high %v758_v27, %v758_v27  ;;  %v243_v36 = vcombine.high %v760_v28, %v760_v28  ;;  %v244_v37 = vcombine.high %v762_v29, %v762_v29  ;;  %v245_v38 = vcombine.high %v764_v30, %v764_v30 }
  0x99   : > { %v255_v39 = vsel %vm254_vm0, %v222_v23, 0.0  ;;  %v262_v40 = vsel %vm254_vm0, %v238_v31, 0.0  ;;  %v269_v41 = vsel %vm254_vm0, %v223_v24, 0.0  ;;  %v276_v42 = vsel %vm254_vm0, %v239_v32, 0.0 }
  0x9a   : > { %v256_v43 = vrot.slane %v255_v39, 4  ;;  %v263_v44 = vrot.slane %v262_v40, 4  ;;  %v270_v45 = vrot.slane %v269_v41, 4  ;;  %v277_v46 = vrot.slane %v276_v42, 4 }
  0x9b   : > { %v283_v47 = vsel %vm254_vm0, %v224_v25, 0.0  ;;  %v290_v48 = vsel %vm254_vm0, %v240_v33, 0.0  ;;  %v297_v49 = vsel %vm254_vm0, %v225_v26, 0.0  ;;  %v304_v50 = vsel %vm254_vm0, %v241_v34, 0.0 }
  0x9c   : > { %v257_v51 = vadd.f32 %v256_v43, %v255_v39  ;;  %v264_v52 = vadd.f32 %v263_v44, %v262_v40  ;;  %v271_v53 = vadd.f32 %v270_v45, %v269_v41  ;;  %v278_v54 = vadd.f32 %v277_v46, %v276_v42 }
  0x9d   : > { %v284_v55 = vrot.slane %v283_v47, 4  ;;  %v291_v56 = vrot.slane %v290_v48, 4  ;;  %v298_v57 = vrot.slane %v297_v49, 4  ;;  %v305_v58 = vrot.slane %v304_v50, 4 }
  0x9e   : > { %v258_v59 = vrot.slane %v257_v51, 2  ;;  %v265_v60 = vrot.slane %v264_v52, 2  ;;  %v272_v61 = vrot.slane %v271_v53, 2  ;;  %v279_v62 = vrot.slane %v278_v54, 2 }
  0x9f   : > { %v285_v63 = vadd.f32 %v284_v55, %v283_v47  ;;  %v292_v0 = vadd.f32 %v291_v56, %v290_v48  ;;  %v299_v1 = vadd.f32 %v298_v57, %v297_v49  ;;  %v306_v2 = vadd.f32 %v305_v58, %v304_v50 }
  0xa0   : > { %v259_v3 = vadd.f32 %v258_v59, %v257_v51  ;;  %v266_v4 = vadd.f32 %v265_v60, %v264_v52  ;;  %v273_v5 = vadd.f32 %v272_v61, %v271_v53  ;;  %v280_v6 = vadd.f32 %v279_v62, %v278_v54 }
  0xa1   : > { %v286_v7 = vrot.slane %v285_v63, 2  ;;  %v293_v8 = vrot.slane %v292_v0, 2  ;;  %v300_v9 = vrot.slane %v299_v1, 2  ;;  %v307_v10 = vrot.slane %v306_v2, 2 }
  0xa2   : > { %v260_v11 = vrot.slane %v259_v3, 1  ;;  %v267_v12 = vrot.slane %v266_v4, 1  ;;  %v274_v13 = vrot.slane %v273_v5, 1  ;;  %v281_v14 = vrot.slane %v280_v6, 1 }
  0xa3   : > { %v287_v15 = vadd.f32 %v286_v7, %v285_v63  ;;  %v294_v16 = vadd.f32 %v293_v8, %v292_v0  ;;  %v301_v17 = vadd.f32 %v300_v9, %v299_v1  ;;  %v308_v18 = vadd.f32 %v307_v10, %v306_v2 }
  0xa4   : > { %v782_v19 = vadd.f32 %v260_v11, %v259_v3  ;;  %v784_v20 = vadd.f32 %v267_v12, %v266_v4  ;;  %v786_v21 = vadd.f32 %v274_v13, %v273_v5  ;;  %v788_v23 = vadd.f32 %v281_v14, %v280_v6 }
  0xa5   : > { %v288_v24 = vrot.slane %v287_v15, 1  ;;  %v295_v25 = vrot.slane %v294_v16, 1  ;;  %v302_v26 = vrot.slane %v301_v17, 1  ;;  %v309_v31 = vrot.slane %v308_v18, 1 }
  0xa6   : > { %v311_v32 = vsel %vm254_vm0, %v758_v27, 0.0  ;;  %v318_v33 = vsel %vm254_vm0, %v242_v35, 0.0  ;;  %v325_v34 = vsel %vm254_vm0, %v760_v28, 0.0  ;;  %v332_v39 = vsel %vm254_vm0, %v243_v36, 0.0 }
  0xa7   : > { %v796_v40 = vadd.f32 %v288_v24, %v287_v15  ;;  %v798_v41 = vadd.f32 %v295_v25, %v294_v16  ;;  %v800_v42 = vadd.f32 %v302_v26, %v301_v17  ;;  %v802_v43 = vadd.f32 %v309_v31, %v308_v18 }
  0xa8   : > { %v312_v44 = vrot.slane %v311_v32, 4  ;;  %v319_v45 = vrot.slane %v318_v33, 4  ;;  %v326_v46 = vrot.slane %v325_v34, 4  ;;  %v333_v47 = vrot.slane %v332_v39, 4 }
  0xa9   : > { %v339_v27 = vsel %vm254_vm0, %v762_v29, 0.0  ;;  %v346_v28 = vsel %vm254_vm0, %v244_v37, 0.0  ;;  %v353_v35 = vsel %vm254_vm0, %v764_v30, 0.0  ;;  %v360_v36 = vsel %vm254_vm0, %v245_v38, 0.0 }
  0xaa   : > { %v313_v48 = vadd.f32 %v312_v44, %v311_v32  ;;  %v320_v49 = vadd.f32 %v319_v45, %v318_v33  ;;  %v327_v50 = vadd.f32 %v326_v46, %v325_v34  ;;  %v334_v51 = vadd.f32 %v333_v47, %v332_v39 }
  0xab   : > { %v340_v52 = vrot.slane %v339_v27, 4  ;;  %v347_v53 = vrot.slane %v346_v28, 4  ;;  %v354_v54 = vrot.slane %v353_v35, 4  ;;  %v361_v55 = vrot.slane %v360_v36, 4 }
  0xac   : > { %v314_v56 = vrot.slane %v313_v48, 2  ;;  %v321_v29 = vrot.slane %v320_v49, 2  ;;  %v328_v57 = vrot.slane %v327_v50, 2  ;;  %v335_v37 = vrot.slane %v334_v51, 2 }
  0xad   : > { %v341_v58 = vadd.f32 %v340_v52, %v339_v27  ;;  %v348_v59 = vadd.f32 %v347_v53, %v346_v28  ;;  %v355_v60 = vadd.f32 %v354_v54, %v353_v35  ;;  %v362_v61 = vadd.f32 %v361_v55, %v360_v36 }
  0xae   : > { %v315_v62 = vadd.f32 %v314_v56, %v313_v48  ;;  %v322_v30 = vadd.f32 %v321_v29, %v320_v49  ;;  %v329_v38 = vadd.f32 %v328_v57, %v327_v50  ;;  %v336_v63 = vadd.f32 %v335_v37, %v334_v51 }
  0xaf   : > { %v342_v0 = vrot.slane %v341_v58, 2  ;;  %v349_v1 = vrot.slane %v348_v59, 2  ;;  %v356_v2 = vrot.slane %v355_v60, 2  ;;  %v363_v3 = vrot.slane %v362_v61, 2 }
  0xb0   : > { %v316_v4 = vrot.slane %v315_v62, 1  ;;  %v323_v5 = vrot.slane %v322_v30, 1  ;;  %v330_v6 = vrot.slane %v329_v38, 1  ;;  %v337_v7 = vrot.slane %v336_v63, 1 }
  0xb1   : > { %v343_v8 = vadd.f32 %v342_v0, %v341_v58  ;;  %v350_v9 = vadd.f32 %v349_v1, %v348_v59  ;;  %v357_v10 = vadd.f32 %v356_v2, %v355_v60  ;;  %v364_v11 = vadd.f32 %v363_v3, %v362_v61 }
  0xb2   : > { %v317_v12 = vadd.f32 %v316_v4, %v315_v62  ;;  %v324_v13 = vadd.f32 %v323_v5, %v322_v30  ;;  %v331_v14 = vadd.f32 %v330_v6, %v329_v38  ;;  %v338_v15 = vadd.f32 %v337_v7, %v336_v63 }
  0xb3   : > { %v344_v16 = vrot.slane %v343_v8, 1  ;;  %v351_v17 = vrot.slane %v350_v9, 1  ;;  %v358_v18 = vrot.slane %v357_v10, 1  ;;  %v365_v24 = vrot.slane %v364_v11, 1 }
  0xb4   : > { %v383_v25 = vcombine.low %v782_v19, %v784_v20  ;;  %v384_v26 = vcombine.low %v786_v21, %v788_v23  ;;  %v385_v31 = vcombine.low %v796_v40, %v798_v41  ;;  %v386_v32 = vcombine.low %v800_v42, %v802_v43 }
  0xb5   : > { %v345_v33 = vadd.f32 %v344_v16, %v343_v8  ;;  %v352_v34 = vadd.f32 %v351_v17, %v350_v9  ;;  %v359_v39 = vadd.f32 %v358_v18, %v357_v10  ;;  %v366_v44 = vadd.f32 %v365_v24, %v364_v11 }
  0xb6   : > { %v393_v45 = vrot.slane %v383_v25, %v756_v22  ;;  %v400_v46 = vrot.slane %v384_v26, %v756_v22  ;;  %v407_v19 = vrot.slane %v385_v31, %v756_v22  ;;  %v414_v20 = vrot.slane %v386_v32, %v756_v22 }
  0xb7   : > { %v432_v21 = vcombine.low %v317_v12, %v324_v13  ;;  %v433_v23 = vcombine.low %v331_v14, %v338_v15  ;;  %v434_v40 = vcombine.low %v345_v33, %v352_v34  ;;  %v435_v41 = vcombine.low %v359_v39, %v366_v44 }
  0xb8   : > { %v415_v42 = vcombine.low %v393_v45, %v400_v46  ;;  %v416_v43 = vcombine.low %v407_v19, %v414_v20 }
  0xb9   : > { %v442_v47 = vrot.slane %v432_v21, %v756_v22  ;;  %v449_v27 = vrot.slane %v433_v23, %v756_v22  ;;  %v456_v28 = vrot.slane %v434_v40, %v756_v22  ;;  %v463_v35 = vrot.slane %v435_v41, %v756_v22 }
  0xba   : > { %v423_v36 = vrot.slane %v415_v42, %v756_v22  ;;  %v430_v48 = vrot.slane %v416_v43, %v756_v22 }
  0xbb   : > { %v464_v49 = vcombine.low %v442_v47, %v449_v27  ;;  %v465_v50 = vcombine.low %v456_v28, %v463_v35 }
  0xbc   : > { %v431_v51 = vcombine.low %v423_v36, %v430_v48 }
  0xbd   : > { %v472_v52 = vrot.slane %v464_v49, %v756_v22  ;;  %v479_v53 = vrot.slane %v465_v50, %v756_v22 }
  0xbe   : > { %500 = vst [vmem:[%s499_s5] ss:$8 sm:$0xf] %v431_v51  ;;  %501 = vst [vmem:[%s499_s5] ss:$8 sm:$0xf0] %v431_v51 }
  0xbf   : > { %v480_v54 = vcombine.low %v472_v52, %v479_v53 }
  0xc1   : > { %589 = vst [vmem:[%s499_s5 + $0x40] ss:$8 sm:$0xf] %v480_v54  ;;  %590 = vst [vmem:[%s499_s5 + $0x40] ss:$8 sm:$0xf0] %v480_v54 }
  0xc2 PF: > { %s12_s11 = sadd.s32 1, %s648_s11   ;;  %s853_s9 = smov %s644_s10 }
  0xc3   : > { %p9_p6 = scmp.ge.s32.totalorder %s12_s11, 4   ;;  %s854_s10 = smov %s856_s12 }
  0xc5   :  { %11 = sbr.rel (!%p9_p6) target bundleno = 2 (0x2), region = 71 }

// kernel: multiscale_resnest_se_forward.4
= control target key start
LH: loop header
LB: loop body
LE: loop exit
PB: predicated region body
PF: predicated region fallthrough
CT: control target
= control target key end

     0   :  { %s566_s9 = smov 0   ;;  %s568_s10 = smov 0   ;;  %s688_s0 = inlined_call_operand.vmem [shape: f32[64,1], index: 0, kind: input, shape index: {}]   ;;  %s689_s1 = inlined_call_operand.vmem [shape: f32[2,64,512], index: 1, kind: input, shape index: {}]   ;;  %s690_s2 = inlined_call_operand.vmem [shape: f32[8,512], index: 2, kind: output, shape index: {}]  }
   0x1   :  { %s570_s11 = smov 0  }
   0x2 LB: > { %s24_s12 = sadd.s32 1, %s541_s10  ;;  %p482_p0 = scmp.ge.s32.totalorder %s545_s11, 1  ;;  %s545_s11 = sphi %s570_s11, %s12_s11   ;;  %s541_s10 = sphi %s568_s10, %s694_s10   ;;  %s537_s9 = sphi %s566_s9, %s693_s9  }
   0x3   : > { %p26_p1 = scmp.ge.s32.totalorder %s24_s12, 2  ;;  %p138_p2 = scmp.lt.s32.totalorder %s545_s11, 3 }
   0x5   : > { %s696_s12 = smov (%p26_p1, %s24_s12), 0  ;;  %p139_p3 = pnand %p482_p0, %p138_p2 }
   0x6   : > { %p172_p4 = scmp.lt.s32.totalorder (!%p139_p3), %s537_s9, 1  ;;  %p182_p5 = scmp.eq.s32.totalorder (!%p139_p3), %s537_s9, 0 }
   0x7   : > { %142 = sbr.rel (%p139_p3) target bundleno = 195 (0xc3), region = 28 }
   0xc   : > { %s173_s13 = scalar_select %p172_p4, %s537_s9, 1  ;;  %v547_v0 = vmov (%p182_p5), 0.0  }
   0xd   : > { %187 = sbr.rel (!%p182_p5) target bundleno = 18 (0x12), region = 32  ;;  %188 = vst [vmem:[%s690_s2] sm:$0xff] (%p182_p5), %v547_v0  ;;  %189 = vst [vmem:[%s690_s2 + $0x8] sm:$0xff] (%p182_p5), %v547_v0 }
   0xe   : > { %s490_s14 = sshll.u32 %s173_s13, 8  ;;  %190 = vst [vmem:[%s690_s2 + $0x10] sm:$0xff] (%p182_p5), %v547_v0  ;;  %191 = vst [vmem:[%s690_s2 + $0x18] sm:$0xff] (%p182_p5), %v547_v0 }
   0xf   : > { %s592_s17 = scalar_lea.vmem %s689_s1, %s490_s14 }
  0x12 PF: > { %v235_v1 = vld [vmem:[%s688_s0 + $0x10] sm:$0xff]  ;;  %v233_v2 = vld [vmem:[%s688_s0] sm:$0xff]  ;;  %v548_v3 = vmov 0   ;;  %v236_v4 = vld [vmem:[%s688_s0 + $0x18] sm:$0xff]  ;;  %v195_v10 = vlaneseq  ;;  %v549_v12 = vmov 0.0   ;;  %s407_s19 = sand.u32 7, %s537_s9 }
  0x13   : > { %522 = vset.pattern.permute.xlu1 %v548_v3  ;;  %521 = vset.pattern.permute.xlu0 %v548_v3  ;;  %v234_v5 = vld [vmem:[%s688_s0 + $0x8] sm:$0xff]  ;;  %v237_v7 = vld [vmem:[%s688_s0 + $0x20] sm:$0xff]  ;;  %v240_v8 = vld [vmem:[%s688_s0 + $0x38] sm:$0xff] }
  0x14   : > { %253 = vperm.xlu1 %522, %v235_v1   ;;  %243 = vperm.xlu0 %521, %v233_v2   ;;  %v238_v6 = vld [vmem:[%s688_s0 + $0x28] sm:$0xff]  ;;  %v239_v9 = vld [vmem:[%s688_s0 + $0x30] sm:$0xff]  ;;  %vm631_vm0 = vcmp.lt.s32.totalorder %v195_v10, 512  ;;  %v201_v15 = vld [vmem:[%s592_s17] sm:$0xff] }
  0x15   : > { %199 = vst.msk [vmem:[#allocation2] sm:$0xf] %vm631_vm0, %v549_v12  ;;  %v202_v16 = vld [vmem:[%s592_s17 + $0x8] sm:$0xff]  ;;  %v209_v17 = vld [vmem:[%s592_s17 + $0x40] sm:$0xff]  ;;  %v203_v18 = vld [vmem:[%s592_s17 + $0x10] sm:$0xff] }
  0x16   : > { %v204_v19 = vld [vmem:[%s592_s17 + $0x18] sm:$0xff]  ;;  %v205_v20 = vld [vmem:[%s592_s17 + $0x20] sm:$0xff]  ;;  %v206_v21 = vld [vmem:[%s592_s17 + $0x28] sm:$0xff] }
  0x17   : > { %v207_v22 = vld [vmem:[%s592_s17 + $0x30] sm:$0xff]  ;;  %v208_v23 = vld [vmem:[%s592_s17 + $0x38] sm:$0xff]  ;;  %v210_v24 = vld [vmem:[%s592_s17 + $0x48] sm:$0xff] }
  0x18   : > { %258 = vperm.xlu1 %522, %v236_v4   ;;  %248 = vperm.xlu0 %521, %v234_v5   ;;  %v211_v25 = vld [vmem:[%s592_s17 + $0x50] sm:$0xff]  ;;  %v212_v26 = vld [vmem:[%s592_s17 + $0x58] sm:$0xff]  ;;  %v213_v33 = vld [vmem:[%s592_s17 + $0x60] sm:$0xff] }
  0x19   : > { %v214_v34 = vld [vmem:[%s592_s17 + $0x68] sm:$0xff]  ;;  %v215_v35 = vld [vmem:[%s592_s17 + $0x70] sm:$0xff]  ;;  %v216_v36 = vld [vmem:[%s592_s17 + $0x78] sm:$0xff] }
  0x1a   : > { %v217_v45 = vld [vmem:[%s592_s17 + $0x80] sm:$0xff]  ;;  %v218_v52 = vld [vmem:[%s592_s17 + $0x88] sm:$0xff]  ;;  %v219_v53 = vld [vmem:[%s592_s17 + $0x90] sm:$0xff] }
  0x1b   : > { %v220_v54 = vld [vmem:[%s592_s17 + $0x98] sm:$0xff]  ;;  %v221_v59 = vld [vmem:[%s592_s17 + $0xa0] sm:$0xff]  ;;  %v222_v0 = vld [vmem:[%s592_s17 + $0xa8] sm:$0xff] }
  0x1c   : > { %268 = vperm.xlu1 %522, %v238_v6   ;;  %263 = vperm.xlu0 %521, %v237_v7   ;;  %v223_v1 = vld [vmem:[%s592_s17 + $0xb0] sm:$0xff]  ;;  %v224_v2 = vld [vmem:[%s592_s17 + $0xb8] sm:$0xff]  ;;  %v225_v7 = vld [vmem:[%s592_s17 + $0xc0] sm:$0xff] }
  0x20   : > { %278 = vperm.xlu1 %522, %v240_v8   ;;  %273 = vperm.xlu0 %521, %v239_v9  }
  0x8f   : > { %v254_v13 = vpop.permute.xlu1 %253  ;;  %v244_v14 = vpop.permute.xlu0 %243 }
  0x90   : > { %v281_v29 = vmul.f32 %v244_v14, %v201_v15  ;;  %v282_v30 = vmul.f32 %v244_v14, %v202_v16  ;;  %v283_v31 = vmul.f32 %v244_v14, %v203_v18  ;;  %v284_v32 = vmul.f32 %v244_v14, %v204_v19  ;;  %v226_v15 = vld [vmem:[%s592_s17 + $0xc8] sm:$0xff]  ;;  %v227_v16 = vld [vmem:[%s592_s17 + $0xd0] sm:$0xff] }
  0x91   : > { %v289_v41 = vmul.f32 %v254_v13, %v209_v17  ;;  %v290_v42 = vmul.f32 %v254_v13, %v210_v24  ;;  %v291_v43 = vmul.f32 %v254_v13, %v211_v25  ;;  %v292_v44 = vmul.f32 %v254_v13, %v212_v26  ;;  %v228_v17 = vld [vmem:[%s592_s17 + $0xd8] sm:$0xff] }
  0x93   : > { %v259_v27 = vpop.permute.xlu1 %258  ;;  %v249_v28 = vpop.permute.xlu0 %248 }
  0x94   : > { %v285_v37 = vmul.f32 %v249_v28, %v205_v20  ;;  %v286_v38 = vmul.f32 %v249_v28, %v206_v21  ;;  %v287_v39 = vmul.f32 %v249_v28, %v207_v22  ;;  %v288_v40 = vmul.f32 %v249_v28, %v208_v23  ;;  %v229_v22 = vld [vmem:[%s592_s17 + $0xe0] sm:$0xff]  ;;  %v230_v28 = vld [vmem:[%s592_s17 + $0xe8] sm:$0xff] }
  0x95   : > { %v293_v55 = vmul.f32 %v259_v27, %v213_v33  ;;  %v294_v56 = vmul.f32 %v259_v27, %v214_v34  ;;  %v295_v57 = vmul.f32 %v259_v27, %v215_v35  ;;  %v296_v58 = vmul.f32 %v259_v27, %v216_v36 }
  0x96   : > { %v313_v46 = vadd.f32 %v285_v37, %v281_v29  ;;  %v326_v47 = vadd.f32 %v286_v38, %v282_v30  ;;  %v339_v48 = vadd.f32 %v287_v39, %v283_v31  ;;  %v352_v49 = vadd.f32 %v288_v40, %v284_v32  ;;  %v231_v29 = vld [vmem:[%s592_s17 + $0xf0] sm:$0xff]  ;;  %v232_v30 = vld [vmem:[%s592_s17 + $0xf8] sm:$0xff]  ;;  %s404_s17 = sshra.s32 %s537_s9, 3 }
  0x97   : > { %v269_v50 = vpop.permute.xlu1 %268  ;;  %v264_v51 = vpop.permute.xlu0 %263  ;;  %s492_s20 = sshll.u32 %s404_s17, 5 }
  0x98   : > { %v314_v60 = vadd.f32 %v313_v46, %v289_v41  ;;  %v327_v61 = vadd.f32 %v326_v47, %v290_v42  ;;  %v340_v62 = vadd.f32 %v339_v48, %v291_v43  ;;  %v353_v63 = vadd.f32 %v352_v49, %v292_v44  ;;  %s410_s21 = sadd.s32 %s492_s20, %s407_s19 }
  0x99   : > { %v297_v3 = vmul.f32 %v264_v51, %v217_v45  ;;  %v298_v4 = vmul.f32 %v264_v51, %v218_v52  ;;  %v299_v5 = vmul.f32 %v264_v51, %v219_v53  ;;  %v300_v6 = vmul.f32 %v264_v51, %v220_v54  ;;  %s411_s24 = scalar_lea.vmem %s690_s2, %s410_s21 }
  0x9a   : > { %v315_v8 = vadd.f32 %v314_v60, %v293_v55  ;;  %v328_v9 = vadd.f32 %v327_v61, %v294_v56  ;;  %v341_v12 = vadd.f32 %v340_v62, %v295_v57  ;;  %v354_v13 = vadd.f32 %v353_v63, %v296_v58 }
  0x9b   : > { %v274_v14 = vpop.permute.xlu0 %273  ;;  %v301_v18 = vmul.f32 %v269_v50, %v221_v59  ;;  %v302_v19 = vmul.f32 %v269_v50, %v222_v0  ;;  %v303_v20 = vmul.f32 %v269_v50, %v223_v1  ;;  %v304_v21 = vmul.f32 %v269_v50, %v224_v2  ;;  %v279_v27 = vpop.permute.xlu1 %278 }
  0x9c   : > { %v316_v23 = vadd.f32 %v315_v8, %v297_v3  ;;  %v329_v24 = vadd.f32 %v328_v9, %v298_v4  ;;  %v342_v25 = vadd.f32 %v341_v12, %v299_v5  ;;  %v355_v26 = vadd.f32 %v354_v13, %v300_v6 }
  0x9d   : > { %v305_v31 = vmul.f32 %v274_v14, %v225_v7  ;;  %v306_v32 = vmul.f32 %v274_v14, %v226_v15  ;;  %v307_v33 = vmul.f32 %v274_v14, %v227_v16  ;;  %v308_v34 = vmul.f32 %v274_v14, %v228_v17 }
  0x9e   : > { %v317_v35 = vadd.f32 %v316_v23, %v301_v18  ;;  %v330_v36 = vadd.f32 %v329_v24, %v302_v19  ;;  %v343_v37 = vadd.f32 %v342_v25, %v303_v20  ;;  %v356_v38 = vadd.f32 %v355_v26, %v304_v21 }
  0x9f   : > { %v309_v39 = vmul.f32 %v279_v27, %v229_v22  ;;  %v310_v40 = vmul.f32 %v279_v27, %v230_v28  ;;  %v311_v41 = vmul.f32 %v279_v27, %v231_v29  ;;  %v312_v42 = vmul.f32 %v279_v27, %v232_v30  ;;  %v200_v22 = vld [vmem:[#allocation2] sm:$0xf] }
  0xa0   : > { %v318_v43 = vadd.f32 %v317_v35, %v305_v31  ;;  %v331_v44 = vadd.f32 %v330_v36, %v306_v32  ;;  %v344_v45 = vadd.f32 %v343_v37, %v307_v33  ;;  %v357_v46 = vadd.f32 %v356_v38, %v308_v34 }
  0xa1   : > { %v550_v55 = vmov 1966171168   ;;  %v375_v2 = vshrl.u32 %v195_v10, 7 }
  0xa2   : > { %v319_v47 = vadd.f32 %v318_v43, %v309_v39  ;;  %v332_v48 = vadd.f32 %v331_v44, %v310_v40  ;;  %v345_v49 = vadd.f32 %v344_v45, %v311_v41  ;;  %v358_v50 = vadd.f32 %v357_v46, %v312_v42 }
  0xa3   : > { %v372_v56 = vunpack.c.l.s4 %v550_v55 }
  0xa4   : > { %v320_v51 = vrot.slane %v319_v47, 4  ;;  %v333_v52 = vrot.slane %v332_v48, 4  ;;  %v346_v53 = vrot.slane %v345_v49, 4  ;;  %v359_v54 = vrot.slane %v358_v50, 4 }
  0xa5   : > { %v373_v1 = vunpack.c.0.s8 %v372_v56 }
  0xa6   : > { %v321_v57 = vadd.f32 %v320_v51, %v319_v47  ;;  %v334_v58 = vadd.f32 %v333_v52, %v332_v48  ;;  %v347_v59 = vadd.f32 %v346_v53, %v345_v49  ;;  %v360_v60 = vadd.f32 %v359_v54, %v358_v50 }
  0xa7   : > { %v376_v13 = vsub.s32 %v373_v1, %v375_v2 }
  0xa8   : > { %v322_v61 = vrot.slane %v321_v57, 2  ;;  %v335_v62 = vrot.slane %v334_v58, 2  ;;  %v348_v63 = vrot.slane %v347_v59, 2  ;;  %v361_v0 = vrot.slane %v360_v60, 2 }
  0xaa   : > { %v323_v3 = vadd.f32 %v322_v61, %v321_v57  ;;  %v336_v4 = vadd.f32 %v335_v62, %v334_v58  ;;  %v349_v5 = vadd.f32 %v348_v63, %v347_v59  ;;  %v362_v6 = vadd.f32 %v361_v0, %v360_v60 }
  0xac   : > { %v324_v7 = vrot.slane %v323_v3, 1  ;;  %v337_v8 = vrot.slane %v336_v4, 1  ;;  %v350_v9 = vrot.slane %v349_v5, 1  ;;  %v363_v12 = vrot.slane %v362_v6, 1 }
  0xae   : > { %v325_v14 = vadd.f32 %v324_v7, %v323_v3  ;;  %v338_v15 = vadd.f32 %v337_v8, %v336_v4  ;;  %v351_v16 = vadd.f32 %v350_v9, %v349_v5  ;;  %v364_v17 = vadd.f32 %v363_v12, %v362_v6 }
  0xb0   : > { %v369_v18 = vcombine.low %v325_v14, %v338_v15  ;;  %v370_v19 = vcombine.low %v351_v16, %v364_v17 }
  0xb2   : > { %v377_v20 = vrot.slane %v369_v18, %v376_v13  ;;  %v384_v21 = vrot.slane %v370_v19, %v376_v13 }
  0xb4   : > { %v385_v10 = vcombine.low %v377_v20, %v384_v21 }
  0xb6   : > { %v392_v23 = vrot.slane %v385_v10, %v376_v13 }
  0xb8   : > { %v394_v24 = vadd.f32 %v392_v23, %v200_v22 }
  0xba   : > { %399 = vst.msk [vmem:[#allocation2] sm:$0xf] %vm631_vm0, %v394_v24 }
  0xc1   : > { %v403_v25 = vld [vmem:[#allocation2] sm:$0xf] }
  0xc2   : > { %412 = vst.msk [vmem:[%s411_s24] ss:$8 sm:$0xf] %vm631_vm0, %v403_v25 }
  0xc3 PF: > { %s12_s11 = sadd.s32 1, %s545_s11   ;;  %s693_s9 = smov %s541_s10 }
  0xc4   : > { %p9_p6 = scmp.ge.s32.totalorder %s12_s11, 4   ;;  %s694_s10 = smov %s696_s12 }
  0xc6   :  { %11 = sbr.rel (!%p9_p6) target bundleno = 2 (0x2), region = 70 }

// kernel: multiscale_resnest_se_forward.7
= control target key start
LH: loop header
LB: loop body
LE: loop exit
PB: predicated region body
PF: predicated region fallthrough
CT: control target
= control target key end

     0   :  { %11 = vsyncpa [#allocation4], 0  ;;  %s9695_s0 = inlined_call_operand.vmem [shape: f32[8,3584], index: 0, kind: input, shape index: {}]   ;;  %s9696_s1 = inlined_call_operand.hbm [shape: bf16[3584,2048], index: 1, kind: input, shape index: {}]   ;;  %s9697_s2 = inlined_call_operand.hbm [shape: f32[2048,128], index: 2, kind: input, shape index: {}]   ;;  %s9698_s3 = inlined_call_operand.hbm [shape: f32[128,2048], index: 3, kind: input, shape index: {}]   ;;  %s9699_s4 = inlined_call_operand.vmem [shape: f32[2048,128], index: 4, kind: input, shape index: {}]   ;;  %s9700_s5 = inlined_call_operand.vmem [shape: f32[1,128], index: 5, kind: input, shape index: {}]   ;;  %s9701_s6 = inlined_call_operand.vmem [shape: f32[8,128], index: 6, kind: output, shape index: {}]  }
   0x1   :  { %13 = vsyncpa [#allocation4 + $0x1], 0 }
   0x2   :  { %14 = vsyncpa [#allocation6], 0  ;;  %s8203_s21 = smov 0   ;;  %s8205_s22 = smov 0  }
   0x3   :  { %s8207_s23 = smov 0   ;;  %s8209_s24 = smov 0  }
   0x4 LB: > { %s8222_s25 = sadd.s32 4294967295, %s8156_s24   ;;  %p66_p0 = scmp.ne.s32.totalorder %s8148_s22, %s8144_s21  ;;  %s8156_s24 = sphi %s8209_s24, %s9718_s24   ;;  %s8152_s23 = sphi %s8207_s23, %s9717_s23   ;;  %s8148_s22 = sphi %s8205_s22, %s9716_s22   ;;  %s8144_s21 = sphi %s8203_s21, %s9715_s21  }
   0x5   : > { %p9702_p1 = scmp.eq.s32.totalorder %s8222_s25, 0  ;;  %p6782_p2 = scmp.ge.s32.totalorder %s8156_s24, 1 }
   0x6   : > { %p182_p3 = scmp.lt.s32.totalorder %s8156_s24, 8  ;;  %s8158_s28 = smov [#allocation5]  }
   0x7   : > { %p8231_p5 = por %p9702_p1, %p66_p0  ;;  %s194_s29 = sshll.u32 %s8158_s28, 4  ;;  %s195_s29 = int_to_ptr.vmem [resolvable:$true] %s194_s29 }
   0x8   : > { %p8235_p6 = pnand %p6782_p2, %p182_p3  ;;  %s8159_s7 = smov [#allocation7]  }
   0x9   : > { %s9705_s26 = scalar_select %p8231_p5, 1, 0 }
   0xa   : > { %s9706_s27 = scalar_select %p8235_p6, 1, 0 }
   0xb   : > { %p7901_p7 = pneg %p8235_p6  ;;  %s207_s8 = sshll.u32 %s8159_s7, 4  ;;  %s208_s8 = int_to_ptr.vmem [resolvable:$true] %s207_s8 }
   0xc   : > { %s8049_s9 = scalar_lea.vmem %s195_s29, 32768  ;;  %p8057_p13 = scmp.lt.s32.totalorder %s195_s29, %s195_s29 }
   0xd   : > { %p8243_p8 = pnand %p7901_p7, %p9702_p1  ;;  %p8050_p10 = scmp.ne.s32.totalorder %s195_s29, %s8049_s9 }
   0xe   : > { %p8058_p0 = scmp.lt.s32.totalorder %s8049_s9, %s8049_s9 }
   0xf   : > { %p8040_p9 = pneg %p8243_p8 }
  0x10   : > { %p8059_p2 = por %p8058_p0, %p8057_p13 }
  0x11   : > { %p8052_p11 = pnand %p8050_p10, %p8040_p9 }
  0x13   : > { %p8053_p12 = pneg %p8052_p11 }
  0x15   : > { %p8060_p3 = pnand %p8059_p2, %p8053_p12 }
  0x17   : > { %8063 = shalt.err (!%p8060_p3)
}
  0x18   : > { %s8160_s10 = smov 128   ;;  %s8161_s11 = smov 8  }
  0x19   : > { %7904 = dma.hbm_to_vmem [thread:$0]  (!%p8243_p8), %s9697_s2, 32768, %s195_s29, [#allocation6], %s8160_s10, %s8160_s10, %s8161_s11  }
  0x1a   : > { %s8075_s14 = scalar_lea.vmem %s208_s8, 32768  ;;  %p8083_p4 = scmp.lt.s32.totalorder %s208_s8, %s208_s8 }
  0x1b   : > { %p8076_p7 = scmp.ne.s32.totalorder %s208_s8, %s8075_s14  ;;  %p8084_p1 = scmp.lt.s32.totalorder %s8075_s14, %s8075_s14 }
  0x1d   : > { %p8078_p10 = pnand %p8076_p7, %p8040_p9  ;;  %p8085_p13 = por %p8084_p1, %p8083_p4 }
  0x1f   : > { %p8079_p11 = pneg %p8078_p10 }
  0x21   : > { %p8086_p12 = pnand %p8085_p13, %p8079_p11 }
  0x23   : > { %8089 = shalt.err (!%p8086_p12)
}
  0x24   : > { %s8162_s15 = smov 2048   ;;  %s8266_s18 = sadd.s32 1, %s8156_s24  }
  0x25   : > { %7907 = dma.hbm_to_vmem [thread:$0]  (!%p8243_p8), %s9698_s3, 32768, %s208_s8, [#allocation6], %s8162_s15, %s8162_s15, %s8160_s10  }
  0x26   : > { %s50_s19 = ssub.s32 %s8156_s24, %s8266_s18  ;;  %s53_s20 = sadd.s32 1, %s8152_s23 }
  0x27   : > { %p51_p1 = scmp.eq.s32.totalorder %s50_s19, 0  ;;  %p60_p4 = scmp.ne.s32.totalorder %s8152_s23, %s8148_s22 }
  0x28   : > { %p61_p9 = scmp.eq.s32.totalorder %s8156_s24, 0  ;;  %p7914_p0 = scmp.lt.s32.totalorder %s8156_s24, 7 }
  0x29   : > { %s8276_s21 = scalar_select %p51_p1, %s8152_s23, %s53_s20  }
  0x2a   : > { %p62_p2 = por %p61_p9, %p60_p4  ;;  %s236_s28 = sand.u32 1, %s8152_s23  }
  0x2b   : > { %s6786_s29 = sshll.u32 %s236_s28, 12  ;;  %s7330_s30 = sshll.u32 %s8156_s24, 16 }
  0x2c   : > { %s8283_s11 = scalar_lea.hbm %s9696_s1, %s7330_s30  ;;  %s240_s8 = scalar_lea.vmem [#allocation3], %s6786_s29 }
  0x2d   : > { %s248_s10 = sshll.u32 %s240_s8, 4  ;;  %p8287_p8 = pnand %p7914_p0, %p62_p2  ;;  %s8285_s10 = int_to_ptr.vmem [resolvable:$true] %s248_s10 }
  0x2e   : > { %s8291_s13 = scalar_lea.sflag [#allocation4], %s236_s28  ;;  %s8090_s24 = scalar_lea.hbm %s8283_s11, 65536 }
  0x2f   : > { %p8091_p3 = scmp.ne.s32.totalorder %s8283_s11, %s8090_s24  ;;  %p8092_p7 = pneg %p8287_p8 }
  0x30   : > { %s8095_s16 = scalar_lea.hbm %s9696_s1, 458752  ;;  %p8096_p13 = scmp.lt.s32.totalorder %s8283_s11, %s9696_s1 }
  0x31   : > { %p8093_p10 = pnand %p8092_p7, %p8091_p3  ;;  %p8097_p12 = scmp.lt.s32.totalorder %s8095_s16, %s8090_s24 }
  0x33   : > { %p8094_p11 = pneg %p8093_p10  ;;  %p8098_p1 = por %p8097_p12, %p8096_p13 }
  0x35   : > { %p8099_p4 = pnand %p8098_p1, %p8094_p11 }
  0x37   : > { %8102 = shalt.err (!%p8099_p4)
}
  0x38   : > { %s8103_s20 = scalar_lea.vmem %s8285_s10, 65536  ;;  %s8163_s28 = smov [#allocation3]  }
  0x39   : > { %p8104_p9 = scmp.ne.s32.totalorder %s8285_s10, %s8103_s20  ;;  %s8108_s29 = sshll.u32 %s8163_s28, 4  ;;  %s8109_s29 = int_to_ptr.vmem [resolvable:$false] %s8108_s29 }
  0x3a   : > { %s8110_s30 = scalar_lea.vmem %s8109_s29, 131072  ;;  %p8111_p3 = scmp.lt.s32.totalorder %s8285_s10, %s8109_s29 }
  0x3b   : > { %p8106_p0 = pnand %p8104_p9, %p8092_p7  ;;  %p8112_p10 = scmp.lt.s32.totalorder %s8110_s30, %s8103_s20 }
  0x3d   : > { %p8107_p2 = pneg %p8106_p0  ;;  %p8113_p5 = por %p8112_p10, %p8111_p3 }
  0x3f   : > { %p8114_p6 = pnand %p8113_p5, %p8107_p2 }
  0x41   : > { %8117 = shalt.err (!%p8114_p6)
}
  0x42   : > { %s8164_s7 = smov 1024   ;;  %s8165_s9 = smov 64  }
  0x43   : > { %7911 = dma.hbm_to_vmem [thread:$0]  (!%p8287_p8), %s8283_s11, 65536, %s8285_s10, %s8291_s13, %s8164_s7, %s8164_s7, %s8165_s9  }
  0x44   : > { %p9709_p7 = scmp.ne.s32.totalorder %s9706_s27, 0 }
  0x45   : > { %s262_s8 = sand.u32 (!%p9709_p7), 1, %s8148_s22   ;;  %p9710_p5 = scmp.ne.s32.totalorder (!%p9709_p7), %s9705_s26, 0 }
  0x46   : > { %260 = sbr.rel (%p9709_p7) target bundleno = 1686 (0x696), region = 44  ;;  %s6791_s24 = sshll.u32 (!%p9709_p7), %s262_s8, 12 }
  0x47   : > { %s263_s14 = scalar_lea.sflag (!%p9709_p7), [#allocation4], %s262_s8  ;;  %s8315_s15 = scalar_lea.vmem (!%p9709_p7), [#allocation3], %s6791_s24 }
  0x4b   : > { %8135 = dma.done.wait (%p9710_p5), %s263_s14, 65536  }
  0x4c   : > { %8137 = vsyncadd (%p9710_p5), %s263_s14, 4294901760  ;;  %p9711_p6 = scmp.eq.s32.totalorder %s8222_s25, 0 }
  0x4e   : > { %8139 = dma.done.wait (%p9711_p6), [#allocation6], 65536   ;;  %p9712_p8 = pmov %p9711_p6 }
  0x4f   : > { %s6794_s27 = sshll.u32 %s8222_s25, 2  ;;  %p9713_p13 = scmp.ne.s32.totalorder %s8222_s25, 0 }
  0x50   : > { %8141 = vsyncadd (%p9712_p8), [#allocation6], 4294901760  ;;  %p304_p11 = scmp.lt.s32.totalorder %s6794_s27, 27 }
  0x51   : > { %313 = sbr.rel (%p9713_p13) target bundleno = 95 (0x5f), region = 60 }
  0x52   : > { %s9720_s27 = smov (!%p304_p11, %s6794_s27), 27 }
  0x53   : > { %s6795_s11 = sshll.u32 %s9720_s27, 3 }
  0x54   : > { %s8329_s13 = scalar_lea.vmem %s9695_s0, %s6795_s11 }
  0x56   : > { %v8166_v0 = vmov 0.0  }
  0x57   : > { %314 = vst [vmem:[#allocation2 + $0x30] sm:$0xff] %v8166_v0  ;;  %315 = vst [vmem:[#allocation2] sm:$0xff] %v8166_v0 }
  0x58   : > { %316 = vst [vmem:[#allocation2 + $0x58] sm:$0xff] %v8166_v0  ;;  %317 = vst [vmem:[#allocation2 + $0x18] sm:$0xff] %v8166_v0 }
  0x59   : > { %318 = vst [vmem:[#allocation2 + $0x50] sm:$0xff] %v8166_v0  ;;  %319 = vst [vmem:[#allocation2 + $0x68] sm:$0xff] %v8166_v0 }
  0x5a   : > { %320 = vst [vmem:[#allocation2 + $0x8] sm:$0xff] %v8166_v0  ;;  %321 = vst [vmem:[#allocation2 + $0x48] sm:$0xff] %v8166_v0 }
  0x5b   : > { %322 = vst [vmem:[#allocation2 + $0x40] sm:$0xff] %v8166_v0  ;;  %323 = vst [vmem:[#allocation2 + $0x20] sm:$0xff] %v8166_v0 }
  0x5c   : > { %324 = vst [vmem:[#allocation2 + $0x10] sm:$0xff] %v8166_v0  ;;  %325 = vst [vmem:[#allocation2 + $0x38] sm:$0xff] %v8166_v0 }
  0x5d   : > { %326 = vst [vmem:[#allocation2 + $0x60] sm:$0xff] %v8166_v0  ;;  %327 = vst [vmem:[#allocation2 + $0x70] sm:$0xff] %v8166_v0 }
  0x5e   : > { %328 = vst [vmem:[#allocation2 + $0x78] sm:$0xff] %v8166_v0  ;;  %329 = vst [vmem:[#allocation2 + $0x28] sm:$0xff] %v8166_v0 }
  0x5f PF: > { %v466_v1 = vld [vmem:[%s8315_s15 + $0x380] sm:$0xff]  ;;  %v347_v54 = vld [vmem:[%s8329_s13 + $0x8] sm:$0xff]  ;;  %v349_v55 = vld [vmem:[%s8329_s13 + $0x18] sm:$0xff]  ;;  %p7309_p12 = scmp.ne.s32.totalorder %s8222_s25, 6 }
  0x60   : > { %v474_v2 = vld [vmem:[%s8315_s15 + $0x3c0] sm:$0xff]  ;;  %v8365_v59 = vpack.c.bf16 %v347_v54, %v347_v54  ;;  %v8367_v60 = vpack.c.bf16 %v349_v55, %v349_v55 }
  0x61   : > { %v722_v3 = vld [vmem:[%s8315_s15 + $0xb80] sm:$0xff]  ;;  %v6910_v4 = vcombine.high %v466_v1, %v474_v2  ;;  %v6909_v6 = vcombine.low %v466_v1, %v474_v2 }
  0x62   : > { %v730_v5 = vld [vmem:[%s8315_s15 + $0xbc0] sm:$0xff]  ;;  %3458 = vmatprep.mubr.bf16.mxu0 %v8365_v59  ;;  %3499 = vmatprep.mubr.bf16.mxu1 %v8367_v60 }
  0x63   : > { %v450_v7 = vld [vmem:[%s8315_s15 + $0x300] sm:$0xff]  ;;  %v7166_v9 = vcombine.high %v722_v3, %v730_v5  ;;  %v7165_v10 = vcombine.low %v722_v3, %v730_v5  ;;  %3426 = vmatprep.subr.bf16.mxu0 %v6910_v4 }
  0x64   : > { %v458_v8 = vld [vmem:[%s8315_s15 + $0x340] sm:$0xff]  ;;  %3427 = vmatpush1.bf16.msra.mxu0 %v6909_v6 }
  0x65   : > { %v6894_v11 = vcombine.high %v450_v7, %v458_v8  ;;  %v706_v12 = vld [vmem:[%s8315_s15 + $0xb00] sm:$0xff]  ;;  %3467 = vmatprep.subr.bf16.mxu1 %v7166_v9  ;;  %v6893_v19 = vcombine.low %v450_v7, %v458_v8 }
  0x66   : > { %v714_v13 = vld [vmem:[%s8315_s15 + $0xb40] sm:$0xff]  ;;  %3468 = vmatpush1.bf16.msra.mxu1 %v7165_v10 }
  0x67   : > { %v434_v14 = vld [vmem:[%s8315_s15 + $0x280] sm:$0xff]  ;;  %v7150_v15 = vcombine.high %v706_v12, %v714_v13  ;;  %3428 = vmatprep.subr.bf16.mxu0 %v6894_v11  ;;  %v7149_v20 = vcombine.low %v706_v12, %v714_v13 }
  0x68   : > { %v442_v16 = vld [vmem:[%s8315_s15 + $0x2c0] sm:$0xff]  ;;  %3429 = vmatpush1.bf16.msra.mxu0 %v6893_v19 }
  0x69   : > { %v690_v17 = vld [vmem:[%s8315_s15 + $0xa80] sm:$0xff]  ;;  %v6878_v21 = vcombine.high %v434_v14, %v442_v16  ;;  %3469 = vmatprep.subr.bf16.mxu1 %v7150_v15  ;;  %v6877_v27 = vcombine.low %v434_v14, %v442_v16 }
  0x6a   : > { %v698_v18 = vld [vmem:[%s8315_s15 + $0xac0] sm:$0xff]  ;;  %3470 = vmatpush1.bf16.msra.mxu1 %v7149_v20 }
  0x6b   : > { %v7134_v22 = vcombine.high %v690_v17, %v698_v18  ;;  %v418_v23 = vld [vmem:[%s8315_s15 + $0x200] sm:$0xff]  ;;  %3430 = vmatprep.subr.bf16.mxu0 %v6878_v21  ;;  %v7133_v28 = vcombine.low %v690_v17, %v698_v18 }
  0x6c   : > { %v426_v24 = vld [vmem:[%s8315_s15 + $0x240] sm:$0xff]  ;;  %3431 = vmatpush1.bf16.msra.mxu0 %v6877_v27 }
  0x6d   : > { %v674_v25 = vld [vmem:[%s8315_s15 + $0xa00] sm:$0xff]  ;;  %v6862_v29 = vcombine.high %v418_v23, %v426_v24  ;;  %3471 = vmatprep.subr.bf16.mxu1 %v7134_v22  ;;  %v6861_v35 = vcombine.low %v418_v23, %v426_v24 }
  0x6e   : > { %v682_v26 = vld [vmem:[%s8315_s15 + $0xa40] sm:$0xff]  ;;  %3472 = vmatpush1.bf16.msra.mxu1 %v7133_v28 }
  0x6f   : > { %v7118_v30 = vcombine.high %v674_v25, %v682_v26  ;;  %v402_v31 = vld [vmem:[%s8315_s15 + $0x180] sm:$0xff]  ;;  %3432 = vmatprep.subr.bf16.mxu0 %v6862_v29  ;;  %v7117_v36 = vcombine.low %v674_v25, %v682_v26 }
  0x70   : > { %v410_v32 = vld [vmem:[%s8315_s15 + $0x1c0] sm:$0xff]  ;;  %3433 = vmatpush1.bf16.msra.mxu0 %v6861_v35 }
  0x71   : > { %v658_v33 = vld [vmem:[%s8315_s15 + $0x980] sm:$0xff]  ;;  %v6846_v37 = vcombine.high %v402_v31, %v410_v32  ;;  %3473 = vmatprep.subr.bf16.mxu1 %v7118_v30  ;;  %v6845_v43 = vcombine.low %v402_v31, %v410_v32 }
  0x72   : > { %v666_v34 = vld [vmem:[%s8315_s15 + $0x9c0] sm:$0xff]  ;;  %3474 = vmatpush1.bf16.msra.mxu1 %v7117_v36 }
  0x73   : > { %v7102_v38 = vcombine.high %v658_v33, %v666_v34  ;;  %v386_v39 = vld [vmem:[%s8315_s15 + $0x100] sm:$0xff]  ;;  %3434 = vmatprep.subr.bf16.mxu0 %v6846_v37  ;;  %v7101_v44 = vcombine.low %v658_v33, %v666_v34 }
  0x74   : > { %v394_v40 = vld [vmem:[%s8315_s15 + $0x140] sm:$0xff]  ;;  %3435 = vmatpush1.bf16.msra.mxu0 %v6845_v43 }
  0x75   : > { %v642_v41 = vld [vmem:[%s8315_s15 + $0x900] sm:$0xff]  ;;  %v6830_v45 = vcombine.high %v386_v39, %v394_v40  ;;  %3475 = vmatprep.subr.bf16.mxu1 %v7102_v38  ;;  %v6829_v51 = vcombine.low %v386_v39, %v394_v40 }
  0x76   : > { %v650_v42 = vld [vmem:[%s8315_s15 + $0x940] sm:$0xff]  ;;  %3476 = vmatpush1.bf16.msra.mxu1 %v7101_v44 }
  0x77   : > { %v7086_v46 = vcombine.high %v642_v41, %v650_v42  ;;  %v370_v47 = vld [vmem:[%s8315_s15 + $0x80] sm:$0xff]  ;;  %3436 = vmatprep.subr.bf16.mxu0 %v6830_v45  ;;  %v7085_v52 = vcombine.low %v642_v41, %v650_v42 }
  0x78   : > { %v378_v48 = vld [vmem:[%s8315_s15 + $0xc0] sm:$0xff]  ;;  %3437 = vmatpush1.bf16.msra.mxu0 %v6829_v51 }
  0x79   : > { %v626_v49 = vld [vmem:[%s8315_s15 + $0x880] sm:$0xff]  ;;  %v6814_v53 = vcombine.high %v370_v47, %v378_v48  ;;  %3477 = vmatprep.subr.bf16.mxu1 %v7086_v46  ;;  %v6813_v63 = vcombine.low %v370_v47, %v378_v48 }
  0x7a   : > { %v634_v50 = vld [vmem:[%s8315_s15 + $0x8c0] sm:$0xff]  ;;  %3478 = vmatpush1.bf16.msra.mxu1 %v7085_v52 }
  0x7b   : > { %v7070_v56 = vcombine.high %v626_v49, %v634_v50  ;;  %v354_v57 = vld [vmem:[%s8315_s15] sm:$0xff]  ;;  %3438 = vmatprep.subr.bf16.mxu0 %v6814_v53  ;;  %v7069_v0 = vcombine.low %v626_v49, %v634_v50 }
  0x7c   : > { %v362_v58 = vld [vmem:[%s8315_s15 + $0x40] sm:$0xff]  ;;  %3439 = vmatpush1.bf16.msra.mxu0 %v6813_v63 }
  0x7d   : > { %v610_v61 = vld [vmem:[%s8315_s15 + $0x800] sm:$0xff]  ;;  %v6798_v1 = vcombine.high %v354_v57, %v362_v58  ;;  %3479 = vmatprep.subr.bf16.mxu1 %v7070_v56  ;;  %v6797_v7 = vcombine.low %v354_v57, %v362_v58 }
  0x7e   : > { %v618_v62 = vld [vmem:[%s8315_s15 + $0x840] sm:$0xff]  ;;  %3480 = vmatpush1.bf16.msra.mxu1 %v7069_v0 }
  0x7f   : > { %v7054_v2 = vcombine.high %v610_v61, %v618_v62  ;;  %v594_v3 = vld [vmem:[%s8315_s15 + $0x780] sm:$0xff]  ;;  %3440 = vmatprep.subr.bf16.mxu0 %v6798_v1  ;;  %v7053_v8 = vcombine.low %v610_v61, %v618_v62 }
  0x80   : > { %v602_v4 = vld [vmem:[%s8315_s15 + $0x7c0] sm:$0xff]  ;;  %3441 = vmatpush1.bf16.msra.mxu0 %v6797_v7  ;;  %v723_v7 = vld [vmem:[%s8315_s15 + $0xb88] sm:$0xff] }
  0x81   : > { %v850_v5 = vld [vmem:[%s8315_s15 + $0xf80] sm:$0xff]  ;;  %v7038_v9 = vcombine.high %v594_v3, %v602_v4  ;;  %3481 = vmatprep.subr.bf16.mxu1 %v7054_v2  ;;  %v7037_v15 = vcombine.low %v594_v3, %v602_v4 }
  0x82   : > { %v858_v6 = vld [vmem:[%s8315_s15 + $0xfc0] sm:$0xff]  ;;  %3482 = vmatpush1.bf16.msra.mxu1 %v7053_v8  ;;  %v731_v8 = vld [vmem:[%s8315_s15 + $0xbc8] sm:$0xff] }
  0x83   : > { %v7294_v10 = vcombine.high %v850_v5, %v858_v6  ;;  %v578_v11 = vld [vmem:[%s8315_s15 + $0x700] sm:$0xff]  ;;  %3442 = vmatprep.subr.bf16.mxu0 %v7038_v9  ;;  %v7293_v16 = vcombine.low %v850_v5, %v858_v6  ;;  %v467_v5 = vld [vmem:[%s8315_s15 + $0x388] sm:$0xff] }
  0x84   : > { %v586_v12 = vld [vmem:[%s8315_s15 + $0x740] sm:$0xff]  ;;  %3443 = vmatpush2.bf16.msra.mxu0 %v7037_v15  ;;  %v475_v6 = vld [vmem:[%s8315_s15 + $0x3c8] sm:$0xff] }
  0x85   : > { %v834_v13 = vld [vmem:[%s8315_s15 + $0xf00] sm:$0xff]  ;;  %v7022_v17 = vcombine.high %v578_v11, %v586_v12  ;;  %3483 = vmatprep.subr.bf16.mxu1 %v7294_v10  ;;  %v7021_v23 = vcombine.low %v578_v11, %v586_v12  ;;  %v348_v12 = vld [vmem:[%s8329_s13 + $0x10] sm:$0xff]  ;;  %v451_v15 = vld [vmem:[%s8315_s15 + $0x308] sm:$0xff] }
  0x86   : > { %v842_v14 = vld [vmem:[%s8315_s15 + $0xf40] sm:$0xff]  ;;  %3484 = vmatpush2.bf16.msra.mxu1 %v7293_v16  ;;  %v459_v16 = vld [vmem:[%s8315_s15 + $0x348] sm:$0xff] }
  0x87   : > { %v7278_v18 = vcombine.high %v834_v13, %v842_v14  ;;  %v562_v19 = vld [vmem:[%s8315_s15 + $0x680] sm:$0xff]  ;;  %3444 = vmatprep.subr.bf16.mxu0 %v7022_v17  ;;  %v7277_v24 = vcombine.low %v834_v13, %v842_v14  ;;  %v6912_v13 = vcombine.high %v467_v5, %v475_v6  ;;  %v7168_v14 = vcombine.high %v723_v7, %v731_v8 }
  0x88   : > { %v570_v20 = vld [vmem:[%s8315_s15 + $0x6c0] sm:$0xff]  ;;  %3445 = vmatpush2.bf16.msra.mxu0 %v7021_v23  ;;  %v6896_v23 = vcombine.high %v451_v15, %v459_v16 }
  0x89   : > { %v818_v21 = vld [vmem:[%s8315_s15 + $0xe80] sm:$0xff]  ;;  %v7006_v25 = vcombine.high %v562_v19, %v570_v20  ;;  %3485 = vmatprep.subr.bf16.mxu1 %v7278_v18  ;;  %v7005_v31 = vcombine.low %v562_v19, %v570_v20  ;;  %v707_v18 = vld [vmem:[%s8315_s15 + $0xb08] sm:$0xff]  ;;  %v8417_v20 = vpack.c.bf16 %v348_v12, %v348_v12 }
  0x8a   : > { %v826_v22 = vld [vmem:[%s8315_s15 + $0xec0] sm:$0xff]  ;;  %3486 = vmatpush2.bf16.msra.mxu1 %v7277_v24  ;;  %v715_v19 = vld [vmem:[%s8315_s15 + $0xb48] sm:$0xff] }
  0x8b   : > { %v7262_v26 = vcombine.high %v818_v21, %v826_v22  ;;  %v546_v27 = vld [vmem:[%s8315_s15 + $0x600] sm:$0xff]  ;;  %3446 = vmatprep.subr.bf16.mxu0 %v7006_v25  ;;  %v7261_v32 = vcombine.low %v818_v21, %v826_v22  ;;  %v6911_v21 = vcombine.low %v467_v5, %v475_v6  ;;  %v7167_v22 = vcombine.low %v723_v7, %v731_v8  ;;  %v435_v25 = vld [vmem:[%s8315_s15 + $0x288] sm:$0xff] }
  0x8c   : > { %v554_v28 = vld [vmem:[%s8315_s15 + $0x640] sm:$0xff]  ;;  %3447 = vmatpush2.bf16.msra.mxu0 %v7005_v31  ;;  %v7152_v24 = vcombine.high %v707_v18, %v715_v19  ;;  %v611_v5 = vld [vmem:[%s8315_s15 + $0x808] sm:$0xff] }
  0x8d   : > { %v802_v29 = vld [vmem:[%s8315_s15 + $0xe00] sm:$0xff]  ;;  %v6990_v33 = vcombine.high %v546_v27, %v554_v28  ;;  %3487 = vmatprep.subr.bf16.mxu1 %v7262_v26  ;;  %v6989_v39 = vcombine.low %v546_v27, %v554_v28  ;;  %v443_v26 = vld [vmem:[%s8315_s15 + $0x2c8] sm:$0xff] }
  0x8e   : > { %v810_v30 = vld [vmem:[%s8315_s15 + $0xe40] sm:$0xff]  ;;  %3488 = vmatpush2.bf16.msra.mxu1 %v7261_v32  ;;  %v691_v27 = vld [vmem:[%s8315_s15 + $0xa88] sm:$0xff]  ;;  %v6880_v31 = vcombine.high %v435_v25, %v443_v26 }
  0x8f   : > { %v7246_v34 = vcombine.high %v802_v29, %v810_v30  ;;  %v530_v35 = vld [vmem:[%s8315_s15 + $0x580] sm:$0xff]  ;;  %3448 = vmatprep.subr.bf16.mxu0 %v6990_v33  ;;  %v7245_v40 = vcombine.low %v802_v29, %v810_v30  ;;  %v699_v28 = vld [vmem:[%s8315_s15 + $0xac8] sm:$0xff]  ;;  %v6895_v29 = vcombine.low %v451_v15, %v459_v16  ;;  %v7151_v30 = vcombine.low %v707_v18, %v715_v19 }
  0x90   : > { %v538_v36 = vld [vmem:[%s8315_s15 + $0x5c0] sm:$0xff]  ;;  %3449 = vmatpush2.bf16.msra.mxu0 %v6989_v39  ;;  %v7136_v32 = vcombine.high %v691_v27, %v699_v28  ;;  %v419_v33 = vld [vmem:[%s8315_s15 + $0x208] sm:$0xff] }
  0x91   : > { %v786_v37 = vld [vmem:[%s8315_s15 + $0xd80] sm:$0xff]  ;;  %v6974_v41 = vcombine.high %v530_v35, %v538_v36  ;;  %3489 = vmatprep.subr.bf16.mxu1 %v7246_v34  ;;  %v6973_v47 = vcombine.low %v530_v35, %v538_v36  ;;  %v427_v34 = vld [vmem:[%s8315_s15 + $0x248] sm:$0xff] }
  0x92   : > { %v794_v38 = vld [vmem:[%s8315_s15 + $0xdc0] sm:$0xff]  ;;  %3490 = vmatpush2.bf16.msra.mxu1 %v7245_v40  ;;  %v675_v35 = vld [vmem:[%s8315_s15 + $0xa08] sm:$0xff]  ;;  %v6864_v39 = vcombine.high %v419_v33, %v427_v34 }
  0x93   : > { %v7230_v42 = vcombine.high %v786_v37, %v794_v38  ;;  %v514_v43 = vld [vmem:[%s8315_s15 + $0x500] sm:$0xff]  ;;  %3450 = vmatprep.subr.bf16.mxu0 %v6974_v41  ;;  %v7229_v48 = vcombine.low %v786_v37, %v794_v38  ;;  %v683_v36 = vld [vmem:[%s8315_s15 + $0xa48] sm:$0xff]  ;;  %v6879_v37 = vcombine.low %v435_v25, %v443_v26  ;;  %v7135_v38 = vcombine.low %v691_v27, %v699_v28 }
  0x94   : > { %v522_v44 = vld [vmem:[%s8315_s15 + $0x540] sm:$0xff]  ;;  %3451 = vmatpush2.bf16.msra.mxu0 %v6973_v47  ;;  %v7120_v40 = vcombine.high %v675_v35, %v683_v36  ;;  %v403_v41 = vld [vmem:[%s8315_s15 + $0x188] sm:$0xff] }
  0x95   : > { %v770_v45 = vld [vmem:[%s8315_s15 + $0xd00] sm:$0xff]  ;;  %v6958_v49 = vcombine.high %v514_v43, %v522_v44  ;;  %3491 = vmatprep.subr.bf16.mxu1 %v7230_v42  ;;  %v6957_v55 = vcombine.low %v514_v43, %v522_v44  ;;  %v411_v42 = vld [vmem:[%s8315_s15 + $0x1c8] sm:$0xff] }
  0x96   : > { %v778_v46 = vld [vmem:[%s8315_s15 + $0xd40] sm:$0xff]  ;;  %3492 = vmatpush2.bf16.msra.mxu1 %v7229_v48  ;;  %v659_v43 = vld [vmem:[%s8315_s15 + $0x988] sm:$0xff]  ;;  %v6848_v47 = vcombine.high %v403_v41, %v411_v42 }
  0x97   : > { %v7214_v50 = vcombine.high %v770_v45, %v778_v46  ;;  %v498_v51 = vld [vmem:[%s8315_s15 + $0x480] sm:$0xff]  ;;  %3452 = vmatprep.subr.bf16.mxu0 %v6958_v49  ;;  %v7213_v56 = vcombine.low %v770_v45, %v778_v46  ;;  %v667_v44 = vld [vmem:[%s8315_s15 + $0x9c8] sm:$0xff]  ;;  %v6863_v45 = vcombine.low %v419_v33, %v427_v34  ;;  %v7119_v46 = vcombine.low %v675_v35, %v683_v36 }
  0x98   : > { %v506_v52 = vld [vmem:[%s8315_s15 + $0x4c0] sm:$0xff]  ;;  %3453 = vmatpush2.bf16.msra.mxu0 %v6957_v55  ;;  %v7104_v48 = vcombine.high %v659_v43, %v667_v44  ;;  %v387_v49 = vld [vmem:[%s8315_s15 + $0x108] sm:$0xff] }
  0x99   : > { %v754_v53 = vld [vmem:[%s8315_s15 + $0xc80] sm:$0xff]  ;;  %v6942_v57 = vcombine.high %v498_v51, %v506_v52  ;;  %3493 = vmatprep.subr.bf16.mxu1 %v7214_v50  ;;  %v6941_v1 = vcombine.low %v498_v51, %v506_v52  ;;  %v395_v50 = vld [vmem:[%s8315_s15 + $0x148] sm:$0xff] }
  0x9a   : > { %v762_v54 = vld [vmem:[%s8315_s15 + $0xcc0] sm:$0xff]  ;;  %3494 = vmatpush2.bf16.msra.mxu1 %v7213_v56  ;;  %v643_v51 = vld [vmem:[%s8315_s15 + $0x908] sm:$0xff]  ;;  %v6832_v55 = vcombine.high %v387_v49, %v395_v50 }
  0x9b   : > { %v7198_v58 = vcombine.high %v754_v53, %v762_v54  ;;  %v482_v61 = vld [vmem:[%s8315_s15 + $0x400] sm:$0xff]  ;;  %3454 = vmatprep.subr.bf16.mxu0 %v6942_v57  ;;  %v7197_v2 = vcombine.low %v754_v53, %v762_v54  ;;  %v651_v52 = vld [vmem:[%s8315_s15 + $0x948] sm:$0xff]  ;;  %v6847_v53 = vcombine.low %v403_v41, %v411_v42  ;;  %v7103_v54 = vcombine.low %v659_v43, %v667_v44 }
  0x9c   : > { %v490_v62 = vld [vmem:[%s8315_s15 + $0x440] sm:$0xff]  ;;  %3455 = vmatpush2.bf16.msra.mxu0 %v6941_v1  ;;  %v7088_v56 = vcombine.high %v643_v51, %v651_v52  ;;  %v371_v57 = vld [vmem:[%s8315_s15 + $0x88] sm:$0xff] }
  0x9d   : > { %v738_v63 = vld [vmem:[%s8315_s15 + $0xc00] sm:$0xff]  ;;  %v6926_v3 = vcombine.high %v482_v61, %v490_v62  ;;  %3495 = vmatprep.subr.bf16.mxu1 %v7198_v58  ;;  %v6925_v9 = vcombine.low %v482_v61, %v490_v62  ;;  %v379_v58 = vld [vmem:[%s8315_s15 + $0xc8] sm:$0xff] }
  0x9e   : > { %v746_v0 = vld [vmem:[%s8315_s15 + $0xc40] sm:$0xff]  ;;  %3496 = vmatpush2.bf16.msra.mxu1 %v7197_v2  ;;  %v627_v61 = vld [vmem:[%s8315_s15 + $0x888] sm:$0xff]  ;;  %v6816_v1 = vcombine.high %v371_v57, %v379_v58  ;;  %v6815_v7 = vcombine.low %v371_v57, %v379_v58 }
  0x9f   : > { %v7182_v4 = vcombine.high %v738_v63, %v746_v0  ;;  %v346_v10 = vld [vmem:[%s8329_s13] sm:$0xff]  ;;  %3456 = vmatprep.subr.bf16.mxu0 %v6926_v3  ;;  %v7181_v11 = vcombine.low %v738_v63, %v746_v0  ;;  %v635_v62 = vld [vmem:[%s8315_s15 + $0x8c8] sm:$0xff]  ;;  %v6831_v63 = vcombine.low %v387_v49, %v395_v50  ;;  %v7087_v0 = vcombine.low %v643_v51, %v651_v52 }
  0xa0   : > { %v8413_v17 = vpack.c.bf16 %v346_v10, %v346_v10  ;;  %3457 = vmatpush2.bf16.msra.mxu0 %v6925_v9  ;;  %v7072_v2 = vcombine.high %v627_v61, %v635_v62  ;;  %v355_v3 = vld [vmem:[%s8315_s15 + $0x8] sm:$0xff]  ;;  %v7071_v8 = vcombine.low %v627_v61, %v635_v62 }
  0xa1   : > { %3497 = vmatprep.subr.bf16.mxu1 %v7182_v4  ;;  %3508 = vmatprep.subr.bf16.mxu0 %v6912_v13  ;;  %v363_v4 = vld [vmem:[%s8315_s15 + $0x48] sm:$0xff] }
  0xa2   : > { %3498 = vmatpush2.bf16.msra.mxu1 %v7181_v11  ;;  %v619_v6 = vld [vmem:[%s8315_s15 + $0x848] sm:$0xff]  ;;  %v6800_v9 = vcombine.high %v355_v3, %v363_v4  ;;  %v6799_v15 = vcombine.low %v355_v3, %v363_v4 }
  0xa3   : > { %3549 = vmatprep.subr.bf16.mxu1 %v7168_v14  ;;  %3459 = vmatmul.mubr.bf16.vlgmr.msra.gmra.mxu0 %v8413_v17  ;;  %v7056_v10 = vcombine.high %v611_v5, %v619_v6  ;;  %v595_v11 = vld [vmem:[%s8315_s15 + $0x788] sm:$0xff]  ;;  %v7055_v16 = vcombine.low %v611_v5, %v619_v6 }
  0xa4   : > { %3509 = vmatpush1.bf16.msra.mxu0 %v6911_v21  ;;  %3540 = vmatprep.mubr.bf16.mxu0 %v8365_v59  ;;  %v603_v12 = vld [vmem:[%s8315_s15 + $0x7c8] sm:$0xff] }
  0xa5   : > { %3500 = vmatmul.mubr.bf16.vlgmr.msra.gmra.mxu1 %v8417_v20  ;;  %3510 = vmatprep.subr.bf16.mxu0 %v6896_v23  ;;  %v851_v13 = vld [vmem:[%s8315_s15 + $0xf88] sm:$0xff]  ;;  %v7040_v18 = vcombine.high %v595_v11, %v603_v12  ;;  %v7039_v25 = vcombine.low %v595_v11, %v603_v12 }
  0xa6   : > { %3550 = vmatpush1.bf16.msra.mxu1 %v7167_v22  ;;  %3581 = vmatprep.mubr.bf16.mxu1 %v8367_v60  ;;  %v859_v14 = vld [vmem:[%s8315_s15 + $0xfc8] sm:$0xff] }
  0xa7   : > { %3551 = vmatprep.subr.bf16.mxu1 %v7152_v24  ;;  %v7296_v19 = vcombine.high %v851_v13, %v859_v14  ;;  %v579_v21 = vld [vmem:[%s8315_s15 + $0x708] sm:$0xff]  ;;  %v7295_v26 = vcombine.low %v851_v13, %v859_v14 }
  0xa8   : > { %3511 = vmatpush1.bf16.msra.mxu0 %v6895_v29  ;;  %v587_v22 = vld [vmem:[%s8315_s15 + $0x748] sm:$0xff] }
  0xa9   : > { %3512 = vmatprep.subr.bf16.mxu0 %v6880_v31  ;;  %v835_v23 = vld [vmem:[%s8315_s15 + $0xf08] sm:$0xff]  ;;  %v7024_v27 = vcombine.high %v579_v21, %v587_v22  ;;  %v7023_v33 = vcombine.low %v579_v21, %v587_v22 }
  0xaa   : > { %3552 = vmatpush1.bf16.msra.mxu1 %v7151_v30  ;;  %v843_v24 = vld [vmem:[%s8315_s15 + $0xf48] sm:$0xff] }
  0xab   : > { %3553 = vmatprep.subr.bf16.mxu1 %v7136_v32  ;;  %v7280_v28 = vcombine.high %v835_v23, %v843_v24  ;;  %v563_v29 = vld [vmem:[%s8315_s15 + $0x688] sm:$0xff]  ;;  %v7279_v34 = vcombine.low %v835_v23, %v843_v24 }
  0xac   : > { %3513 = vmatpush1.bf16.msra.mxu0 %v6879_v37  ;;  %v571_v30 = vld [vmem:[%s8315_s15 + $0x6c8] sm:$0xff] }
  0xad   : > { %3514 = vmatprep.subr.bf16.mxu0 %v6864_v39  ;;  %v819_v31 = vld [vmem:[%s8315_s15 + $0xe88] sm:$0xff]  ;;  %v7008_v35 = vcombine.high %v563_v29, %v571_v30  ;;  %v7007_v41 = vcombine.low %v563_v29, %v571_v30 }
  0xae   : > { %3554 = vmatpush1.bf16.msra.mxu1 %v7135_v38  ;;  %v827_v32 = vld [vmem:[%s8315_s15 + $0xec8] sm:$0xff] }
  0xaf   : > { %3555 = vmatprep.subr.bf16.mxu1 %v7120_v40  ;;  %v7264_v36 = vcombine.high %v819_v31, %v827_v32  ;;  %v547_v37 = vld [vmem:[%s8315_s15 + $0x608] sm:$0xff]  ;;  %v7263_v42 = vcombine.low %v819_v31, %v827_v32 }
  0xb0   : > { %3515 = vmatpush1.bf16.msra.mxu0 %v6863_v45  ;;  %v555_v38 = vld [vmem:[%s8315_s15 + $0x648] sm:$0xff] }
  0xb1   : > { %3516 = vmatprep.subr.bf16.mxu0 %v6848_v47  ;;  %v803_v39 = vld [vmem:[%s8315_s15 + $0xe08] sm:$0xff]  ;;  %v6992_v43 = vcombine.high %v547_v37, %v555_v38  ;;  %v6991_v49 = vcombine.low %v547_v37, %v555_v38 }
  0xb2   : > { %3556 = vmatpush1.bf16.msra.mxu1 %v7119_v46  ;;  %v811_v40 = vld [vmem:[%s8315_s15 + $0xe48] sm:$0xff] }
  0xb3   : > { %3557 = vmatprep.subr.bf16.mxu1 %v7104_v48  ;;  %v7248_v44 = vcombine.high %v803_v39, %v811_v40  ;;  %v531_v45 = vld [vmem:[%s8315_s15 + $0x588] sm:$0xff]  ;;  %v7247_v50 = vcombine.low %v803_v39, %v811_v40 }
  0xb4   : > { %3517 = vmatpush1.bf16.msra.mxu0 %v6847_v53  ;;  %v539_v46 = vld [vmem:[%s8315_s15 + $0x5c8] sm:$0xff] }
  0xb5   : > { %3518 = vmatprep.subr.bf16.mxu0 %v6832_v55  ;;  %v787_v47 = vld [vmem:[%s8315_s15 + $0xd88] sm:$0xff]  ;;  %v6976_v51 = vcombine.high %v531_v45, %v539_v46  ;;  %v6975_v57 = vcombine.low %v531_v45, %v539_v46 }
  0xb6   : > { %3558 = vmatpush1.bf16.msra.mxu1 %v7103_v54  ;;  %v795_v48 = vld [vmem:[%s8315_s15 + $0xdc8] sm:$0xff] }
  0xb7   : > { %3559 = vmatprep.subr.bf16.mxu1 %v7088_v56  ;;  %v7232_v52 = vcombine.high %v787_v47, %v795_v48  ;;  %v515_v53 = vld [vmem:[%s8315_s15 + $0x508] sm:$0xff]  ;;  %v7231_v58 = vcombine.low %v787_v47, %v795_v48 }
  0xb8   : > { %3519 = vmatpush1.bf16.msra.mxu0 %v6831_v63  ;;  %v523_v54 = vld [vmem:[%s8315_s15 + $0x548] sm:$0xff] }
  0xb9   : > { %3520 = vmatprep.subr.bf16.mxu0 %v6816_v1  ;;  %v771_v55 = vld [vmem:[%s8315_s15 + $0xd08] sm:$0xff]  ;;  %v6960_v61 = vcombine.high %v515_v53, %v523_v54  ;;  %v6959_v3 = vcombine.low %v515_v53, %v523_v54 }
  0xba   : > { %3560 = vmatpush1.bf16.msra.mxu1 %v7087_v0  ;;  %v779_v56 = vld [vmem:[%s8315_s15 + $0xd48] sm:$0xff] }
  0xbb   : > { %3561 = vmatprep.subr.bf16.mxu1 %v7072_v2  ;;  %v7216_v62 = vcombine.high %v771_v55, %v779_v56  ;;  %v499_v63 = vld [vmem:[%s8315_s15 + $0x488] sm:$0xff]  ;;  %v7215_v4 = vcombine.low %v771_v55, %v779_v56 }
  0xbc   : > { %3521 = vmatpush1.bf16.msra.mxu0 %v6815_v7  ;;  %v507_v0 = vld [vmem:[%s8315_s15 + $0x4c8] sm:$0xff] }
  0xbd   : > { %3522 = vmatprep.subr.bf16.mxu0 %v6800_v9  ;;  %v755_v1 = vld [vmem:[%s8315_s15 + $0xc88] sm:$0xff]  ;;  %v6944_v5 = vcombine.high %v499_v63, %v507_v0  ;;  %v6943_v11 = vcombine.low %v499_v63, %v507_v0 }
  0xbe   : > { %3562 = vmatpush1.bf16.msra.mxu1 %v7071_v8  ;;  %v763_v2 = vld [vmem:[%s8315_s15 + $0xcc8] sm:$0xff] }
  0xbf   : > { %3563 = vmatprep.subr.bf16.mxu1 %v7056_v10  ;;  %v7200_v6 = vcombine.high %v755_v1, %v763_v2  ;;  %v483_v7 = vld [vmem:[%s8315_s15 + $0x408] sm:$0xff]  ;;  %v7199_v12 = vcombine.low %v755_v1, %v763_v2 }
  0xc0   : > { %3523 = vmatpush1.bf16.msra.mxu0 %v6799_v15  ;;  %v491_v8 = vld [vmem:[%s8315_s15 + $0x448] sm:$0xff]  ;;  %v468_v15 = vld [vmem:[%s8315_s15 + $0x390] sm:$0xff] }
  0xc1   : > { %3524 = vmatprep.subr.bf16.mxu0 %v7040_v18  ;;  %v739_v9 = vld [vmem:[%s8315_s15 + $0xc08] sm:$0xff]  ;;  %v6928_v13 = vcombine.high %v483_v7, %v491_v8  ;;  %v724_v18 = vld [vmem:[%s8315_s15 + $0xb90] sm:$0xff]  ;;  %v6927_v21 = vcombine.low %v483_v7, %v491_v8 }
  0xc2   : > { %3564 = vmatpush1.bf16.msra.mxu1 %v7055_v16  ;;  %v747_v10 = vld [vmem:[%s8315_s15 + $0xc48] sm:$0xff]  ;;  %v476_v16 = vld [vmem:[%s8315_s15 + $0x3d0] sm:$0xff] }
  0xc3   : > { %3565 = vmatprep.subr.bf16.mxu1 %v7296_v19  ;;  %v7184_v14 = vcombine.high %v739_v9, %v747_v10  ;;  %v732_v19 = vld [vmem:[%s8315_s15 + $0xbd0] sm:$0xff]  ;;  %v7183_v22 = vcombine.low %v739_v9, %v747_v10  ;;  %v6914_v23 = vcombine.high %v468_v15, %v476_v16  ;;  %v6913_v29 = vcombine.low %v468_v15, %v476_v16 }
  0xc4   : > { %3525 = vmatpush2.bf16.msra.mxu0 %v7039_v25  ;;  %v7170_v24 = vcombine.high %v724_v18, %v732_v19  ;;  %v452_v25 = vld [vmem:[%s8315_s15 + $0x310] sm:$0xff]  ;;  %v7169_v30 = vcombine.low %v724_v18, %v732_v19 }
  0xc5   : > { %3526 = vmatprep.subr.bf16.mxu0 %v7024_v27  ;;  %v708_v27 = vld [vmem:[%s8315_s15 + $0xb10] sm:$0xff] }
  0xc6   : > { %3566 = vmatpush2.bf16.msra.mxu1 %v7295_v26  ;;  %v460_v26 = vld [vmem:[%s8315_s15 + $0x350] sm:$0xff] }
  0xc7   : > { %3567 = vmatprep.subr.bf16.mxu1 %v7280_v28  ;;  %v716_v28 = vld [vmem:[%s8315_s15 + $0xb50] sm:$0xff]  ;;  %v6898_v31 = vcombine.high %v452_v25, %v460_v26  ;;  %v6897_v37 = vcombine.low %v452_v25, %v460_v26 }
  0xc8   : > { %3527 = vmatpush2.bf16.msra.mxu0 %v7023_v33  ;;  %v7154_v32 = vcombine.high %v708_v27, %v716_v28  ;;  %v436_v33 = vld [vmem:[%s8315_s15 + $0x290] sm:$0xff]  ;;  %v7153_v38 = vcombine.low %v708_v27, %v716_v28 }
  0xc9   : > { %3528 = vmatprep.subr.bf16.mxu0 %v7008_v35  ;;  %v692_v35 = vld [vmem:[%s8315_s15 + $0xa90] sm:$0xff] }
  0xca   : > { %3568 = vmatpush2.bf16.msra.mxu1 %v7279_v34  ;;  %v444_v34 = vld [vmem:[%s8315_s15 + $0x2d0] sm:$0xff] }
  0xcb   : > { %3569 = vmatprep.subr.bf16.mxu1 %v7264_v36  ;;  %v700_v36 = vld [vmem:[%s8315_s15 + $0xad0] sm:$0xff]  ;;  %v6882_v39 = vcombine.high %v436_v33, %v444_v34  ;;  %v6881_v45 = vcombine.low %v436_v33, %v444_v34 }
  0xcc   : > { %3529 = vmatpush2.bf16.msra.mxu0 %v7007_v41  ;;  %v7138_v40 = vcombine.high %v692_v35, %v700_v36  ;;  %v420_v41 = vld [vmem:[%s8315_s15 + $0x210] sm:$0xff]  ;;  %v7137_v46 = vcombine.low %v692_v35, %v700_v36 }
  0xcd   : > { %3530 = vmatprep.subr.bf16.mxu0 %v6992_v43  ;;  %v676_v43 = vld [vmem:[%s8315_s15 + $0xa10] sm:$0xff] }
  0xce   : > { %3570 = vmatpush2.bf16.msra.mxu1 %v7263_v42  ;;  %v428_v42 = vld [vmem:[%s8315_s15 + $0x250] sm:$0xff] }
  0xcf   : > { %3571 = vmatprep.subr.bf16.mxu1 %v7248_v44  ;;  %v684_v44 = vld [vmem:[%s8315_s15 + $0xa50] sm:$0xff]  ;;  %v6866_v47 = vcombine.high %v420_v41, %v428_v42  ;;  %v6865_v53 = vcombine.low %v420_v41, %v428_v42 }
  0xd0   : > { %3531 = vmatpush2.bf16.msra.mxu0 %v6991_v49  ;;  %v7122_v48 = vcombine.high %v676_v43, %v684_v44  ;;  %v404_v49 = vld [vmem:[%s8315_s15 + $0x190] sm:$0xff]  ;;  %v7121_v54 = vcombine.low %v676_v43, %v684_v44 }
  0xd1   : > { %3532 = vmatprep.subr.bf16.mxu0 %v6976_v51  ;;  %v660_v51 = vld [vmem:[%s8315_s15 + $0x990] sm:$0xff] }
  0xd2   : > { %3572 = vmatpush2.bf16.msra.mxu1 %v7247_v50  ;;  %v412_v50 = vld [vmem:[%s8315_s15 + $0x1d0] sm:$0xff] }
  0xd3   : > { %3573 = vmatprep.subr.bf16.mxu1 %v7232_v52  ;;  %v668_v52 = vld [vmem:[%s8315_s15 + $0x9d0] sm:$0xff]  ;;  %v6850_v55 = vcombine.high %v404_v49, %v412_v50  ;;  %v6849_v63 = vcombine.low %v404_v49, %v412_v50 }
  0xd4   : > { %3533 = vmatpush2.bf16.msra.mxu0 %v6975_v57  ;;  %v7106_v56 = vcombine.high %v660_v51, %v668_v52  ;;  %v388_v57 = vld [vmem:[%s8315_s15 + $0x110] sm:$0xff]  ;;  %v7105_v0 = vcombine.low %v660_v51, %v668_v52 }
  0xd5   : > { %3534 = vmatprep.subr.bf16.mxu0 %v6960_v61  ;;  %v644_v61 = vld [vmem:[%s8315_s15 + $0x910] sm:$0xff] }
  0xd6   : > { %3574 = vmatpush2.bf16.msra.mxu1 %v7231_v58  ;;  %v396_v58 = vld [vmem:[%s8315_s15 + $0x150] sm:$0xff] }
  0xd7   : > { %3575 = vmatprep.subr.bf16.mxu1 %v7216_v62  ;;  %v652_v62 = vld [vmem:[%s8315_s15 + $0x950] sm:$0xff]  ;;  %v6834_v1 = vcombine.high %v388_v57, %v396_v58  ;;  %v6833_v7 = vcombine.low %v388_v57, %v396_v58 }
  0xd8   : > { %3535 = vmatpush2.bf16.msra.mxu0 %v6959_v3  ;;  %v7090_v2 = vcombine.high %v644_v61, %v652_v62  ;;  %v372_v3 = vld [vmem:[%s8315_s15 + $0x90] sm:$0xff]  ;;  %v7089_v8 = vcombine.low %v644_v61, %v652_v62 }
  0xd9   : > { %3536 = vmatprep.subr.bf16.mxu0 %v6944_v5  ;;  %v628_v5 = vld [vmem:[%s8315_s15 + $0x890] sm:$0xff] }
  0xda   : > { %3576 = vmatpush2.bf16.msra.mxu1 %v7215_v4  ;;  %v380_v4 = vld [vmem:[%s8315_s15 + $0xd0] sm:$0xff] }
  0xdb   : > { %3577 = vmatprep.subr.bf16.mxu1 %v7200_v6  ;;  %v636_v6 = vld [vmem:[%s8315_s15 + $0x8d0] sm:$0xff]  ;;  %v6818_v9 = vcombine.high %v372_v3, %v380_v4  ;;  %v6817_v15 = vcombine.low %v372_v3, %v380_v4 }
  0xdc   : > { %3537 = vmatpush2.bf16.msra.mxu0 %v6943_v11  ;;  %v7074_v10 = vcombine.high %v628_v5, %v636_v6  ;;  %v356_v11 = vld [vmem:[%s8315_s15 + $0x10] sm:$0xff]  ;;  %v7073_v16 = vcombine.low %v628_v5, %v636_v6 }
  0xdd   : > { %3538 = vmatprep.subr.bf16.mxu0 %v6928_v13  ;;  %v612_v13 = vld [vmem:[%s8315_s15 + $0x810] sm:$0xff] }
  0xde   : > { %3578 = vmatpush2.bf16.msra.mxu1 %v7199_v12  ;;  %v364_v12 = vld [vmem:[%s8315_s15 + $0x50] sm:$0xff] }
  0xdf   : > { %3579 = vmatprep.subr.bf16.mxu1 %v7184_v14  ;;  %v620_v14 = vld [vmem:[%s8315_s15 + $0x850] sm:$0xff]  ;;  %v6802_v18 = vcombine.high %v356_v11, %v364_v12  ;;  %v6801_v25 = vcombine.low %v356_v11, %v364_v12 }
  0xe0   : > { %3539 = vmatpush2.bf16.msra.mxu0 %v6927_v21  ;;  %v7058_v19 = vcombine.high %v612_v13, %v620_v14  ;;  %v596_v21 = vld [vmem:[%s8315_s15 + $0x790] sm:$0xff]  ;;  %v7057_v26 = vcombine.low %v612_v13, %v620_v14 }
  0xe1   : > { %3590 = vmatprep.subr.bf16.mxu0 %v6914_v23  ;;  %v852_v23 = vld [vmem:[%s8315_s15 + $0xf90] sm:$0xff] }
  0xe2   : > { %3580 = vmatpush2.bf16.msra.mxu1 %v7183_v22  ;;  %v604_v22 = vld [vmem:[%s8315_s15 + $0x7d0] sm:$0xff] }
  0xe3   : > { %3631 = vmatprep.subr.bf16.mxu1 %v7170_v24  ;;  %3541 = vmatmul.mubr.bf16.vlgmr.msra.gmra.mxu0 %v8413_v17  ;;  %v860_v24 = vld [vmem:[%s8315_s15 + $0xfd0] sm:$0xff]  ;;  %v7042_v27 = vcombine.high %v596_v21, %v604_v22  ;;  %v7041_v33 = vcombine.low %v596_v21, %v604_v22 }
  0xe4   : > { %3591 = vmatpush1.bf16.msra.mxu0 %v6913_v29  ;;  %3622 = vmatprep.mubr.bf16.mxu0 %v8365_v59  ;;  %v7298_v28 = vcombine.high %v852_v23, %v860_v24  ;;  %v580_v29 = vld [vmem:[%s8315_s15 + $0x710] sm:$0xff]  ;;  %v7297_v34 = vcombine.low %v852_v23, %v860_v24 }
  0xe5   : > { %3582 = vmatmul.mubr.bf16.vlgmr.msra.gmra.mxu1 %v8417_v20  ;;  %3592 = vmatprep.subr.bf16.mxu0 %v6898_v31  ;;  %v836_v31 = vld [vmem:[%s8315_s15 + $0xf10] sm:$0xff] }
  0xe6   : > { %3632 = vmatpush1.bf16.msra.mxu1 %v7169_v30  ;;  %3663 = vmatprep.mubr.bf16.mxu1 %v8367_v60  ;;  %v588_v30 = vld [vmem:[%s8315_s15 + $0x750] sm:$0xff] }
  0xe7   : > { %3633 = vmatprep.subr.bf16.mxu1 %v7154_v32  ;;  %v844_v32 = vld [vmem:[%s8315_s15 + $0xf50] sm:$0xff]  ;;  %v7026_v35 = vcombine.high %v580_v29, %v588_v30  ;;  %v7025_v41 = vcombine.low %v580_v29, %v588_v30 }
  0xe8   : > { %3593 = vmatpush1.bf16.msra.mxu0 %v6897_v37  ;;  %v7282_v36 = vcombine.high %v836_v31, %v844_v32  ;;  %v564_v37 = vld [vmem:[%s8315_s15 + $0x690] sm:$0xff]  ;;  %v7281_v42 = vcombine.low %v836_v31, %v844_v32 }
  0xe9   : > { %3594 = vmatprep.subr.bf16.mxu0 %v6882_v39  ;;  %v820_v39 = vld [vmem:[%s8315_s15 + $0xe90] sm:$0xff] }
  0xea   : > { %3634 = vmatpush1.bf16.msra.mxu1 %v7153_v38  ;;  %v572_v38 = vld [vmem:[%s8315_s15 + $0x6d0] sm:$0xff] }
  0xeb   : > { %3635 = vmatprep.subr.bf16.mxu1 %v7138_v40  ;;  %v828_v40 = vld [vmem:[%s8315_s15 + $0xed0] sm:$0xff]  ;;  %v7010_v43 = vcombine.high %v564_v37, %v572_v38  ;;  %v7009_v49 = vcombine.low %v564_v37, %v572_v38 }
  0xec   : > { %3595 = vmatpush1.bf16.msra.mxu0 %v6881_v45  ;;  %v7266_v44 = vcombine.high %v820_v39, %v828_v40  ;;  %v548_v45 = vld [vmem:[%s8315_s15 + $0x610] sm:$0xff]  ;;  %v7265_v50 = vcombine.low %v820_v39, %v828_v40 }
  0xed   : > { %3596 = vmatprep.subr.bf16.mxu0 %v6866_v47  ;;  %v804_v47 = vld [vmem:[%s8315_s15 + $0xe10] sm:$0xff] }
  0xee   : > { %3636 = vmatpush1.bf16.msra.mxu1 %v7137_v46  ;;  %v556_v46 = vld [vmem:[%s8315_s15 + $0x650] sm:$0xff] }
  0xef   : > { %3637 = vmatprep.subr.bf16.mxu1 %v7122_v48  ;;  %v812_v48 = vld [vmem:[%s8315_s15 + $0xe50] sm:$0xff]  ;;  %v6994_v51 = vcombine.high %v548_v45, %v556_v46  ;;  %v6993_v57 = vcombine.low %v548_v45, %v556_v46 }
  0xf0   : > { %3597 = vmatpush1.bf16.msra.mxu0 %v6865_v53  ;;  %v7250_v52 = vcombine.high %v804_v47, %v812_v48  ;;  %v532_v53 = vld [vmem:[%s8315_s15 + $0x590] sm:$0xff]  ;;  %v7249_v58 = vcombine.low %v804_v47, %v812_v48 }
  0xf1   : > { %3598 = vmatprep.subr.bf16.mxu0 %v6850_v55  ;;  %v788_v55 = vld [vmem:[%s8315_s15 + $0xd90] sm:$0xff] }
  0xf2   : > { %3638 = vmatpush1.bf16.msra.mxu1 %v7121_v54  ;;  %v540_v54 = vld [vmem:[%s8315_s15 + $0x5d0] sm:$0xff] }
  0xf3   : > { %3639 = vmatprep.subr.bf16.mxu1 %v7106_v56  ;;  %v796_v56 = vld [vmem:[%s8315_s15 + $0xdd0] sm:$0xff]  ;;  %v6978_v61 = vcombine.high %v532_v53, %v540_v54  ;;  %v6977_v3 = vcombine.low %v532_v53, %v540_v54 }
  0xf4   : > { %3599 = vmatpush1.bf16.msra.mxu0 %v6849_v63  ;;  %v7234_v62 = vcombine.high %v788_v55, %v796_v56  ;;  %v516_v63 = vld [vmem:[%s8315_s15 + $0x510] sm:$0xff]  ;;  %v7233_v4 = vcombine.low %v788_v55, %v796_v56 }
  0xf5   : > { %3600 = vmatprep.subr.bf16.mxu0 %v6834_v1  ;;  %v772_v1 = vld [vmem:[%s8315_s15 + $0xd10] sm:$0xff] }
  0xf6   : > { %3640 = vmatpush1.bf16.msra.mxu1 %v7105_v0  ;;  %v524_v0 = vld [vmem:[%s8315_s15 + $0x550] sm:$0xff] }
  0xf7   : > { %3641 = vmatprep.subr.bf16.mxu1 %v7090_v2  ;;  %v780_v2 = vld [vmem:[%s8315_s15 + $0xd50] sm:$0xff]  ;;  %v6962_v5 = vcombine.high %v516_v63, %v524_v0  ;;  %v6961_v11 = vcombine.low %v516_v63, %v524_v0 }
  0xf8   : > { %3601 = vmatpush1.bf16.msra.mxu0 %v6833_v7  ;;  %v7218_v6 = vcombine.high %v772_v1, %v780_v2  ;;  %v500_v7 = vld [vmem:[%s8315_s15 + $0x490] sm:$0xff]  ;;  %v7217_v12 = vcombine.low %v772_v1, %v780_v2 }
  0xf9   : > { %3602 = vmatprep.subr.bf16.mxu0 %v6818_v9  ;;  %v756_v9 = vld [vmem:[%s8315_s15 + $0xc90] sm:$0xff] }
  0xfa   : > { %3642 = vmatpush1.bf16.msra.mxu1 %v7089_v8  ;;  %v508_v8 = vld [vmem:[%s8315_s15 + $0x4d0] sm:$0xff] }
  0xfb   : > { %3643 = vmatprep.subr.bf16.mxu1 %v7074_v10  ;;  %v764_v10 = vld [vmem:[%s8315_s15 + $0xcd0] sm:$0xff]  ;;  %v6946_v13 = vcombine.high %v500_v7, %v508_v8  ;;  %v6945_v21 = vcombine.low %v500_v7, %v508_v8 }
  0xfc   : > { %3603 = vmatpush1.bf16.msra.mxu0 %v6817_v15  ;;  %v7202_v14 = vcombine.high %v756_v9, %v764_v10  ;;  %v484_v15 = vld [vmem:[%s8315_s15 + $0x410] sm:$0xff]  ;;  %v7201_v22 = vcombine.low %v756_v9, %v764_v10 }
  0xfd   : > { %3604 = vmatprep.subr.bf16.mxu0 %v6802_v18  ;;  %v740_v18 = vld [vmem:[%s8315_s15 + $0xc10] sm:$0xff] }
  0xfe   : > { %3644 = vmatpush1.bf16.msra.mxu1 %v7073_v16  ;;  %v492_v16 = vld [vmem:[%s8315_s15 + $0x450] sm:$0xff] }
  0xff   : > { %3645 = vmatprep.subr.bf16.mxu1 %v7058_v19  ;;  %v748_v19 = vld [vmem:[%s8315_s15 + $0xc50] sm:$0xff]  ;;  %v6930_v23 = vcombine.high %v484_v15, %v492_v16  ;;  %v6929_v29 = vcombine.low %v484_v15, %v492_v16 }
 0x100   : > { %3605 = vmatpush1.bf16.msra.mxu0 %v6801_v25  ;;  %v7186_v24 = vcombine.high %v740_v18, %v748_v19  ;;  %v469_v25 = vld [vmem:[%s8315_s15 + $0x398] sm:$0xff]  ;;  %v7185_v30 = vcombine.low %v740_v18, %v748_v19 }
 0x101   : > { %3606 = vmatprep.subr.bf16.mxu0 %v7042_v27  ;;  %v725_v27 = vld [vmem:[%s8315_s15 + $0xb98] sm:$0xff] }
 0x102   : > { %3646 = vmatpush1.bf16.msra.mxu1 %v7057_v26  ;;  %v477_v26 = vld [vmem:[%s8315_s15 + $0x3d8] sm:$0xff] }
 0x103   : > { %3647 = vmatprep.subr.bf16.mxu1 %v7298_v28  ;;  %v733_v28 = vld [vmem:[%s8315_s15 + $0xbd8] sm:$0xff]  ;;  %v6916_v31 = vcombine.high %v469_v25, %v477_v26  ;;  %v6915_v37 = vcombine.low %v469_v25, %v477_v26 }
 0x104   : > { %3607 = vmatpush2.bf16.msra.mxu0 %v7041_v33  ;;  %v7172_v32 = vcombine.high %v725_v27, %v733_v28  ;;  %v453_v33 = vld [vmem:[%s8315_s15 + $0x318] sm:$0xff]  ;;  %v7171_v38 = vcombine.low %v725_v27, %v733_v28 }
 0x105   : > { %3608 = vmatprep.subr.bf16.mxu0 %v7026_v35  ;;  %v709_v35 = vld [vmem:[%s8315_s15 + $0xb18] sm:$0xff] }
 0x106   : > { %3648 = vmatpush2.bf16.msra.mxu1 %v7297_v34  ;;  %v461_v34 = vld [vmem:[%s8315_s15 + $0x358] sm:$0xff] }
 0x107   : > { %3649 = vmatprep.subr.bf16.mxu1 %v7282_v36  ;;  %v717_v36 = vld [vmem:[%s8315_s15 + $0xb58] sm:$0xff]  ;;  %v6900_v39 = vcombine.high %v453_v33, %v461_v34  ;;  %v6899_v45 = vcombine.low %v453_v33, %v461_v34 }
 0x108   : > { %3609 = vmatpush2.bf16.msra.mxu0 %v7025_v41  ;;  %v7156_v40 = vcombine.high %v709_v35, %v717_v36  ;;  %v437_v41 = vld [vmem:[%s8315_s15 + $0x298] sm:$0xff]  ;;  %v7155_v46 = vcombine.low %v709_v35, %v717_v36 }
 0x109   : > { %3610 = vmatprep.subr.bf16.mxu0 %v7010_v43  ;;  %v693_v43 = vld [vmem:[%s8315_s15 + $0xa98] sm:$0xff] }
 0x10a   : > { %3650 = vmatpush2.bf16.msra.mxu1 %v7281_v42  ;;  %v445_v42 = vld [vmem:[%s8315_s15 + $0x2d8] sm:$0xff] }
 0x10b   : > { %3651 = vmatprep.subr.bf16.mxu1 %v7266_v44  ;;  %v701_v44 = vld [vmem:[%s8315_s15 + $0xad8] sm:$0xff]  ;;  %v6884_v47 = vcombine.high %v437_v41, %v445_v42  ;;  %v6883_v53 = vcombine.low %v437_v41, %v445_v42 }
 0x10c   : > { %3611 = vmatpush2.bf16.msra.mxu0 %v7009_v49  ;;  %v7140_v48 = vcombine.high %v693_v43, %v701_v44  ;;  %v421_v49 = vld [vmem:[%s8315_s15 + $0x218] sm:$0xff]  ;;  %v7139_v54 = vcombine.low %v693_v43, %v701_v44 }
 0x10d   : > { %3612 = vmatprep.subr.bf16.mxu0 %v6994_v51  ;;  %v677_v51 = vld [vmem:[%s8315_s15 + $0xa18] sm:$0xff] }
 0x10e   : > { %3652 = vmatpush2.bf16.msra.mxu1 %v7265_v50  ;;  %v429_v50 = vld [vmem:[%s8315_s15 + $0x258] sm:$0xff] }
 0x10f   : > { %3653 = vmatprep.subr.bf16.mxu1 %v7250_v52  ;;  %v685_v52 = vld [vmem:[%s8315_s15 + $0xa58] sm:$0xff]  ;;  %v6868_v55 = vcombine.high %v421_v49, %v429_v50  ;;  %v6867_v63 = vcombine.low %v421_v49, %v429_v50 }
 0x110   : > { %3613 = vmatpush2.bf16.msra.mxu0 %v6993_v57  ;;  %v7124_v56 = vcombine.high %v677_v51, %v685_v52  ;;  %v405_v57 = vld [vmem:[%s8315_s15 + $0x198] sm:$0xff]  ;;  %v7123_v0 = vcombine.low %v677_v51, %v685_v52 }
 0x111   : > { %3614 = vmatprep.subr.bf16.mxu0 %v6978_v61  ;;  %v661_v61 = vld [vmem:[%s8315_s15 + $0x998] sm:$0xff] }
 0x112   : > { %3654 = vmatpush2.bf16.msra.mxu1 %v7249_v58  ;;  %v413_v58 = vld [vmem:[%s8315_s15 + $0x1d8] sm:$0xff] }
 0x113   : > { %3655 = vmatprep.subr.bf16.mxu1 %v7234_v62  ;;  %v669_v62 = vld [vmem:[%s8315_s15 + $0x9d8] sm:$0xff]  ;;  %v6852_v1 = vcombine.high %v405_v57, %v413_v58  ;;  %v6851_v7 = vcombine.low %v405_v57, %v413_v58 }
 0x114   : > { %3615 = vmatpush2.bf16.msra.mxu0 %v6977_v3  ;;  %v7108_v2 = vcombine.high %v661_v61, %v669_v62  ;;  %v389_v3 = vld [vmem:[%s8315_s15 + $0x118] sm:$0xff]  ;;  %v7107_v8 = vcombine.low %v661_v61, %v669_v62 }
 0x115   : > { %3616 = vmatprep.subr.bf16.mxu0 %v6962_v5  ;;  %v645_v5 = vld [vmem:[%s8315_s15 + $0x918] sm:$0xff] }
 0x116   : > { %3656 = vmatpush2.bf16.msra.mxu1 %v7233_v4  ;;  %v397_v4 = vld [vmem:[%s8315_s15 + $0x158] sm:$0xff] }
 0x117   : > { %3657 = vmatprep.subr.bf16.mxu1 %v7218_v6  ;;  %v653_v6 = vld [vmem:[%s8315_s15 + $0x958] sm:$0xff]  ;;  %v6836_v9 = vcombine.high %v389_v3, %v397_v4  ;;  %v6835_v15 = vcombine.low %v389_v3, %v397_v4 }
 0x118   : > { %3617 = vmatpush2.bf16.msra.mxu0 %v6961_v11  ;;  %v7092_v10 = vcombine.high %v645_v5, %v653_v6  ;;  %v373_v11 = vld [vmem:[%s8315_s15 + $0x98] sm:$0xff]  ;;  %v7091_v16 = vcombine.low %v645_v5, %v653_v6 }
 0x119   : > { %3618 = vmatprep.subr.bf16.mxu0 %v6946_v13  ;;  %v629_v13 = vld [vmem:[%s8315_s15 + $0x898] sm:$0xff] }
 0x11a   : > { %3658 = vmatpush2.bf16.msra.mxu1 %v7217_v12  ;;  %v381_v12 = vld [vmem:[%s8315_s15 + $0xd8] sm:$0xff] }
 0x11b   : > { %3659 = vmatprep.subr.bf16.mxu1 %v7202_v14  ;;  %v637_v14 = vld [vmem:[%s8315_s15 + $0x8d8] sm:$0xff]  ;;  %v6820_v18 = vcombine.high %v373_v11, %v381_v12  ;;  %v6819_v25 = vcombine.low %v373_v11, %v381_v12 }
 0x11c   : > { %3619 = vmatpush2.bf16.msra.mxu0 %v6945_v21  ;;  %v7076_v19 = vcombine.high %v629_v13, %v637_v14  ;;  %v357_v21 = vld [vmem:[%s8315_s15 + $0x18] sm:$0xff]  ;;  %v7075_v26 = vcombine.low %v629_v13, %v637_v14 }
 0x11d   : > { %3620 = vmatprep.subr.bf16.mxu0 %v6930_v23  ;;  %v613_v23 = vld [vmem:[%s8315_s15 + $0x818] sm:$0xff] }
 0x11e   : > { %3660 = vmatpush2.bf16.msra.mxu1 %v7201_v22  ;;  %v365_v22 = vld [vmem:[%s8315_s15 + $0x58] sm:$0xff] }
 0x11f   : > { %3661 = vmatprep.subr.bf16.mxu1 %v7186_v24  ;;  %v621_v24 = vld [vmem:[%s8315_s15 + $0x858] sm:$0xff]  ;;  %v6804_v27 = vcombine.high %v357_v21, %v365_v22  ;;  %v6803_v33 = vcombine.low %v357_v21, %v365_v22 }
 0x120   : > { %3621 = vmatpush2.bf16.msra.mxu0 %v6929_v29  ;;  %v7060_v28 = vcombine.high %v613_v23, %v621_v24  ;;  %v597_v29 = vld [vmem:[%s8315_s15 + $0x798] sm:$0xff]  ;;  %v7059_v34 = vcombine.low %v613_v23, %v621_v24 }
 0x121   : > { %3672 = vmatprep.subr.bf16.mxu0 %v6916_v31  ;;  %v853_v31 = vld [vmem:[%s8315_s15 + $0xf98] sm:$0xff] }
 0x122   : > { %3662 = vmatpush2.bf16.msra.mxu1 %v7185_v30  ;;  %v605_v30 = vld [vmem:[%s8315_s15 + $0x7d8] sm:$0xff] }
 0x123   : > { %3713 = vmatprep.subr.bf16.mxu1 %v7172_v32  ;;  %3623 = vmatmul.mubr.bf16.vlgmr.msra.gmra.mxu0 %v8413_v17  ;;  %v861_v32 = vld [vmem:[%s8315_s15 + $0xfd8] sm:$0xff]  ;;  %v7044_v35 = vcombine.high %v597_v29, %v605_v30  ;;  %v7043_v41 = vcombine.low %v597_v29, %v605_v30 }
 0x124   : > { %3673 = vmatpush1.bf16.msra.mxu0 %v6915_v37  ;;  %3704 = vmatprep.mubr.bf16.mxu0 %v8365_v59  ;;  %v7300_v36 = vcombine.high %v853_v31, %v861_v32  ;;  %v581_v37 = vld [vmem:[%s8315_s15 + $0x718] sm:$0xff]  ;;  %v7299_v42 = vcombine.low %v853_v31, %v861_v32 }
 0x125   : > { %3664 = vmatmul.mubr.bf16.vlgmr.msra.gmra.mxu1 %v8417_v20  ;;  %3674 = vmatprep.subr.bf16.mxu0 %v6900_v39  ;;  %v837_v39 = vld [vmem:[%s8315_s15 + $0xf18] sm:$0xff] }
 0x126   : > { %3714 = vmatpush1.bf16.msra.mxu1 %v7171_v38  ;;  %3745 = vmatprep.mubr.bf16.mxu1 %v8367_v60  ;;  %v589_v38 = vld [vmem:[%s8315_s15 + $0x758] sm:$0xff] }
 0x127   : > { %3715 = vmatprep.subr.bf16.mxu1 %v7156_v40  ;;  %v845_v40 = vld [vmem:[%s8315_s15 + $0xf58] sm:$0xff]  ;;  %v7028_v43 = vcombine.high %v581_v37, %v589_v38  ;;  %v7027_v49 = vcombine.low %v581_v37, %v589_v38 }
 0x128   : > { %3675 = vmatpush1.bf16.msra.mxu0 %v6899_v45  ;;  %v7284_v44 = vcombine.high %v837_v39, %v845_v40  ;;  %v565_v45 = vld [vmem:[%s8315_s15 + $0x698] sm:$0xff]  ;;  %v7283_v50 = vcombine.low %v837_v39, %v845_v40 }
 0x129   : > { %3676 = vmatprep.subr.bf16.mxu0 %v6884_v47  ;;  %v821_v47 = vld [vmem:[%s8315_s15 + $0xe98] sm:$0xff] }
 0x12a   : > { %3716 = vmatpush1.bf16.msra.mxu1 %v7155_v46  ;;  %v573_v46 = vld [vmem:[%s8315_s15 + $0x6d8] sm:$0xff] }
 0x12b   : > { %3717 = vmatprep.subr.bf16.mxu1 %v7140_v48  ;;  %v829_v48 = vld [vmem:[%s8315_s15 + $0xed8] sm:$0xff]  ;;  %v7012_v51 = vcombine.high %v565_v45, %v573_v46  ;;  %v7011_v57 = vcombine.low %v565_v45, %v573_v46 }
 0x12c   : > { %3677 = vmatpush1.bf16.msra.mxu0 %v6883_v53  ;;  %v7268_v52 = vcombine.high %v821_v47, %v829_v48  ;;  %v549_v53 = vld [vmem:[%s8315_s15 + $0x618] sm:$0xff]  ;;  %v7267_v58 = vcombine.low %v821_v47, %v829_v48 }
 0x12d   : > { %3678 = vmatprep.subr.bf16.mxu0 %v6868_v55  ;;  %v805_v55 = vld [vmem:[%s8315_s15 + $0xe18] sm:$0xff] }
 0x12e   : > { %3718 = vmatpush1.bf16.msra.mxu1 %v7139_v54  ;;  %v557_v54 = vld [vmem:[%s8315_s15 + $0x658] sm:$0xff] }
 0x12f   : > { %3719 = vmatprep.subr.bf16.mxu1 %v7124_v56  ;;  %v813_v56 = vld [vmem:[%s8315_s15 + $0xe58] sm:$0xff]  ;;  %v6996_v61 = vcombine.high %v549_v53, %v557_v54  ;;  %v6995_v3 = vcombine.low %v549_v53, %v557_v54  ;;  %v702_v53 = vld [vmem:[%s8315_s15 + $0xae0] sm:$0xff]  ;;  %v330_v54 = vld [vmem:[#allocation2 + $0x30] sm:$0xff] }
 0x130   : > { %3679 = vmatpush1.bf16.msra.mxu0 %v6867_v63  ;;  %v7252_v62 = vcombine.high %v805_v55, %v813_v56  ;;  %v533_v63 = vld [vmem:[%s8315_s15 + $0x598] sm:$0xff]  ;;  %v7251_v4 = vcombine.low %v805_v55, %v813_v56 }
 0x131   : > { %3680 = vmatprep.subr.bf16.mxu0 %v6852_v1  ;;  %v789_v1 = vld [vmem:[%s8315_s15 + $0xd98] sm:$0xff] }
 0x132   : > { %3720 = vmatpush1.bf16.msra.mxu1 %v7123_v0  ;;  %v541_v0 = vld [vmem:[%s8315_s15 + $0x5d8] sm:$0xff] }
 0x133   : > { %3721 = vmatprep.subr.bf16.mxu1 %v7108_v2  ;;  %v797_v2 = vld [vmem:[%s8315_s15 + $0xdd8] sm:$0xff]  ;;  %v6980_v5 = vcombine.high %v533_v63, %v541_v0  ;;  %v6979_v11 = vcombine.low %v533_v63, %v541_v0  ;;  %v331_v63 = vld [vmem:[#allocation2] sm:$0xff] }
 0x134   : > { %3681 = vmatpush1.bf16.msra.mxu0 %v6851_v7  ;;  %v7236_v6 = vcombine.high %v789_v1, %v797_v2  ;;  %v517_v7 = vld [vmem:[%s8315_s15 + $0x518] sm:$0xff]  ;;  %v7235_v12 = vcombine.low %v789_v1, %v797_v2  ;;  %v422_v2 = vld [vmem:[%s8315_s15 + $0x220] sm:$0xff] }
 0x135   : > { %3682 = vmatprep.subr.bf16.mxu0 %v6836_v9  ;;  %v773_v9 = vld [vmem:[%s8315_s15 + $0xd18] sm:$0xff] }
 0x136   : > { %3722 = vmatpush1.bf16.msra.mxu1 %v7107_v8  ;;  %v525_v8 = vld [vmem:[%s8315_s15 + $0x558] sm:$0xff] }
 0x137   : > { %3723 = vmatprep.subr.bf16.mxu1 %v7092_v10  ;;  %v781_v10 = vld [vmem:[%s8315_s15 + $0xd58] sm:$0xff]  ;;  %v6964_v13 = vcombine.high %v517_v7, %v525_v8  ;;  %v6963_v21 = vcombine.low %v517_v7, %v525_v8  ;;  %v678_v7 = vld [vmem:[%s8315_s15 + $0xa20] sm:$0xff] }
 0x138   : > { %3683 = vmatpush1.bf16.msra.mxu0 %v6835_v15  ;;  %v7220_v14 = vcombine.high %v773_v9, %v781_v10  ;;  %v501_v15 = vld [vmem:[%s8315_s15 + $0x498] sm:$0xff]  ;;  %v7219_v22 = vcombine.low %v773_v9, %v781_v10  ;;  %v686_v8 = vld [vmem:[%s8315_s15 + $0xa60] sm:$0xff] }
 0x139   : > { %3684 = vmatprep.subr.bf16.mxu0 %v6820_v18  ;;  %v757_v18 = vld [vmem:[%s8315_s15 + $0xc98] sm:$0xff] }
 0x13a   : > { %3724 = vmatpush1.bf16.msra.mxu1 %v7091_v16  ;;  %v509_v16 = vld [vmem:[%s8315_s15 + $0x4d8] sm:$0xff] }
 0x13b   : > { %3725 = vmatprep.subr.bf16.mxu1 %v7076_v19  ;;  %v765_v19 = vld [vmem:[%s8315_s15 + $0xcd8] sm:$0xff]  ;;  %v6948_v23 = vcombine.high %v501_v15, %v509_v16  ;;  %v6947_v29 = vcombine.low %v501_v15, %v509_v16  ;;  %v7126_v16 = vcombine.high %v678_v7, %v686_v8 }
 0x13c   : > { %3685 = vmatpush1.bf16.msra.mxu0 %v6819_v25  ;;  %v7204_v24 = vcombine.high %v757_v18, %v765_v19  ;;  %v485_v25 = vld [vmem:[%s8315_s15 + $0x418] sm:$0xff]  ;;  %v7203_v30 = vcombine.low %v757_v18, %v765_v19  ;;  %v406_v18 = vld [vmem:[%s8315_s15 + $0x1a0] sm:$0xff] }
 0x13d   : > { %3686 = vmatprep.subr.bf16.mxu0 %v6804_v27  ;;  %v741_v27 = vld [vmem:[%s8315_s15 + $0xc18] sm:$0xff]  ;;  %v414_v19 = vld [vmem:[%s8315_s15 + $0x1e0] sm:$0xff] }
 0x13e   : > { %3726 = vmatpush1.bf16.msra.mxu1 %v7075_v26  ;;  %v493_v26 = vld [vmem:[%s8315_s15 + $0x458] sm:$0xff] }
 0x13f   : > { %3727 = vmatprep.subr.bf16.mxu1 %v7060_v28  ;;  %v749_v28 = vld [vmem:[%s8315_s15 + $0xc58] sm:$0xff]  ;;  %v6932_v31 = vcombine.high %v485_v25, %v493_v26  ;;  %v6931_v37 = vcombine.low %v485_v25, %v493_v26  ;;  %v6854_v25 = vcombine.high %v406_v18, %v414_v19 }
 0x140   : > { %3687 = vmatpush1.bf16.msra.mxu0 %v6803_v33  ;;  %v7188_v32 = vcombine.high %v741_v27, %v749_v28  ;;  %v470_v33 = vld [vmem:[%s8315_s15 + $0x3a0] sm:$0xff]  ;;  %v7187_v38 = vcombine.low %v741_v27, %v749_v28 }
 0x141   : > { %3688 = vmatprep.subr.bf16.mxu0 %v7044_v35  ;;  %v726_v35 = vld [vmem:[%s8315_s15 + $0xba0] sm:$0xff] }
 0x142   : > { %3728 = vmatpush1.bf16.msra.mxu1 %v7059_v34  ;;  %v478_v34 = vld [vmem:[%s8315_s15 + $0x3e0] sm:$0xff] }
 0x143   : > { %3729 = vmatprep.subr.bf16.mxu1 %v7300_v36  ;;  %v734_v36 = vld [vmem:[%s8315_s15 + $0xbe0] sm:$0xff]  ;;  %v6918_v39 = vcombine.high %v470_v33, %v478_v34  ;;  %v6917_v45 = vcombine.low %v470_v33, %v478_v34 }
 0x144   : > { %3689 = vmatpush2.bf16.msra.mxu0 %v7043_v41  ;;  %v7174_v40 = vcombine.high %v726_v35, %v734_v36  ;;  %v454_v41 = vld [vmem:[%s8315_s15 + $0x320] sm:$0xff]  ;;  %v7173_v46 = vcombine.low %v726_v35, %v734_v36 }
 0x145   : > { %3690 = vmatprep.subr.bf16.mxu0 %v7028_v43  ;;  %v710_v43 = vld [vmem:[%s8315_s15 + $0xb20] sm:$0xff] }
 0x146   : > { %3730 = vmatpush2.bf16.msra.mxu1 %v7299_v42  ;;  %v462_v42 = vld [vmem:[%s8315_s15 + $0x360] sm:$0xff] }
 0x147   : > { %3731 = vmatprep.subr.bf16.mxu1 %v7284_v44  ;;  %v718_v44 = vld [vmem:[%s8315_s15 + $0xb60] sm:$0xff]  ;;  %v6902_v47 = vcombine.high %v454_v41, %v462_v42  ;;  %v6901_v56 = vcombine.low %v454_v41, %v462_v42 }
 0x148   : > { %3691 = vmatpush2.bf16.msra.mxu0 %v7027_v49  ;;  %v7158_v48 = vcombine.high %v710_v43, %v718_v44  ;;  %v438_v49 = vld [vmem:[%s8315_s15 + $0x2a0] sm:$0xff] }
 0x149   : > { %3692 = vmatprep.subr.bf16.mxu0 %v7012_v51  ;;  %v390_v27 = vld [vmem:[%s8315_s15 + $0x120] sm:$0xff] }
 0x14a   : > { %3732 = vmatpush2.bf16.msra.mxu1 %v7283_v50  ;;  %v446_v50 = vld [vmem:[%s8315_s15 + $0x2e0] sm:$0xff] }
 0x14b   : > { %3733 = vmatprep.subr.bf16.mxu1 %v7268_v52  ;;  %v694_v52 = vld [vmem:[%s8315_s15 + $0xaa0] sm:$0xff]  ;;  %v6885_v10 = vcombine.low %v438_v49, %v446_v50 }
 0x14c   : > { %3693 = vmatpush2.bf16.msra.mxu0 %v7011_v57  ;;  %v7142_v1 = vcombine.high %v694_v52, %v702_v53  ;;  %v398_v28 = vld [vmem:[%s8315_s15 + $0x160] sm:$0xff] }
 0x14d   : > { %3694 = vmatprep.subr.bf16.mxu0 %v6996_v61  ;;  %v7157_v61 = vcombine.low %v710_v43, %v718_v44  ;;  %v6838_v33 = vcombine.high %v390_v27, %v398_v28  ;;  %v374_v35 = vld [vmem:[%s8315_s15 + $0xa0] sm:$0xff] }
 0x14e   : > { %3734 = vmatpush2.bf16.msra.mxu1 %v7267_v58  ;;  %v382_v36 = vld [vmem:[%s8315_s15 + $0xe0] sm:$0xff] }
 0x14f   : > { %3735 = vmatprep.subr.bf16.mxu1 %v7252_v62  ;;  %v6886_v62 = vcombine.high %v438_v49, %v446_v50  ;;  %v6822_v41 = vcombine.high %v374_v35, %v382_v36  ;;  %v358_v43 = vld [vmem:[%s8315_s15 + $0x20] sm:$0xff] }
 0x150   : > { %3695 = vmatpush2.bf16.msra.mxu0 %v6995_v3  ;;  %v430_v3 = vld [vmem:[%s8315_s15 + $0x260] sm:$0xff] }
 0x151   : > { %3696 = vmatprep.subr.bf16.mxu0 %v6980_v5  ;;  %v366_v44 = vld [vmem:[%s8315_s15 + $0x60] sm:$0xff] }
 0x152   : > { %3736 = vmatpush2.bf16.msra.mxu1 %v7251_v4  ;;  %v6806_v49 = vcombine.high %v358_v43, %v366_v44 }
 0x153   : > { %3737 = vmatprep.subr.bf16.mxu1 %v7236_v6 }
 0x154   : > { %3697 = vmatpush2.bf16.msra.mxu0 %v6979_v11 }
 0x155   : > { %3698 = vmatprep.subr.bf16.mxu0 %v6964_v13  ;;  %v7141_v13 = vcombine.low %v694_v52, %v702_v53  ;;  %v606_v52 = vld [vmem:[%s8315_s15 + $0x7e0] sm:$0xff] }
 0x156   : > { %3738 = vmatpush2.bf16.msra.mxu1 %v7235_v12  ;;  %v854_v53 = vld [vmem:[%s8315_s15 + $0xfa0] sm:$0xff] }
 0x157   : > { %3739 = vmatprep.subr.bf16.mxu1 %v7220_v14  ;;  %v6870_v14 = vcombine.high %v422_v2, %v430_v3 }
 0x158   : > { %3699 = vmatpush2.bf16.msra.mxu0 %v6963_v21  ;;  %v662_v21 = vld [vmem:[%s8315_s15 + $0x9a0] sm:$0xff] }
 0x159   : > { %3700 = vmatprep.subr.bf16.mxu0 %v6948_v23  ;;  %v6869_v23 = vcombine.low %v422_v2, %v430_v3 }
 0x15a   : > { %3740 = vmatpush2.bf16.msra.mxu1 %v7219_v22  ;;  %v670_v22 = vld [vmem:[%s8315_s15 + $0x9e0] sm:$0xff] }
 0x15b   : > { %3741 = vmatprep.subr.bf16.mxu1 %v7204_v24  ;;  %v7125_v24 = vcombine.low %v678_v7, %v686_v8  ;;  %v7110_v26 = vcombine.high %v662_v21, %v670_v22  ;;  %v822_v7 = vld [vmem:[%s8315_s15 + $0xea0] sm:$0xff] }
 0x15c   : > { %3701 = vmatpush2.bf16.msra.mxu0 %v6947_v29  ;;  %v646_v29 = vld [vmem:[%s8315_s15 + $0x920] sm:$0xff] }
 0x15d   : > { %3702 = vmatprep.subr.bf16.mxu0 %v6932_v31  ;;  %v6853_v31 = vcombine.low %v406_v18, %v414_v19  ;;  %v830_v8 = vld [vmem:[%s8315_s15 + $0xee0] sm:$0xff] }
 0x15e   : > { %3742 = vmatpush2.bf16.msra.mxu1 %v7203_v30  ;;  %v654_v30 = vld [vmem:[%s8315_s15 + $0x960] sm:$0xff]  ;;  %v7269_v19 = vcombine.low %v822_v7, %v830_v8 }
 0x15f   : > { %3743 = vmatprep.subr.bf16.mxu1 %v7188_v32  ;;  %v7109_v32 = vcombine.low %v662_v21, %v670_v22  ;;  %v7094_v34 = vcombine.high %v646_v29, %v654_v30 }
 0x160   : > { %3703 = vmatpush2.bf16.msra.mxu0 %v6931_v37  ;;  %v630_v37 = vld [vmem:[%s8315_s15 + $0x8a0] sm:$0xff] }
 0x161   : > { %3754 = vmatprep.subr.bf16.mxu0 %v6918_v39  ;;  %v6837_v39 = vcombine.low %v390_v27, %v398_v28 }
 0x162   : > { %3744 = vmatpush2.bf16.msra.mxu1 %v7187_v38  ;;  %v638_v38 = vld [vmem:[%s8315_s15 + $0x8e0] sm:$0xff] }
 0x163   : > { %3795 = vmatprep.subr.bf16.mxu1 %v7174_v40  ;;  %v3460_v51 = vpop.f32.mrf.mxu0  ;;  %3705 = vmatmul.mubr.bf16.vlgmr.msra.gmra.mxu0 %v8413_v17  ;;  %v7093_v40 = vcombine.low %v646_v29, %v654_v30  ;;  %v7078_v42 = vcombine.high %v630_v37, %v638_v38 }
 0x164   : > { %3755 = vmatpush1.bf16.msra.mxu0 %v6917_v45  ;;  %3786 = vmatprep.mubr.bf16.mxu0 %v8365_v59  ;;  %v614_v45 = vld [vmem:[%s8315_s15 + $0x820] sm:$0xff] }
 0x165   : > { %v3501_v55 = vpop.f32.mrf.mxu1  ;;  %3746 = vmatmul.mubr.bf16.vlgmr.msra.gmra.mxu1 %v8417_v20  ;;  %v3462_v58 = vpop.f32.mrf.mxu0  ;;  %3756 = vmatprep.subr.bf16.mxu0 %v6902_v47  ;;  %v6821_v47 = vcombine.low %v374_v35, %v382_v36 }
 0x166   : > { %v3502_v57 = vadd.f32 %v3501_v55, %v3460_v51  ;;  %3796 = vmatpush1.bf16.msra.mxu1 %v7173_v46  ;;  %3827 = vmatprep.mubr.bf16.mxu1 %v8367_v60  ;;  %v622_v46 = vld [vmem:[%s8315_s15 + $0x860] sm:$0xff]  ;;  %v6805_v55 = vcombine.low %v358_v43, %v366_v44 }
 0x167   : > { %v3503_v0 = vpop.f32.mrf.mxu1  ;;  %3797 = vmatprep.subr.bf16.mxu1 %v7158_v48  ;;  %v3464_v6 = vpop.f32.mrf.mxu0  ;;  %v7077_v48 = vcombine.low %v630_v37, %v638_v38  ;;  %v7062_v50 = vcombine.high %v614_v45, %v622_v46  ;;  %v598_v51 = vld [vmem:[%s8315_s15 + $0x7a0] sm:$0xff] }
 0x168   : > { %v4082_v4 = vadd.f32 %v3502_v57, %v330_v54  ;;  %v3504_v5 = vadd.f32 %v3503_v0, %v3462_v58  ;;  %3757 = vmatpush1.bf16.msra.mxu0 %v6901_v56  ;;  %v862_v54 = vld [vmem:[%s8315_s15 + $0xfe0] sm:$0xff]  ;;  %v7061_v56 = vcombine.low %v614_v45, %v622_v46  ;;  %v7046_v57 = vcombine.high %v598_v51, %v606_v52 }
 0x169   : > { %v3505_v9 = vpop.f32.mrf.mxu1  ;;  %v3465_v12 = vpop.f32.mrf.mxu0  ;;  %3758 = vmatprep.subr.bf16.mxu0 %v6886_v62  ;;  %v7302_v58 = vcombine.high %v854_v53, %v862_v54  ;;  %v590_v62 = vld [vmem:[%s8315_s15 + $0x760] sm:$0xff]  ;;  %v7301_v2 = vcombine.low %v854_v53, %v862_v54 }
 0x16a   : > { %4098 = vst [vmem:[#allocation2 + $0x30] sm:$0xff] %v4082_v4  ;;  %v4083_v11 = vadd.f32 %v3504_v5, %v331_v63  ;;  %3798 = vmatpush1.bf16.msra.mxu1 %v7157_v61  ;;  %v582_v61 = vld [vmem:[%s8315_s15 + $0x720] sm:$0xff]  ;;  %v7270_v12 = vcombine.high %v822_v7, %v830_v8 }
 0x16b   : > { %v3506_v15 = vpop.f32.mrf.mxu1  ;;  %3799 = vmatprep.subr.bf16.mxu1 %v7142_v1  ;;  %v838_v63 = vld [vmem:[%s8315_s15 + $0xf20] sm:$0xff]  ;;  %v7045_v1 = vcombine.low %v598_v51, %v606_v52  ;;  %v7030_v3 = vcombine.high %v582_v61, %v590_v62  ;;  %v7029_v9 = vcombine.low %v582_v61, %v590_v62 }
 0x16c   : > { %4099 = vst [vmem:[#allocation2] sm:$0xff] %v4083_v11  ;;  %3759 = vmatpush1.bf16.msra.mxu0 %v6885_v10  ;;  %v846_v0 = vld [vmem:[%s8315_s15 + $0xf60] sm:$0xff] }
 0x16d   : > { %3760 = vmatprep.subr.bf16.mxu0 %v6870_v14  ;;  %v7286_v4 = vcombine.high %v838_v63, %v846_v0  ;;  %v566_v5 = vld [vmem:[%s8315_s15 + $0x6a0] sm:$0xff]  ;;  %v7285_v10 = vcombine.low %v838_v63, %v846_v0 }
 0x16e   : > { %3800 = vmatpush1.bf16.msra.mxu1 %v7141_v13  ;;  %v574_v6 = vld [vmem:[%s8315_s15 + $0x6e0] sm:$0xff] }
 0x16f   : > { %3801 = vmatprep.subr.bf16.mxu1 %v7126_v16  ;;  %v7014_v11 = vcombine.high %v566_v5, %v574_v6  ;;  %v550_v13 = vld [vmem:[%s8315_s15 + $0x620] sm:$0xff]  ;;  %v7013_v18 = vcombine.low %v566_v5, %v574_v6 }
 0x170   : > { %3761 = vmatpush1.bf16.msra.mxu0 %v6869_v23  ;;  %v558_v14 = vld [vmem:[%s8315_s15 + $0x660] sm:$0xff] }
 0x171   : > { %3762 = vmatprep.subr.bf16.mxu0 %v6854_v25  ;;  %v806_v15 = vld [vmem:[%s8315_s15 + $0xe20] sm:$0xff]  ;;  %v6998_v21 = vcombine.high %v550_v13, %v558_v14  ;;  %v6997_v27 = vcombine.low %v550_v13, %v558_v14  ;;  %v703_v13 = vld [vmem:[%s8315_s15 + $0xae8] sm:$0xff]  ;;  %v332_v14 = vld [vmem:[#allocation2 + $0x58] sm:$0xff] }
 0x172   : > { %3802 = vmatpush1.bf16.msra.mxu1 %v7125_v24  ;;  %v814_v16 = vld [vmem:[%s8315_s15 + $0xe60] sm:$0xff] }
 0x173   : > { %3803 = vmatprep.subr.bf16.mxu1 %v7110_v26  ;;  %v7254_v22 = vcombine.high %v806_v15, %v814_v16  ;;  %v534_v23 = vld [vmem:[%s8315_s15 + $0x5a0] sm:$0xff]  ;;  %v7253_v28 = vcombine.low %v806_v15, %v814_v16 }
 0x174   : > { %3763 = vmatpush1.bf16.msra.mxu0 %v6853_v31  ;;  %v542_v24 = vld [vmem:[%s8315_s15 + $0x5e0] sm:$0xff] }
 0x175   : > { %3764 = vmatprep.subr.bf16.mxu0 %v6838_v33  ;;  %v790_v25 = vld [vmem:[%s8315_s15 + $0xda0] sm:$0xff]  ;;  %v6982_v29 = vcombine.high %v534_v23, %v542_v24  ;;  %v6981_v35 = vcombine.low %v534_v23, %v542_v24  ;;  %v333_v23 = vld [vmem:[#allocation2 + $0x18] sm:$0xff] }
 0x176   : > { %3804 = vmatpush1.bf16.msra.mxu1 %v7109_v32  ;;  %v798_v26 = vld [vmem:[%s8315_s15 + $0xde0] sm:$0xff] }
 0x177   : > { %3805 = vmatprep.subr.bf16.mxu1 %v7094_v34  ;;  %v7238_v30 = vcombine.high %v790_v25, %v798_v26  ;;  %v518_v31 = vld [vmem:[%s8315_s15 + $0x520] sm:$0xff]  ;;  %v7237_v36 = vcombine.low %v790_v25, %v798_v26  ;;  %v423_v26 = vld [vmem:[%s8315_s15 + $0x228] sm:$0xff] }
 0x178   : > { %3765 = vmatpush1.bf16.msra.mxu0 %v6837_v39  ;;  %v526_v32 = vld [vmem:[%s8315_s15 + $0x560] sm:$0xff] }
 0x179   : > { %3766 = vmatprep.subr.bf16.mxu0 %v6822_v41  ;;  %v774_v33 = vld [vmem:[%s8315_s15 + $0xd20] sm:$0xff]  ;;  %v6966_v37 = vcombine.high %v518_v31, %v526_v32  ;;  %v6965_v43 = vcombine.low %v518_v31, %v526_v32  ;;  %v679_v31 = vld [vmem:[%s8315_s15 + $0xa28] sm:$0xff] }
 0x17a   : > { %3806 = vmatpush1.bf16.msra.mxu1 %v7093_v40  ;;  %v782_v34 = vld [vmem:[%s8315_s15 + $0xd60] sm:$0xff]  ;;  %v687_v32 = vld [vmem:[%s8315_s15 + $0xa68] sm:$0xff] }
 0x17b   : > { %3807 = vmatprep.subr.bf16.mxu1 %v7078_v42  ;;  %v7222_v38 = vcombine.high %v774_v33, %v782_v34  ;;  %v502_v39 = vld [vmem:[%s8315_s15 + $0x4a0] sm:$0xff]  ;;  %v7221_v44 = vcombine.low %v774_v33, %v782_v34 }
 0x17c   : > { %3767 = vmatpush1.bf16.msra.mxu0 %v6821_v47  ;;  %v510_v40 = vld [vmem:[%s8315_s15 + $0x4e0] sm:$0xff] }
 0x17d   : > { %3768 = vmatprep.subr.bf16.mxu0 %v6806_v49  ;;  %v758_v41 = vld [vmem:[%s8315_s15 + $0xca0] sm:$0xff]  ;;  %v6950_v45 = vcombine.high %v502_v39, %v510_v40  ;;  %v6949_v51 = vcombine.low %v502_v39, %v510_v40  ;;  %v7128_v40 = vcombine.high %v679_v31, %v687_v32 }
 0x17e   : > { %3808 = vmatpush1.bf16.msra.mxu1 %v7077_v48  ;;  %v766_v42 = vld [vmem:[%s8315_s15 + $0xce0] sm:$0xff] }
 0x17f   : > { %3809 = vmatprep.subr.bf16.mxu1 %v7062_v50  ;;  %v7206_v46 = vcombine.high %v758_v41, %v766_v42  ;;  %v486_v47 = vld [vmem:[%s8315_s15 + $0x420] sm:$0xff]  ;;  %v7205_v52 = vcombine.low %v758_v41, %v766_v42  ;;  %v407_v41 = vld [vmem:[%s8315_s15 + $0x1a8] sm:$0xff] }
 0x180   : > { %3769 = vmatpush1.bf16.msra.mxu0 %v6805_v55  ;;  %v494_v48 = vld [vmem:[%s8315_s15 + $0x460] sm:$0xff]  ;;  %v471_v55 = vld [vmem:[%s8315_s15 + $0x3a8] sm:$0xff] }
 0x181   : > { %3770 = vmatprep.subr.bf16.mxu0 %v7046_v57  ;;  %v742_v49 = vld [vmem:[%s8315_s15 + $0xc20] sm:$0xff]  ;;  %v6934_v53 = vcombine.high %v486_v47, %v494_v48  ;;  %v727_v57 = vld [vmem:[%s8315_s15 + $0xba8] sm:$0xff]  ;;  %v6933_v61 = vcombine.low %v486_v47, %v494_v48 }
 0x182   : > { %3810 = vmatpush1.bf16.msra.mxu1 %v7061_v56  ;;  %v750_v50 = vld [vmem:[%s8315_s15 + $0xc60] sm:$0xff]  ;;  %v479_v56 = vld [vmem:[%s8315_s15 + $0x3e8] sm:$0xff] }
 0x183   : > { %3811 = vmatprep.subr.bf16.mxu1 %v7302_v58  ;;  %v7190_v54 = vcombine.high %v742_v49, %v750_v50  ;;  %v735_v58 = vld [vmem:[%s8315_s15 + $0xbe8] sm:$0xff]  ;;  %v7189_v62 = vcombine.low %v742_v49, %v750_v50  ;;  %v6920_v63 = vcombine.high %v471_v55, %v479_v56  ;;  %v6919_v5 = vcombine.low %v471_v55, %v479_v56 }
 0x184   : > { %3771 = vmatpush2.bf16.msra.mxu0 %v7045_v1  ;;  %v7176_v0 = vcombine.high %v727_v57, %v735_v58  ;;  %v455_v1 = vld [vmem:[%s8315_s15 + $0x328] sm:$0xff]  ;;  %v7175_v6 = vcombine.low %v727_v57, %v735_v58 }
 0x185   : > { %3772 = vmatprep.subr.bf16.mxu0 %v7030_v3  ;;  %v711_v3 = vld [vmem:[%s8315_s15 + $0xb28] sm:$0xff] }
 0x186   : > { %3812 = vmatpush2.bf16.msra.mxu1 %v7301_v2  ;;  %v463_v2 = vld [vmem:[%s8315_s15 + $0x368] sm:$0xff] }
 0x187   : > { %3813 = vmatprep.subr.bf16.mxu1 %v7286_v4  ;;  %v719_v4 = vld [vmem:[%s8315_s15 + $0xb68] sm:$0xff]  ;;  %v6904_v7 = vcombine.high %v455_v1, %v463_v2  ;;  %v6903_v16 = vcombine.low %v455_v1, %v463_v2 }
 0x188   : > { %3773 = vmatpush2.bf16.msra.mxu0 %v7029_v9  ;;  %v7160_v8 = vcombine.high %v711_v3, %v719_v4  ;;  %v439_v9 = vld [vmem:[%s8315_s15 + $0x2a8] sm:$0xff] }
 0x189   : > { %3774 = vmatprep.subr.bf16.mxu0 %v7014_v11  ;;  %v415_v42 = vld [vmem:[%s8315_s15 + $0x1e8] sm:$0xff] }
 0x18a   : > { %3814 = vmatpush2.bf16.msra.mxu1 %v7285_v10  ;;  %v447_v10 = vld [vmem:[%s8315_s15 + $0x2e8] sm:$0xff]  ;;  %v6856_v47 = vcombine.high %v407_v41, %v415_v42 }
 0x18b   : > { %3815 = vmatprep.subr.bf16.mxu1 %v7270_v12  ;;  %v695_v12 = vld [vmem:[%s8315_s15 + $0xaa8] sm:$0xff]  ;;  %v6887_v34 = vcombine.low %v439_v9, %v447_v10 }
 0x18c   : > { %3775 = vmatpush2.bf16.msra.mxu0 %v7013_v18  ;;  %v7144_v25 = vcombine.high %v695_v12, %v703_v13  ;;  %v391_v49 = vld [vmem:[%s8315_s15 + $0x128] sm:$0xff] }
 0x18d   : > { %3776 = vmatprep.subr.bf16.mxu0 %v6998_v21  ;;  %v7159_v21 = vcombine.low %v711_v3, %v719_v4  ;;  %v399_v50 = vld [vmem:[%s8315_s15 + $0x168] sm:$0xff] }
 0x18e   : > { %3816 = vmatpush2.bf16.msra.mxu1 %v7269_v19  ;;  %v6840_v55 = vcombine.high %v391_v49, %v399_v50  ;;  %v375_v57 = vld [vmem:[%s8315_s15 + $0xa8] sm:$0xff] }
 0x18f   : > { %3817 = vmatprep.subr.bf16.mxu1 %v7254_v22  ;;  %v6888_v22 = vcombine.high %v439_v9, %v447_v10  ;;  %v383_v58 = vld [vmem:[%s8315_s15 + $0xe8] sm:$0xff] }
 0x190   : > { %3777 = vmatpush2.bf16.msra.mxu0 %v6997_v27  ;;  %v431_v27 = vld [vmem:[%s8315_s15 + $0x268] sm:$0xff]  ;;  %v6824_v1 = vcombine.high %v375_v57, %v383_v58 }
 0x191   : > { %3778 = vmatprep.subr.bf16.mxu0 %v6982_v29  ;;  %v359_v3 = vld [vmem:[%s8315_s15 + $0x28] sm:$0xff] }
 0x192   : > { %3818 = vmatpush2.bf16.msra.mxu1 %v7253_v28  ;;  %v367_v4 = vld [vmem:[%s8315_s15 + $0x68] sm:$0xff] }
 0x193   : > { %3819 = vmatprep.subr.bf16.mxu1 %v7238_v30  ;;  %v6808_v9 = vcombine.high %v359_v3, %v367_v4 }
 0x194   : > { %3779 = vmatpush2.bf16.msra.mxu0 %v6981_v35 }
 0x195   : > { %3780 = vmatprep.subr.bf16.mxu0 %v6966_v37  ;;  %v7143_v37 = vcombine.low %v695_v12, %v703_v13  ;;  %v607_v12 = vld [vmem:[%s8315_s15 + $0x7e8] sm:$0xff] }
 0x196   : > { %3820 = vmatpush2.bf16.msra.mxu1 %v7237_v36  ;;  %v855_v13 = vld [vmem:[%s8315_s15 + $0xfa8] sm:$0xff] }
 0x197   : > { %3821 = vmatprep.subr.bf16.mxu1 %v7222_v38  ;;  %v6872_v38 = vcombine.high %v423_v26, %v431_v27 }
 0x198   : > { %3781 = vmatpush2.bf16.msra.mxu0 %v6965_v43  ;;  %v663_v43 = vld [vmem:[%s8315_s15 + $0x9a8] sm:$0xff] }
 0x199   : > { %3782 = vmatprep.subr.bf16.mxu0 %v6950_v45  ;;  %v6871_v45 = vcombine.low %v423_v26, %v431_v27 }
 0x19a   : > { %3822 = vmatpush2.bf16.msra.mxu1 %v7221_v44  ;;  %v671_v44 = vld [vmem:[%s8315_s15 + $0x9e8] sm:$0xff] }
 0x19b   : > { %3823 = vmatprep.subr.bf16.mxu1 %v7206_v46  ;;  %v7127_v46 = vcombine.low %v679_v31, %v687_v32  ;;  %v7112_v48 = vcombine.high %v663_v43, %v671_v44  ;;  %v823_v31 = vld [vmem:[%s8315_s15 + $0xea8] sm:$0xff] }
 0x19c   : > { %3783 = vmatpush2.bf16.msra.mxu0 %v6949_v51  ;;  %v647_v51 = vld [vmem:[%s8315_s15 + $0x928] sm:$0xff] }
 0x19d   : > { %3784 = vmatprep.subr.bf16.mxu0 %v6934_v53  ;;  %v6855_v53 = vcombine.low %v407_v41, %v415_v42  ;;  %v831_v32 = vld [vmem:[%s8315_s15 + $0xee8] sm:$0xff] }
 0x19e   : > { %3824 = vmatpush2.bf16.msra.mxu1 %v7205_v52  ;;  %v655_v52 = vld [vmem:[%s8315_s15 + $0x968] sm:$0xff]  ;;  %v7271_v42 = vcombine.low %v823_v31, %v831_v32 }
 0x19f   : > { %3825 = vmatprep.subr.bf16.mxu1 %v7190_v54  ;;  %v7111_v54 = vcombine.low %v663_v43, %v671_v44  ;;  %v7096_v56 = vcombine.high %v647_v51, %v655_v52 }
 0x1a0   : > { %3785 = vmatpush2.bf16.msra.mxu0 %v6933_v61  ;;  %v631_v61 = vld [vmem:[%s8315_s15 + $0x8a8] sm:$0xff] }
 0x1a1   : > { %3836 = vmatprep.subr.bf16.mxu0 %v6920_v63  ;;  %v6839_v63 = vcombine.low %v391_v49, %v399_v50 }
 0x1a2   : > { %3826 = vmatpush2.bf16.msra.mxu1 %v7189_v62  ;;  %v639_v62 = vld [vmem:[%s8315_s15 + $0x8e8] sm:$0xff] }
 0x1a3   : > { %3877 = vmatprep.subr.bf16.mxu1 %v7176_v0  ;;  %v3542_v11 = vpop.f32.mrf.mxu0  ;;  %3787 = vmatmul.mubr.bf16.vlgmr.msra.gmra.mxu0 %v8413_v17  ;;  %v7095_v0 = vcombine.low %v647_v51, %v655_v52  ;;  %v7080_v2 = vcombine.high %v631_v61, %v639_v62 }
 0x1a4   : > { %3837 = vmatpush1.bf16.msra.mxu0 %v6919_v5  ;;  %3868 = vmatprep.mubr.bf16.mxu0 %v8365_v59  ;;  %v615_v5 = vld [vmem:[%s8315_s15 + $0x828] sm:$0xff] }
 0x1a5   : > { %v3583_v15 = vpop.f32.mrf.mxu1  ;;  %3828 = vmatmul.mubr.bf16.vlgmr.msra.gmra.mxu1 %v8417_v20  ;;  %v3544_v19 = vpop.f32.mrf.mxu0  ;;  %3838 = vmatprep.subr.bf16.mxu0 %v6904_v7  ;;  %v6823_v7 = vcombine.low %v375_v57, %v383_v58 }
 0x1a6   : > { %v3584_v18 = vadd.f32 %v3583_v15, %v3542_v11  ;;  %3878 = vmatpush1.bf16.msra.mxu1 %v7175_v6  ;;  %3909 = vmatprep.mubr.bf16.mxu1 %v8367_v60  ;;  %v623_v6 = vld [vmem:[%s8315_s15 + $0x868] sm:$0xff]  ;;  %v6807_v15 = vcombine.low %v359_v3, %v367_v4 }
 0x1a7   : > { %v3585_v24 = vpop.f32.mrf.mxu1  ;;  %3879 = vmatprep.subr.bf16.mxu1 %v7160_v8  ;;  %v3546_v30 = vpop.f32.mrf.mxu0  ;;  %v7079_v8 = vcombine.low %v631_v61, %v639_v62  ;;  %v7064_v10 = vcombine.high %v615_v5, %v623_v6  ;;  %v599_v11 = vld [vmem:[%s8315_s15 + $0x7a8] sm:$0xff] }
 0x1a8   : > { %v4084_v28 = vadd.f32 %v3584_v18, %v332_v14  ;;  %v3586_v29 = vadd.f32 %v3585_v24, %v3544_v19  ;;  %3839 = vmatpush1.bf16.msra.mxu0 %v6903_v16  ;;  %v863_v14 = vld [vmem:[%s8315_s15 + $0xfe8] sm:$0xff]  ;;  %v7063_v16 = vcombine.low %v615_v5, %v623_v6  ;;  %v7048_v18 = vcombine.high %v599_v11, %v607_v12 }
 0x1a9   : > { %v3587_v33 = vpop.f32.mrf.mxu1  ;;  %v3547_v36 = vpop.f32.mrf.mxu0  ;;  %3840 = vmatprep.subr.bf16.mxu0 %v6888_v22  ;;  %v7304_v19 = vcombine.high %v855_v13, %v863_v14  ;;  %v591_v22 = vld [vmem:[%s8315_s15 + $0x768] sm:$0xff]  ;;  %v7303_v26 = vcombine.low %v855_v13, %v863_v14 }
 0x1aa   : > { %4100 = vst [vmem:[#allocation2 + $0x58] sm:$0xff] %v4084_v28  ;;  %v4085_v35 = vadd.f32 %v3586_v29, %v333_v23  ;;  %3880 = vmatpush1.bf16.msra.mxu1 %v7159_v21  ;;  %v583_v21 = vld [vmem:[%s8315_s15 + $0x728] sm:$0xff]  ;;  %v7272_v36 = vcombine.high %v823_v31, %v831_v32 }
 0x1ab   : > { %v3588_v39 = vpop.f32.mrf.mxu1  ;;  %3881 = vmatprep.subr.bf16.mxu1 %v7144_v25  ;;  %v839_v23 = vld [vmem:[%s8315_s15 + $0xf28] sm:$0xff]  ;;  %v7047_v25 = vcombine.low %v599_v11, %v607_v12  ;;  %v7032_v27 = vcombine.high %v583_v21, %v591_v22  ;;  %v7031_v33 = vcombine.low %v583_v21, %v591_v22 }
 0x1ac   : > { %4101 = vst [vmem:[#allocation2 + $0x18] sm:$0xff] %v4085_v35  ;;  %3841 = vmatpush1.bf16.msra.mxu0 %v6887_v34  ;;  %v847_v24 = vld [vmem:[%s8315_s15 + $0xf68] sm:$0xff] }
 0x1ad   : > { %3842 = vmatprep.subr.bf16.mxu0 %v6872_v38  ;;  %v7288_v28 = vcombine.high %v839_v23, %v847_v24  ;;  %v567_v29 = vld [vmem:[%s8315_s15 + $0x6a8] sm:$0xff]  ;;  %v7287_v34 = vcombine.low %v839_v23, %v847_v24 }
 0x1ae   : > { %3882 = vmatpush1.bf16.msra.mxu1 %v7143_v37  ;;  %v575_v30 = vld [vmem:[%s8315_s15 + $0x6e8] sm:$0xff] }
 0x1af   : > { %3883 = vmatprep.subr.bf16.mxu1 %v7128_v40  ;;  %v7016_v35 = vcombine.high %v567_v29, %v575_v30  ;;  %v551_v37 = vld [vmem:[%s8315_s15 + $0x628] sm:$0xff]  ;;  %v7015_v41 = vcombine.low %v567_v29, %v575_v30 }
 0x1b0   : > { %3843 = vmatpush1.bf16.msra.mxu0 %v6871_v45  ;;  %v559_v38 = vld [vmem:[%s8315_s15 + $0x668] sm:$0xff] }
 0x1b1   : > { %3844 = vmatprep.subr.bf16.mxu0 %v6856_v47  ;;  %v807_v39 = vld [vmem:[%s8315_s15 + $0xe28] sm:$0xff]  ;;  %v7000_v43 = vcombine.high %v551_v37, %v559_v38  ;;  %v6999_v49 = vcombine.low %v551_v37, %v559_v38  ;;  %v704_v37 = vld [vmem:[%s8315_s15 + $0xaf0] sm:$0xff] }
 0x1b2   : > { %3884 = vmatpush1.bf16.msra.mxu1 %v7127_v46  ;;  %v815_v40 = vld [vmem:[%s8315_s15 + $0xe68] sm:$0xff]  ;;  %v334_v38 = vld [vmem:[#allocation2 + $0x50] sm:$0xff] }
 0x1b3   : > { %3885 = vmatprep.subr.bf16.mxu1 %v7112_v48  ;;  %v7256_v44 = vcombine.high %v807_v39, %v815_v40  ;;  %v535_v45 = vld [vmem:[%s8315_s15 + $0x5a8] sm:$0xff]  ;;  %v7255_v50 = vcombine.low %v807_v39, %v815_v40 }
 0x1b4   : > { %3845 = vmatpush1.bf16.msra.mxu0 %v6855_v53  ;;  %v543_v46 = vld [vmem:[%s8315_s15 + $0x5e8] sm:$0xff] }
 0x1b5   : > { %3846 = vmatprep.subr.bf16.mxu0 %v6840_v55  ;;  %v791_v47 = vld [vmem:[%s8315_s15 + $0xda8] sm:$0xff]  ;;  %v6984_v51 = vcombine.high %v535_v45, %v543_v46  ;;  %v6983_v57 = vcombine.low %v535_v45, %v543_v46 }
 0x1b6   : > { %3886 = vmatpush1.bf16.msra.mxu1 %v7111_v54  ;;  %v799_v48 = vld [vmem:[%s8315_s15 + $0xde8] sm:$0xff] }
 0x1b7   : > { %3887 = vmatprep.subr.bf16.mxu1 %v7096_v56  ;;  %v7240_v52 = vcombine.high %v791_v47, %v799_v48  ;;  %v519_v53 = vld [vmem:[%s8315_s15 + $0x528] sm:$0xff]  ;;  %v7239_v58 = vcombine.low %v791_v47, %v799_v48  ;;  %v424_v48 = vld [vmem:[%s8315_s15 + $0x230] sm:$0xff] }
 0x1b8   : > { %3847 = vmatpush1.bf16.msra.mxu0 %v6839_v63  ;;  %v527_v54 = vld [vmem:[%s8315_s15 + $0x568] sm:$0xff] }
 0x1b9   : > { %3848 = vmatprep.subr.bf16.mxu0 %v6824_v1  ;;  %v775_v55 = vld [vmem:[%s8315_s15 + $0xd28] sm:$0xff]  ;;  %v6968_v61 = vcombine.high %v519_v53, %v527_v54  ;;  %v6967_v3 = vcombine.low %v519_v53, %v527_v54  ;;  %v680_v53 = vld [vmem:[%s8315_s15 + $0xa30] sm:$0xff] }
 0x1ba   : > { %3888 = vmatpush1.bf16.msra.mxu1 %v7095_v0  ;;  %v783_v56 = vld [vmem:[%s8315_s15 + $0xd68] sm:$0xff]  ;;  %v688_v54 = vld [vmem:[%s8315_s15 + $0xa70] sm:$0xff] }
 0x1bb   : > { %3889 = vmatprep.subr.bf16.mxu1 %v7080_v2  ;;  %v7224_v62 = vcombine.high %v775_v55, %v783_v56  ;;  %v503_v63 = vld [vmem:[%s8315_s15 + $0x4a8] sm:$0xff]  ;;  %v7223_v4 = vcombine.low %v775_v55, %v783_v56 }
 0x1bc   : > { %3849 = vmatpush1.bf16.msra.mxu0 %v6823_v7  ;;  %v511_v0 = vld [vmem:[%s8315_s15 + $0x4e8] sm:$0xff] }
 0x1bd   : > { %3850 = vmatprep.subr.bf16.mxu0 %v6808_v9  ;;  %v759_v1 = vld [vmem:[%s8315_s15 + $0xca8] sm:$0xff]  ;;  %v6952_v5 = vcombine.high %v503_v63, %v511_v0  ;;  %v6951_v11 = vcombine.low %v503_v63, %v511_v0  ;;  %v7130_v0 = vcombine.high %v680_v53, %v688_v54 }
 0x1be   : > { %3890 = vmatpush1.bf16.msra.mxu1 %v7079_v8  ;;  %v767_v2 = vld [vmem:[%s8315_s15 + $0xce8] sm:$0xff] }
 0x1bf   : > { %3891 = vmatprep.subr.bf16.mxu1 %v7064_v10  ;;  %v7208_v6 = vcombine.high %v759_v1, %v767_v2  ;;  %v487_v7 = vld [vmem:[%s8315_s15 + $0x428] sm:$0xff]  ;;  %v7207_v12 = vcombine.low %v759_v1, %v767_v2  ;;  %v408_v1 = vld [vmem:[%s8315_s15 + $0x1b0] sm:$0xff] }
 0x1c0   : > { %3851 = vmatpush1.bf16.msra.mxu0 %v6807_v15  ;;  %v495_v8 = vld [vmem:[%s8315_s15 + $0x468] sm:$0xff]  ;;  %v472_v15 = vld [vmem:[%s8315_s15 + $0x3b0] sm:$0xff] }
 0x1c1   : > { %3852 = vmatprep.subr.bf16.mxu0 %v7048_v18  ;;  %v743_v9 = vld [vmem:[%s8315_s15 + $0xc28] sm:$0xff]  ;;  %v6936_v13 = vcombine.high %v487_v7, %v495_v8  ;;  %v728_v18 = vld [vmem:[%s8315_s15 + $0xbb0] sm:$0xff]  ;;  %v6935_v21 = vcombine.low %v487_v7, %v495_v8 }
 0x1c2   : > { %3892 = vmatpush1.bf16.msra.mxu1 %v7063_v16  ;;  %v751_v10 = vld [vmem:[%s8315_s15 + $0xc68] sm:$0xff]  ;;  %v480_v16 = vld [vmem:[%s8315_s15 + $0x3f0] sm:$0xff] }
 0x1c3   : > { %3893 = vmatprep.subr.bf16.mxu1 %v7304_v19  ;;  %v7192_v14 = vcombine.high %v743_v9, %v751_v10  ;;  %v736_v19 = vld [vmem:[%s8315_s15 + $0xbf0] sm:$0xff]  ;;  %v7191_v22 = vcombine.low %v743_v9, %v751_v10  ;;  %v6922_v23 = vcombine.high %v472_v15, %v480_v16  ;;  %v6921_v29 = vcombine.low %v472_v15, %v480_v16  ;;  %v335_v45 = vld [vmem:[#allocation2 + $0x68] sm:$0xff] }
 0x1c4   : > { %3853 = vmatpush2.bf16.msra.mxu0 %v7047_v25  ;;  %v7178_v24 = vcombine.high %v728_v18, %v736_v19  ;;  %v456_v25 = vld [vmem:[%s8315_s15 + $0x330] sm:$0xff]  ;;  %v7177_v30 = vcombine.low %v728_v18, %v736_v19 }
 0x1c5   : > { %3854 = vmatprep.subr.bf16.mxu0 %v7032_v27  ;;  %v712_v27 = vld [vmem:[%s8315_s15 + $0xb30] sm:$0xff] }
 0x1c6   : > { %3894 = vmatpush2.bf16.msra.mxu1 %v7303_v26  ;;  %v464_v26 = vld [vmem:[%s8315_s15 + $0x370] sm:$0xff] }
 0x1c7   : > { %3895 = vmatprep.subr.bf16.mxu1 %v7288_v28  ;;  %v720_v28 = vld [vmem:[%s8315_s15 + $0xb70] sm:$0xff]  ;;  %v6906_v31 = vcombine.high %v456_v25, %v464_v26  ;;  %v6905_v40 = vcombine.low %v456_v25, %v464_v26 }
 0x1c8   : > { %3855 = vmatpush2.bf16.msra.mxu0 %v7031_v33  ;;  %v7162_v32 = vcombine.high %v712_v27, %v720_v28  ;;  %v440_v33 = vld [vmem:[%s8315_s15 + $0x2b0] sm:$0xff] }
 0x1c9   : > { %3856 = vmatprep.subr.bf16.mxu0 %v7016_v35  ;;  %v416_v2 = vld [vmem:[%s8315_s15 + $0x1f0] sm:$0xff] }
 0x1ca   : > { %3896 = vmatpush2.bf16.msra.mxu1 %v7287_v34  ;;  %v448_v34 = vld [vmem:[%s8315_s15 + $0x2f0] sm:$0xff]  ;;  %v6858_v7 = vcombine.high %v408_v1, %v416_v2 }
 0x1cb   : > { %3897 = vmatprep.subr.bf16.mxu1 %v7272_v36  ;;  %v696_v36 = vld [vmem:[%s8315_s15 + $0xab0] sm:$0xff]  ;;  %v6889_v56 = vcombine.low %v440_v33, %v448_v34 }
 0x1cc   : > { %3857 = vmatpush2.bf16.msra.mxu0 %v7015_v41  ;;  %v7146_v47 = vcombine.high %v696_v36, %v704_v37  ;;  %v392_v9 = vld [vmem:[%s8315_s15 + $0x130] sm:$0xff] }
 0x1cd   : > { %3858 = vmatprep.subr.bf16.mxu0 %v7000_v43  ;;  %v7161_v43 = vcombine.low %v712_v27, %v720_v28  ;;  %v400_v10 = vld [vmem:[%s8315_s15 + $0x170] sm:$0xff] }
 0x1ce   : > { %3898 = vmatpush2.bf16.msra.mxu1 %v7271_v42  ;;  %v6842_v15 = vcombine.high %v392_v9, %v400_v10  ;;  %v376_v18 = vld [vmem:[%s8315_s15 + $0xb0] sm:$0xff] }
 0x1cf   : > { %3899 = vmatprep.subr.bf16.mxu1 %v7256_v44  ;;  %v6890_v44 = vcombine.high %v440_v33, %v448_v34  ;;  %v384_v19 = vld [vmem:[%s8315_s15 + $0xf0] sm:$0xff] }
 0x1d0   : > { %3859 = vmatpush2.bf16.msra.mxu0 %v6999_v49  ;;  %v432_v49 = vld [vmem:[%s8315_s15 + $0x270] sm:$0xff]  ;;  %v6826_v25 = vcombine.high %v376_v18, %v384_v19 }
 0x1d1   : > { %3860 = vmatprep.subr.bf16.mxu0 %v6984_v51  ;;  %v360_v27 = vld [vmem:[%s8315_s15 + $0x30] sm:$0xff] }
 0x1d2   : > { %3900 = vmatpush2.bf16.msra.mxu1 %v7255_v50  ;;  %v368_v28 = vld [vmem:[%s8315_s15 + $0x70] sm:$0xff] }
 0x1d3   : > { %3901 = vmatprep.subr.bf16.mxu1 %v7240_v52  ;;  %v6810_v33 = vcombine.high %v360_v27, %v368_v28 }
 0x1d4   : > { %3861 = vmatpush2.bf16.msra.mxu0 %v6983_v57 }
 0x1d5   : > { %3862 = vmatprep.subr.bf16.mxu0 %v6968_v61  ;;  %v7145_v61 = vcombine.low %v696_v36, %v704_v37  ;;  %v608_v36 = vld [vmem:[%s8315_s15 + $0x7f0] sm:$0xff] }
 0x1d6   : > { %3902 = vmatpush2.bf16.msra.mxu1 %v7239_v58  ;;  %v856_v37 = vld [vmem:[%s8315_s15 + $0xfb0] sm:$0xff] }
 0x1d7   : > { %3903 = vmatprep.subr.bf16.mxu1 %v7224_v62  ;;  %v6874_v62 = vcombine.high %v424_v48, %v432_v49 }
 0x1d8   : > { %3863 = vmatpush2.bf16.msra.mxu0 %v6967_v3  ;;  %v664_v3 = vld [vmem:[%s8315_s15 + $0x9b0] sm:$0xff] }
 0x1d9   : > { %3864 = vmatprep.subr.bf16.mxu0 %v6952_v5  ;;  %v6873_v5 = vcombine.low %v424_v48, %v432_v49 }
 0x1da   : > { %3904 = vmatpush2.bf16.msra.mxu1 %v7223_v4  ;;  %v672_v4 = vld [vmem:[%s8315_s15 + $0x9f0] sm:$0xff] }
 0x1db   : > { %3905 = vmatprep.subr.bf16.mxu1 %v7208_v6  ;;  %v7129_v6 = vcombine.low %v680_v53, %v688_v54  ;;  %v7114_v8 = vcombine.high %v664_v3, %v672_v4  ;;  %v824_v53 = vld [vmem:[%s8315_s15 + $0xeb0] sm:$0xff] }
 0x1dc   : > { %3865 = vmatpush2.bf16.msra.mxu0 %v6951_v11  ;;  %v648_v11 = vld [vmem:[%s8315_s15 + $0x930] sm:$0xff] }
 0x1dd   : > { %3866 = vmatprep.subr.bf16.mxu0 %v6936_v13  ;;  %v6857_v13 = vcombine.low %v408_v1, %v416_v2  ;;  %v832_v54 = vld [vmem:[%s8315_s15 + $0xef0] sm:$0xff] }
 0x1de   : > { %3906 = vmatpush2.bf16.msra.mxu1 %v7207_v12  ;;  %v656_v12 = vld [vmem:[%s8315_s15 + $0x970] sm:$0xff]  ;;  %v7273_v2 = vcombine.low %v824_v53, %v832_v54 }
 0x1df   : > { %3907 = vmatprep.subr.bf16.mxu1 %v7192_v14  ;;  %v7113_v14 = vcombine.low %v664_v3, %v672_v4  ;;  %v7098_v16 = vcombine.high %v648_v11, %v656_v12 }
 0x1e0   : > { %3867 = vmatpush2.bf16.msra.mxu0 %v6935_v21  ;;  %v632_v21 = vld [vmem:[%s8315_s15 + $0x8b0] sm:$0xff] }
 0x1e1   : > { %3918 = vmatprep.subr.bf16.mxu0 %v6922_v23  ;;  %v6841_v23 = vcombine.low %v392_v9, %v400_v10 }
 0x1e2   : > { %3908 = vmatpush2.bf16.msra.mxu1 %v7191_v22  ;;  %v640_v22 = vld [vmem:[%s8315_s15 + $0x8f0] sm:$0xff] }
 0x1e3   : > { %3959 = vmatprep.subr.bf16.mxu1 %v7178_v24  ;;  %v3624_v35 = vpop.f32.mrf.mxu0  ;;  %3869 = vmatmul.mubr.bf16.vlgmr.msra.gmra.mxu0 %v8413_v17  ;;  %v7097_v24 = vcombine.low %v648_v11, %v656_v12  ;;  %v7082_v26 = vcombine.high %v632_v21, %v640_v22 }
 0x1e4   : > { %3919 = vmatpush1.bf16.msra.mxu0 %v6921_v29  ;;  %3950 = vmatprep.mubr.bf16.mxu0 %v8365_v59  ;;  %v616_v29 = vld [vmem:[%s8315_s15 + $0x830] sm:$0xff] }
 0x1e5   : > { %v3665_v39 = vpop.f32.mrf.mxu1  ;;  %3910 = vmatmul.mubr.bf16.vlgmr.msra.gmra.mxu1 %v8417_v20  ;;  %v3626_v42 = vpop.f32.mrf.mxu0  ;;  %3920 = vmatprep.subr.bf16.mxu0 %v6906_v31  ;;  %v6825_v31 = vcombine.low %v376_v18, %v384_v19 }
 0x1e6   : > { %v3666_v41 = vadd.f32 %v3665_v39, %v3624_v35  ;;  %3960 = vmatpush1.bf16.msra.mxu1 %v7177_v30  ;;  %3991 = vmatprep.mubr.bf16.mxu1 %v8367_v60  ;;  %v624_v30 = vld [vmem:[%s8315_s15 + $0x870] sm:$0xff]  ;;  %v6809_v39 = vcombine.low %v360_v27, %v368_v28 }
 0x1e7   : > { %v3667_v46 = vpop.f32.mrf.mxu1  ;;  %3961 = vmatprep.subr.bf16.mxu1 %v7162_v32  ;;  %v3628_v52 = vpop.f32.mrf.mxu0  ;;  %v7081_v32 = vcombine.low %v632_v21, %v640_v22  ;;  %v7066_v34 = vcombine.high %v616_v29, %v624_v30  ;;  %v600_v35 = vld [vmem:[%s8315_s15 + $0x7b0] sm:$0xff] }
 0x1e8   : > { %v4086_v50 = vadd.f32 %v3666_v41, %v334_v38  ;;  %v3668_v51 = vadd.f32 %v3667_v46, %v3626_v42  ;;  %3921 = vmatpush1.bf16.msra.mxu0 %v6905_v40  ;;  %v864_v38 = vld [vmem:[%s8315_s15 + $0xff0] sm:$0xff]  ;;  %v7065_v40 = vcombine.low %v616_v29, %v624_v30  ;;  %v7050_v41 = vcombine.high %v600_v35, %v608_v36 }
 0x1e9   : > { %v3669_v55 = vpop.f32.mrf.mxu1  ;;  %v3629_v58 = vpop.f32.mrf.mxu0  ;;  %3922 = vmatprep.subr.bf16.mxu0 %v6890_v44  ;;  %v7306_v42 = vcombine.high %v856_v37, %v864_v38  ;;  %v592_v44 = vld [vmem:[%s8315_s15 + $0x770] sm:$0xff]  ;;  %v7305_v48 = vcombine.low %v856_v37, %v864_v38 }
 0x1ea   : > { %4102 = vst [vmem:[#allocation2 + $0x50] sm:$0xff] %v4086_v50  ;;  %v4087_v57 = vadd.f32 %v3668_v51, %v335_v45  ;;  %3962 = vmatpush1.bf16.msra.mxu1 %v7161_v43  ;;  %v584_v43 = vld [vmem:[%s8315_s15 + $0x730] sm:$0xff]  ;;  %v7274_v58 = vcombine.high %v824_v53, %v832_v54 }
 0x1eb   : > { %v3670_v63 = vpop.f32.mrf.mxu1  ;;  %3963 = vmatprep.subr.bf16.mxu1 %v7146_v47  ;;  %v840_v45 = vld [vmem:[%s8315_s15 + $0xf30] sm:$0xff]  ;;  %v7049_v47 = vcombine.low %v600_v35, %v608_v36  ;;  %v7034_v49 = vcombine.high %v584_v43, %v592_v44  ;;  %v7033_v55 = vcombine.low %v584_v43, %v592_v44 }
 0x1ec   : > { %4103 = vst [vmem:[#allocation2 + $0x68] sm:$0xff] %v4087_v57  ;;  %3923 = vmatpush1.bf16.msra.mxu0 %v6889_v56  ;;  %v848_v46 = vld [vmem:[%s8315_s15 + $0xf70] sm:$0xff] }
 0x1ed   : > { %3924 = vmatprep.subr.bf16.mxu0 %v6874_v62  ;;  %v7290_v50 = vcombine.high %v840_v45, %v848_v46  ;;  %v568_v51 = vld [vmem:[%s8315_s15 + $0x6b0] sm:$0xff]  ;;  %v7289_v56 = vcombine.low %v840_v45, %v848_v46 }
 0x1ee   : > { %3964 = vmatpush1.bf16.msra.mxu1 %v7145_v61  ;;  %v576_v52 = vld [vmem:[%s8315_s15 + $0x6f0] sm:$0xff] }
 0x1ef   : > { %3965 = vmatprep.subr.bf16.mxu1 %v7130_v0  ;;  %v7018_v57 = vcombine.high %v568_v51, %v576_v52  ;;  %v552_v61 = vld [vmem:[%s8315_s15 + $0x630] sm:$0xff]  ;;  %v7017_v1 = vcombine.low %v568_v51, %v576_v52 }
 0x1f0   : > { %3925 = vmatpush1.bf16.msra.mxu0 %v6873_v5  ;;  %v560_v62 = vld [vmem:[%s8315_s15 + $0x670] sm:$0xff] }
 0x1f1   : > { %3926 = vmatprep.subr.bf16.mxu0 %v6858_v7  ;;  %v808_v63 = vld [vmem:[%s8315_s15 + $0xe30] sm:$0xff]  ;;  %v7002_v3 = vcombine.high %v552_v61, %v560_v62  ;;  %v7001_v9 = vcombine.low %v552_v61, %v560_v62  ;;  %v705_v61 = vld [vmem:[%s8315_s15 + $0xaf8] sm:$0xff]  ;;  %v336_v62 = vld [vmem:[#allocation2 + $0x8] sm:$0xff] }
 0x1f2   : > { %3966 = vmatpush1.bf16.msra.mxu1 %v7129_v6  ;;  %v816_v0 = vld [vmem:[%s8315_s15 + $0xe70] sm:$0xff] }
 0x1f3   : > { %3967 = vmatprep.subr.bf16.mxu1 %v7114_v8  ;;  %v7258_v4 = vcombine.high %v808_v63, %v816_v0  ;;  %v536_v5 = vld [vmem:[%s8315_s15 + $0x5b0] sm:$0xff]  ;;  %v7257_v10 = vcombine.low %v808_v63, %v816_v0 }
 0x1f4   : > { %3927 = vmatpush1.bf16.msra.mxu0 %v6857_v13  ;;  %v544_v6 = vld [vmem:[%s8315_s15 + $0x5f0] sm:$0xff] }
 0x1f5   : > { %3928 = vmatprep.subr.bf16.mxu0 %v6842_v15  ;;  %v792_v7 = vld [vmem:[%s8315_s15 + $0xdb0] sm:$0xff]  ;;  %v6986_v11 = vcombine.high %v536_v5, %v544_v6  ;;  %v6985_v18 = vcombine.low %v536_v5, %v544_v6  ;;  %v337_v5 = vld [vmem:[#allocation2 + $0x48] sm:$0xff] }
 0x1f6   : > { %3968 = vmatpush1.bf16.msra.mxu1 %v7113_v14  ;;  %v800_v8 = vld [vmem:[%s8315_s15 + $0xdf0] sm:$0xff] }
 0x1f7   : > { %3969 = vmatprep.subr.bf16.mxu1 %v7098_v16  ;;  %v7242_v12 = vcombine.high %v792_v7, %v800_v8  ;;  %v520_v13 = vld [vmem:[%s8315_s15 + $0x530] sm:$0xff]  ;;  %v7241_v19 = vcombine.low %v792_v7, %v800_v8  ;;  %v425_v8 = vld [vmem:[%s8315_s15 + $0x238] sm:$0xff] }
 0x1f8   : > { %3929 = vmatpush1.bf16.msra.mxu0 %v6841_v23  ;;  %v528_v14 = vld [vmem:[%s8315_s15 + $0x570] sm:$0xff] }
 0x1f9   : > { %3930 = vmatprep.subr.bf16.mxu0 %v6826_v25  ;;  %v776_v15 = vld [vmem:[%s8315_s15 + $0xd30] sm:$0xff]  ;;  %v6970_v21 = vcombine.high %v520_v13, %v528_v14  ;;  %v6969_v27 = vcombine.low %v520_v13, %v528_v14  ;;  %v681_v13 = vld [vmem:[%s8315_s15 + $0xa38] sm:$0xff] }
 0x1fa   : > { %3970 = vmatpush1.bf16.msra.mxu1 %v7097_v24  ;;  %v784_v16 = vld [vmem:[%s8315_s15 + $0xd70] sm:$0xff]  ;;  %v689_v14 = vld [vmem:[%s8315_s15 + $0xa78] sm:$0xff] }
 0x1fb   : > { %3971 = vmatprep.subr.bf16.mxu1 %v7082_v26  ;;  %v7226_v22 = vcombine.high %v776_v15, %v784_v16  ;;  %v504_v23 = vld [vmem:[%s8315_s15 + $0x4b0] sm:$0xff]  ;;  %v7225_v28 = vcombine.low %v776_v15, %v784_v16 }
 0x1fc   : > { %3931 = vmatpush1.bf16.msra.mxu0 %v6825_v31  ;;  %v512_v24 = vld [vmem:[%s8315_s15 + $0x4f0] sm:$0xff] }
 0x1fd   : > { %3932 = vmatprep.subr.bf16.mxu0 %v6810_v33  ;;  %v760_v25 = vld [vmem:[%s8315_s15 + $0xcb0] sm:$0xff]  ;;  %v6954_v29 = vcombine.high %v504_v23, %v512_v24  ;;  %v6953_v35 = vcombine.low %v504_v23, %v512_v24  ;;  %v7132_v23 = vcombine.high %v681_v13, %v689_v14  ;;  %v409_v24 = vld [vmem:[%s8315_s15 + $0x1b8] sm:$0xff] }
 0x1fe   : > { %3972 = vmatpush1.bf16.msra.mxu1 %v7081_v32  ;;  %v768_v26 = vld [vmem:[%s8315_s15 + $0xcf0] sm:$0xff] }
 0x1ff   : > { %3973 = vmatprep.subr.bf16.mxu1 %v7066_v34  ;;  %v7210_v30 = vcombine.high %v760_v25, %v768_v26  ;;  %v488_v31 = vld [vmem:[%s8315_s15 + $0x430] sm:$0xff]  ;;  %v7209_v36 = vcombine.low %v760_v25, %v768_v26  ;;  %v665_v25 = vld [vmem:[%s8315_s15 + $0x9b8] sm:$0xff] }
 0x200   : > { %3933 = vmatpush1.bf16.msra.mxu0 %v6809_v39  ;;  %v496_v32 = vld [vmem:[%s8315_s15 + $0x470] sm:$0xff]  ;;  %v473_v39 = vld [vmem:[%s8315_s15 + $0x3b8] sm:$0xff] }
 0x201   : > { %3934 = vmatprep.subr.bf16.mxu0 %v7050_v41  ;;  %v744_v33 = vld [vmem:[%s8315_s15 + $0xc30] sm:$0xff]  ;;  %v6938_v37 = vcombine.high %v488_v31, %v496_v32  ;;  %v729_v41 = vld [vmem:[%s8315_s15 + $0xbb8] sm:$0xff]  ;;  %v6937_v43 = vcombine.low %v488_v31, %v496_v32 }
 0x202   : > { %3974 = vmatpush1.bf16.msra.mxu1 %v7065_v40  ;;  %v752_v34 = vld [vmem:[%s8315_s15 + $0xc70] sm:$0xff]  ;;  %v481_v40 = vld [vmem:[%s8315_s15 + $0x3f8] sm:$0xff] }
 0x203   : > { %3975 = vmatprep.subr.bf16.mxu1 %v7306_v42  ;;  %v7194_v38 = vcombine.high %v744_v33, %v752_v34  ;;  %v737_v42 = vld [vmem:[%s8315_s15 + $0xbf8] sm:$0xff]  ;;  %v7193_v44 = vcombine.low %v744_v33, %v752_v34  ;;  %v6924_v45 = vcombine.high %v473_v39, %v481_v40  ;;  %v6923_v51 = vcombine.low %v473_v39, %v481_v40 }
 0x204   : > { %3935 = vmatpush2.bf16.msra.mxu0 %v7049_v47  ;;  %v7180_v46 = vcombine.high %v729_v41, %v737_v42  ;;  %v457_v47 = vld [vmem:[%s8315_s15 + $0x338] sm:$0xff]  ;;  %v7179_v52 = vcombine.low %v729_v41, %v737_v42 }
 0x205   : > { %3936 = vmatprep.subr.bf16.mxu0 %v7034_v49  ;;  %v713_v49 = vld [vmem:[%s8315_s15 + $0xb38] sm:$0xff] }
 0x206   : > { %3976 = vmatpush2.bf16.msra.mxu1 %v7305_v48  ;;  %v465_v48 = vld [vmem:[%s8315_s15 + $0x378] sm:$0xff] }
 0x207   : > { %3977 = vmatprep.subr.bf16.mxu1 %v7290_v50  ;;  %v721_v50 = vld [vmem:[%s8315_s15 + $0xb78] sm:$0xff]  ;;  %v6908_v53 = vcombine.high %v457_v47, %v465_v48  ;;  %v6907_v0 = vcombine.low %v457_v47, %v465_v48 }
 0x208   : > { %3937 = vmatpush2.bf16.msra.mxu0 %v7033_v55  ;;  %v7164_v54 = vcombine.high %v713_v49, %v721_v50  ;;  %v441_v55 = vld [vmem:[%s8315_s15 + $0x2b8] sm:$0xff] }
 0x209   : > { %3938 = vmatprep.subr.bf16.mxu0 %v7018_v57  ;;  %v673_v26 = vld [vmem:[%s8315_s15 + $0x9f8] sm:$0xff] }
 0x20a   : > { %3978 = vmatpush2.bf16.msra.mxu1 %v7289_v56  ;;  %v449_v56 = vld [vmem:[%s8315_s15 + $0x2f8] sm:$0xff] }
 0x20b   : > { %3979 = vmatprep.subr.bf16.mxu1 %v7274_v58  ;;  %v697_v58 = vld [vmem:[%s8315_s15 + $0xab8] sm:$0xff]  ;;  %v6891_v16 = vcombine.low %v441_v55, %v449_v56 }
 0x20c   : > { %3939 = vmatpush2.bf16.msra.mxu0 %v7017_v1  ;;  %v7148_v7 = vcombine.high %v697_v58, %v705_v61  ;;  %v393_v31 = vld [vmem:[%s8315_s15 + $0x138] sm:$0xff] }
 0x20d   : > { %3940 = vmatprep.subr.bf16.mxu0 %v7002_v3  ;;  %v7163_v3 = vcombine.low %v713_v49, %v721_v50  ;;  %v401_v32 = vld [vmem:[%s8315_s15 + $0x178] sm:$0xff] }
 0x20e   : > { %3980 = vmatpush2.bf16.msra.mxu1 %v7273_v2  ;;  %v649_v33 = vld [vmem:[%s8315_s15 + $0x938] sm:$0xff] }
 0x20f   : > { %3981 = vmatprep.subr.bf16.mxu1 %v7258_v4  ;;  %v6892_v4 = vcombine.high %v441_v55, %v449_v56  ;;  %v657_v34 = vld [vmem:[%s8315_s15 + $0x978] sm:$0xff] }
 0x210   : > { %3941 = vmatpush2.bf16.msra.mxu0 %v7001_v9  ;;  %v433_v9 = vld [vmem:[%s8315_s15 + $0x278] sm:$0xff] }
 0x211   : > { %3942 = vmatprep.subr.bf16.mxu0 %v6986_v11  ;;  %v377_v39 = vld [vmem:[%s8315_s15 + $0xb8] sm:$0xff] }
 0x212   : > { %3982 = vmatpush2.bf16.msra.mxu1 %v7257_v10  ;;  %v385_v40 = vld [vmem:[%s8315_s15 + $0xf8] sm:$0xff] }
 0x213   : > { %3983 = vmatprep.subr.bf16.mxu1 %v7242_v12  ;;  %v633_v41 = vld [vmem:[%s8315_s15 + $0x8b8] sm:$0xff] }
 0x214   : > { %3943 = vmatpush2.bf16.msra.mxu0 %v6985_v18  ;;  %v641_v42 = vld [vmem:[%s8315_s15 + $0x8f8] sm:$0xff] }
 0x215   : > { %3944 = vmatprep.subr.bf16.mxu0 %v6970_v21  ;;  %v6876_v21 = vcombine.high %v425_v8, %v433_v9  ;;  %v361_v47 = vld [vmem:[%s8315_s15 + $0x38] sm:$0xff] }
 0x216   : > { %3984 = vmatpush2.bf16.msra.mxu1 %v7241_v19  ;;  %v369_v48 = vld [vmem:[%s8315_s15 + $0x78] sm:$0xff] }
 0x217   : > { %3985 = vmatprep.subr.bf16.mxu1 %v7226_v22  ;;  %v617_v49 = vld [vmem:[%s8315_s15 + $0x838] sm:$0xff] }
 0x218   : > { %3945 = vmatpush2.bf16.msra.mxu0 %v6969_v27  ;;  %v6875_v27 = vcombine.low %v425_v8, %v433_v9  ;;  %v625_v50 = vld [vmem:[%s8315_s15 + $0x878] sm:$0xff] }
 0x219   : > { %3946 = vmatprep.subr.bf16.mxu0 %v6954_v29  ;;  %v601_v55 = vld [vmem:[%s8315_s15 + $0x7b8] sm:$0xff] }
 0x21a   : > { %3986 = vmatpush2.bf16.msra.mxu1 %v7225_v28  ;;  %v7131_v28 = vcombine.low %v681_v13, %v689_v14  ;;  %v609_v56 = vld [vmem:[%s8315_s15 + $0x7f8] sm:$0xff] }
 0x21b   : > { %3987 = vmatprep.subr.bf16.mxu1 %v7210_v30  ;;  %v7116_v30 = vcombine.high %v665_v25, %v673_v26  ;;  %v569_v9 = vld [vmem:[%s8315_s15 + $0x6b8] sm:$0xff] }
 0x21c   : > { %3947 = vmatpush2.bf16.msra.mxu0 %v6953_v35 }
 0x21d   : > { %3948 = vmatprep.subr.bf16.mxu0 %v6938_v37  ;;  %v6844_v37 = vcombine.high %v393_v31, %v401_v32 }
 0x21e   : > { %3988 = vmatpush2.bf16.msra.mxu1 %v7209_v36  ;;  %v7115_v36 = vcombine.low %v665_v25, %v673_v26  ;;  %v537_v25 = vld [vmem:[%s8315_s15 + $0x5b8] sm:$0xff] }
 0x21f   : > { %3989 = vmatprep.subr.bf16.mxu1 %v7194_v38  ;;  %v7100_v38 = vcombine.high %v649_v33, %v657_v34  ;;  %v545_v26 = vld [vmem:[%s8315_s15 + $0x5f8] sm:$0xff] }
 0x220   : > { %3949 = vmatpush2.bf16.msra.mxu0 %v6937_v43  ;;  %v6843_v43 = vcombine.low %v393_v31, %v401_v32  ;;  %v6988_v31 = vcombine.high %v537_v25, %v545_v26 }
 0x221   : > { %4000 = vmatprep.subr.bf16.mxu0 %v6924_v45  ;;  %v6828_v45 = vcombine.high %v377_v39, %v385_v40 }
 0x222   : > { %3990 = vmatpush2.bf16.msra.mxu1 %v7193_v44  ;;  %v7099_v44 = vcombine.low %v649_v33, %v657_v34  ;;  %v521_v33 = vld [vmem:[%s8315_s15 + $0x538] sm:$0xff] }
 0x223   : > { %4041 = vmatprep.subr.bf16.mxu1 %v7180_v46  ;;  %v3706_v57 = vpop.f32.mrf.mxu0  ;;  %3951 = vmatmul.mubr.bf16.vlgmr.msra.gmra.mxu0 %v8413_v17  ;;  %v7084_v46 = vcombine.high %v633_v41, %v641_v42  ;;  %v529_v34 = vld [vmem:[%s8315_s15 + $0x578] sm:$0xff] }
 0x224   : > { %4001 = vmatpush1.bf16.msra.mxu0 %v6923_v51  ;;  %4032 = vmatprep.mubr.bf16.mxu0 %v8365_v59  ;;  %v7147_v59 = vcombine.low %v697_v58, %v705_v61  ;;  %v6827_v51 = vcombine.low %v377_v39, %v385_v40  ;;  %v865_v58 = vld [vmem:[%s8315_s15 + $0xff8] sm:$0xff]  ;;  %v6811_v61 = vcombine.low %v361_v47, %v369_v48 }
 0x225   : > { %v3747_v63 = vpop.f32.mrf.mxu1  ;;  %3992 = vmatmul.mubr.bf16.vlgmr.msra.gmra.mxu1 %v8417_v20  ;;  %v3708_v2 = vpop.f32.mrf.mxu0  ;;  %4002 = vmatprep.subr.bf16.mxu0 %v6908_v53  ;;  %v6812_v53 = vcombine.high %v361_v47, %v369_v48  ;;  %v6972_v39 = vcombine.high %v521_v33, %v529_v34 }
 0x226   : > { %v3748_v1 = vadd.f32 %v3747_v63, %v3706_v57  ;;  %4042 = vmatpush1.bf16.msra.mxu1 %v7179_v52  ;;  %4073 = vmatprep.mubr.bf16.mxu1 %v8367_v60  ;;  %v417_v60 = vld [vmem:[%s8315_s15 + $0x1f8] sm:$0xff]  ;;  %v7083_v52 = vcombine.low %v633_v41, %v641_v42  ;;  %v7052_v63 = vcombine.high %v601_v55, %v609_v56 }
 0x227   : > { %v3749_v6 = vpop.f32.mrf.mxu1  ;;  %4043 = vmatprep.subr.bf16.mxu1 %v7164_v54  ;;  %v3710_v12 = vpop.f32.mrf.mxu0  ;;  %v6860_v29 = vcombine.high %v409_v24, %v417_v60  ;;  %v6859_v35 = vcombine.low %v409_v24, %v417_v60  ;;  %v7068_v54 = vcombine.high %v617_v49, %v625_v50  ;;  %v857_v57 = vld [vmem:[%s8315_s15 + $0xfb8] sm:$0xff] }
 0x228   : > { %v4088_v10 = vadd.f32 %v3748_v1, %v336_v62  ;;  %v3750_v11 = vadd.f32 %v3749_v6, %v3708_v2  ;;  %4003 = vmatpush1.bf16.msra.mxu0 %v6907_v0  ;;  %v7067_v62 = vcombine.low %v617_v49, %v625_v50  ;;  %v7308_v0 = vcombine.high %v857_v57, %v865_v58  ;;  %v585_v1 = vld [vmem:[%s8315_s15 + $0x738] sm:$0xff] }
 0x229   : > { %v3751_v15 = vpop.f32.mrf.mxu1  ;;  %v3711_v19 = vpop.f32.mrf.mxu0  ;;  %4004 = vmatprep.subr.bf16.mxu0 %v6892_v4  ;;  %v593_v2 = vld [vmem:[%s8315_s15 + $0x778] sm:$0xff]  ;;  %v7307_v6 = vcombine.low %v857_v57, %v865_v58 }
 0x22a   : > { %4104 = vst [vmem:[#allocation2 + $0x8] sm:$0xff] %v4088_v10  ;;  %v4089_v18 = vadd.f32 %v3750_v11, %v337_v5  ;;  %4044 = vmatpush1.bf16.msra.mxu1 %v7163_v3  ;;  %v841_v3 = vld [vmem:[%s8315_s15 + $0xf38] sm:$0xff]  ;;  %v7051_v5 = vcombine.low %v601_v55, %v609_v56  ;;  %v7035_v13 = vcombine.low %v585_v1, %v593_v2 }
 0x22b   : > { %v3752_v22 = vpop.f32.mrf.mxu1  ;;  %4045 = vmatprep.subr.bf16.mxu1 %v7148_v7  ;;  %v849_v4 = vld [vmem:[%s8315_s15 + $0xf78] sm:$0xff]  ;;  %v7036_v7 = vcombine.high %v585_v1, %v593_v2  ;;  %v339_v2 = vld [vmem:[#allocation2 + $0x20] sm:$0xff] }
 0x22c   : > { %4105 = vst [vmem:[#allocation2 + $0x48] sm:$0xff] %v4089_v18  ;;  %4005 = vmatpush1.bf16.msra.mxu0 %v6891_v16  ;;  %v7292_v8 = vcombine.high %v841_v3, %v849_v4  ;;  %v577_v10 = vld [vmem:[%s8315_s15 + $0x6f8] sm:$0xff]  ;;  %v7291_v14 = vcombine.low %v841_v3, %v849_v4 }
 0x22d   : > { %4006 = vmatprep.subr.bf16.mxu0 %v6876_v21  ;;  %v825_v11 = vld [vmem:[%s8315_s15 + $0xeb8] sm:$0xff]  ;;  %v7020_v15 = vcombine.high %v569_v9, %v577_v10  ;;  %v7019_v22 = vcombine.low %v569_v9, %v577_v10 }
 0x22e   : > { %4046 = vmatpush1.bf16.msra.mxu1 %v7147_v59  ;;  %v833_v12 = vld [vmem:[%s8315_s15 + $0xef8] sm:$0xff] }
 0x22f   : > { %4047 = vmatprep.subr.bf16.mxu1 %v7132_v23  ;;  %v7276_v16 = vcombine.high %v825_v11, %v833_v12  ;;  %v553_v18 = vld [vmem:[%s8315_s15 + $0x638] sm:$0xff]  ;;  %v7275_v23 = vcombine.low %v825_v11, %v833_v12  ;;  %v340_v12 = vld [vmem:[#allocation2 + $0x10] sm:$0xff] }
 0x230   : > { %4007 = vmatpush1.bf16.msra.mxu0 %v6875_v27  ;;  %v561_v19 = vld [vmem:[%s8315_s15 + $0x678] sm:$0xff] }
 0x231   : > { %4008 = vmatprep.subr.bf16.mxu0 %v6860_v29  ;;  %v809_v59 = vld [vmem:[%s8315_s15 + $0xe38] sm:$0xff]  ;;  %v7004_v24 = vcombine.high %v553_v18, %v561_v19  ;;  %v7003_v29 = vcombine.low %v553_v18, %v561_v19 }
 0x232   : > { %4048 = vmatpush1.bf16.msra.mxu1 %v7131_v28  ;;  %v817_v21 = vld [vmem:[%s8315_s15 + $0xe78] sm:$0xff] }
 0x233   : > { %4049 = vmatprep.subr.bf16.mxu1 %v7116_v30  ;;  %v7260_v60 = vcombine.high %v809_v59, %v817_v21  ;;  %v793_v27 = vld [vmem:[%s8315_s15 + $0xdb8] sm:$0xff]  ;;  %v7259_v30 = vcombine.low %v809_v59, %v817_v21 }
 0x234   : > { %4009 = vmatpush1.bf16.msra.mxu0 %v6859_v35  ;;  %v801_v28 = vld [vmem:[%s8315_s15 + $0xdf8] sm:$0xff] }
 0x235   : > { %4010 = vmatprep.subr.bf16.mxu0 %v6844_v37  ;;  %v7244_v32 = vcombine.high %v793_v27, %v801_v28  ;;  %v777_v35 = vld [vmem:[%s8315_s15 + $0xd38] sm:$0xff]  ;;  %v6987_v37 = vcombine.low %v537_v25, %v545_v26 }
 0x236   : > { %4050 = vmatpush1.bf16.msra.mxu1 %v7115_v36  ;;  %v785_v36 = vld [vmem:[%s8315_s15 + $0xd78] sm:$0xff] }
 0x237   : > { %4051 = vmatprep.subr.bf16.mxu1 %v7100_v38  ;;  %v7243_v38 = vcombine.low %v793_v27, %v801_v28  ;;  %v7228_v40 = vcombine.high %v777_v35, %v785_v36  ;;  %v505_v41 = vld [vmem:[%s8315_s15 + $0x4b8] sm:$0xff]  ;;  %v343_v28 = vld [vmem:[#allocation2 + $0x70] sm:$0xff] }
 0x238   : > { %4011 = vmatpush1.bf16.msra.mxu0 %v6843_v43  ;;  %v513_v42 = vld [vmem:[%s8315_s15 + $0x4f8] sm:$0xff] }
 0x239   : > { %4012 = vmatprep.subr.bf16.mxu0 %v6828_v45  ;;  %v761_v43 = vld [vmem:[%s8315_s15 + $0xcb8] sm:$0xff]  ;;  %v6971_v45 = vcombine.low %v521_v33, %v529_v34  ;;  %v6956_v47 = vcombine.high %v505_v41, %v513_v42 }
 0x23a   : > { %4052 = vmatpush1.bf16.msra.mxu1 %v7099_v44  ;;  %v769_v44 = vld [vmem:[%s8315_s15 + $0xcf8] sm:$0xff] }
 0x23b   : > { %4053 = vmatprep.subr.bf16.mxu1 %v7084_v46  ;;  %v7227_v46 = vcombine.low %v777_v35, %v785_v36  ;;  %v7212_v48 = vcombine.high %v761_v43, %v769_v44  ;;  %v489_v49 = vld [vmem:[%s8315_s15 + $0x438] sm:$0xff] }
 0x23c   : > { %4013 = vmatpush1.bf16.msra.mxu0 %v6827_v51  ;;  %v497_v50 = vld [vmem:[%s8315_s15 + $0x478] sm:$0xff] }
 0x23d   : > { %4014 = vmatprep.subr.bf16.mxu0 %v6812_v53  ;;  %v745_v51 = vld [vmem:[%s8315_s15 + $0xc38] sm:$0xff]  ;;  %v6955_v53 = vcombine.low %v505_v41, %v513_v42  ;;  %v6940_v55 = vcombine.high %v489_v49, %v497_v50  ;;  %v6939_v57 = vcombine.low %v489_v49, %v497_v50  ;;  %v345_v42 = vld [vmem:[#allocation2 + $0x28] sm:$0xff] }
 0x23e   : > { %4054 = vmatpush1.bf16.msra.mxu1 %v7083_v52  ;;  %v753_v52 = vld [vmem:[%s8315_s15 + $0xc78] sm:$0xff] }
 0x23f   : > { %4055 = vmatprep.subr.bf16.mxu1 %v7068_v54  ;;  %v7211_v54 = vcombine.low %v761_v43, %v769_v44  ;;  %v7196_v56 = vcombine.high %v745_v51, %v753_v52  ;;  %v7195_v58 = vcombine.low %v745_v51, %v753_v52 }
 0x240   : > { %4015 = vmatpush1.bf16.msra.mxu0 %v6811_v61 }
 0x241   : > { %4016 = vmatprep.subr.bf16.mxu0 %v7052_v63 }
 0x242   : > { %4056 = vmatpush1.bf16.msra.mxu1 %v7067_v62  ;;  %v338_v62 = vld [vmem:[#allocation2 + $0x40] sm:$0xff] }
 0x243   : > { %4057 = vmatprep.subr.bf16.mxu1 %v7308_v0 }
 0x244   : > { %4017 = vmatpush2.bf16.msra.mxu0 %v7051_v5 }
 0x245   : > { %4018 = vmatprep.subr.bf16.mxu0 %v7036_v7 }
 0x246   : > { %4058 = vmatpush2.bf16.msra.mxu1 %v7307_v6 }
 0x247   : > { %4059 = vmatprep.subr.bf16.mxu1 %v7292_v8 }
 0x248   : > { %4019 = vmatpush2.bf16.msra.mxu0 %v7035_v13 }
 0x249   : > { %4020 = vmatprep.subr.bf16.mxu0 %v7020_v15  ;;  %v341_v15 = vld [vmem:[#allocation2 + $0x38] sm:$0xff] }
 0x24a   : > { %4060 = vmatpush2.bf16.msra.mxu1 %v7291_v14 }
 0x24b   : > { %4061 = vmatprep.subr.bf16.mxu1 %v7276_v16 }
 0x24c   : > { %4021 = vmatpush2.bf16.msra.mxu0 %v7019_v22 }
 0x24d   : > { %4022 = vmatprep.subr.bf16.mxu0 %v7004_v24 }
 0x24e   : > { %4062 = vmatpush2.bf16.msra.mxu1 %v7275_v23 }
 0x24f   : > { %4063 = vmatprep.subr.bf16.mxu1 %v7260_v60  ;;  %v342_v60 = vld [vmem:[#allocation2 + $0x60] sm:$0xff] }
 0x250   : > { %4023 = vmatpush2.bf16.msra.mxu0 %v7003_v29 }
 0x251   : > { %4024 = vmatprep.subr.bf16.mxu0 %v6988_v31 }
 0x252   : > { %4064 = vmatpush2.bf16.msra.mxu1 %v7259_v30 }
 0x253   : > { %4065 = vmatprep.subr.bf16.mxu1 %v7244_v32 }
 0x254   : > { %4025 = vmatpush2.bf16.msra.mxu0 %v6987_v37 }
 0x255   : > { %4026 = vmatprep.subr.bf16.mxu0 %v6972_v39 }
 0x256   : > { %4066 = vmatpush2.bf16.msra.mxu1 %v7243_v38  ;;  %v344_v38 = vld [vmem:[#allocation2 + $0x78] sm:$0xff] }
 0x257   : > { %4067 = vmatprep.subr.bf16.mxu1 %v7228_v40 }
 0x258   : > { %4027 = vmatpush2.bf16.msra.mxu0 %v6971_v45 }
 0x259   : > { %4028 = vmatprep.subr.bf16.mxu0 %v6956_v47 }
 0x25a   : > { %4068 = vmatpush2.bf16.msra.mxu1 %v7227_v46 }
 0x25b   : > { %4069 = vmatprep.subr.bf16.mxu1 %v7212_v48 }
 0x25c   : > { %4029 = vmatpush2.bf16.msra.mxu0 %v6955_v53 }
 0x25d   : > { %4030 = vmatprep.subr.bf16.mxu0 %v6940_v55 }
 0x25e   : > { %4070 = vmatpush2.bf16.msra.mxu1 %v7211_v54 }
 0x25f   : > { %4071 = vmatprep.subr.bf16.mxu1 %v7196_v56 }
 0x260   : > { %4031 = vmatpush2.bf16.msra.mxu0 %v6939_v57 }
 0x262   : > { %4072 = vmatpush2.bf16.msra.mxu1 %v7195_v58 }
 0x263   : > { %v3788_v61 = vpop.f32.mrf.mxu0  ;;  %4033 = vmatmul.mubr.bf16.vlgmr.msra.gmra.mxu0 %v8413_v17 }
 0x265   : > { %v3829_v63 = vpop.f32.mrf.mxu1  ;;  %4074 = vmatmul.mubr.bf16.vlgmr.msra.gmra.mxu1 %v8417_v20  ;;  %v3790_v1 = vpop.f32.mrf.mxu0 }
 0x266   : > { %v3830_v0 = vadd.f32 %v3829_v63, %v3788_v61 }
 0x267   : > { %v3831_v3 = vpop.f32.mrf.mxu1  ;;  %v3792_v6 = vpop.f32.mrf.mxu0 }
 0x268   : > { %v4090_v4 = vadd.f32 %v3830_v0, %v338_v62  ;;  %v3832_v5 = vadd.f32 %v3831_v3, %v3790_v1 }
 0x269   : > { %v3833_v7 = vpop.f32.mrf.mxu1  ;;  %v3793_v9 = vpop.f32.mrf.mxu0 }
 0x26a   : > { %4106 = vst [vmem:[#allocation2 + $0x40] sm:$0xff] %v4090_v4  ;;  %v4091_v8 = vadd.f32 %v3832_v5, %v339_v2 }
 0x26b   : > { %v3834_v10 = vpop.f32.mrf.mxu1 }
 0x26c   : > { %4107 = vst [vmem:[#allocation2 + $0x20] sm:$0xff] %v4091_v8 }
 0x2a3   : > { %v3870_v11 = vpop.f32.mrf.mxu0 }
 0x2a5   : > { %v3911_v17 = vpop.f32.mrf.mxu1  ;;  %v3872_v14 = vpop.f32.mrf.mxu0 }
 0x2a6   : > { %v3912_v13 = vadd.f32 %v3911_v17, %v3870_v11 }
 0x2a7   : > { %v3913_v20 = vpop.f32.mrf.mxu1  ;;  %v3874_v19 = vpop.f32.mrf.mxu0 }
 0x2a8   : > { %v4092_v16 = vadd.f32 %v3912_v13, %v340_v12  ;;  %v3914_v18 = vadd.f32 %v3913_v20, %v3872_v14 }
 0x2a9   : > { %v3915_v59 = vpop.f32.mrf.mxu1  ;;  %v3875_v22 = vpop.f32.mrf.mxu0 }
 0x2aa   : > { %4108 = vst [vmem:[#allocation2 + $0x10] sm:$0xff] %v4092_v16  ;;  %v4093_v21 = vadd.f32 %v3914_v18, %v341_v15 }
 0x2ab   : > { %v3916_v23 = vpop.f32.mrf.mxu1 }
 0x2ac   : > { %4109 = vst [vmem:[#allocation2 + $0x38] sm:$0xff] %v4093_v21 }
 0x2e3   : > { %v3952_v24 = vpop.f32.mrf.mxu0 }
 0x2e5   : > { %v3993_v25 = vpop.f32.mrf.mxu1  ;;  %v3954_v27 = vpop.f32.mrf.mxu0 }
 0x2e6   : > { %v3994_v26 = vadd.f32 %v3993_v25, %v3952_v24 }
 0x2e7   : > { %v3995_v29 = vpop.f32.mrf.mxu1  ;;  %v3956_v32 = vpop.f32.mrf.mxu0 }
 0x2e8   : > { %v4094_v30 = vadd.f32 %v3994_v26, %v342_v60  ;;  %v3996_v31 = vadd.f32 %v3995_v29, %v3954_v27 }
 0x2e9   : > { %v3997_v33 = vpop.f32.mrf.mxu1  ;;  %v3957_v35 = vpop.f32.mrf.mxu0 }
 0x2ea   : > { %4110 = vst [vmem:[#allocation2 + $0x60] sm:$0xff] %v4094_v30  ;;  %v4095_v34 = vadd.f32 %v3996_v31, %v343_v28 }
 0x2eb   : > { %v3998_v36 = vpop.f32.mrf.mxu1 }
 0x2ec   : > { %4111 = vst [vmem:[#allocation2 + $0x70] sm:$0xff] %v4095_v34 }
 0x323   : > { %v4034_v37 = vpop.f32.mrf.mxu0 }
 0x325   : > { %v4075_v39 = vpop.f32.mrf.mxu1  ;;  %v4036_v41 = vpop.f32.mrf.mxu0 }
 0x326   : > { %v4076_v40 = vadd.f32 %v4075_v39, %v4034_v37 }
 0x327   : > { %v4077_v43 = vpop.f32.mrf.mxu1  ;;  %v4038_v46 = vpop.f32.mrf.mxu0 }
 0x328   : > { %v4096_v44 = vadd.f32 %v4076_v40, %v344_v38  ;;  %v4078_v45 = vadd.f32 %v4077_v43, %v4036_v41  ;;  %4117 = sbr.rel (%p7309_p12) target bundleno = 1686 (0x696), region = 64 }
 0x329   : > { %v4079_v47 = vpop.f32.mrf.mxu1  ;;  %v4039_v49 = vpop.f32.mrf.mxu0 }
 0x32a   : > { %4112 = vst [vmem:[#allocation2 + $0x78] sm:$0xff] %v4096_v44  ;;  %v4097_v48 = vadd.f32 %v4078_v45, %v345_v42 }
 0x32b   : > { %v4080_v50 = vpop.f32.mrf.mxu1 }
 0x32c   : > { %4113 = vst [vmem:[#allocation2 + $0x28] sm:$0xff] %v4097_v48 }
 0x32d   : > { %v4165_v51 = vld [vmem:[#allocation5 + $0xf8] sm:$0xff]  ;;  %v4164_v55 = vld [vmem:[#allocation5 + $0xf0] sm:$0xff]  ;;  %v4163_v61 = vld [vmem:[#allocation5 + $0xe8] sm:$0xff] }
 0x32e   : > { %v4197_v52 = vld [vmem:[#allocation5 + $0x1f8] sm:$0xff]  ;;  %7331 = vmatprep.subr.mxu0 %v4165_v51  ;;  %v4196_v56 = vld [vmem:[#allocation5 + $0x1f0] sm:$0xff]  ;;  %v4195_v62 = vld [vmem:[#allocation5 + $0x1e8] sm:$0xff] }
 0x32f   : > { %v4149_v53 = vld [vmem:[#allocation5 + $0x78] sm:$0xff]  ;;  %7366 = vmatprep.subr.mxu1 %v4197_v52  ;;  %v4148_v57 = vld [vmem:[#allocation5 + $0x70] sm:$0xff]  ;;  %v4147_v63 = vld [vmem:[#allocation5 + $0x68] sm:$0xff] }
 0x330   : > { %v4181_v54 = vld [vmem:[#allocation5 + $0x178] sm:$0xff]  ;;  %7332 = vmatpush3.msra.mxu0 %v4149_v53  ;;  %v4180_v58 = vld [vmem:[#allocation5 + $0x170] sm:$0xff]  ;;  %v4179_v0 = vld [vmem:[#allocation5 + $0x168] sm:$0xff] }
 0x331   : > { %7367 = vmatpush3.msra.mxu1 %v4181_v54  ;;  %7333 = vmatprep.subr.mxu0 %v4164_v55  ;;  %v4162_v1 = vld [vmem:[#allocation5 + $0xe0] sm:$0xff]  ;;  %v4161_v5 = vld [vmem:[#allocation5 + $0xd8] sm:$0xff]  ;;  %v4160_v9 = vld [vmem:[#allocation5 + $0xd0] sm:$0xff] }
 0x332   : > { %7368 = vmatprep.subr.mxu1 %v4196_v56  ;;  %7334 = vmatpush3.msra.mxu0 %v4148_v57  ;;  %v4194_v2 = vld [vmem:[#allocation5 + $0x1e0] sm:$0xff]  ;;  %v4193_v6 = vld [vmem:[#allocation5 + $0x1d8] sm:$0xff]  ;;  %v4192_v10 = vld [vmem:[#allocation5 + $0x1d0] sm:$0xff] }
 0x333   : > { %7369 = vmatpush3.msra.mxu1 %v4180_v58  ;;  %7335 = vmatprep.subr.mxu0 %v4163_v61  ;;  %v4146_v3 = vld [vmem:[#allocation5 + $0x60] sm:$0xff]  ;;  %v4145_v7 = vld [vmem:[#allocation5 + $0x58] sm:$0xff]  ;;  %v4144_v11 = vld [vmem:[#allocation5 + $0x50] sm:$0xff] }
 0x334   : > { %7370 = vmatprep.subr.mxu1 %v4195_v62  ;;  %v4178_v4 = vld [vmem:[#allocation5 + $0x160] sm:$0xff]  ;;  %7336 = vmatpush3.msra.mxu0 %v4147_v63  ;;  %v4177_v8 = vld [vmem:[#allocation5 + $0x158] sm:$0xff]  ;;  %v4176_v12 = vld [vmem:[#allocation5 + $0x150] sm:$0xff] }
 0x335   : > { %7371 = vmatpush3.msra.mxu1 %v4179_v0  ;;  %7337 = vmatprep.subr.mxu0 %v4162_v1  ;;  %v4159_v17 = vld [vmem:[#allocation5 + $0xc8] sm:$0xff]  ;;  %v4158_v20 = vld [vmem:[#allocation5 + $0xc0] sm:$0xff]  ;;  %v4157_v59 = vld [vmem:[#allocation5 + $0xb8] sm:$0xff] }
 0x336   : > { %7372 = vmatprep.subr.mxu1 %v4194_v2  ;;  %7338 = vmatpush3.msra.mxu0 %v4146_v3  ;;  %v4191_v13 = vld [vmem:[#allocation5 + $0x1c8] sm:$0xff]  ;;  %v4190_v16 = vld [vmem:[#allocation5 + $0x1c0] sm:$0xff]  ;;  %v4189_v21 = vld [vmem:[#allocation5 + $0x1b8] sm:$0xff] }
 0x337   : > { %7373 = vmatpush3.msra.mxu1 %v4178_v4  ;;  %7339 = vmatprep.subr.mxu0 %v4161_v5  ;;  %v4143_v14 = vld [vmem:[#allocation5 + $0x48] sm:$0xff]  ;;  %v4142_v18 = vld [vmem:[#allocation5 + $0x40] sm:$0xff]  ;;  %v4141_v22 = vld [vmem:[#allocation5 + $0x38] sm:$0xff] }
 0x338   : > { %7374 = vmatprep.subr.mxu1 %v4193_v6  ;;  %7340 = vmatpush3.msra.mxu0 %v4145_v7  ;;  %v4175_v15 = vld [vmem:[#allocation5 + $0x148] sm:$0xff]  ;;  %v4174_v19 = vld [vmem:[#allocation5 + $0x140] sm:$0xff]  ;;  %v4173_v23 = vld [vmem:[#allocation5 + $0x138] sm:$0xff] }
 0x339   : > { %7375 = vmatpush3.msra.mxu1 %v4177_v8  ;;  %7341 = vmatprep.subr.mxu0 %v4160_v9  ;;  %v4156_v24 = vld [vmem:[#allocation5 + $0xb0] sm:$0xff]  ;;  %v4155_v27 = vld [vmem:[#allocation5 + $0xa8] sm:$0xff]  ;;  %v4154_v31 = vld [vmem:[#allocation5 + $0xa0] sm:$0xff] }
 0x33a   : > { %7376 = vmatprep.subr.mxu1 %v4192_v10  ;;  %7342 = vmatpush3.msra.mxu0 %v4144_v11  ;;  %v4188_v60 = vld [vmem:[#allocation5 + $0x1b0] sm:$0xff]  ;;  %v4187_v28 = vld [vmem:[#allocation5 + $0x1a8] sm:$0xff]  ;;  %v4186_v32 = vld [vmem:[#allocation5 + $0x1a0] sm:$0xff] }
 0x33b   : > { %7377 = vmatpush3.msra.mxu1 %v4176_v12  ;;  %7343 = vmatprep.subr.mxu0 %v4159_v17  ;;  %v4140_v25 = vld [vmem:[#allocation5 + $0x30] sm:$0xff]  ;;  %v4139_v29 = vld [vmem:[#allocation5 + $0x28] sm:$0xff]  ;;  %v4138_v33 = vld [vmem:[#allocation5 + $0x20] sm:$0xff] }
 0x33c   : > { %7378 = vmatprep.subr.mxu1 %v4191_v13  ;;  %7344 = vmatpush3.msra.mxu0 %v4143_v14  ;;  %v4172_v26 = vld [vmem:[#allocation5 + $0x130] sm:$0xff]  ;;  %v4171_v30 = vld [vmem:[#allocation5 + $0x128] sm:$0xff]  ;;  %v4170_v34 = vld [vmem:[#allocation5 + $0x120] sm:$0xff] }
 0x33d   : > { %7379 = vmatpush3.msra.mxu1 %v4175_v15  ;;  %7345 = vmatprep.subr.mxu0 %v4158_v20  ;;  %v4153_v35 = vld [vmem:[#allocation5 + $0x98] sm:$0xff]  ;;  %v4152_v39 = vld [vmem:[#allocation5 + $0x90] sm:$0xff]  ;;  %v4151_v43 = vld [vmem:[#allocation5 + $0x88] sm:$0xff] }
 0x33e   : > { %7380 = vmatprep.subr.mxu1 %v4190_v16  ;;  %7346 = vmatpush3.msra.mxu0 %v4142_v18  ;;  %v4185_v36 = vld [vmem:[#allocation5 + $0x198] sm:$0xff]  ;;  %v4184_v40 = vld [vmem:[#allocation5 + $0x190] sm:$0xff]  ;;  %v4183_v44 = vld [vmem:[#allocation5 + $0x188] sm:$0xff] }
 0x33f   : > { %7381 = vmatpush3.msra.mxu1 %v4174_v19  ;;  %7347 = vmatprep.subr.mxu0 %v4157_v59  ;;  %v4137_v37 = vld [vmem:[#allocation5 + $0x18] sm:$0xff]  ;;  %v4136_v41 = vld [vmem:[#allocation5 + $0x10] sm:$0xff]  ;;  %v4135_v45 = vld [vmem:[#allocation5 + $0x8] sm:$0xff] }
 0x340   : > { %7382 = vmatprep.subr.mxu1 %v4189_v21  ;;  %7348 = vmatpush3.msra.mxu0 %v4141_v22  ;;  %v4169_v38 = vld [vmem:[#allocation5 + $0x118] sm:$0xff]  ;;  %v4168_v42 = vld [vmem:[#allocation5 + $0x110] sm:$0xff]  ;;  %v4167_v46 = vld [vmem:[#allocation5 + $0x108] sm:$0xff] }
 0x341   : > { %7383 = vmatpush3.msra.mxu1 %v4173_v23  ;;  %7349 = vmatprep.subr.mxu0 %v4156_v24  ;;  %v4150_v47 = vld [vmem:[#allocation5 + $0x80] sm:$0xff]  ;;  %v4121_v52 = vld [vmem:[#allocation2 + $0x18] sm:$0xff]  ;;  %v4118_v53 = vld [vmem:[#allocation2 + $0x30] sm:$0xff] }
 0x342   : > { %7384 = vmatprep.subr.mxu1 %v4188_v60  ;;  %7350 = vmatpush3.msra.mxu0 %v4140_v25  ;;  %v4182_v48 = vld [vmem:[#allocation5 + $0x180] sm:$0xff]  ;;  %v4120_v54 = vld [vmem:[#allocation2 + $0x58] sm:$0xff]  ;;  %v4228_v61 = vld [vmem:[#allocation5 + $0x2f0] sm:$0xff] }
 0x343   : > { %7385 = vmatpush3.msra.mxu1 %v4172_v26  ;;  %7351 = vmatprep.subr.mxu0 %v4155_v27  ;;  %v4134_v49 = vld [vmem:[#allocation5] sm:$0xff]  ;;  %v4229_v55 = vld [vmem:[#allocation5 + $0x2f8] sm:$0xff]  ;;  %v4260_v62 = vld [vmem:[#allocation5 + $0x3f0] sm:$0xff] }
 0x344   : > { %7386 = vmatprep.subr.mxu1 %v4187_v28  ;;  %7352 = vmatpush3.msra.mxu0 %v4139_v29  ;;  %v4119_v50 = vld [vmem:[#allocation2] sm:$0xff]  ;;  %v4261_v56 = vld [vmem:[#allocation5 + $0x3f8] sm:$0xff]  ;;  %v4212_v63 = vld [vmem:[#allocation5 + $0x270] sm:$0xff] }
 0x345   : > { %7387 = vmatpush3.msra.mxu1 %v4171_v30  ;;  %7353 = vmatprep.subr.mxu0 %v4154_v31  ;;  %v4166_v51 = vld [vmem:[#allocation5 + $0x100] sm:$0xff]  ;;  %v4213_v57 = vld [vmem:[#allocation5 + $0x278] sm:$0xff]  ;;  %v4244_v0 = vld [vmem:[#allocation5 + $0x370] sm:$0xff] }
 0x346   : > { %7388 = vmatprep.subr.mxu1 %v4186_v32  ;;  %7354 = vmatpush3.msra.mxu0 %v4138_v33  ;;  %v4245_v58 = vld [vmem:[#allocation5 + $0x378] sm:$0xff]  ;;  %v4227_v1 = vld [vmem:[#allocation5 + $0x2e8] sm:$0xff]  ;;  %v4226_v5 = vld [vmem:[#allocation5 + $0x2e0] sm:$0xff] }
 0x347   : > { %7389 = vmatpush3.msra.mxu1 %v4170_v34  ;;  %7355 = vmatprep.subr.mxu0 %v4153_v35  ;;  %v4259_v2 = vld [vmem:[#allocation5 + $0x3e8] sm:$0xff]  ;;  %v4258_v6 = vld [vmem:[#allocation5 + $0x3e0] sm:$0xff]  ;;  %v4225_v9 = vld [vmem:[#allocation5 + $0x2d8] sm:$0xff] }
 0x348   : > { %7390 = vmatprep.subr.mxu1 %v4185_v36  ;;  %7356 = vmatpush3.msra.mxu0 %v4137_v37  ;;  %v4211_v3 = vld [vmem:[#allocation5 + $0x268] sm:$0xff]  ;;  %v4210_v7 = vld [vmem:[#allocation5 + $0x260] sm:$0xff]  ;;  %v4257_v10 = vld [vmem:[#allocation5 + $0x3d8] sm:$0xff] }
 0x349   : > { %7391 = vmatpush3.msra.mxu1 %v4169_v38  ;;  %7357 = vmatprep.subr.mxu0 %v4152_v39  ;;  %v4243_v4 = vld [vmem:[#allocation5 + $0x368] sm:$0xff]  ;;  %v4242_v8 = vld [vmem:[#allocation5 + $0x360] sm:$0xff]  ;;  %v4209_v11 = vld [vmem:[#allocation5 + $0x258] sm:$0xff] }
 0x34a   : > { %7392 = vmatprep.subr.mxu1 %v4184_v40  ;;  %7358 = vmatpush3.msra.mxu0 %v4136_v41  ;;  %v4241_v12 = vld [vmem:[#allocation5 + $0x358] sm:$0xff]  ;;  %v4224_v17 = vld [vmem:[#allocation5 + $0x2d0] sm:$0xff]  ;;  %v4223_v20 = vld [vmem:[#allocation5 + $0x2c8] sm:$0xff] }
 0x34b   : > { %7393 = vmatpush3.msra.mxu1 %v4168_v42  ;;  %7359 = vmatprep.subr.mxu0 %v4151_v43  ;;  %v4256_v13 = vld [vmem:[#allocation5 + $0x3d0] sm:$0xff]  ;;  %v4255_v16 = vld [vmem:[#allocation5 + $0x3c8] sm:$0xff]  ;;  %v4222_v59 = vld [vmem:[#allocation5 + $0x2c0] sm:$0xff] }
 0x34c   : > { %7394 = vmatprep.subr.mxu1 %v4183_v44  ;;  %7360 = vmatpush3.msra.mxu0 %v4135_v45  ;;  %v4208_v14 = vld [vmem:[#allocation5 + $0x250] sm:$0xff]  ;;  %v4207_v18 = vld [vmem:[#allocation5 + $0x248] sm:$0xff]  ;;  %v4254_v21 = vld [vmem:[#allocation5 + $0x3c0] sm:$0xff] }
 0x34d   : > { %7395 = vmatpush3.msra.mxu1 %v4167_v46  ;;  %7361 = vmatprep.subr.mxu0 %v4150_v47  ;;  %v4240_v15 = vld [vmem:[#allocation5 + $0x350] sm:$0xff]  ;;  %v4239_v19 = vld [vmem:[#allocation5 + $0x348] sm:$0xff]  ;;  %v4206_v22 = vld [vmem:[#allocation5 + $0x240] sm:$0xff] }
 0x34e   : > { %7396 = vmatprep.subr.mxu1 %v4182_v48  ;;  %7362 = vmatpush3.msra.mxu0 %v4134_v49  ;;  %v4238_v23 = vld [vmem:[#allocation5 + $0x340] sm:$0xff]  ;;  %v4221_v24 = vld [vmem:[#allocation5 + $0x2b8] sm:$0xff]  ;;  %v4220_v27 = vld [vmem:[#allocation5 + $0x2b0] sm:$0xff] }
 0x34f   : > { %4454 = vmatprep.mubr.f32.mxu0 %v4119_v50  ;;  %7397 = vmatpush3.msra.mxu1 %v4166_v51  ;;  %v4253_v60 = vld [vmem:[#allocation5 + $0x3b8] sm:$0xff]  ;;  %v4252_v28 = vld [vmem:[#allocation5 + $0x3b0] sm:$0xff]  ;;  %v4219_v31 = vld [vmem:[#allocation5 + $0x2a8] sm:$0xff] }
 0x350   : > { %4524 = vmatprep.mubr.f32.mxu1 %v4121_v52  ;;  %4455 = vmatmul.mubr.f32.vlgmr.msra.gmra.mxu0 %v4118_v53  ;;  %v4205_v25 = vld [vmem:[#allocation5 + $0x238] sm:$0xff]  ;;  %v4204_v29 = vld [vmem:[#allocation5 + $0x230] sm:$0xff]  ;;  %v4251_v32 = vld [vmem:[#allocation5 + $0x3a8] sm:$0xff] }
 0x351   : > { %4525 = vmatmul.mubr.f32.vlgmr.msra.gmra.mxu1 %v4120_v54  ;;  %7401 = vmatprep.subr.mxu0 %v4229_v55  ;;  %v4237_v26 = vld [vmem:[#allocation5 + $0x338] sm:$0xff]  ;;  %v4236_v30 = vld [vmem:[#allocation5 + $0x330] sm:$0xff]  ;;  %v4203_v33 = vld [vmem:[#allocation5 + $0x228] sm:$0xff] }
 0x352   : > { %7436 = vmatprep.subr.mxu1 %v4261_v56  ;;  %7402 = vmatpush3.msra.mxu0 %v4213_v57  ;;  %v4235_v34 = vld [vmem:[#allocation5 + $0x328] sm:$0xff]  ;;  %v4218_v35 = vld [vmem:[#allocation5 + $0x2a0] sm:$0xff]  ;;  %v4217_v39 = vld [vmem:[#allocation5 + $0x298] sm:$0xff] }
 0x353   : > { %7437 = vmatpush3.msra.mxu1 %v4245_v58  ;;  %7403 = vmatprep.subr.mxu0 %v4228_v61  ;;  %v4250_v36 = vld [vmem:[#allocation5 + $0x3a0] sm:$0xff]  ;;  %v4249_v40 = vld [vmem:[#allocation5 + $0x398] sm:$0xff]  ;;  %v4216_v43 = vld [vmem:[#allocation5 + $0x290] sm:$0xff] }
 0x354   : > { %7438 = vmatprep.subr.mxu1 %v4260_v62  ;;  %7404 = vmatpush3.msra.mxu0 %v4212_v63  ;;  %v4202_v37 = vld [vmem:[#allocation5 + $0x220] sm:$0xff]  ;;  %v4201_v41 = vld [vmem:[#allocation5 + $0x218] sm:$0xff]  ;;  %v4248_v44 = vld [vmem:[#allocation5 + $0x390] sm:$0xff] }
 0x355   : > { %7439 = vmatpush3.msra.mxu1 %v4244_v0  ;;  %7405 = vmatprep.subr.mxu0 %v4227_v1  ;;  %v4234_v38 = vld [vmem:[#allocation5 + $0x320] sm:$0xff]  ;;  %v4233_v42 = vld [vmem:[#allocation5 + $0x318] sm:$0xff]  ;;  %v4200_v45 = vld [vmem:[#allocation5 + $0x210] sm:$0xff] }
 0x356   : > { %7440 = vmatprep.subr.mxu1 %v4259_v2  ;;  %7406 = vmatpush3.msra.mxu0 %v4211_v3  ;;  %v4232_v46 = vld [vmem:[#allocation5 + $0x310] sm:$0xff]  ;;  %v4215_v47 = vld [vmem:[#allocation5 + $0x288] sm:$0xff]  ;;  %v4214_v51 = vld [vmem:[#allocation5 + $0x280] sm:$0xff] }
 0x357   : > { %7441 = vmatpush3.msra.mxu1 %v4243_v4  ;;  %7407 = vmatprep.subr.mxu0 %v4226_v5  ;;  %v4247_v48 = vld [vmem:[#allocation5 + $0x388] sm:$0xff]  ;;  %v4246_v52 = vld [vmem:[#allocation5 + $0x380] sm:$0xff]  ;;  %v4122_v56 = vld [vmem:[#allocation2 + $0x50] sm:$0xff] }
 0x358   : > { %7442 = vmatprep.subr.mxu1 %v4258_v6  ;;  %7408 = vmatpush3.msra.mxu0 %v4210_v7  ;;  %v4199_v49 = vld [vmem:[#allocation5 + $0x208] sm:$0xff]  ;;  %v4198_v53 = vld [vmem:[#allocation5 + $0x200] sm:$0xff]  ;;  %v4293_v58 = vld [vmem:[#allocation5 + $0x4f8] sm:$0xff] }
 0x359   : > { %7443 = vmatpush3.msra.mxu1 %v4242_v8  ;;  %7409 = vmatprep.subr.mxu0 %v4225_v9  ;;  %v4231_v50 = vld [vmem:[#allocation5 + $0x308] sm:$0xff]  ;;  %v4230_v55 = vld [vmem:[#allocation5 + $0x300] sm:$0xff]  ;;  %v4325_v61 = vld [vmem:[#allocation5 + $0x5f8] sm:$0xff] }
 0x35a   : > { %7444 = vmatprep.subr.mxu1 %v4257_v10  ;;  %7410 = vmatpush3.msra.mxu0 %v4209_v11  ;;  %v4123_v54 = vld [vmem:[#allocation2 + $0x68] sm:$0xff]  ;;  %v4277_v63 = vld [vmem:[#allocation5 + $0x478] sm:$0xff]  ;;  %v4292_v1 = vld [vmem:[#allocation5 + $0x4f0] sm:$0xff] }
 0x35b   : > { %7445 = vmatpush3.msra.mxu1 %v4241_v12  ;;  %7411 = vmatprep.subr.mxu0 %v4224_v17  ;;  %v4125_v57 = vld [vmem:[#allocation2 + $0x48] sm:$0xff]  ;;  %v4309_v0 = vld [vmem:[#allocation5 + $0x578] sm:$0xff]  ;;  %v4324_v2 = vld [vmem:[#allocation5 + $0x5f0] sm:$0xff] }
 0x35c   : > { %7446 = vmatprep.subr.mxu1 %v4256_v13  ;;  %7412 = vmatpush3.msra.mxu0 %v4208_v14  ;;  %v4124_v62 = vld [vmem:[#allocation2 + $0x8] sm:$0xff]  ;;  %v4276_v3 = vld [vmem:[#allocation5 + $0x470] sm:$0xff]  ;;  %v4290_v9 = vld [vmem:[#allocation5 + $0x4e0] sm:$0xff] }
 0x35d   : > { %7447 = vmatpush3.msra.mxu1 %v4240_v15  ;;  %7413 = vmatprep.subr.mxu0 %v4223_v20  ;;  %v4308_v4 = vld [vmem:[#allocation5 + $0x570] sm:$0xff]  ;;  %v4291_v5 = vld [vmem:[#allocation5 + $0x4e8] sm:$0xff]  ;;  %v4322_v10 = vld [vmem:[#allocation5 + $0x5e0] sm:$0xff] }
 0x35e   : > { %7448 = vmatprep.subr.mxu1 %v4255_v16  ;;  %7414 = vmatpush3.msra.mxu0 %v4207_v18  ;;  %v4323_v6 = vld [vmem:[#allocation5 + $0x5e8] sm:$0xff]  ;;  %v4274_v11 = vld [vmem:[#allocation5 + $0x460] sm:$0xff]  ;;  %v4289_v17 = vld [vmem:[#allocation5 + $0x4d8] sm:$0xff] }
 0x35f   : > { %7449 = vmatpush3.msra.mxu1 %v4239_v19  ;;  %7415 = vmatprep.subr.mxu0 %v4222_v59  ;;  %v4275_v7 = vld [vmem:[#allocation5 + $0x468] sm:$0xff]  ;;  %v4306_v12 = vld [vmem:[#allocation5 + $0x560] sm:$0xff]  ;;  %v4321_v13 = vld [vmem:[#allocation5 + $0x5d8] sm:$0xff] }
 0x360   : > { %7450 = vmatprep.subr.mxu1 %v4254_v21  ;;  %7416 = vmatpush3.msra.mxu0 %v4206_v22  ;;  %v4307_v8 = vld [vmem:[#allocation5 + $0x568] sm:$0xff]  ;;  %v4273_v14 = vld [vmem:[#allocation5 + $0x458] sm:$0xff]  ;;  %v4288_v20 = vld [vmem:[#allocation5 + $0x4d0] sm:$0xff] }
 0x361   : > { %7451 = vmatpush3.msra.mxu1 %v4238_v23  ;;  %7417 = vmatprep.subr.mxu0 %v4221_v24  ;;  %v4305_v15 = vld [vmem:[#allocation5 + $0x558] sm:$0xff]  ;;  %v4320_v16 = vld [vmem:[#allocation5 + $0x5d0] sm:$0xff]  ;;  %v4287_v59 = vld [vmem:[#allocation5 + $0x4c8] sm:$0xff] }
 0x362   : > { %7452 = vmatprep.subr.mxu1 %v4253_v60  ;;  %7418 = vmatpush3.msra.mxu0 %v4205_v25  ;;  %v4272_v18 = vld [vmem:[#allocation5 + $0x450] sm:$0xff]  ;;  %v4319_v21 = vld [vmem:[#allocation5 + $0x5c8] sm:$0xff]  ;;  %v4286_v24 = vld [vmem:[#allocation5 + $0x4c0] sm:$0xff] }
 0x363   : > { %7453 = vmatpush3.msra.mxu1 %v4237_v26  ;;  %7419 = vmatprep.subr.mxu0 %v4220_v27  ;;  %v4304_v19 = vld [vmem:[#allocation5 + $0x550] sm:$0xff]  ;;  %v4271_v22 = vld [vmem:[#allocation5 + $0x448] sm:$0xff]  ;;  %v4318_v60 = vld [vmem:[#allocation5 + $0x5c0] sm:$0xff] }
 0x364   : > { %7454 = vmatprep.subr.mxu1 %v4252_v28  ;;  %7420 = vmatpush3.msra.mxu0 %v4204_v29  ;;  %v4303_v23 = vld [vmem:[#allocation5 + $0x548] sm:$0xff]  ;;  %v4270_v25 = vld [vmem:[#allocation5 + $0x440] sm:$0xff]  ;;  %v4285_v27 = vld [vmem:[#allocation5 + $0x4b8] sm:$0xff] }
 0x365   : > { %7455 = vmatpush3.msra.mxu1 %v4236_v30  ;;  %7421 = vmatprep.subr.mxu0 %v4219_v31  ;;  %v4302_v26 = vld [vmem:[#allocation5 + $0x540] sm:$0xff]  ;;  %v4317_v28 = vld [vmem:[#allocation5 + $0x5b8] sm:$0xff]  ;;  %v4284_v31 = vld [vmem:[#allocation5 + $0x4b0] sm:$0xff] }
 0x366   : > { %7456 = vmatprep.subr.mxu1 %v4251_v32  ;;  %7422 = vmatpush3.msra.mxu0 %v4203_v33  ;;  %v4269_v29 = vld [vmem:[#allocation5 + $0x438] sm:$0xff]  ;;  %v4316_v32 = vld [vmem:[#allocation5 + $0x5b0] sm:$0xff] }
 0x367   : > { %7457 = vmatpush3.msra.mxu1 %v4235_v34  ;;  %7423 = vmatprep.subr.mxu0 %v4218_v35  ;;  %v4301_v30 = vld [vmem:[#allocation5 + $0x538] sm:$0xff]  ;;  %v4268_v33 = vld [vmem:[#allocation5 + $0x430] sm:$0xff]  ;;  %v4283_v35 = vld [vmem:[#allocation5 + $0x4a8] sm:$0xff] }
 0x368   : > { %7458 = vmatprep.subr.mxu1 %v4250_v36  ;;  %7424 = vmatpush3.msra.mxu0 %v4202_v37  ;;  %v4300_v34 = vld [vmem:[#allocation5 + $0x530] sm:$0xff]  ;;  %v4315_v36 = vld [vmem:[#allocation5 + $0x5a8] sm:$0xff] }
 0x369   : > { %7459 = vmatpush3.msra.mxu1 %v4234_v38  ;;  %7425 = vmatprep.subr.mxu0 %v4217_v39  ;;  %v4267_v37 = vld [vmem:[#allocation5 + $0x428] sm:$0xff]  ;;  %v4282_v39 = vld [vmem:[#allocation5 + $0x4a0] sm:$0xff] }
 0x36a   : > { %7460 = vmatprep.subr.mxu1 %v4249_v40  ;;  %7426 = vmatpush3.msra.mxu0 %v4201_v41  ;;  %v4299_v38 = vld [vmem:[#allocation5 + $0x528] sm:$0xff]  ;;  %v4314_v40 = vld [vmem:[#allocation5 + $0x5a0] sm:$0xff] }
 0x36b   : > { %7461 = vmatpush3.msra.mxu1 %v4233_v42  ;;  %7427 = vmatprep.subr.mxu0 %v4216_v43  ;;  %v4266_v41 = vld [vmem:[#allocation5 + $0x420] sm:$0xff]  ;;  %v4281_v43 = vld [vmem:[#allocation5 + $0x498] sm:$0xff] }
 0x36c   : > { %7462 = vmatprep.subr.mxu1 %v4248_v44  ;;  %7428 = vmatpush3.msra.mxu0 %v4200_v45  ;;  %v4298_v42 = vld [vmem:[#allocation5 + $0x520] sm:$0xff]  ;;  %v4313_v44 = vld [vmem:[#allocation5 + $0x598] sm:$0xff] }
 0x36d   : > { %7463 = vmatpush3.msra.mxu1 %v4232_v46  ;;  %7429 = vmatprep.subr.mxu0 %v4215_v47  ;;  %v4265_v45 = vld [vmem:[#allocation5 + $0x418] sm:$0xff]  ;;  %v4280_v47 = vld [vmem:[#allocation5 + $0x490] sm:$0xff] }
 0x36e   : > { %7464 = vmatprep.subr.mxu1 %v4247_v48  ;;  %7430 = vmatpush3.msra.mxu0 %v4199_v49  ;;  %v4297_v46 = vld [vmem:[#allocation5 + $0x518] sm:$0xff]  ;;  %v4312_v48 = vld [vmem:[#allocation5 + $0x590] sm:$0xff] }
 0x36f   : > { %7465 = vmatpush3.msra.mxu1 %v4231_v50  ;;  %7431 = vmatprep.subr.mxu0 %v4214_v51  ;;  %v4264_v49 = vld [vmem:[#allocation5 + $0x410] sm:$0xff]  ;;  %v4279_v51 = vld [vmem:[#allocation5 + $0x488] sm:$0xff] }
 0x370   : > { %7466 = vmatprep.subr.mxu1 %v4246_v52  ;;  %7432 = vmatpush3.msra.mxu0 %v4198_v53  ;;  %v4296_v50 = vld [vmem:[#allocation5 + $0x510] sm:$0xff]  ;;  %v4311_v52 = vld [vmem:[#allocation5 + $0x588] sm:$0xff] }
 0x371   : > { %4594 = vmatprep.mubr.f32.mxu0 %v4123_v54  ;;  %7467 = vmatpush3.msra.mxu1 %v4230_v55  ;;  %v4263_v53 = vld [vmem:[#allocation5 + $0x408] sm:$0xff]  ;;  %v4278_v55 = vld [vmem:[#allocation5 + $0x480] sm:$0xff] }
 0x372   : > { %4595 = vmatmul.mubr.f32.vlgmr.msra.gmra.mxu0 %v4122_v56  ;;  %4664 = vmatprep.mubr.f32.mxu1 %v4125_v57  ;;  %v4295_v54 = vld [vmem:[#allocation5 + $0x508] sm:$0xff]  ;;  %v4310_v56 = vld [vmem:[#allocation5 + $0x580] sm:$0xff] }
 0x373   : > { %7471 = vmatprep.subr.mxu0 %v4293_v58  ;;  %7506 = vmatprep.subr.mxu1 %v4325_v61  ;;  %v4262_v57 = vld [vmem:[#allocation5 + $0x400] sm:$0xff] }
 0x374   : > { %4665 = vmatmul.mubr.f32.vlgmr.msra.gmra.mxu1 %v4124_v62  ;;  %7472 = vmatpush3.msra.mxu0 %v4277_v63  ;;  %v4127_v58 = vld [vmem:[#allocation2 + $0x20] sm:$0xff]  ;;  %v4129_v63 = vld [vmem:[#allocation2 + $0x38] sm:$0xff] }
 0x375   : > { %7507 = vmatpush3.msra.mxu1 %v4309_v0  ;;  %7473 = vmatprep.subr.mxu0 %v4292_v1  ;;  %v4294_v61 = vld [vmem:[#allocation5 + $0x500] sm:$0xff]  ;;  %v4357_v0 = vld [vmem:[#allocation5 + $0x6f8] sm:$0xff] }
 0x376   : > { %7508 = vmatprep.subr.mxu1 %v4324_v2  ;;  %7474 = vmatpush3.msra.mxu0 %v4276_v3  ;;  %v4126_v62 = vld [vmem:[#allocation2 + $0x40] sm:$0xff]  ;;  %v4389_v1 = vld [vmem:[#allocation5 + $0x7f8] sm:$0xff]  ;;  %v4128_v2 = vld [vmem:[#allocation2 + $0x10] sm:$0xff] }
 0x377   : > { %7509 = vmatpush3.msra.mxu1 %v4308_v4  ;;  %7475 = vmatprep.subr.mxu0 %v4291_v5  ;;  %v4341_v3 = vld [vmem:[#allocation5 + $0x678] sm:$0xff]  ;;  %v4356_v5 = vld [vmem:[#allocation5 + $0x6f0] sm:$0xff] }
 0x378   : > { %7510 = vmatprep.subr.mxu1 %v4323_v6  ;;  %7476 = vmatpush3.msra.mxu0 %v4275_v7  ;;  %v4373_v4 = vld [vmem:[#allocation5 + $0x778] sm:$0xff]  ;;  %v4388_v6 = vld [vmem:[#allocation5 + $0x7f0] sm:$0xff] }
 0x379   : > { %7511 = vmatpush3.msra.mxu1 %v4307_v8  ;;  %7477 = vmatprep.subr.mxu0 %v4290_v9  ;;  %v4340_v7 = vld [vmem:[#allocation5 + $0x670] sm:$0xff]  ;;  %v4355_v9 = vld [vmem:[#allocation5 + $0x6e8] sm:$0xff] }
 0x37a   : > { %7512 = vmatprep.subr.mxu1 %v4322_v10  ;;  %7478 = vmatpush3.msra.mxu0 %v4274_v11  ;;  %v4372_v8 = vld [vmem:[#allocation5 + $0x770] sm:$0xff]  ;;  %v4387_v10 = vld [vmem:[#allocation5 + $0x7e8] sm:$0xff] }
 0x37b   : > { %7513 = vmatpush3.msra.mxu1 %v4306_v12  ;;  %7479 = vmatprep.subr.mxu0 %v4289_v17  ;;  %v4339_v11 = vld [vmem:[#allocation5 + $0x668] sm:$0xff]  ;;  %v4354_v17 = vld [vmem:[#allocation5 + $0x6e0] sm:$0xff] }
 0x37c   : > { %7514 = vmatprep.subr.mxu1 %v4321_v13  ;;  %7480 = vmatpush3.msra.mxu0 %v4273_v14  ;;  %v4371_v12 = vld [vmem:[#allocation5 + $0x768] sm:$0xff]  ;;  %v4386_v13 = vld [vmem:[#allocation5 + $0x7e0] sm:$0xff] }
 0x37d   : > { %7515 = vmatpush3.msra.mxu1 %v4305_v15  ;;  %7481 = vmatprep.subr.mxu0 %v4288_v20  ;;  %v4338_v14 = vld [vmem:[#allocation5 + $0x660] sm:$0xff]  ;;  %v4353_v20 = vld [vmem:[#allocation5 + $0x6d8] sm:$0xff] }
 0x37e   : > { %7516 = vmatprep.subr.mxu1 %v4320_v16  ;;  %7482 = vmatpush3.msra.mxu0 %v4272_v18  ;;  %v4370_v15 = vld [vmem:[#allocation5 + $0x760] sm:$0xff]  ;;  %v4385_v16 = vld [vmem:[#allocation5 + $0x7d8] sm:$0xff] }
 0x37f   : > { %7517 = vmatpush3.msra.mxu1 %v4304_v19  ;;  %7483 = vmatprep.subr.mxu0 %v4287_v59  ;;  %v4337_v18 = vld [vmem:[#allocation5 + $0x658] sm:$0xff]  ;;  %v4352_v59 = vld [vmem:[#allocation5 + $0x6d0] sm:$0xff] }
 0x380   : > { %7518 = vmatprep.subr.mxu1 %v4319_v21  ;;  %7484 = vmatpush3.msra.mxu0 %v4271_v22  ;;  %v4369_v19 = vld [vmem:[#allocation5 + $0x758] sm:$0xff]  ;;  %v4384_v21 = vld [vmem:[#allocation5 + $0x7d0] sm:$0xff] }
 0x381   : > { %7519 = vmatpush3.msra.mxu1 %v4303_v23  ;;  %7485 = vmatprep.subr.mxu0 %v4286_v24  ;;  %v4336_v22 = vld [vmem:[#allocation5 + $0x650] sm:$0xff]  ;;  %v4351_v24 = vld [vmem:[#allocation5 + $0x6c8] sm:$0xff] }
 0x382   : > { %7520 = vmatprep.subr.mxu1 %v4318_v60  ;;  %7486 = vmatpush3.msra.mxu0 %v4270_v25  ;;  %v4368_v23 = vld [vmem:[#allocation5 + $0x750] sm:$0xff]  ;;  %v4383_v60 = vld [vmem:[#allocation5 + $0x7c8] sm:$0xff] }
 0x383   : > { %7521 = vmatpush3.msra.mxu1 %v4302_v26  ;;  %7487 = vmatprep.subr.mxu0 %v4285_v27  ;;  %v4335_v25 = vld [vmem:[#allocation5 + $0x648] sm:$0xff]  ;;  %v4350_v27 = vld [vmem:[#allocation5 + $0x6c0] sm:$0xff] }
 0x384   : > { %7522 = vmatprep.subr.mxu1 %v4317_v28  ;;  %7488 = vmatpush3.msra.mxu0 %v4269_v29  ;;  %v4367_v26 = vld [vmem:[#allocation5 + $0x748] sm:$0xff]  ;;  %v4382_v28 = vld [vmem:[#allocation5 + $0x7c0] sm:$0xff] }
 0x385   : > { %7523 = vmatpush3.msra.mxu1 %v4301_v30  ;;  %7489 = vmatprep.subr.mxu0 %v4284_v31  ;;  %v4334_v29 = vld [vmem:[#allocation5 + $0x640] sm:$0xff]  ;;  %v4349_v31 = vld [vmem:[#allocation5 + $0x6b8] sm:$0xff] }
 0x386   : > { %7524 = vmatprep.subr.mxu1 %v4316_v32  ;;  %7490 = vmatpush3.msra.mxu0 %v4268_v33  ;;  %v4366_v30 = vld [vmem:[#allocation5 + $0x740] sm:$0xff]  ;;  %v4381_v32 = vld [vmem:[#allocation5 + $0x7b8] sm:$0xff] }
 0x387   : > { %7525 = vmatpush3.msra.mxu1 %v4300_v34  ;;  %7491 = vmatprep.subr.mxu0 %v4283_v35  ;;  %v4333_v33 = vld [vmem:[#allocation5 + $0x638] sm:$0xff]  ;;  %v4348_v35 = vld [vmem:[#allocation5 + $0x6b0] sm:$0xff] }
 0x388   : > { %7526 = vmatprep.subr.mxu1 %v4315_v36  ;;  %7492 = vmatpush3.msra.mxu0 %v4267_v37  ;;  %v4365_v34 = vld [vmem:[#allocation5 + $0x738] sm:$0xff]  ;;  %v4380_v36 = vld [vmem:[#allocation5 + $0x7b0] sm:$0xff] }
 0x389   : > { %7527 = vmatpush3.msra.mxu1 %v4299_v38  ;;  %7493 = vmatprep.subr.mxu0 %v4282_v39  ;;  %v4332_v37 = vld [vmem:[#allocation5 + $0x630] sm:$0xff]  ;;  %v4347_v39 = vld [vmem:[#allocation5 + $0x6a8] sm:$0xff] }
 0x38a   : > { %7528 = vmatprep.subr.mxu1 %v4314_v40  ;;  %7494 = vmatpush3.msra.mxu0 %v4266_v41  ;;  %v4364_v38 = vld [vmem:[#allocation5 + $0x730] sm:$0xff]  ;;  %v4379_v40 = vld [vmem:[#allocation5 + $0x7a8] sm:$0xff] }
 0x38b   : > { %7529 = vmatpush3.msra.mxu1 %v4298_v42  ;;  %7495 = vmatprep.subr.mxu0 %v4281_v43  ;;  %v4331_v41 = vld [vmem:[#allocation5 + $0x628] sm:$0xff]  ;;  %v4346_v43 = vld [vmem:[#allocation5 + $0x6a0] sm:$0xff] }
 0x38c   : > { %7530 = vmatprep.subr.mxu1 %v4313_v44  ;;  %7496 = vmatpush3.msra.mxu0 %v4265_v45  ;;  %v4363_v42 = vld [vmem:[#allocation5 + $0x728] sm:$0xff]  ;;  %v4378_v44 = vld [vmem:[#allocation5 + $0x7a0] sm:$0xff] }
 0x38d   : > { %7531 = vmatpush3.msra.mxu1 %v4297_v46  ;;  %7497 = vmatprep.subr.mxu0 %v4280_v47  ;;  %v4330_v45 = vld [vmem:[#allocation5 + $0x620] sm:$0xff]  ;;  %v4345_v47 = vld [vmem:[#allocation5 + $0x698] sm:$0xff] }
 0x38e   : > { %7532 = vmatprep.subr.mxu1 %v4312_v48  ;;  %7498 = vmatpush3.msra.mxu0 %v4264_v49  ;;  %v4362_v46 = vld [vmem:[#allocation5 + $0x720] sm:$0xff]  ;;  %v4377_v48 = vld [vmem:[#allocation5 + $0x798] sm:$0xff] }
 0x38f   : > { %7533 = vmatpush3.msra.mxu1 %v4296_v50  ;;  %7499 = vmatprep.subr.mxu0 %v4279_v51  ;;  %v4329_v49 = vld [vmem:[#allocation5 + $0x618] sm:$0xff]  ;;  %v4344_v51 = vld [vmem:[#allocation5 + $0x690] sm:$0xff] }
 0x390   : > { %7534 = vmatprep.subr.mxu1 %v4311_v52  ;;  %7500 = vmatpush3.msra.mxu0 %v4263_v53  ;;  %v4361_v50 = vld [vmem:[#allocation5 + $0x718] sm:$0xff]  ;;  %v4376_v52 = vld [vmem:[#allocation5 + $0x790] sm:$0xff] }
 0x391   : > { %7535 = vmatpush3.msra.mxu1 %v4295_v54  ;;  %7501 = vmatprep.subr.mxu0 %v4278_v55  ;;  %v4328_v53 = vld [vmem:[#allocation5 + $0x610] sm:$0xff]  ;;  %v4343_v55 = vld [vmem:[#allocation5 + $0x688] sm:$0xff] }
 0x392   : > { %7536 = vmatprep.subr.mxu1 %v4310_v56  ;;  %7502 = vmatpush3.msra.mxu0 %v4262_v57  ;;  %v4360_v54 = vld [vmem:[#allocation5 + $0x710] sm:$0xff]  ;;  %v4375_v56 = vld [vmem:[#allocation5 + $0x788] sm:$0xff] }
 0x393   : > { %4734 = vmatprep.mubr.f32.mxu0 %v4127_v58  ;;  %7537 = vmatpush3.msra.mxu1 %v4294_v61  ;;  %v4327_v57 = vld [vmem:[#allocation5 + $0x608] sm:$0xff]  ;;  %v4342_v61 = vld [vmem:[#allocation5 + $0x680] sm:$0xff] }
 0x394   : > { %4735 = vmatmul.mubr.f32.vlgmr.msra.gmra.mxu0 %v4126_v62  ;;  %4804 = vmatprep.mubr.f32.mxu1 %v4129_v63  ;;  %v4359_v58 = vld [vmem:[#allocation5 + $0x708] sm:$0xff]  ;;  %v4374_v62 = vld [vmem:[#allocation5 + $0x780] sm:$0xff] }
 0x395   : > { %7541 = vmatprep.subr.mxu0 %v4357_v0  ;;  %7576 = vmatprep.subr.mxu1 %v4389_v1  ;;  %v4326_v63 = vld [vmem:[#allocation5 + $0x600] sm:$0xff]  ;;  %v4131_v0 = vld [vmem:[#allocation2 + $0x70] sm:$0xff] }
 0x396   : > { %4805 = vmatmul.mubr.f32.vlgmr.msra.gmra.mxu1 %v4128_v2  ;;  %7542 = vmatpush3.msra.mxu0 %v4341_v3  ;;  %v4358_v1 = vld [vmem:[#allocation5 + $0x700] sm:$0xff]  ;;  %v4133_v2 = vld [vmem:[#allocation2 + $0x28] sm:$0xff] }
 0x397   : > { %7577 = vmatpush3.msra.mxu1 %v4373_v4  ;;  %7543 = vmatprep.subr.mxu0 %v4356_v5  ;;  %v4130_v3 = vld [vmem:[#allocation2 + $0x60] sm:$0xff]  ;;  %v4132_v4 = vld [vmem:[#allocation2 + $0x78] sm:$0xff]  ;;  %v5192_v5 = vld [vmem:[#allocation7 + $0x788] sm:$0xff] }
 0x398   : > { %7578 = vmatprep.subr.mxu1 %v4388_v6  ;;  %7544 = vmatpush3.msra.mxu0 %v4340_v7  ;;  %v5194_v6 = vld [vmem:[#allocation7 + $0x798] sm:$0xff]  ;;  %v5191_v7 = vld [vmem:[#allocation7 + $0x780] sm:$0xff] }
 0x399   : > { %7579 = vmatpush3.msra.mxu1 %v4372_v8  ;;  %7545 = vmatprep.subr.mxu0 %v4355_v9  ;;  %v5193_v8 = vld [vmem:[#allocation7 + $0x790] sm:$0xff]  ;;  %v5176_v9 = vld [vmem:[#allocation7 + $0x708] sm:$0xff] }
 0x39a   : > { %7580 = vmatprep.subr.mxu1 %v4387_v10  ;;  %7546 = vmatpush3.msra.mxu0 %v4339_v11  ;;  %v5178_v10 = vld [vmem:[#allocation7 + $0x718] sm:$0xff]  ;;  %v5175_v11 = vld [vmem:[#allocation7 + $0x700] sm:$0xff] }
 0x39b   : > { %7581 = vmatpush3.msra.mxu1 %v4371_v12  ;;  %7547 = vmatprep.subr.mxu0 %v4354_v17  ;;  %v5177_v12 = vld [vmem:[#allocation7 + $0x710] sm:$0xff]  ;;  %v5160_v17 = vld [vmem:[#allocation7 + $0x688] sm:$0xff] }
 0x39c   : > { %7582 = vmatprep.subr.mxu1 %v4386_v13  ;;  %7548 = vmatpush3.msra.mxu0 %v4338_v14  ;;  %v5162_v13 = vld [vmem:[#allocation7 + $0x698] sm:$0xff]  ;;  %v5159_v14 = vld [vmem:[#allocation7 + $0x680] sm:$0xff] }
 0x39d   : > { %7583 = vmatpush3.msra.mxu1 %v4370_v15  ;;  %7549 = vmatprep.subr.mxu0 %v4353_v20  ;;  %v5161_v15 = vld [vmem:[#allocation7 + $0x690] sm:$0xff]  ;;  %v5144_v20 = vld [vmem:[#allocation7 + $0x608] sm:$0xff] }
 0x39e   : > { %7584 = vmatprep.subr.mxu1 %v4385_v16  ;;  %7550 = vmatpush3.msra.mxu0 %v4337_v18  ;;  %v5146_v16 = vld [vmem:[#allocation7 + $0x618] sm:$0xff]  ;;  %v5143_v18 = vld [vmem:[#allocation7 + $0x600] sm:$0xff] }
 0x39f   : > { %7585 = vmatpush3.msra.mxu1 %v4369_v19  ;;  %7551 = vmatprep.subr.mxu0 %v4352_v59  ;;  %v5145_v19 = vld [vmem:[#allocation7 + $0x610] sm:$0xff]  ;;  %v5128_v59 = vld [vmem:[#allocation7 + $0x588] sm:$0xff] }
 0x3a0   : > { %7586 = vmatprep.subr.mxu1 %v4384_v21  ;;  %7552 = vmatpush3.msra.mxu0 %v4336_v22  ;;  %v5130_v21 = vld [vmem:[#allocation7 + $0x598] sm:$0xff]  ;;  %v5127_v22 = vld [vmem:[#allocation7 + $0x580] sm:$0xff] }
 0x3a1   : > { %7587 = vmatpush3.msra.mxu1 %v4368_v23  ;;  %7553 = vmatprep.subr.mxu0 %v4351_v24  ;;  %v5129_v23 = vld [vmem:[#allocation7 + $0x590] sm:$0xff]  ;;  %v5112_v24 = vld [vmem:[#allocation7 + $0x508] sm:$0xff] }
 0x3a2   : > { %7588 = vmatprep.subr.mxu1 %v4383_v60  ;;  %7554 = vmatpush3.msra.mxu0 %v4335_v25  ;;  %v5114_v60 = vld [vmem:[#allocation7 + $0x518] sm:$0xff]  ;;  %v5111_v25 = vld [vmem:[#allocation7 + $0x500] sm:$0xff] }
 0x3a3   : > { %7589 = vmatpush3.msra.mxu1 %v4367_v26  ;;  %7555 = vmatprep.subr.mxu0 %v4350_v27  ;;  %v5113_v26 = vld [vmem:[#allocation7 + $0x510] sm:$0xff]  ;;  %v5096_v27 = vld [vmem:[#allocation7 + $0x488] sm:$0xff] }
 0x3a4   : > { %7590 = vmatprep.subr.mxu1 %v4382_v28  ;;  %7556 = vmatpush3.msra.mxu0 %v4334_v29  ;;  %v5098_v28 = vld [vmem:[#allocation7 + $0x498] sm:$0xff]  ;;  %v5095_v29 = vld [vmem:[#allocation7 + $0x480] sm:$0xff] }
 0x3a5   : > { %7591 = vmatpush3.msra.mxu1 %v4366_v30  ;;  %7557 = vmatprep.subr.mxu0 %v4349_v31  ;;  %v5097_v30 = vld [vmem:[#allocation7 + $0x490] sm:$0xff]  ;;  %v5080_v31 = vld [vmem:[#allocation7 + $0x408] sm:$0xff] }
 0x3a6   : > { %7592 = vmatprep.subr.mxu1 %v4381_v32  ;;  %7558 = vmatpush3.msra.mxu0 %v4333_v33  ;;  %v5082_v32 = vld [vmem:[#allocation7 + $0x418] sm:$0xff]  ;;  %v5079_v33 = vld [vmem:[#allocation7 + $0x400] sm:$0xff] }
 0x3a7   : > { %7593 = vmatpush3.msra.mxu1 %v4365_v34  ;;  %7559 = vmatprep.subr.mxu0 %v4348_v35  ;;  %v5081_v34 = vld [vmem:[#allocation7 + $0x410] sm:$0xff]  ;;  %v5064_v35 = vld [vmem:[#allocation7 + $0x388] sm:$0xff] }
 0x3a8   : > { %7594 = vmatprep.subr.mxu1 %v4380_v36  ;;  %7560 = vmatpush3.msra.mxu0 %v4332_v37  ;;  %v5066_v36 = vld [vmem:[#allocation7 + $0x398] sm:$0xff]  ;;  %v5063_v37 = vld [vmem:[#allocation7 + $0x380] sm:$0xff] }
 0x3a9   : > { %7595 = vmatpush3.msra.mxu1 %v4364_v38  ;;  %7561 = vmatprep.subr.mxu0 %v4347_v39  ;;  %v5065_v38 = vld [vmem:[#allocation7 + $0x390] sm:$0xff]  ;;  %v5048_v39 = vld [vmem:[#allocation7 + $0x308] sm:$0xff] }
 0x3aa   : > { %7596 = vmatprep.subr.mxu1 %v4379_v40  ;;  %7562 = vmatpush3.msra.mxu0 %v4331_v41  ;;  %v5050_v40 = vld [vmem:[#allocation7 + $0x318] sm:$0xff]  ;;  %v5047_v41 = vld [vmem:[#allocation7 + $0x300] sm:$0xff] }
 0x3ab   : > { %7597 = vmatpush3.msra.mxu1 %v4363_v42  ;;  %7563 = vmatprep.subr.mxu0 %v4346_v43  ;;  %v5049_v42 = vld [vmem:[#allocation7 + $0x310] sm:$0xff]  ;;  %v5032_v43 = vld [vmem:[#allocation7 + $0x288] sm:$0xff] }
 0x3ac   : > { %7598 = vmatprep.subr.mxu1 %v4378_v44  ;;  %7564 = vmatpush3.msra.mxu0 %v4330_v45  ;;  %v5034_v44 = vld [vmem:[#allocation7 + $0x298] sm:$0xff]  ;;  %v5031_v45 = vld [vmem:[#allocation7 + $0x280] sm:$0xff] }
 0x3ad   : > { %7599 = vmatpush3.msra.mxu1 %v4362_v46  ;;  %7565 = vmatprep.subr.mxu0 %v4345_v47  ;;  %v5033_v46 = vld [vmem:[#allocation7 + $0x290] sm:$0xff]  ;;  %v5016_v47 = vld [vmem:[#allocation7 + $0x208] sm:$0xff] }
 0x3ae   : > { %7600 = vmatprep.subr.mxu1 %v4377_v48  ;;  %7566 = vmatpush3.msra.mxu0 %v4329_v49  ;;  %v5018_v48 = vld [vmem:[#allocation7 + $0x218] sm:$0xff]  ;;  %v5015_v49 = vld [vmem:[#allocation7 + $0x200] sm:$0xff] }
 0x3af   : > { %7601 = vmatpush3.msra.mxu1 %v4361_v50  ;;  %7567 = vmatprep.subr.mxu0 %v4344_v51  ;;  %v5017_v50 = vld [vmem:[#allocation7 + $0x210] sm:$0xff]  ;;  %v5000_v51 = vld [vmem:[#allocation7 + $0x188] sm:$0xff] }
 0x3b0   : > { %7602 = vmatprep.subr.mxu1 %v4376_v52  ;;  %7568 = vmatpush3.msra.mxu0 %v4328_v53  ;;  %v5002_v52 = vld [vmem:[#allocation7 + $0x198] sm:$0xff]  ;;  %v4999_v53 = vld [vmem:[#allocation7 + $0x180] sm:$0xff] }
 0x3b1   : > { %7603 = vmatpush3.msra.mxu1 %v4360_v54  ;;  %7569 = vmatprep.subr.mxu0 %v4343_v55  ;;  %v5001_v54 = vld [vmem:[#allocation7 + $0x190] sm:$0xff]  ;;  %v4984_v55 = vld [vmem:[#allocation7 + $0x108] sm:$0xff] }
 0x3b2   : > { %7604 = vmatprep.subr.mxu1 %v4375_v56  ;;  %7570 = vmatpush3.msra.mxu0 %v4327_v57  ;;  %v4986_v56 = vld [vmem:[#allocation7 + $0x118] sm:$0xff]  ;;  %v4983_v57 = vld [vmem:[#allocation7 + $0x100] sm:$0xff] }
 0x3b3   : > { %7605 = vmatpush3.msra.mxu1 %v4359_v58  ;;  %7571 = vmatprep.subr.mxu0 %v4342_v61  ;;  %v4985_v58 = vld [vmem:[#allocation7 + $0x110] sm:$0xff]  ;;  %v4968_v61 = vld [vmem:[#allocation7 + $0x88] sm:$0xff] }
 0x3b4   : > { %7606 = vmatprep.subr.mxu1 %v4374_v62  ;;  %7572 = vmatpush3.msra.mxu0 %v4326_v63  ;;  %v4970_v62 = vld [vmem:[#allocation7 + $0x98] sm:$0xff]  ;;  %v4967_v63 = vld [vmem:[#allocation7 + $0x80] sm:$0xff] }
 0x3b5   : > { %4874 = vmatprep.mubr.f32.mxu0 %v4131_v0  ;;  %7607 = vmatpush3.msra.mxu1 %v4358_v1  ;;  %v4969_v0 = vld [vmem:[#allocation7 + $0x90] sm:$0xff]  ;;  %v4952_v1 = vld [vmem:[#allocation7 + $0x8] sm:$0xff] }
 0x3b6   : > { %4944 = vmatprep.mubr.f32.mxu1 %v4133_v2  ;;  %4875 = vmatmul.mubr.f32.vlgmr.msra.gmra.mxu0 %v4130_v3  ;;  %v4954_v2 = vld [vmem:[#allocation7 + $0x18] sm:$0xff]  ;;  %v4951_v3 = vld [vmem:[#allocation7] sm:$0xff] }
 0x3b7   : > { %4945 = vmatmul.mubr.f32.vlgmr.msra.gmra.mxu1 %v4132_v4  ;;  %5207 = vmatprep.subr.mxu0 %v5192_v5  ;;  %v4953_v4 = vld [vmem:[#allocation7 + $0x10] sm:$0xff]  ;;  %v5196_v5 = vld [vmem:[#allocation7 + $0x7a8] sm:$0xff] }
 0x3b8   : > { %5278 = vmatprep.subr.mxu1 %v5194_v6  ;;  %5208 = vmatpush1.msra.mxu0 %v5191_v7  ;;  %v5198_v6 = vld [vmem:[#allocation7 + $0x7b8] sm:$0xff]  ;;  %v8167_v7 = vmov 0.0  }
 0x3b9   : > { %5279 = vmatpush1.msra.mxu1 %v5193_v8  ;;  %5209 = vmatprep.subr.mxu0 %v5176_v9 }
 0x3ba   : > { %5280 = vmatprep.subr.mxu1 %v5178_v10  ;;  %5210 = vmatpush1.msra.mxu0 %v5175_v11 }
 0x3bb   : > { %5281 = vmatpush1.msra.mxu1 %v5177_v12  ;;  %5211 = vmatprep.subr.mxu0 %v5160_v17 }
 0x3bc   : > { %5282 = vmatprep.subr.mxu1 %v5162_v13  ;;  %5212 = vmatpush1.msra.mxu0 %v5159_v14 }
 0x3bd   : > { %5283 = vmatpush1.msra.mxu1 %v5161_v15  ;;  %5213 = vmatprep.subr.mxu0 %v5144_v20 }
 0x3be   : > { %5284 = vmatprep.subr.mxu1 %v5146_v16  ;;  %5214 = vmatpush1.msra.mxu0 %v5143_v18 }
 0x3bf   : > { %5285 = vmatpush1.msra.mxu1 %v5145_v19  ;;  %5215 = vmatprep.subr.mxu0 %v5128_v59 }
 0x3c0   : > { %5286 = vmatprep.subr.mxu1 %v5130_v21  ;;  %5216 = vmatpush1.msra.mxu0 %v5127_v22 }
 0x3c1   : > { %5287 = vmatpush1.msra.mxu1 %v5129_v23  ;;  %5217 = vmatprep.subr.mxu0 %v5112_v24 }
 0x3c2   : > { %5288 = vmatprep.subr.mxu1 %v5114_v60  ;;  %5218 = vmatpush1.msra.mxu0 %v5111_v25 }
 0x3c3   : > { %5289 = vmatpush1.msra.mxu1 %v5113_v26  ;;  %5219 = vmatprep.subr.mxu0 %v5096_v27 }
 0x3c4   : > { %5290 = vmatprep.subr.mxu1 %v5098_v28  ;;  %5220 = vmatpush1.msra.mxu0 %v5095_v29 }
 0x3c5   : > { %5291 = vmatpush1.msra.mxu1 %v5097_v30  ;;  %5221 = vmatprep.subr.mxu0 %v5080_v31 }
 0x3c6   : > { %5292 = vmatprep.subr.mxu1 %v5082_v32  ;;  %5222 = vmatpush1.msra.mxu0 %v5079_v33 }
 0x3c7   : > { %5293 = vmatpush1.msra.mxu1 %v5081_v34  ;;  %5223 = vmatprep.subr.mxu0 %v5064_v35 }
 0x3c8   : > { %5294 = vmatprep.subr.mxu1 %v5066_v36  ;;  %5224 = vmatpush1.msra.mxu0 %v5063_v37 }
 0x3c9   : > { %5295 = vmatpush1.msra.mxu1 %v5065_v38  ;;  %5225 = vmatprep.subr.mxu0 %v5048_v39  ;;  %v5195_v38 = vld [vmem:[#allocation7 + $0x7a0] sm:$0xff]  ;;  %v5197_v39 = vld [vmem:[#allocation7 + $0x7b0] sm:$0xff] }
 0x3ca   : > { %5296 = vmatprep.subr.mxu1 %v5050_v40  ;;  %5226 = vmatpush1.msra.mxu0 %v5047_v41  ;;  %v5180_v40 = vld [vmem:[#allocation7 + $0x728] sm:$0xff]  ;;  %v5182_v41 = vld [vmem:[#allocation7 + $0x738] sm:$0xff] }
 0x3cb   : > { %5297 = vmatpush1.msra.mxu1 %v5049_v42  ;;  %5227 = vmatprep.subr.mxu0 %v5032_v43  ;;  %v5179_v42 = vld [vmem:[#allocation7 + $0x720] sm:$0xff]  ;;  %v5181_v43 = vld [vmem:[#allocation7 + $0x730] sm:$0xff] }
 0x3cc   : > { %5298 = vmatprep.subr.mxu1 %v5034_v44  ;;  %5228 = vmatpush1.msra.mxu0 %v5031_v45  ;;  %v5164_v44 = vld [vmem:[#allocation7 + $0x6a8] sm:$0xff]  ;;  %v5166_v45 = vld [vmem:[#allocation7 + $0x6b8] sm:$0xff] }
 0x3cd   : > { %5299 = vmatpush1.msra.mxu1 %v5033_v46  ;;  %5229 = vmatprep.subr.mxu0 %v5016_v47  ;;  %v5163_v46 = vld [vmem:[#allocation7 + $0x6a0] sm:$0xff]  ;;  %v5165_v47 = vld [vmem:[#allocation7 + $0x6b0] sm:$0xff] }
 0x3ce   : > { %5300 = vmatprep.subr.mxu1 %v5018_v48  ;;  %5230 = vmatpush1.msra.mxu0 %v5015_v49  ;;  %v5148_v48 = vld [vmem:[#allocation7 + $0x628] sm:$0xff]  ;;  %v5150_v49 = vld [vmem:[#allocation7 + $0x638] sm:$0xff] }
 0x3cf   : > { %5301 = vmatpush1.msra.mxu1 %v5017_v50  ;;  %5231 = vmatprep.subr.mxu0 %v5000_v51  ;;  %v5147_v50 = vld [vmem:[#allocation7 + $0x620] sm:$0xff]  ;;  %v5149_v51 = vld [vmem:[#allocation7 + $0x630] sm:$0xff] }
 0x3d0   : > { %5302 = vmatprep.subr.mxu1 %v5002_v52  ;;  %5232 = vmatpush1.msra.mxu0 %v4999_v53  ;;  %v5132_v52 = vld [vmem:[#allocation7 + $0x5a8] sm:$0xff]  ;;  %v5134_v53 = vld [vmem:[#allocation7 + $0x5b8] sm:$0xff] }
 0x3d1   : > { %5303 = vmatpush1.msra.mxu1 %v5001_v54  ;;  %5233 = vmatprep.subr.mxu0 %v4984_v55  ;;  %v5131_v54 = vld [vmem:[#allocation7 + $0x5a0] sm:$0xff]  ;;  %v5133_v55 = vld [vmem:[#allocation7 + $0x5b0] sm:$0xff] }
 0x3d2   : > { %5304 = vmatprep.subr.mxu1 %v4986_v56  ;;  %5234 = vmatpush1.msra.mxu0 %v4983_v57  ;;  %v5116_v56 = vld [vmem:[#allocation7 + $0x528] sm:$0xff]  ;;  %v5118_v57 = vld [vmem:[#allocation7 + $0x538] sm:$0xff] }
 0x3d3   : > { %5305 = vmatpush1.msra.mxu1 %v4985_v58  ;;  %5235 = vmatprep.subr.mxu0 %v4968_v61  ;;  %v5115_v58 = vld [vmem:[#allocation7 + $0x520] sm:$0xff]  ;;  %v5117_v61 = vld [vmem:[#allocation7 + $0x530] sm:$0xff] }
 0x3d4   : > { %5306 = vmatprep.subr.mxu1 %v4970_v62  ;;  %5236 = vmatpush1.msra.mxu0 %v4967_v63  ;;  %v5100_v62 = vld [vmem:[#allocation7 + $0x4a8] sm:$0xff]  ;;  %v5102_v63 = vld [vmem:[#allocation7 + $0x4b8] sm:$0xff] }
 0x3d5   : > { %5307 = vmatpush1.msra.mxu1 %v4969_v0  ;;  %5237 = vmatprep.subr.mxu0 %v4952_v1  ;;  %v5099_v0 = vld [vmem:[#allocation7 + $0x4a0] sm:$0xff]  ;;  %v5101_v1 = vld [vmem:[#allocation7 + $0x4b0] sm:$0xff] }
 0x3d6   : > { %5308 = vmatprep.subr.mxu1 %v4954_v2  ;;  %5238 = vmatpush1.msra.mxu0 %v4951_v3  ;;  %v5084_v2 = vld [vmem:[#allocation7 + $0x428] sm:$0xff]  ;;  %v5086_v3 = vld [vmem:[#allocation7 + $0x438] sm:$0xff] }
 0x3d7   : > { %5309 = vmatpush1.msra.mxu1 %v4953_v4  ;;  %5271 = vmatprep.mubr.f32.mxu0 %v8167_v7  ;;  %v5083_v4 = vld [vmem:[#allocation7 + $0x420] sm:$0xff] }
 0x3d8   : > { %5342 = vmatprep.mubr.f32.mxu1 %v8167_v7  ;;  %5349 = vmatprep.subr.mxu0 %v5196_v5  ;;  %v5085_v5 = vld [vmem:[#allocation7 + $0x430] sm:$0xff] }
 0x3d9   : > { %5420 = vmatprep.subr.mxu1 %v5198_v6  ;;  %v5068_v6 = vld [vmem:[#allocation7 + $0x3a8] sm:$0xff] }
 0x410   : > { %v7363_v8 = vpop.f32.mrf.mxu0 }
 0x411   : > { %v7398_v9 = vpop.f32.mrf.mxu1 }
 0x412   : > { %v7364_v10 = vpop.f32.mrf.mxu0 }
 0x413   : > { %v7399_v12 = vpop.f32.mrf.mxu1  ;;  %v7365_v14 = vadd.f32 %v7364_v10, %v7363_v8  ;;  %v5070_v8 = vld [vmem:[#allocation7 + $0x3b8] sm:$0xff]  ;;  %v5069_v10 = vld [vmem:[#allocation7 + $0x3b0] sm:$0xff] }
 0x414   : > { %v7400_v15 = vadd.f32 %v7399_v12, %v7398_v9  ;;  %v5067_v9 = vld [vmem:[#allocation7 + $0x3a0] sm:$0xff]  ;;  %v5054_v12 = vld [vmem:[#allocation7 + $0x338] sm:$0xff] }
 0x416   : > { %v4527_v19 = vadd.f32 %v7400_v15, %v7365_v14  ;;  %v5036_v14 = vld [vmem:[#allocation7 + $0x2a8] sm:$0xff]  ;;  %v5038_v15 = vld [vmem:[#allocation7 + $0x2b8] sm:$0xff] }
 0x432   : > { %v7433_v11 = vpop.f32.mrf.mxu0 }
 0x434   : > { %v7468_v17 = vpop.f32.mrf.mxu1  ;;  %v7434_v13 = vpop.f32.mrf.mxu0 }
 0x435   : > { %v7435_v16 = vadd.f32 %v7434_v13, %v7433_v11  ;;  %v5052_v11 = vld [vmem:[#allocation7 + $0x328] sm:$0xff]  ;;  %v5053_v13 = vld [vmem:[#allocation7 + $0x330] sm:$0xff] }
 0x436   : > { %v7469_v18 = vpop.f32.mrf.mxu1 }
 0x437   : > { %v4597_v22 = vadd.f32 %v7435_v16, %v4527_v19  ;;  %v7470_v23 = vadd.f32 %v7469_v18, %v7468_v17  ;;  %v5051_v17 = vld [vmem:[#allocation7 + $0x320] sm:$0xff]  ;;  %v5037_v16 = vld [vmem:[#allocation7 + $0x2b0] sm:$0xff]  ;;  %v5020_v18 = vld [vmem:[#allocation7 + $0x228] sm:$0xff] }
 0x438   : > { %v5022_v19 = vld [vmem:[#allocation7 + $0x238] sm:$0xff] }
 0x439   : > { %v4667_v25 = vadd.f32 %v7470_v23, %v4597_v22  ;;  %v5004_v22 = vld [vmem:[#allocation7 + $0x1a8] sm:$0xff]  ;;  %v5006_v23 = vld [vmem:[#allocation7 + $0x1b8] sm:$0xff] }
 0x454   : > { %v7503_v20 = vpop.f32.mrf.mxu0 }
 0x456   : > { %v7538_v59 = vpop.f32.mrf.mxu1  ;;  %v7504_v21 = vpop.f32.mrf.mxu0 }
 0x457   : > { %v7505_v24 = vadd.f32 %v7504_v21, %v7503_v20  ;;  %v5035_v20 = vld [vmem:[#allocation7 + $0x2a0] sm:$0xff]  ;;  %v5021_v21 = vld [vmem:[#allocation7 + $0x230] sm:$0xff] }
 0x458   : > { %v7539_v60 = vpop.f32.mrf.mxu1 }
 0x459   : > { %v4737_v26 = vadd.f32 %v7505_v24, %v4667_v25  ;;  %v7540_v27 = vadd.f32 %v7539_v60, %v7538_v59  ;;  %v5019_v59 = vld [vmem:[#allocation7 + $0x220] sm:$0xff]  ;;  %v5005_v60 = vld [vmem:[#allocation7 + $0x1b0] sm:$0xff]  ;;  %v4988_v25 = vld [vmem:[#allocation7 + $0x128] sm:$0xff] }
 0x45a   : > { %v5003_v24 = vld [vmem:[#allocation7 + $0x1a0] sm:$0xff] }
 0x45b   : > { %v4807_v32 = vadd.f32 %v7540_v27, %v4737_v26  ;;  %v4990_v26 = vld [vmem:[#allocation7 + $0x138] sm:$0xff]  ;;  %v4987_v27 = vld [vmem:[#allocation7 + $0x120] sm:$0xff] }
 0x476   : > { %v7573_v28 = vpop.f32.mrf.mxu0 }
 0x477   : > { %v7608_v29 = vpop.f32.mrf.mxu1 }
 0x478   : > { %v7574_v30 = vpop.f32.mrf.mxu0 }
 0x479   : > { %v7609_v31 = vpop.f32.mrf.mxu1  ;;  %v7575_v33 = vadd.f32 %v7574_v30, %v7573_v28  ;;  %v4989_v28 = vld [vmem:[#allocation7 + $0x130] sm:$0xff]  ;;  %v4974_v30 = vld [vmem:[#allocation7 + $0xb8] sm:$0xff] }
 0x47a   : > { %v7610_v35 = vadd.f32 %v7609_v31, %v7608_v29  ;;  %v4972_v29 = vld [vmem:[#allocation7 + $0xa8] sm:$0xff]  ;;  %v4971_v31 = vld [vmem:[#allocation7 + $0xa0] sm:$0xff] }
 0x47b   : > { %v4877_v34 = vadd.f32 %v7575_v33, %v4807_v32  ;;  %v4973_v32 = vld [vmem:[#allocation7 + $0xb0] sm:$0xff]  ;;  %v4956_v33 = vld [vmem:[#allocation7 + $0x28] sm:$0xff] }
 0x47d   : > { %v4947_v36 = vadd.f32 %v7610_v35, %v4877_v34  ;;  %v4958_v34 = vld [vmem:[#allocation7 + $0x38] sm:$0xff]  ;;  %v4955_v35 = vld [vmem:[#allocation7 + $0x20] sm:$0xff] }
 0x47f   : > { %v8892_v37 = vmax.f32 %v4947_v36, 0.0  ;;  %v4957_v36 = vld [vmem:[#allocation7 + $0x30] sm:$0xff] }
 0x481   : > { %5272 = vmatmul.mubr.f32.vlgmr.msra.gmra.mxu0 %v8892_v37  ;;  %5343 = vmatmul.mubr.f32.vlgmr.msra.gmra.mxu1 %v8892_v37 }
 0x482   : > { %5350 = vmatpush1.msra.mxu0 %v5195_v38  ;;  %5421 = vmatpush1.msra.mxu1 %v5197_v39  ;;  %v5200_v38 = vld [vmem:[#allocation7 + $0x7c8] sm:$0xff]  ;;  %v5202_v39 = vld [vmem:[#allocation7 + $0x7d8] sm:$0xff] }
 0x483   : > { %5351 = vmatprep.subr.mxu0 %v5180_v40  ;;  %5422 = vmatprep.subr.mxu1 %v5182_v41  ;;  %v5199_v40 = vld [vmem:[#allocation7 + $0x7c0] sm:$0xff]  ;;  %v5201_v41 = vld [vmem:[#allocation7 + $0x7d0] sm:$0xff] }
 0x484   : > { %5352 = vmatpush1.msra.mxu0 %v5179_v42  ;;  %5423 = vmatpush1.msra.mxu1 %v5181_v43  ;;  %v5184_v42 = vld [vmem:[#allocation7 + $0x748] sm:$0xff]  ;;  %v5186_v43 = vld [vmem:[#allocation7 + $0x758] sm:$0xff] }
 0x485   : > { %5353 = vmatprep.subr.mxu0 %v5164_v44  ;;  %5424 = vmatprep.subr.mxu1 %v5166_v45  ;;  %v5183_v44 = vld [vmem:[#allocation7 + $0x740] sm:$0xff]  ;;  %v5185_v45 = vld [vmem:[#allocation7 + $0x750] sm:$0xff] }
 0x486   : > { %5354 = vmatpush1.msra.mxu0 %v5163_v46  ;;  %5425 = vmatpush1.msra.mxu1 %v5165_v47  ;;  %v5168_v46 = vld [vmem:[#allocation7 + $0x6c8] sm:$0xff]  ;;  %v5170_v47 = vld [vmem:[#allocation7 + $0x6d8] sm:$0xff] }
 0x487   : > { %5355 = vmatprep.subr.mxu0 %v5148_v48  ;;  %5426 = vmatprep.subr.mxu1 %v5150_v49  ;;  %v5167_v48 = vld [vmem:[#allocation7 + $0x6c0] sm:$0xff]  ;;  %v5169_v49 = vld [vmem:[#allocation7 + $0x6d0] sm:$0xff] }
 0x488   : > { %5356 = vmatpush1.msra.mxu0 %v5147_v50  ;;  %5427 = vmatpush1.msra.mxu1 %v5149_v51  ;;  %v5152_v50 = vld [vmem:[#allocation7 + $0x648] sm:$0xff]  ;;  %v5154_v51 = vld [vmem:[#allocation7 + $0x658] sm:$0xff] }
 0x489   : > { %5357 = vmatprep.subr.mxu0 %v5132_v52  ;;  %5428 = vmatprep.subr.mxu1 %v5134_v53  ;;  %v5151_v52 = vld [vmem:[#allocation7 + $0x640] sm:$0xff]  ;;  %v5153_v53 = vld [vmem:[#allocation7 + $0x650] sm:$0xff] }
 0x48a   : > { %5358 = vmatpush1.msra.mxu0 %v5131_v54  ;;  %5429 = vmatpush1.msra.mxu1 %v5133_v55  ;;  %v5136_v54 = vld [vmem:[#allocation7 + $0x5c8] sm:$0xff]  ;;  %v5138_v55 = vld [vmem:[#allocation7 + $0x5d8] sm:$0xff] }
 0x48b   : > { %5359 = vmatprep.subr.mxu0 %v5116_v56  ;;  %5430 = vmatprep.subr.mxu1 %v5118_v57  ;;  %v5135_v56 = vld [vmem:[#allocation7 + $0x5c0] sm:$0xff]  ;;  %v5137_v57 = vld [vmem:[#allocation7 + $0x5d0] sm:$0xff] }
 0x48c   : > { %5360 = vmatpush1.msra.mxu0 %v5115_v58  ;;  %5431 = vmatpush1.msra.mxu1 %v5117_v61  ;;  %v5120_v58 = vld [vmem:[#allocation7 + $0x548] sm:$0xff]  ;;  %v5122_v61 = vld [vmem:[#allocation7 + $0x558] sm:$0xff] }
 0x48d   : > { %5361 = vmatprep.subr.mxu0 %v5100_v62  ;;  %5432 = vmatprep.subr.mxu1 %v5102_v63  ;;  %v5119_v62 = vld [vmem:[#allocation7 + $0x540] sm:$0xff]  ;;  %v5121_v63 = vld [vmem:[#allocation7 + $0x550] sm:$0xff] }
 0x48e   : > { %5362 = vmatpush1.msra.mxu0 %v5099_v0  ;;  %5433 = vmatpush1.msra.mxu1 %v5101_v1  ;;  %v5104_v0 = vld [vmem:[#allocation7 + $0x4c8] sm:$0xff]  ;;  %v5106_v1 = vld [vmem:[#allocation7 + $0x4d8] sm:$0xff] }
 0x48f   : > { %5363 = vmatprep.subr.mxu0 %v5084_v2  ;;  %5434 = vmatprep.subr.mxu1 %v5086_v3  ;;  %v5103_v2 = vld [vmem:[#allocation7 + $0x4c0] sm:$0xff]  ;;  %v5105_v3 = vld [vmem:[#allocation7 + $0x4d0] sm:$0xff] }
 0x490   : > { %5364 = vmatpush1.msra.mxu0 %v5083_v4  ;;  %5435 = vmatpush1.msra.mxu1 %v5085_v5  ;;  %v5088_v4 = vld [vmem:[#allocation7 + $0x448] sm:$0xff]  ;;  %v5090_v5 = vld [vmem:[#allocation7 + $0x458] sm:$0xff] }
 0x491   : > { %5365 = vmatprep.subr.mxu0 %v5068_v6  ;;  %5436 = vmatprep.subr.mxu1 %v5070_v8  ;;  %v5087_v6 = vld [vmem:[#allocation7 + $0x440] sm:$0xff]  ;;  %v5089_v8 = vld [vmem:[#allocation7 + $0x450] sm:$0xff] }
 0x492   : > { %5366 = vmatpush1.msra.mxu0 %v5067_v9  ;;  %5437 = vmatpush1.msra.mxu1 %v5069_v10  ;;  %v5072_v9 = vld [vmem:[#allocation7 + $0x3c8] sm:$0xff]  ;;  %v5074_v10 = vld [vmem:[#allocation7 + $0x3d8] sm:$0xff] }
 0x493   : > { %5367 = vmatprep.subr.mxu0 %v5052_v11  ;;  %5438 = vmatprep.subr.mxu1 %v5054_v12  ;;  %v5071_v11 = vld [vmem:[#allocation7 + $0x3c0] sm:$0xff]  ;;  %v5073_v12 = vld [vmem:[#allocation7 + $0x3d0] sm:$0xff] }
 0x494   : > { %5368 = vmatpush1.msra.mxu0 %v5051_v17  ;;  %5439 = vmatpush1.msra.mxu1 %v5053_v13  ;;  %v5056_v17 = vld [vmem:[#allocation7 + $0x348] sm:$0xff]  ;;  %v5058_v13 = vld [vmem:[#allocation7 + $0x358] sm:$0xff] }
 0x495   : > { %5369 = vmatprep.subr.mxu0 %v5036_v14  ;;  %5440 = vmatprep.subr.mxu1 %v5038_v15  ;;  %v5055_v14 = vld [vmem:[#allocation7 + $0x340] sm:$0xff]  ;;  %v5057_v15 = vld [vmem:[#allocation7 + $0x350] sm:$0xff] }
 0x496   : > { %5370 = vmatpush1.msra.mxu0 %v5035_v20  ;;  %5441 = vmatpush1.msra.mxu1 %v5037_v16  ;;  %v5040_v20 = vld [vmem:[#allocation7 + $0x2c8] sm:$0xff]  ;;  %v5042_v16 = vld [vmem:[#allocation7 + $0x2d8] sm:$0xff] }
 0x497   : > { %5371 = vmatprep.subr.mxu0 %v5020_v18  ;;  %5442 = vmatprep.subr.mxu1 %v5022_v19  ;;  %v5039_v18 = vld [vmem:[#allocation7 + $0x2c0] sm:$0xff]  ;;  %v5041_v19 = vld [vmem:[#allocation7 + $0x2d0] sm:$0xff] }
 0x498   : > { %5372 = vmatpush1.msra.mxu0 %v5019_v59  ;;  %5443 = vmatpush1.msra.mxu1 %v5021_v21  ;;  %v5024_v59 = vld [vmem:[#allocation7 + $0x248] sm:$0xff]  ;;  %v5026_v21 = vld [vmem:[#allocation7 + $0x258] sm:$0xff] }
 0x499   : > { %5373 = vmatprep.subr.mxu0 %v5004_v22  ;;  %5444 = vmatprep.subr.mxu1 %v5006_v23  ;;  %v5023_v22 = vld [vmem:[#allocation7 + $0x240] sm:$0xff]  ;;  %v5025_v23 = vld [vmem:[#allocation7 + $0x250] sm:$0xff] }
 0x49a   : > { %5374 = vmatpush1.msra.mxu0 %v5003_v24  ;;  %5445 = vmatpush1.msra.mxu1 %v5005_v60  ;;  %v5008_v24 = vld [vmem:[#allocation7 + $0x1c8] sm:$0xff]  ;;  %v5010_v60 = vld [vmem:[#allocation7 + $0x1d8] sm:$0xff] }
 0x49b   : > { %5375 = vmatprep.subr.mxu0 %v4988_v25  ;;  %5446 = vmatprep.subr.mxu1 %v4990_v26  ;;  %v5007_v25 = vld [vmem:[#allocation7 + $0x1c0] sm:$0xff]  ;;  %v5009_v26 = vld [vmem:[#allocation7 + $0x1d0] sm:$0xff] }
 0x49c   : > { %5376 = vmatpush1.msra.mxu0 %v4987_v27  ;;  %5447 = vmatpush1.msra.mxu1 %v4989_v28  ;;  %v4992_v27 = vld [vmem:[#allocation7 + $0x148] sm:$0xff]  ;;  %v4994_v28 = vld [vmem:[#allocation7 + $0x158] sm:$0xff] }
 0x49d   : > { %5377 = vmatprep.subr.mxu0 %v4972_v29  ;;  %5448 = vmatprep.subr.mxu1 %v4974_v30  ;;  %v4991_v29 = vld [vmem:[#allocation7 + $0x140] sm:$0xff]  ;;  %v4993_v30 = vld [vmem:[#allocation7 + $0x150] sm:$0xff] }
 0x49e   : > { %5378 = vmatpush1.msra.mxu0 %v4971_v31  ;;  %5449 = vmatpush1.msra.mxu1 %v4973_v32  ;;  %v4976_v31 = vld [vmem:[#allocation7 + $0xc8] sm:$0xff]  ;;  %v4978_v32 = vld [vmem:[#allocation7 + $0xd8] sm:$0xff] }
 0x49f   : > { %5379 = vmatprep.subr.mxu0 %v4956_v33  ;;  %5450 = vmatprep.subr.mxu1 %v4958_v34  ;;  %v4975_v33 = vld [vmem:[#allocation7 + $0xc0] sm:$0xff]  ;;  %v4977_v34 = vld [vmem:[#allocation7 + $0xd0] sm:$0xff] }
 0x4a0   : > { %5380 = vmatpush1.msra.mxu0 %v4955_v35  ;;  %5413 = vmatprep.mubr.f32.mxu0 %v8167_v7  ;;  %v4960_v35 = vld [vmem:[#allocation7 + $0x48] sm:$0xff] }
 0x4a1   : > { %5451 = vmatpush1.msra.mxu1 %v4957_v36  ;;  %5484 = vmatprep.mubr.f32.mxu1 %v8167_v7  ;;  %v4962_v36 = vld [vmem:[#allocation7 + $0x58] sm:$0xff] }
 0x4a2   : > { %5414 = vmatmul.mubr.f32.vlgmr.msra.gmra.mxu0 %v8892_v37  ;;  %5485 = vmatmul.mubr.f32.vlgmr.msra.gmra.mxu1 %v8892_v37 }
 0x4a3   : > { %5491 = vmatprep.subr.mxu0 %v5200_v38  ;;  %5562 = vmatprep.subr.mxu1 %v5202_v39  ;;  %v4959_v38 = vld [vmem:[#allocation7 + $0x40] sm:$0xff]  ;;  %v4961_v39 = vld [vmem:[#allocation7 + $0x50] sm:$0xff] }
 0x4a4   : > { %5492 = vmatpush1.msra.mxu0 %v5199_v40  ;;  %5563 = vmatpush1.msra.mxu1 %v5201_v41  ;;  %v5204_v40 = vld [vmem:[#allocation7 + $0x7e8] sm:$0xff]  ;;  %v5206_v41 = vld [vmem:[#allocation7 + $0x7f8] sm:$0xff] }
 0x4a5   : > { %5493 = vmatprep.subr.mxu0 %v5184_v42  ;;  %5564 = vmatprep.subr.mxu1 %v5186_v43  ;;  %v5203_v42 = vld [vmem:[#allocation7 + $0x7e0] sm:$0xff]  ;;  %v5205_v43 = vld [vmem:[#allocation7 + $0x7f0] sm:$0xff] }
 0x4a6   : > { %5494 = vmatpush1.msra.mxu0 %v5183_v44  ;;  %5565 = vmatpush1.msra.mxu1 %v5185_v45  ;;  %v5188_v44 = vld [vmem:[#allocation7 + $0x768] sm:$0xff]  ;;  %v5190_v45 = vld [vmem:[#allocation7 + $0x778] sm:$0xff] }
 0x4a7   : > { %5495 = vmatprep.subr.mxu0 %v5168_v46  ;;  %5566 = vmatprep.subr.mxu1 %v5170_v47  ;;  %v5187_v46 = vld [vmem:[#allocation7 + $0x760] sm:$0xff]  ;;  %v5189_v47 = vld [vmem:[#allocation7 + $0x770] sm:$0xff] }
 0x4a8   : > { %5496 = vmatpush1.msra.mxu0 %v5167_v48  ;;  %5567 = vmatpush1.msra.mxu1 %v5169_v49  ;;  %v5172_v48 = vld [vmem:[#allocation7 + $0x6e8] sm:$0xff]  ;;  %v5174_v49 = vld [vmem:[#allocation7 + $0x6f8] sm:$0xff] }
 0x4a9   : > { %5497 = vmatprep.subr.mxu0 %v5152_v50  ;;  %5568 = vmatprep.subr.mxu1 %v5154_v51  ;;  %v5171_v50 = vld [vmem:[#allocation7 + $0x6e0] sm:$0xff]  ;;  %v5173_v51 = vld [vmem:[#allocation7 + $0x6f0] sm:$0xff] }
 0x4aa   : > { %5498 = vmatpush1.msra.mxu0 %v5151_v52  ;;  %5569 = vmatpush1.msra.mxu1 %v5153_v53  ;;  %v5156_v52 = vld [vmem:[#allocation7 + $0x668] sm:$0xff]  ;;  %v5158_v53 = vld [vmem:[#allocation7 + $0x678] sm:$0xff] }
 0x4ab   : > { %5499 = vmatprep.subr.mxu0 %v5136_v54  ;;  %5570 = vmatprep.subr.mxu1 %v5138_v55  ;;  %v5155_v54 = vld [vmem:[#allocation7 + $0x660] sm:$0xff]  ;;  %v5157_v55 = vld [vmem:[#allocation7 + $0x670] sm:$0xff] }
 0x4ac   : > { %5500 = vmatpush1.msra.mxu0 %v5135_v56  ;;  %5571 = vmatpush1.msra.mxu1 %v5137_v57  ;;  %v5140_v56 = vld [vmem:[#allocation7 + $0x5e8] sm:$0xff]  ;;  %v5142_v57 = vld [vmem:[#allocation7 + $0x5f8] sm:$0xff] }
 0x4ad   : > { %5501 = vmatprep.subr.mxu0 %v5120_v58  ;;  %5572 = vmatprep.subr.mxu1 %v5122_v61  ;;  %v5139_v58 = vld [vmem:[#allocation7 + $0x5e0] sm:$0xff]  ;;  %v5141_v61 = vld [vmem:[#allocation7 + $0x5f0] sm:$0xff] }
 0x4ae   : > { %5502 = vmatpush1.msra.mxu0 %v5119_v62  ;;  %5573 = vmatpush1.msra.mxu1 %v5121_v63  ;;  %v5124_v62 = vld [vmem:[#allocation7 + $0x568] sm:$0xff]  ;;  %v5126_v63 = vld [vmem:[#allocation7 + $0x578] sm:$0xff] }
 0x4af   : > { %5503 = vmatprep.subr.mxu0 %v5104_v0  ;;  %5574 = vmatprep.subr.mxu1 %v5106_v1  ;;  %v5123_v0 = vld [vmem:[#allocation7 + $0x560] sm:$0xff]  ;;  %v5125_v1 = vld [vmem:[#allocation7 + $0x570] sm:$0xff] }
 0x4b0   : > { %5504 = vmatpush1.msra.mxu0 %v5103_v2  ;;  %5575 = vmatpush1.msra.mxu1 %v5105_v3  ;;  %v5108_v2 = vld [vmem:[#allocation7 + $0x4e8] sm:$0xff]  ;;  %v5110_v3 = vld [vmem:[#allocation7 + $0x4f8] sm:$0xff] }
 0x4b1   : > { %5505 = vmatprep.subr.mxu0 %v5088_v4  ;;  %5576 = vmatprep.subr.mxu1 %v5090_v5  ;;  %v5107_v4 = vld [vmem:[#allocation7 + $0x4e0] sm:$0xff]  ;;  %v5109_v5 = vld [vmem:[#allocation7 + $0x4f0] sm:$0xff] }
 0x4b2   : > { %5506 = vmatpush1.msra.mxu0 %v5087_v6  ;;  %5577 = vmatpush1.msra.mxu1 %v5089_v8  ;;  %v5092_v6 = vld [vmem:[#allocation7 + $0x468] sm:$0xff]  ;;  %v5094_v8 = vld [vmem:[#allocation7 + $0x478] sm:$0xff] }
 0x4b3   : > { %5507 = vmatprep.subr.mxu0 %v5072_v9  ;;  %5578 = vmatprep.subr.mxu1 %v5074_v10  ;;  %v5091_v9 = vld [vmem:[#allocation7 + $0x460] sm:$0xff]  ;;  %v5093_v10 = vld [vmem:[#allocation7 + $0x470] sm:$0xff] }
 0x4b4   : > { %5508 = vmatpush1.msra.mxu0 %v5071_v11  ;;  %5579 = vmatpush1.msra.mxu1 %v5073_v12  ;;  %v5076_v11 = vld [vmem:[#allocation7 + $0x3e8] sm:$0xff]  ;;  %v5078_v12 = vld [vmem:[#allocation7 + $0x3f8] sm:$0xff] }
 0x4b5   : > { %5509 = vmatprep.subr.mxu0 %v5056_v17  ;;  %5580 = vmatprep.subr.mxu1 %v5058_v13  ;;  %v5075_v17 = vld [vmem:[#allocation7 + $0x3e0] sm:$0xff]  ;;  %v5077_v13 = vld [vmem:[#allocation7 + $0x3f0] sm:$0xff] }
 0x4b6   : > { %5510 = vmatpush1.msra.mxu0 %v5055_v14  ;;  %5581 = vmatpush1.msra.mxu1 %v5057_v15  ;;  %v5060_v14 = vld [vmem:[#allocation7 + $0x368] sm:$0xff]  ;;  %v5062_v15 = vld [vmem:[#allocation7 + $0x378] sm:$0xff] }
 0x4b7   : > { %5511 = vmatprep.subr.mxu0 %v5040_v20  ;;  %5582 = vmatprep.subr.mxu1 %v5042_v16  ;;  %v5059_v20 = vld [vmem:[#allocation7 + $0x360] sm:$0xff]  ;;  %v5061_v16 = vld [vmem:[#allocation7 + $0x370] sm:$0xff] }
 0x4b8   : > { %5512 = vmatpush1.msra.mxu0 %v5039_v18  ;;  %5583 = vmatpush1.msra.mxu1 %v5041_v19  ;;  %v5044_v18 = vld [vmem:[#allocation7 + $0x2e8] sm:$0xff]  ;;  %v5046_v19 = vld [vmem:[#allocation7 + $0x2f8] sm:$0xff] }
 0x4b9   : > { %5513 = vmatprep.subr.mxu0 %v5024_v59  ;;  %5584 = vmatprep.subr.mxu1 %v5026_v21  ;;  %v5043_v59 = vld [vmem:[#allocation7 + $0x2e0] sm:$0xff]  ;;  %v5045_v21 = vld [vmem:[#allocation7 + $0x2f0] sm:$0xff] }
 0x4ba   : > { %5514 = vmatpush1.msra.mxu0 %v5023_v22  ;;  %5585 = vmatpush1.msra.mxu1 %v5025_v23  ;;  %v5028_v22 = vld [vmem:[#allocation7 + $0x268] sm:$0xff]  ;;  %v5030_v23 = vld [vmem:[#allocation7 + $0x278] sm:$0xff] }
 0x4bb   : > { %5515 = vmatprep.subr.mxu0 %v5008_v24  ;;  %5586 = vmatprep.subr.mxu1 %v5010_v60  ;;  %v5027_v24 = vld [vmem:[#allocation7 + $0x260] sm:$0xff]  ;;  %v5029_v60 = vld [vmem:[#allocation7 + $0x270] sm:$0xff] }
 0x4bc   : > { %5516 = vmatpush1.msra.mxu0 %v5007_v25  ;;  %5587 = vmatpush1.msra.mxu1 %v5009_v26  ;;  %v5012_v25 = vld [vmem:[#allocation7 + $0x1e8] sm:$0xff]  ;;  %v5014_v26 = vld [vmem:[#allocation7 + $0x1f8] sm:$0xff] }
 0x4bd   : > { %5517 = vmatprep.subr.mxu0 %v4992_v27  ;;  %5588 = vmatprep.subr.mxu1 %v4994_v28  ;;  %v5011_v27 = vld [vmem:[#allocation7 + $0x1e0] sm:$0xff]  ;;  %v5013_v28 = vld [vmem:[#allocation7 + $0x1f0] sm:$0xff] }
 0x4be   : > { %5518 = vmatpush1.msra.mxu0 %v4991_v29  ;;  %5589 = vmatpush1.msra.mxu1 %v4993_v30  ;;  %v4996_v29 = vld [vmem:[#allocation7 + $0x168] sm:$0xff]  ;;  %v4998_v30 = vld [vmem:[#allocation7 + $0x178] sm:$0xff] }
 0x4bf   : > { %5519 = vmatprep.subr.mxu0 %v4976_v31  ;;  %5590 = vmatprep.subr.mxu1 %v4978_v32  ;;  %v4995_v31 = vld [vmem:[#allocation7 + $0x160] sm:$0xff]  ;;  %v4997_v32 = vld [vmem:[#allocation7 + $0x170] sm:$0xff] }
 0x4c0   : > { %5520 = vmatpush1.msra.mxu0 %v4975_v33  ;;  %5591 = vmatpush1.msra.mxu1 %v4977_v34  ;;  %v4980_v33 = vld [vmem:[#allocation7 + $0xe8] sm:$0xff]  ;;  %v4982_v34 = vld [vmem:[#allocation7 + $0xf8] sm:$0xff] }
 0x4c1   : > { %5521 = vmatprep.subr.mxu0 %v4960_v35  ;;  %5592 = vmatprep.subr.mxu1 %v4962_v36  ;;  %v4979_v35 = vld [vmem:[#allocation7 + $0xe0] sm:$0xff]  ;;  %v4981_v36 = vld [vmem:[#allocation7 + $0xf0] sm:$0xff] }
 0x4c2   : > { %5522 = vmatpush1.msra.mxu0 %v4959_v38  ;;  %5555 = vmatprep.mubr.f32.mxu0 %v8167_v7  ;;  %v4964_v38 = vld [vmem:[#allocation7 + $0x68] sm:$0xff] }
 0x4c3   : > { %5593 = vmatpush1.msra.mxu1 %v4961_v39  ;;  %5626 = vmatprep.mubr.f32.mxu1 %v8167_v7  ;;  %v4966_v39 = vld [vmem:[#allocation7 + $0x78] sm:$0xff] }
 0x4c4   : > { %5556 = vmatmul.mubr.f32.vlgmr.msra.gmra.mxu0 %v8892_v37  ;;  %5627 = vmatmul.mubr.f32.vlgmr.msra.gmra.mxu1 %v8892_v37 }
 0x4c5   : > { %5633 = vmatprep.subr.mxu0 %v5204_v40  ;;  %5704 = vmatprep.subr.mxu1 %v5206_v41  ;;  %v4963_v40 = vld [vmem:[#allocation7 + $0x60] sm:$0xff]  ;;  %v4965_v41 = vld [vmem:[#allocation7 + $0x70] sm:$0xff] }
 0x4c6   : > { %5634 = vmatpush1.msra.mxu0 %v5203_v42  ;;  %5705 = vmatpush1.msra.mxu1 %v5205_v43  ;;  %v5918_v42 = vld [vmem:[%s9699_s4 + $0xf8] sm:$0xff] }
 0x4c7   : > { %5635 = vmatprep.subr.mxu0 %v5188_v44  ;;  %5706 = vmatprep.subr.mxu1 %v5190_v45  ;;  %v5950_v43 = vld [vmem:[%s9699_s4 + $0x1f8] sm:$0xff] }
 0x4c8   : > { %5636 = vmatpush1.msra.mxu0 %v5187_v46  ;;  %5707 = vmatpush1.msra.mxu1 %v5189_v47  ;;  %v5902_v44 = vld [vmem:[%s9699_s4 + $0x78] sm:$0xff]  ;;  %v5917_v46 = vld [vmem:[%s9699_s4 + $0xf0] sm:$0xff] }
 0x4c9   : > { %5637 = vmatprep.subr.mxu0 %v5172_v48  ;;  %5708 = vmatprep.subr.mxu1 %v5174_v49  ;;  %v5934_v45 = vld [vmem:[%s9699_s4 + $0x178] sm:$0xff]  ;;  %v5901_v47 = vld [vmem:[%s9699_s4 + $0x70] sm:$0xff]  ;;  %v5948_v49 = vld [vmem:[%s9699_s4 + $0x1e8] sm:$0xff] }
 0x4ca   : > { %5638 = vmatpush1.msra.mxu0 %v5171_v50  ;;  %5709 = vmatpush1.msra.mxu1 %v5173_v51  ;;  %v5933_v48 = vld [vmem:[%s9699_s4 + $0x170] sm:$0xff]  ;;  %v5900_v50 = vld [vmem:[%s9699_s4 + $0x68] sm:$0xff] }
 0x4cb   : > { %5639 = vmatprep.subr.mxu0 %v5156_v52  ;;  %5710 = vmatprep.subr.mxu1 %v5158_v53  ;;  %v5932_v51 = vld [vmem:[%s9699_s4 + $0x168] sm:$0xff]  ;;  %v5915_v52 = vld [vmem:[%s9699_s4 + $0xe0] sm:$0xff] }
 0x4cc   : > { %5640 = vmatpush1.msra.mxu0 %v5155_v54  ;;  %5711 = vmatpush1.msra.mxu1 %v5157_v55  ;;  %v5947_v53 = vld [vmem:[%s9699_s4 + $0x1e0] sm:$0xff] }
 0x4cd   : > { %5641 = vmatprep.subr.mxu0 %v5140_v56  ;;  %5712 = vmatprep.subr.mxu1 %v5142_v57  ;;  %v5899_v54 = vld [vmem:[%s9699_s4 + $0x60] sm:$0xff]  ;;  %v5914_v56 = vld [vmem:[%s9699_s4 + $0xd8] sm:$0xff] }
 0x4ce   : > { %5642 = vmatpush1.msra.mxu0 %v5139_v58  ;;  %5713 = vmatpush1.msra.mxu1 %v5141_v61  ;;  %v5931_v55 = vld [vmem:[%s9699_s4 + $0x160] sm:$0xff]  ;;  %v5946_v57 = vld [vmem:[%s9699_s4 + $0x1d8] sm:$0xff] }
 0x4cf   : > { %5643 = vmatprep.subr.mxu0 %v5124_v62  ;;  %5714 = vmatprep.subr.mxu1 %v5126_v63  ;;  %v5898_v58 = vld [vmem:[%s9699_s4 + $0x58] sm:$0xff]  ;;  %v5913_v62 = vld [vmem:[%s9699_s4 + $0xd0] sm:$0xff] }
 0x4d0   : > { %5644 = vmatpush1.msra.mxu0 %v5123_v0  ;;  %5715 = vmatpush1.msra.mxu1 %v5125_v1  ;;  %v5930_v61 = vld [vmem:[%s9699_s4 + $0x158] sm:$0xff]  ;;  %v5945_v63 = vld [vmem:[%s9699_s4 + $0x1d0] sm:$0xff] }
 0x4d1   : > { %5645 = vmatprep.subr.mxu0 %v5108_v2  ;;  %5716 = vmatprep.subr.mxu1 %v5110_v3  ;;  %v5897_v0 = vld [vmem:[%s9699_s4 + $0x50] sm:$0xff]  ;;  %v5912_v2 = vld [vmem:[%s9699_s4 + $0xc8] sm:$0xff] }
 0x4d2   : > { %5646 = vmatpush1.msra.mxu0 %v5107_v4  ;;  %5717 = vmatpush1.msra.mxu1 %v5109_v5  ;;  %v5929_v1 = vld [vmem:[%s9699_s4 + $0x150] sm:$0xff]  ;;  %v5944_v3 = vld [vmem:[%s9699_s4 + $0x1c8] sm:$0xff] }
 0x4d3   : > { %5647 = vmatprep.subr.mxu0 %v5092_v6  ;;  %5718 = vmatprep.subr.mxu1 %v5094_v8  ;;  %v5896_v4 = vld [vmem:[%s9699_s4 + $0x48] sm:$0xff]  ;;  %v5911_v6 = vld [vmem:[%s9699_s4 + $0xc0] sm:$0xff] }
 0x4d4   : > { %5648 = vmatpush1.msra.mxu0 %v5091_v9  ;;  %5719 = vmatpush1.msra.mxu1 %v5093_v10  ;;  %v5928_v5 = vld [vmem:[%s9699_s4 + $0x148] sm:$0xff]  ;;  %v5943_v8 = vld [vmem:[%s9699_s4 + $0x1c0] sm:$0xff] }
 0x4d5   : > { %5649 = vmatprep.subr.mxu0 %v5076_v11  ;;  %5720 = vmatprep.subr.mxu1 %v5078_v12  ;;  %v5895_v9 = vld [vmem:[%s9699_s4 + $0x40] sm:$0xff]  ;;  %v5910_v11 = vld [vmem:[%s9699_s4 + $0xb8] sm:$0xff] }
 0x4d6   : > { %5650 = vmatpush1.msra.mxu0 %v5075_v17  ;;  %5721 = vmatpush1.msra.mxu1 %v5077_v13  ;;  %v5927_v10 = vld [vmem:[%s9699_s4 + $0x140] sm:$0xff]  ;;  %v5942_v12 = vld [vmem:[%s9699_s4 + $0x1b8] sm:$0xff] }
 0x4d7   : > { %5651 = vmatprep.subr.mxu0 %v5060_v14  ;;  %5722 = vmatprep.subr.mxu1 %v5062_v15  ;;  %v5894_v17 = vld [vmem:[%s9699_s4 + $0x38] sm:$0xff]  ;;  %v5909_v14 = vld [vmem:[%s9699_s4 + $0xb0] sm:$0xff] }
 0x4d8   : > { %5652 = vmatpush1.msra.mxu0 %v5059_v20  ;;  %5723 = vmatpush1.msra.mxu1 %v5061_v16  ;;  %v5926_v13 = vld [vmem:[%s9699_s4 + $0x138] sm:$0xff]  ;;  %v5941_v15 = vld [vmem:[%s9699_s4 + $0x1b0] sm:$0xff] }
 0x4d9   : > { %5653 = vmatprep.subr.mxu0 %v5044_v18  ;;  %5724 = vmatprep.subr.mxu1 %v5046_v19  ;;  %v5893_v20 = vld [vmem:[%s9699_s4 + $0x30] sm:$0xff]  ;;  %v5908_v18 = vld [vmem:[%s9699_s4 + $0xa8] sm:$0xff] }
 0x4da   : > { %5654 = vmatpush1.msra.mxu0 %v5043_v59  ;;  %5725 = vmatpush1.msra.mxu1 %v5045_v21  ;;  %v5925_v16 = vld [vmem:[%s9699_s4 + $0x130] sm:$0xff]  ;;  %v5940_v19 = vld [vmem:[%s9699_s4 + $0x1a8] sm:$0xff] }
 0x4db   : > { %5655 = vmatprep.subr.mxu0 %v5028_v22  ;;  %5726 = vmatprep.subr.mxu1 %v5030_v23  ;;  %v5892_v59 = vld [vmem:[%s9699_s4 + $0x28] sm:$0xff]  ;;  %v5907_v22 = vld [vmem:[%s9699_s4 + $0xa0] sm:$0xff] }
 0x4dc   : > { %5656 = vmatpush1.msra.mxu0 %v5027_v24  ;;  %5727 = vmatpush1.msra.mxu1 %v5029_v60  ;;  %v5924_v21 = vld [vmem:[%s9699_s4 + $0x128] sm:$0xff]  ;;  %v5939_v23 = vld [vmem:[%s9699_s4 + $0x1a0] sm:$0xff] }
 0x4dd   : > { %5657 = vmatprep.subr.mxu0 %v5012_v25  ;;  %5728 = vmatprep.subr.mxu1 %v5014_v26  ;;  %v5891_v24 = vld [vmem:[%s9699_s4 + $0x20] sm:$0xff]  ;;  %v5906_v25 = vld [vmem:[%s9699_s4 + $0x98] sm:$0xff] }
 0x4de   : > { %5658 = vmatpush1.msra.mxu0 %v5011_v27  ;;  %5729 = vmatpush1.msra.mxu1 %v5013_v28  ;;  %v5923_v60 = vld [vmem:[%s9699_s4 + $0x120] sm:$0xff]  ;;  %v5938_v26 = vld [vmem:[%s9699_s4 + $0x198] sm:$0xff] }
 0x4df   : > { %5659 = vmatprep.subr.mxu0 %v4996_v29  ;;  %5730 = vmatprep.subr.mxu1 %v4998_v30  ;;  %v5890_v27 = vld [vmem:[%s9699_s4 + $0x18] sm:$0xff]  ;;  %v5905_v29 = vld [vmem:[%s9699_s4 + $0x90] sm:$0xff] }
 0x4e0   : > { %5660 = vmatpush1.msra.mxu0 %v4995_v31  ;;  %5731 = vmatpush1.msra.mxu1 %v4997_v32  ;;  %v5922_v28 = vld [vmem:[%s9699_s4 + $0x118] sm:$0xff]  ;;  %v5937_v30 = vld [vmem:[%s9699_s4 + $0x190] sm:$0xff] }
 0x4e1   : > { %5661 = vmatprep.subr.mxu0 %v4980_v33  ;;  %5732 = vmatprep.subr.mxu1 %v4982_v34  ;;  %v5889_v31 = vld [vmem:[%s9699_s4 + $0x10] sm:$0xff]  ;;  %v5904_v33 = vld [vmem:[%s9699_s4 + $0x88] sm:$0xff] }
 0x4e2   : > { %5662 = vmatpush1.msra.mxu0 %v4979_v35  ;;  %5733 = vmatpush1.msra.mxu1 %v4981_v36  ;;  %v5921_v32 = vld [vmem:[%s9699_s4 + $0x110] sm:$0xff]  ;;  %v5936_v34 = vld [vmem:[%s9699_s4 + $0x188] sm:$0xff] }
 0x4e3   : > { %5663 = vmatprep.subr.mxu0 %v4964_v38  ;;  %5734 = vmatprep.subr.mxu1 %v4966_v39  ;;  %v5888_v35 = vld [vmem:[%s9699_s4 + $0x8] sm:$0xff]  ;;  %v5903_v38 = vld [vmem:[%s9699_s4 + $0x80] sm:$0xff] }
 0x4e4   : > { %5664 = vmatpush1.msra.mxu0 %v4963_v40  ;;  %5697 = vmatprep.mubr.f32.mxu0 %v8167_v7  ;;  %v5920_v36 = vld [vmem:[%s9699_s4 + $0x108] sm:$0xff]  ;;  %v5935_v39 = vld [vmem:[%s9699_s4 + $0x180] sm:$0xff] }
 0x4e5   : > { %5735 = vmatpush1.msra.mxu1 %v4965_v41  ;;  %5768 = vmatprep.mubr.f32.mxu1 %v8167_v7  ;;  %v5949_v7 = vld [vmem:[%s9699_s4 + $0x1f0] sm:$0xff]  ;;  %v5887_v40 = vld [vmem:[%s9699_s4] sm:$0xff] }
 0x4e6   : > { %5698 = vmatmul.mubr.f32.vlgmr.msra.gmra.mxu0 %v8892_v37  ;;  %5769 = vmatmul.mubr.f32.vlgmr.msra.gmra.mxu1 %v8892_v37  ;;  %v5916_v37 = vld [vmem:[%s9699_s4 + $0xe8] sm:$0xff]  ;;  %v5919_v41 = vld [vmem:[%s9699_s4 + $0x100] sm:$0xff] }
 0x4e7   : > { %7611 = vmatprep.subr.mxu0 %v5918_v42  ;;  %7646 = vmatprep.subr.mxu1 %v5950_v43  ;;  %v5982_v42 = vld [vmem:[%s9699_s4 + $0x2f8] sm:$0xff] }
 0x4e8   : > { %7612 = vmatpush3.msra.mxu0 %v5902_v44  ;;  %7647 = vmatpush3.msra.mxu1 %v5934_v45  ;;  %v6014_v43 = vld [vmem:[%s9699_s4 + $0x3f8] sm:$0xff] }
 0x4e9   : > { %7613 = vmatprep.subr.mxu0 %v5917_v46  ;;  %7648 = vmatprep.subr.mxu1 %v5949_v7 }
 0x4ea   : > { %7614 = vmatpush3.msra.mxu0 %v5901_v47  ;;  %7649 = vmatpush3.msra.mxu1 %v5933_v48 }
 0x4eb   : > { %7615 = vmatprep.subr.mxu0 %v5916_v37  ;;  %7650 = vmatprep.subr.mxu1 %v5948_v49 }
 0x4ec   : > { %7616 = vmatpush3.msra.mxu0 %v5900_v50  ;;  %7651 = vmatpush3.msra.mxu1 %v5932_v51 }
 0x4ed   : > { %7617 = vmatprep.subr.mxu0 %v5915_v52  ;;  %7652 = vmatprep.subr.mxu1 %v5947_v53 }
 0x4ee   : > { %7618 = vmatpush3.msra.mxu0 %v5899_v54  ;;  %7653 = vmatpush3.msra.mxu1 %v5931_v55 }
 0x4ef   : > { %7619 = vmatprep.subr.mxu0 %v5914_v56  ;;  %7654 = vmatprep.subr.mxu1 %v5946_v57 }
 0x4f0   : > { %7620 = vmatpush3.msra.mxu0 %v5898_v58  ;;  %7655 = vmatpush3.msra.mxu1 %v5930_v61 }
 0x4f1   : > { %7621 = vmatprep.subr.mxu0 %v5913_v62  ;;  %7656 = vmatprep.subr.mxu1 %v5945_v63 }
 0x4f2   : > { %7622 = vmatpush3.msra.mxu0 %v5897_v0  ;;  %7657 = vmatpush3.msra.mxu1 %v5929_v1 }
 0x4f3   : > { %7623 = vmatprep.subr.mxu0 %v5912_v2  ;;  %7658 = vmatprep.subr.mxu1 %v5944_v3 }
 0x4f4   : > { %7624 = vmatpush3.msra.mxu0 %v5896_v4  ;;  %7659 = vmatpush3.msra.mxu1 %v5928_v5 }
 0x4f5   : > { %7625 = vmatprep.subr.mxu0 %v5911_v6  ;;  %7660 = vmatprep.subr.mxu1 %v5943_v8  ;;  %v8022_v6 = vld [vmem:[#allocation2] sm:$0xff] }
 0x4f6   : > { %7626 = vmatpush3.msra.mxu0 %v5895_v9  ;;  %7661 = vmatpush3.msra.mxu1 %v5927_v10  ;;  %v8023_v9 = vld [vmem:[#allocation2 + $0x30] sm:$0xff] }
 0x4f7   : > { %7627 = vmatprep.subr.mxu0 %v5910_v11  ;;  %7662 = vmatprep.subr.mxu1 %v5942_v12 }
 0x4f8   : > { %7628 = vmatpush3.msra.mxu0 %v5894_v17  ;;  %7663 = vmatpush3.msra.mxu1 %v5926_v13  ;;  %v8024_v17 = vld [vmem:[#allocation2 + $0x18] sm:$0xff] }
 0x4f9   : > { %7629 = vmatprep.subr.mxu0 %v5909_v14  ;;  %7664 = vmatprep.subr.mxu1 %v5941_v15  ;;  %v5966_v14 = vld [vmem:[%s9699_s4 + $0x278] sm:$0xff] }
 0x4fa   : > { %7630 = vmatpush3.msra.mxu0 %v5893_v20  ;;  %7665 = vmatpush3.msra.mxu1 %v5925_v16  ;;  %v8025_v15 = vld [vmem:[#allocation2 + $0x58] sm:$0xff] }
 0x4fb   : > { %7631 = vmatprep.subr.mxu0 %v5908_v18  ;;  %7666 = vmatprep.subr.mxu1 %v5940_v19  ;;  %v5998_v16 = vld [vmem:[%s9699_s4 + $0x378] sm:$0xff]  ;;  %v5981_v18 = vld [vmem:[%s9699_s4 + $0x2f0] sm:$0xff] }
 0x4fc   : > { %7632 = vmatpush3.msra.mxu0 %v5892_v59  ;;  %7667 = vmatpush3.msra.mxu1 %v5924_v21  ;;  %v6013_v19 = vld [vmem:[%s9699_s4 + $0x3f0] sm:$0xff] }
 0x4fd   : > { %7633 = vmatprep.subr.mxu0 %v5907_v22  ;;  %7668 = vmatprep.subr.mxu1 %v5939_v23  ;;  %v5965_v59 = vld [vmem:[%s9699_s4 + $0x270] sm:$0xff]  ;;  %v5980_v22 = vld [vmem:[%s9699_s4 + $0x2e8] sm:$0xff] }
 0x4fe   : > { %7634 = vmatpush3.msra.mxu0 %v5891_v24  ;;  %7669 = vmatpush3.msra.mxu1 %v5923_v60  ;;  %v5997_v21 = vld [vmem:[%s9699_s4 + $0x370] sm:$0xff]  ;;  %v6012_v23 = vld [vmem:[%s9699_s4 + $0x3e8] sm:$0xff] }
 0x4ff   : > { %7635 = vmatprep.subr.mxu0 %v5906_v25  ;;  %7670 = vmatprep.subr.mxu1 %v5938_v26  ;;  %v5964_v24 = vld [vmem:[%s9699_s4 + $0x268] sm:$0xff]  ;;  %v5979_v25 = vld [vmem:[%s9699_s4 + $0x2e0] sm:$0xff] }
 0x500   : > { %7636 = vmatpush3.msra.mxu0 %v5890_v27  ;;  %7671 = vmatpush3.msra.mxu1 %v5922_v28  ;;  %v5996_v60 = vld [vmem:[%s9699_s4 + $0x368] sm:$0xff]  ;;  %v6011_v26 = vld [vmem:[%s9699_s4 + $0x3e0] sm:$0xff] }
 0x501   : > { %7637 = vmatprep.subr.mxu0 %v5905_v29  ;;  %7672 = vmatprep.subr.mxu1 %v5937_v30  ;;  %v5963_v27 = vld [vmem:[%s9699_s4 + $0x260] sm:$0xff]  ;;  %v5978_v29 = vld [vmem:[%s9699_s4 + $0x2d8] sm:$0xff] }
 0x502   : > { %7638 = vmatpush3.msra.mxu0 %v5889_v31  ;;  %7673 = vmatpush3.msra.mxu1 %v5921_v32  ;;  %v5995_v28 = vld [vmem:[%s9699_s4 + $0x360] sm:$0xff]  ;;  %v6010_v30 = vld [vmem:[%s9699_s4 + $0x3d8] sm:$0xff] }
 0x503   : > { %7639 = vmatprep.subr.mxu0 %v5904_v33  ;;  %7674 = vmatprep.subr.mxu1 %v5936_v34  ;;  %v5962_v31 = vld [vmem:[%s9699_s4 + $0x258] sm:$0xff]  ;;  %v5977_v33 = vld [vmem:[%s9699_s4 + $0x2d0] sm:$0xff] }
 0x504   : > { %7640 = vmatpush3.msra.mxu0 %v5888_v35  ;;  %7675 = vmatpush3.msra.mxu1 %v5920_v36  ;;  %v5994_v32 = vld [vmem:[%s9699_s4 + $0x358] sm:$0xff]  ;;  %v6009_v34 = vld [vmem:[%s9699_s4 + $0x3d0] sm:$0xff] }
 0x505   : > { %7641 = vmatprep.subr.mxu0 %v5903_v38  ;;  %7676 = vmatprep.subr.mxu1 %v5935_v39  ;;  %v5961_v35 = vld [vmem:[%s9699_s4 + $0x250] sm:$0xff]  ;;  %v5976_v38 = vld [vmem:[%s9699_s4 + $0x2c8] sm:$0xff] }
 0x506   : > { %7642 = vmatpush3.msra.mxu0 %v5887_v40  ;;  %7677 = vmatpush3.msra.mxu1 %v5919_v41  ;;  %v5993_v36 = vld [vmem:[%s9699_s4 + $0x350] sm:$0xff]  ;;  %v6008_v39 = vld [vmem:[%s9699_s4 + $0x3c8] sm:$0xff] }
 0x507   : > { %7681 = vmatprep.subr.mxu0 %v5982_v42  ;;  %7716 = vmatprep.subr.mxu1 %v6014_v43  ;;  %v5960_v40 = vld [vmem:[%s9699_s4 + $0x248] sm:$0xff]  ;;  %v5975_v43 = vld [vmem:[%s9699_s4 + $0x2c0] sm:$0xff] }
 0x508   : > { %v5992_v42 = vld [vmem:[%s9699_s4 + $0x348] sm:$0xff] }
 0x541   : > { %v5273_v44 = vpop.f32.mrf.mxu0  ;;  %v5344_v45 = vpop.f32.mrf.mxu1 }
 0x542   : > { %v7310_v46 = vmul.f32 -1.442695, %v5273_v44  ;;  %v7312_v7 = vmul.f32 -1.442695, %v5344_v45 }
 0x543   : > { %v5275_v47 = vpop.f32.mrf.mxu0  ;;  %v5346_v48 = vpop.f32.mrf.mxu1 }
 0x544   : > { %7958 = vpow2.f32 %v7310_v46  ;;  %v7311_v37 = vmul.f32 -1.442695, %v5275_v47  ;;  %v7313_v49 = vmul.f32 -1.442695, %v5346_v48  ;;  %v6007_v46 = vld [vmem:[%s9699_s4 + $0x3c0] sm:$0xff] }
 0x545   : > { %7960 = vpow2.f32 %v7312_v7  ;;  %v5959_v7 = vld [vmem:[%s9699_s4 + $0x240] sm:$0xff] }
 0x546   : > { %7962 = vpow2.f32 %v7311_v37  ;;  %v5991_v37 = vld [vmem:[%s9699_s4 + $0x340] sm:$0xff] }
 0x547   : > { %7964 = vpow2.f32 %v7313_v49  ;;  %v5974_v49 = vld [vmem:[%s9699_s4 + $0x2b8] sm:$0xff] }
 0x551   : > { %v7959_v50 = vpop.eup %7958 }
 0x552   : > { %v7961_v51 = vpop.eup %7960  ;;  %v5823_v52 = vadd.f32 1.0, %v7959_v50 }
 0x553   : > { %v7963_v53 = vpop.eup %7962  ;;  %v5825_v54 = vadd.f32 1.0, %v7961_v51 }
 0x554   : > { %v7965_v55 = vpop.eup %7964  ;;  %7966 = vrcp.f32 %v5823_v52  ;;  %v5824_v56 = vadd.f32 1.0, %v7963_v53  ;;  %v6006_v52 = vld [vmem:[%s9699_s4 + $0x3b8] sm:$0xff] }
 0x555   : > { %7968 = vrcp.f32 %v5825_v54  ;;  %v5826_v57 = vadd.f32 1.0, %v7965_v55  ;;  %v5958_v53 = vld [vmem:[%s9699_s4 + $0x238] sm:$0xff] }
 0x556   : > { %7970 = vrcp.f32 %v5824_v56  ;;  %v5990_v55 = vld [vmem:[%s9699_s4 + $0x338] sm:$0xff]  ;;  %v5973_v56 = vld [vmem:[%s9699_s4 + $0x2b0] sm:$0xff] }
 0x557   : > { %7972 = vrcp.f32 %v5826_v57  ;;  %v6005_v57 = vld [vmem:[%s9699_s4 + $0x3b0] sm:$0xff] }
 0x561   : > { %v7967_v58 = vpop.eup %7966 }
 0x562   : > { %v7969_v61 = vpop.eup %7968  ;;  %v5415_v62 = vpop.f32.mrf.mxu0  ;;  %v5871_v10 = vmul.f32 %v8023_v9, %v7967_v58  ;;  %v5957_v58 = vld [vmem:[%s9699_s4 + $0x230] sm:$0xff]  ;;  %v5954_v9 = vld [vmem:[%s9699_s4 + $0x218] sm:$0xff] }
 0x563   : > { %v5486_v63 = vpop.f32.mrf.mxu1  ;;  %v7971_v0 = vpop.eup %7970  ;;  %v7314_v1 = vmul.f32 -1.442695, %v5415_v62  ;;  %v5873_v20 = vmul.f32 %v8025_v15, %v7969_v61  ;;  %v5989_v61 = vld [vmem:[%s9699_s4 + $0x330] sm:$0xff]  ;;  %v5972_v62 = vld [vmem:[%s9699_s4 + $0x2a8] sm:$0xff] }
 0x564   : > { %v7316_v2 = vmul.f32 -1.442695, %v5486_v63  ;;  %v7973_v3 = vpop.eup %7972  ;;  %v5417_v4 = vpop.f32.mrf.mxu0  ;;  %v5872_v8 = vmul.f32 %v8022_v6, %v7971_v0  ;;  %v6004_v63 = vld [vmem:[%s9699_s4 + $0x3a8] sm:$0xff]  ;;  %v5970_v6 = vld [vmem:[%s9699_s4 + $0x298] sm:$0xff] }
 0x565   : > { %v5488_v5 = vpop.f32.mrf.mxu1  ;;  %7974 = vpow2.f32 %v7314_v1  ;;  %v7315_v11 = vmul.f32 -1.442695, %v5417_v4  ;;  %v5874_v13 = vmul.f32 %v8024_v17, %v7973_v3  ;;  %v5956_v0 = vld [vmem:[%s9699_s4 + $0x228] sm:$0xff]  ;;  %v6003_v3 = vld [vmem:[%s9699_s4 + $0x3a0] sm:$0xff]  ;;  %v5953_v17 = vld [vmem:[%s9699_s4 + $0x210] sm:$0xff] }
 0x566   : > { %v7317_v12 = vmul.f32 -1.442695, %v5488_v5  ;;  %7976 = vpow2.f32 %v7316_v2  ;;  %6214 = vmatprep.mubr.f32.mxu0 %v5872_v8  ;;  %v5988_v1 = vld [vmem:[%s9699_s4 + $0x328] sm:$0xff]  ;;  %v5971_v2 = vld [vmem:[%s9699_s4 + $0x2a0] sm:$0xff]  ;;  %v6002_v8 = vld [vmem:[%s9699_s4 + $0x398] sm:$0xff] }
 0x567   : > { %7978 = vpow2.f32 %v7315_v11  ;;  %6284 = vmatprep.mubr.f32.mxu1 %v5874_v13  ;;  %6215 = vmatmul.mubr.f32.vlgmr.msra.gmra.mxu0 %v5871_v10  ;;  %v5955_v4 = vld [vmem:[%s9699_s4 + $0x220] sm:$0xff]  ;;  %v5986_v10 = vld [vmem:[%s9699_s4 + $0x318] sm:$0xff]  ;;  %v5969_v11 = vld [vmem:[%s9699_s4 + $0x290] sm:$0xff] }
 0x568   : > { %7980 = vpow2.f32 %v7317_v12  ;;  %6285 = vmatmul.mubr.f32.vlgmr.msra.gmra.mxu1 %v5873_v20  ;;  %7682 = vmatpush3.msra.mxu0 %v5966_v14  ;;  %v5987_v5 = vld [vmem:[%s9699_s4 + $0x320] sm:$0xff]  ;;  %v6001_v12 = vld [vmem:[%s9699_s4 + $0x390] sm:$0xff]  ;;  %v5968_v14 = vld [vmem:[%s9699_s4 + $0x288] sm:$0xff] }
 0x569   : > { %7717 = vmatpush3.msra.mxu1 %v5998_v16  ;;  %7683 = vmatprep.subr.mxu0 %v5981_v18  ;;  %v5985_v13 = vld [vmem:[%s9699_s4 + $0x310] sm:$0xff]  ;;  %v6000_v15 = vld [vmem:[%s9699_s4 + $0x388] sm:$0xff] }
 0x56a   : > { %7718 = vmatprep.subr.mxu1 %v6013_v19  ;;  %7684 = vmatpush3.msra.mxu0 %v5965_v59  ;;  %v5952_v20 = vld [vmem:[%s9699_s4 + $0x208] sm:$0xff]  ;;  %v5967_v19 = vld [vmem:[%s9699_s4 + $0x280] sm:$0xff] }
 0x56b   : > { %7719 = vmatpush3.msra.mxu1 %v5997_v21  ;;  %7685 = vmatprep.subr.mxu0 %v5980_v22  ;;  %v5984_v18 = vld [vmem:[%s9699_s4 + $0x308] sm:$0xff]  ;;  %v5999_v21 = vld [vmem:[%s9699_s4 + $0x380] sm:$0xff] }
 0x56c   : > { %7720 = vmatprep.subr.mxu1 %v6012_v23  ;;  %7686 = vmatpush3.msra.mxu0 %v5964_v24  ;;  %v5951_v22 = vld [vmem:[%s9699_s4 + $0x200] sm:$0xff] }
 0x56d   : > { %7721 = vmatpush3.msra.mxu1 %v5996_v60  ;;  %7687 = vmatprep.subr.mxu0 %v5979_v25  ;;  %v5983_v25 = vld [vmem:[%s9699_s4 + $0x300] sm:$0xff] }
 0x56e   : > { %7722 = vmatprep.subr.mxu1 %v6011_v26  ;;  %7688 = vmatpush3.msra.mxu0 %v5963_v27 }
 0x56f   : > { %7723 = vmatpush3.msra.mxu1 %v5995_v28  ;;  %7689 = vmatprep.subr.mxu0 %v5978_v29  ;;  %v8026_v29 = vld [vmem:[#allocation2 + $0x68] sm:$0xff] }
 0x570   : > { %7724 = vmatprep.subr.mxu1 %v6010_v30  ;;  %7690 = vmatpush3.msra.mxu0 %v5962_v31 }
 0x571   : > { %7725 = vmatpush3.msra.mxu1 %v5994_v32  ;;  %7691 = vmatprep.subr.mxu0 %v5977_v33  ;;  %v8027_v33 = vld [vmem:[#allocation2 + $0x48] sm:$0xff] }
 0x572   : > { %v7975_v41 = vpop.eup %7974  ;;  %7726 = vmatprep.subr.mxu1 %v6009_v34  ;;  %7692 = vmatpush3.msra.mxu0 %v5961_v35  ;;  %v8028_v35 = vld [vmem:[#allocation2 + $0x50] sm:$0xff] }
 0x573   : > { %v7977_v44 = vpop.eup %7976  ;;  %v5827_v45 = vadd.f32 1.0, %v7975_v41  ;;  %7727 = vmatpush3.msra.mxu1 %v5993_v36  ;;  %7693 = vmatprep.subr.mxu0 %v5976_v38  ;;  %v6046_v38 = vld [vmem:[%s9699_s4 + $0x4f8] sm:$0xff]  ;;  %v8029_v41 = vld [vmem:[#allocation2 + $0x8] sm:$0xff] }
 0x574   : > { %v7979_v47 = vpop.eup %7978  ;;  %v5829_v48 = vadd.f32 1.0, %v7977_v44  ;;  %7728 = vmatprep.subr.mxu1 %v6008_v39  ;;  %7694 = vmatpush3.msra.mxu0 %v5960_v40  ;;  %v6030_v44 = vld [vmem:[%s9699_s4 + $0x478] sm:$0xff] }
 0x575   : > { %v7981_v50 = vpop.eup %7980  ;;  %7982 = vrcp.f32 %v5827_v45  ;;  %v5828_v51 = vadd.f32 1.0, %v7979_v47  ;;  %7729 = vmatpush3.msra.mxu1 %v5992_v42  ;;  %7695 = vmatprep.subr.mxu0 %v5975_v43  ;;  %v6078_v43 = vld [vmem:[%s9699_s4 + $0x5f8] sm:$0xff]  ;;  %v6029_v47 = vld [vmem:[%s9699_s4 + $0x470] sm:$0xff] }
 0x576   : > { %7984 = vrcp.f32 %v5829_v48  ;;  %v5830_v54 = vadd.f32 1.0, %v7981_v50  ;;  %7730 = vmatprep.subr.mxu1 %v6007_v46  ;;  %7696 = vmatpush3.msra.mxu0 %v5959_v7  ;;  %v6062_v45 = vld [vmem:[%s9699_s4 + $0x578] sm:$0xff]  ;;  %v6045_v46 = vld [vmem:[%s9699_s4 + $0x4f0] sm:$0xff]  ;;  %v6028_v50 = vld [vmem:[%s9699_s4 + $0x468] sm:$0xff] }
 0x577   : > { %7986 = vrcp.f32 %v5828_v51  ;;  %7731 = vmatpush3.msra.mxu1 %v5991_v37  ;;  %7697 = vmatprep.subr.mxu0 %v5974_v49  ;;  %v6077_v7 = vld [vmem:[%s9699_s4 + $0x5f0] sm:$0xff]  ;;  %v6044_v37 = vld [vmem:[%s9699_s4 + $0x4e8] sm:$0xff] }
 0x578   : > { %7988 = vrcp.f32 %v5830_v54  ;;  %7732 = vmatprep.subr.mxu1 %v6006_v52  ;;  %7698 = vmatpush3.msra.mxu0 %v5958_v53  ;;  %v6061_v48 = vld [vmem:[%s9699_s4 + $0x570] sm:$0xff]  ;;  %v6076_v49 = vld [vmem:[%s9699_s4 + $0x5e8] sm:$0xff]  ;;  %v6043_v52 = vld [vmem:[%s9699_s4 + $0x4e0] sm:$0xff] }
 0x579   : > { %7733 = vmatpush3.msra.mxu1 %v5990_v55  ;;  %7699 = vmatprep.subr.mxu0 %v5973_v56  ;;  %v6060_v51 = vld [vmem:[%s9699_s4 + $0x568] sm:$0xff]  ;;  %v6075_v53 = vld [vmem:[%s9699_s4 + $0x5e0] sm:$0xff]  ;;  %v6042_v56 = vld [vmem:[%s9699_s4 + $0x4d8] sm:$0xff] }
 0x57a   : > { %7734 = vmatprep.subr.mxu1 %v6005_v57  ;;  %7700 = vmatpush3.msra.mxu0 %v5957_v58  ;;  %v6027_v54 = vld [vmem:[%s9699_s4 + $0x460] sm:$0xff]  ;;  %v6074_v57 = vld [vmem:[%s9699_s4 + $0x5d8] sm:$0xff] }
 0x57b   : > { %7735 = vmatpush3.msra.mxu1 %v5989_v61  ;;  %7701 = vmatprep.subr.mxu0 %v5972_v62  ;;  %v6059_v55 = vld [vmem:[%s9699_s4 + $0x560] sm:$0xff]  ;;  %v6026_v58 = vld [vmem:[%s9699_s4 + $0x458] sm:$0xff]  ;;  %v6041_v62 = vld [vmem:[%s9699_s4 + $0x4d0] sm:$0xff] }
 0x57c   : > { %7736 = vmatprep.subr.mxu1 %v6004_v63  ;;  %7702 = vmatpush3.msra.mxu0 %v5956_v0  ;;  %v6058_v61 = vld [vmem:[%s9699_s4 + $0x558] sm:$0xff]  ;;  %v6073_v63 = vld [vmem:[%s9699_s4 + $0x5d0] sm:$0xff] }
 0x57d   : > { %7737 = vmatpush3.msra.mxu1 %v5988_v1  ;;  %7703 = vmatprep.subr.mxu0 %v5971_v2  ;;  %v6025_v0 = vld [vmem:[%s9699_s4 + $0x450] sm:$0xff]  ;;  %v6040_v2 = vld [vmem:[%s9699_s4 + $0x4c8] sm:$0xff] }
 0x57e   : > { %7738 = vmatprep.subr.mxu1 %v6003_v3  ;;  %7704 = vmatpush3.msra.mxu0 %v5955_v4  ;;  %v6057_v1 = vld [vmem:[%s9699_s4 + $0x550] sm:$0xff]  ;;  %v6072_v3 = vld [vmem:[%s9699_s4 + $0x5c8] sm:$0xff] }
 0x57f   : > { %7739 = vmatpush3.msra.mxu1 %v5987_v5  ;;  %7705 = vmatprep.subr.mxu0 %v5970_v6  ;;  %v6024_v4 = vld [vmem:[%s9699_s4 + $0x448] sm:$0xff] }
 0x580   : > { %7740 = vmatprep.subr.mxu1 %v6002_v8  ;;  %7706 = vmatpush3.msra.mxu0 %v5954_v9  ;;  %v6056_v6 = vld [vmem:[%s9699_s4 + $0x548] sm:$0xff]  ;;  %v6039_v8 = vld [vmem:[%s9699_s4 + $0x4c0] sm:$0xff] }
 0x581   : > { %7741 = vmatpush3.msra.mxu1 %v5986_v10  ;;  %7707 = vmatprep.subr.mxu0 %v5969_v11  ;;  %v6071_v11 = vld [vmem:[%s9699_s4 + $0x5c0] sm:$0xff] }
 0x582   : > { %v7983_v16 = vpop.eup %7982  ;;  %7742 = vmatprep.subr.mxu1 %v6001_v12  ;;  %7708 = vmatpush3.msra.mxu0 %v5953_v17  ;;  %v6023_v12 = vld [vmem:[%s9699_s4 + $0x440] sm:$0xff] }
 0x583   : > { %v7985_v59 = vpop.eup %7984  ;;  %7743 = vmatpush3.msra.mxu1 %v5985_v13  ;;  %7709 = vmatprep.subr.mxu0 %v5968_v14  ;;  %v5875_v36 = vmul.f32 %v8028_v35, %v7983_v16  ;;  %v6055_v14 = vld [vmem:[%s9699_s4 + $0x540] sm:$0xff]  ;;  %v6018_v35 = vld [vmem:[%s9699_s4 + $0x418] sm:$0xff] }
 0x584   : > { %v7987_v23 = vpop.eup %7986  ;;  %v5557_v24 = vpop.f32.mrf.mxu0  ;;  %7744 = vmatprep.subr.mxu1 %v6000_v15  ;;  %7710 = vmatpush3.msra.mxu0 %v5952_v20  ;;  %v5877_v42 = vmul.f32 %v8029_v41, %v7985_v59  ;;  %v6038_v15 = vld [vmem:[%s9699_s4 + $0x4b8] sm:$0xff]  ;;  %v6049_v41 = vld [vmem:[%s9699_s4 + $0x510] sm:$0xff] }
 0x585   : > { %v5628_v60 = vpop.f32.mrf.mxu1  ;;  %v7989_v26 = vpop.eup %7988  ;;  %v7318_v27 = vmul.f32 -1.442695, %v5557_v24  ;;  %7745 = vmatpush3.msra.mxu1 %v5984_v18  ;;  %7711 = vmatprep.subr.mxu0 %v5967_v19  ;;  %v5876_v30 = vmul.f32 %v8026_v29, %v7987_v23  ;;  %v6070_v18 = vld [vmem:[%s9699_s4 + $0x5b8] sm:$0xff]  ;;  %v6069_v23 = vld [vmem:[%s9699_s4 + $0x5b0] sm:$0xff]  ;;  %v6035_v29 = vld [vmem:[%s9699_s4 + $0x4a0] sm:$0xff] }
 0x586   : > { %v7320_v28 = vmul.f32 -1.442695, %v5628_v60  ;;  %v5559_v31 = vpop.f32.mrf.mxu0  ;;  %7746 = vmatprep.subr.mxu1 %v5999_v21  ;;  %7712 = vmatpush3.msra.mxu0 %v5951_v22  ;;  %v5878_v34 = vmul.f32 %v8027_v33, %v7989_v26  ;;  %v6022_v19 = vld [vmem:[%s9699_s4 + $0x438] sm:$0xff]  ;;  %v6037_v22 = vld [vmem:[%s9699_s4 + $0x4b0] sm:$0xff]  ;;  %v6068_v26 = vld [vmem:[%s9699_s4 + $0x5a8] sm:$0xff] }
 0x587   : > { %v5630_v32 = vpop.f32.mrf.mxu1  ;;  %7990 = vpow2.f32 %v7318_v27  ;;  %v7319_v39 = vmul.f32 -1.442695, %v5559_v31  ;;  %6354 = vmatprep.mubr.f32.mxu0 %v5876_v30  ;;  %7747 = vmatpush3.msra.mxu1 %v5983_v25  ;;  %v6054_v21 = vld [vmem:[%s9699_s4 + $0x538] sm:$0xff]  ;;  %v6021_v24 = vld [vmem:[%s9699_s4 + $0x430] sm:$0xff]  ;;  %v6036_v25 = vld [vmem:[%s9699_s4 + $0x4a8] sm:$0xff] }
 0x588   : > { %v7321_v40 = vmul.f32 -1.442695, %v5630_v32  ;;  %7992 = vpow2.f32 %v7320_v28  ;;  %6424 = vmatprep.mubr.f32.mxu1 %v5878_v34  ;;  %6355 = vmatmul.mubr.f32.vlgmr.msra.gmra.mxu0 %v5875_v36  ;;  %v6053_v60 = vld [vmem:[%s9699_s4 + $0x530] sm:$0xff]  ;;  %v6020_v27 = vld [vmem:[%s9699_s4 + $0x428] sm:$0xff]  ;;  %v6067_v30 = vld [vmem:[%s9699_s4 + $0x5a0] sm:$0xff] }
 0x589   : > { %7994 = vpow2.f32 %v7319_v39  ;;  %6425 = vmatmul.mubr.f32.vlgmr.msra.gmra.mxu1 %v5877_v42  ;;  %7751 = vmatprep.subr.mxu0 %v6046_v38  ;;  %v6052_v28 = vld [vmem:[%s9699_s4 + $0x528] sm:$0xff]  ;;  %v6019_v31 = vld [vmem:[%s9699_s4 + $0x420] sm:$0xff]  ;;  %v6034_v33 = vld [vmem:[%s9699_s4 + $0x498] sm:$0xff] }
 0x58a   : > { %7996 = vpow2.f32 %v7321_v40  ;;  %7786 = vmatprep.subr.mxu1 %v6078_v43  ;;  %7752 = vmatpush3.msra.mxu0 %v6030_v44  ;;  %v6051_v32 = vld [vmem:[%s9699_s4 + $0x520] sm:$0xff]  ;;  %v6066_v34 = vld [vmem:[%s9699_s4 + $0x598] sm:$0xff]  ;;  %v6033_v38 = vld [vmem:[%s9699_s4 + $0x490] sm:$0xff] }
 0x58b   : > { %7787 = vmatpush3.msra.mxu1 %v6062_v45  ;;  %7753 = vmatprep.subr.mxu0 %v6045_v46  ;;  %v6050_v36 = vld [vmem:[%s9699_s4 + $0x518] sm:$0xff]  ;;  %v6065_v39 = vld [vmem:[%s9699_s4 + $0x590] sm:$0xff]  ;;  %v6032_v42 = vld [vmem:[%s9699_s4 + $0x488] sm:$0xff] }
 0x58c   : > { %7788 = vmatprep.subr.mxu1 %v6077_v7  ;;  %7754 = vmatpush3.msra.mxu0 %v6029_v47  ;;  %v6017_v40 = vld [vmem:[%s9699_s4 + $0x410] sm:$0xff]  ;;  %v6064_v43 = vld [vmem:[%s9699_s4 + $0x588] sm:$0xff]  ;;  %v6031_v7 = vld [vmem:[%s9699_s4 + $0x480] sm:$0xff] }
 0x58d   : > { %7789 = vmatpush3.msra.mxu1 %v6061_v48  ;;  %7755 = vmatprep.subr.mxu0 %v6044_v37  ;;  %v6016_v44 = vld [vmem:[%s9699_s4 + $0x408] sm:$0xff]  ;;  %v6063_v48 = vld [vmem:[%s9699_s4 + $0x580] sm:$0xff] }
 0x58e   : > { %7790 = vmatprep.subr.mxu1 %v6076_v49  ;;  %7756 = vmatpush3.msra.mxu0 %v6028_v50  ;;  %v6048_v46 = vld [vmem:[%s9699_s4 + $0x508] sm:$0xff]  ;;  %v6015_v37 = vld [vmem:[%s9699_s4 + $0x400] sm:$0xff] }
 0x58f   : > { %7791 = vmatpush3.msra.mxu1 %v6060_v51  ;;  %7757 = vmatprep.subr.mxu0 %v6043_v52  ;;  %v6047_v52 = vld [vmem:[%s9699_s4 + $0x500] sm:$0xff] }
 0x590   : > { %7792 = vmatprep.subr.mxu1 %v6075_v53  ;;  %7758 = vmatpush3.msra.mxu0 %v6027_v54 }
 0x591   : > { %7793 = vmatpush3.msra.mxu1 %v6059_v55  ;;  %7759 = vmatprep.subr.mxu0 %v6042_v56  ;;  %v8030_v56 = vld [vmem:[#allocation2 + $0x20] sm:$0xff] }
 0x592   : > { %7794 = vmatprep.subr.mxu1 %v6074_v57  ;;  %7760 = vmatpush3.msra.mxu0 %v6026_v58 }
 0x593   : > { %7795 = vmatpush3.msra.mxu1 %v6058_v61  ;;  %7761 = vmatprep.subr.mxu0 %v6041_v62  ;;  %v8031_v62 = vld [vmem:[#allocation2 + $0x38] sm:$0xff] }
 0x594   : > { %v7991_v5 = vpop.eup %7990  ;;  %7796 = vmatprep.subr.mxu1 %v6073_v63  ;;  %7762 = vmatpush3.msra.mxu0 %v6025_v0  ;;  %v8032_v0 = vld [vmem:[#allocation2 + $0x40] sm:$0xff] }
 0x595   : > { %v7993_v9 = vpop.eup %7992  ;;  %v5831_v10 = vadd.f32 1.0, %v7991_v5  ;;  %7797 = vmatpush3.msra.mxu1 %v6057_v1  ;;  %7763 = vmatprep.subr.mxu0 %v6040_v2  ;;  %v6110_v2 = vld [vmem:[%s9699_s4 + $0x6f8] sm:$0xff]  ;;  %v8033_v5 = vld [vmem:[#allocation2 + $0x10] sm:$0xff] }
 0x596   : > { %v7995_v17 = vpop.eup %7994  ;;  %v5833_v13 = vadd.f32 1.0, %v7993_v9  ;;  %7798 = vmatprep.subr.mxu1 %v6072_v3  ;;  %7764 = vmatpush3.msra.mxu0 %v6024_v4  ;;  %v6094_v9 = vld [vmem:[%s9699_s4 + $0x678] sm:$0xff] }
 0x597   : > { %v7997_v20 = vpop.eup %7996  ;;  %7998 = vrcp.f32 %v5831_v10  ;;  %v5832_v16 = vadd.f32 1.0, %v7995_v17  ;;  %7799 = vmatpush3.msra.mxu1 %v6056_v6  ;;  %7765 = vmatprep.subr.mxu0 %v6039_v8  ;;  %v6142_v8 = vld [vmem:[%s9699_s4 + $0x7f8] sm:$0xff]  ;;  %v6093_v17 = vld [vmem:[%s9699_s4 + $0x670] sm:$0xff] }
 0x598   : > { %8000 = vrcp.f32 %v5833_v13  ;;  %v5834_v59 = vadd.f32 1.0, %v7997_v20  ;;  %7800 = vmatprep.subr.mxu1 %v6071_v11  ;;  %7766 = vmatpush3.msra.mxu0 %v6023_v12  ;;  %v6126_v10 = vld [vmem:[%s9699_s4 + $0x778] sm:$0xff]  ;;  %v6109_v11 = vld [vmem:[%s9699_s4 + $0x6f0] sm:$0xff]  ;;  %v6092_v20 = vld [vmem:[%s9699_s4 + $0x668] sm:$0xff] }
 0x599   : > { %8002 = vrcp.f32 %v5832_v16  ;;  %7801 = vmatpush3.msra.mxu1 %v6055_v14  ;;  %7767 = vmatprep.subr.mxu0 %v6038_v15  ;;  %v6141_v12 = vld [vmem:[%s9699_s4 + $0x7f0] sm:$0xff]  ;;  %v6108_v14 = vld [vmem:[%s9699_s4 + $0x6e8] sm:$0xff] }
 0x59a   : > { %8004 = vrcp.f32 %v5834_v59  ;;  %7802 = vmatprep.subr.mxu1 %v6070_v18  ;;  %7768 = vmatpush3.msra.mxu0 %v6022_v19  ;;  %v6125_v13 = vld [vmem:[%s9699_s4 + $0x770] sm:$0xff]  ;;  %v6140_v15 = vld [vmem:[%s9699_s4 + $0x7e8] sm:$0xff]  ;;  %v6107_v18 = vld [vmem:[%s9699_s4 + $0x6e0] sm:$0xff] }
 0x59b   : > { %7803 = vmatpush3.msra.mxu1 %v6054_v21  ;;  %7769 = vmatprep.subr.mxu0 %v6037_v22  ;;  %v6124_v16 = vld [vmem:[%s9699_s4 + $0x768] sm:$0xff]  ;;  %v6139_v19 = vld [vmem:[%s9699_s4 + $0x7e0] sm:$0xff]  ;;  %v6106_v22 = vld [vmem:[%s9699_s4 + $0x6d8] sm:$0xff] }
 0x59c   : > { %7804 = vmatprep.subr.mxu1 %v6069_v23  ;;  %7770 = vmatpush3.msra.mxu0 %v6021_v24  ;;  %v6091_v59 = vld [vmem:[%s9699_s4 + $0x660] sm:$0xff]  ;;  %v6138_v23 = vld [vmem:[%s9699_s4 + $0x7d8] sm:$0xff] }
 0x59d   : > { %7805 = vmatpush3.msra.mxu1 %v6053_v60  ;;  %7771 = vmatprep.subr.mxu0 %v6036_v25  ;;  %v6123_v21 = vld [vmem:[%s9699_s4 + $0x760] sm:$0xff]  ;;  %v6090_v24 = vld [vmem:[%s9699_s4 + $0x658] sm:$0xff]  ;;  %v6105_v25 = vld [vmem:[%s9699_s4 + $0x6d0] sm:$0xff] }
 0x59e   : > { %7806 = vmatprep.subr.mxu1 %v6068_v26  ;;  %7772 = vmatpush3.msra.mxu0 %v6020_v27  ;;  %v6122_v60 = vld [vmem:[%s9699_s4 + $0x758] sm:$0xff]  ;;  %v6137_v26 = vld [vmem:[%s9699_s4 + $0x7d0] sm:$0xff] }
 0x59f   : > { %7807 = vmatpush3.msra.mxu1 %v6052_v28  ;;  %7773 = vmatprep.subr.mxu0 %v6035_v29  ;;  %v6089_v27 = vld [vmem:[%s9699_s4 + $0x650] sm:$0xff]  ;;  %v6104_v29 = vld [vmem:[%s9699_s4 + $0x6c8] sm:$0xff] }
 0x5a0   : > { %7808 = vmatprep.subr.mxu1 %v6067_v30  ;;  %7774 = vmatpush3.msra.mxu0 %v6019_v31  ;;  %v6121_v28 = vld [vmem:[%s9699_s4 + $0x750] sm:$0xff]  ;;  %v6136_v30 = vld [vmem:[%s9699_s4 + $0x7c8] sm:$0xff] }
 0x5a1   : > { %7809 = vmatpush3.msra.mxu1 %v6051_v32  ;;  %7775 = vmatprep.subr.mxu0 %v6034_v33  ;;  %v6088_v31 = vld [vmem:[%s9699_s4 + $0x648] sm:$0xff] }
 0x5a2   : > { %7810 = vmatprep.subr.mxu1 %v6066_v34  ;;  %7776 = vmatpush3.msra.mxu0 %v6018_v35  ;;  %v6120_v33 = vld [vmem:[%s9699_s4 + $0x748] sm:$0xff]  ;;  %v6103_v34 = vld [vmem:[%s9699_s4 + $0x6c0] sm:$0xff] }
 0x5a3   : > { %7811 = vmatpush3.msra.mxu1 %v6050_v36  ;;  %7777 = vmatprep.subr.mxu0 %v6033_v38  ;;  %v6135_v38 = vld [vmem:[%s9699_s4 + $0x7c0] sm:$0xff] }
 0x5a4   : > { %v7999_v45 = vpop.eup %7998  ;;  %7812 = vmatprep.subr.mxu1 %v6065_v39  ;;  %7778 = vmatpush3.msra.mxu0 %v6017_v40  ;;  %v6087_v39 = vld [vmem:[%s9699_s4 + $0x640] sm:$0xff] }
 0x5a5   : > { %v8001_v47 = vpop.eup %8000  ;;  %7813 = vmatpush3.msra.mxu1 %v6049_v41  ;;  %7779 = vmatprep.subr.mxu0 %v6032_v42  ;;  %v5879_v1 = vmul.f32 %v8032_v0, %v7999_v45  ;;  %v6119_v42 = vld [vmem:[%s9699_s4 + $0x740] sm:$0xff]  ;;  %v6082_v0 = vld [vmem:[%s9699_s4 + $0x618] sm:$0xff] }
 0x5a6   : > { %v8003_v49 = vpop.eup %8002  ;;  %v5699_v50 = vpop.f32.mrf.mxu0  ;;  %7814 = vmatprep.subr.mxu1 %v6064_v43  ;;  %7780 = vmatpush3.msra.mxu0 %v6016_v44  ;;  %v5881_v6 = vmul.f32 %v8033_v5, %v8001_v47  ;;  %v6102_v43 = vld [vmem:[%s9699_s4 + $0x6b8] sm:$0xff]  ;;  %v6113_v5 = vld [vmem:[%s9699_s4 + $0x710] sm:$0xff] }
 0x5a7   : > { %v5770_v51 = vpop.f32.mrf.mxu1  ;;  %v8005_v53 = vpop.eup %8004  ;;  %v7322_v54 = vmul.f32 -1.442695, %v5699_v50  ;;  %7815 = vmatpush3.msra.mxu1 %v6048_v46  ;;  %7781 = vmatprep.subr.mxu0 %v6031_v7  ;;  %v5880_v57 = vmul.f32 %v8030_v56, %v8003_v49  ;;  %v6134_v46 = vld [vmem:[%s9699_s4 + $0x7b8] sm:$0xff]  ;;  %v6133_v49 = vld [vmem:[%s9699_s4 + $0x7b0] sm:$0xff]  ;;  %v6099_v56 = vld [vmem:[%s9699_s4 + $0x6a0] sm:$0xff] }
 0x5a8   : > { %v7324_v55 = vmul.f32 -1.442695, %v5770_v51  ;;  %v5701_v58 = vpop.f32.mrf.mxu0  ;;  %7816 = vmatprep.subr.mxu1 %v6063_v48  ;;  %7782 = vmatpush3.msra.mxu0 %v6015_v37  ;;  %v5882_v63 = vmul.f32 %v8031_v62, %v8005_v53  ;;  %v6086_v7 = vld [vmem:[%s9699_s4 + $0x638] sm:$0xff]  ;;  %v6101_v37 = vld [vmem:[%s9699_s4 + $0x6b0] sm:$0xff]  ;;  %v6132_v53 = vld [vmem:[%s9699_s4 + $0x7a8] sm:$0xff] }
 0x5a9   : > { %v5772_v61 = vpop.f32.mrf.mxu1  ;;  %8006 = vpow2.f32 %v7322_v54  ;;  %v7323_v3 = vmul.f32 -1.442695, %v5701_v58  ;;  %6494 = vmatprep.mubr.f32.mxu0 %v5880_v57  ;;  %7817 = vmatpush3.msra.mxu1 %v6047_v52  ;;  %v6118_v48 = vld [vmem:[%s9699_s4 + $0x738] sm:$0xff]  ;;  %v6085_v50 = vld [vmem:[%s9699_s4 + $0x630] sm:$0xff]  ;;  %v6100_v52 = vld [vmem:[%s9699_s4 + $0x6a8] sm:$0xff] }
 0x5aa   : > { %v7325_v4 = vmul.f32 -1.442695, %v5772_v61  ;;  %8008 = vpow2.f32 %v7324_v55  ;;  %6564 = vmatprep.mubr.f32.mxu1 %v5882_v63  ;;  %6495 = vmatmul.mubr.f32.vlgmr.msra.gmra.mxu0 %v5879_v1  ;;  %v6117_v51 = vld [vmem:[%s9699_s4 + $0x730] sm:$0xff]  ;;  %v6084_v54 = vld [vmem:[%s9699_s4 + $0x628] sm:$0xff]  ;;  %v6131_v57 = vld [vmem:[%s9699_s4 + $0x7a0] sm:$0xff] }
 0x5ab   : > { %8010 = vpow2.f32 %v7323_v3  ;;  %6565 = vmatmul.mubr.f32.vlgmr.msra.gmra.mxu1 %v5881_v6  ;;  %7821 = vmatprep.subr.mxu0 %v6110_v2  ;;  %v6116_v55 = vld [vmem:[%s9699_s4 + $0x728] sm:$0xff]  ;;  %v6083_v58 = vld [vmem:[%s9699_s4 + $0x620] sm:$0xff]  ;;  %v6098_v62 = vld [vmem:[%s9699_s4 + $0x698] sm:$0xff] }
 0x5ac   : > { %8012 = vpow2.f32 %v7325_v4  ;;  %7856 = vmatprep.subr.mxu1 %v6142_v8  ;;  %7822 = vmatpush3.msra.mxu0 %v6094_v9  ;;  %v6115_v61 = vld [vmem:[%s9699_s4 + $0x720] sm:$0xff]  ;;  %v6130_v63 = vld [vmem:[%s9699_s4 + $0x798] sm:$0xff]  ;;  %v6097_v2 = vld [vmem:[%s9699_s4 + $0x690] sm:$0xff] }
 0x5ad   : > { %7857 = vmatpush3.msra.mxu1 %v6126_v10  ;;  %7823 = vmatprep.subr.mxu0 %v6109_v11  ;;  %v6114_v1 = vld [vmem:[%s9699_s4 + $0x718] sm:$0xff]  ;;  %v6129_v3 = vld [vmem:[%s9699_s4 + $0x790] sm:$0xff]  ;;  %v6096_v6 = vld [vmem:[%s9699_s4 + $0x688] sm:$0xff] }
 0x5ae   : > { %7858 = vmatprep.subr.mxu1 %v6141_v12  ;;  %7824 = vmatpush3.msra.mxu0 %v6093_v17  ;;  %v6081_v4 = vld [vmem:[%s9699_s4 + $0x610] sm:$0xff]  ;;  %v6128_v8 = vld [vmem:[%s9699_s4 + $0x788] sm:$0xff]  ;;  %v6095_v12 = vld [vmem:[%s9699_s4 + $0x680] sm:$0xff] }
 0x5af   : > { %7859 = vmatpush3.msra.mxu1 %v6125_v13  ;;  %7825 = vmatprep.subr.mxu0 %v6108_v14  ;;  %v6080_v9 = vld [vmem:[%s9699_s4 + $0x608] sm:$0xff]  ;;  %v6127_v13 = vld [vmem:[%s9699_s4 + $0x780] sm:$0xff] }
 0x5b0   : > { %7860 = vmatprep.subr.mxu1 %v6140_v15  ;;  %7826 = vmatpush3.msra.mxu0 %v6092_v20  ;;  %v6112_v11 = vld [vmem:[%s9699_s4 + $0x708] sm:$0xff]  ;;  %v6079_v14 = vld [vmem:[%s9699_s4 + $0x600] sm:$0xff] }
 0x5b1   : > { %7861 = vmatpush3.msra.mxu1 %v6124_v16  ;;  %7827 = vmatprep.subr.mxu0 %v6107_v18  ;;  %v6111_v20 = vld [vmem:[%s9699_s4 + $0x700] sm:$0xff]  ;;  %v8034_v18 = vld [vmem:[#allocation2 + $0x70] sm:$0xff] }
 0x5b2   : > { %7862 = vmatprep.subr.mxu1 %v6139_v19  ;;  %7828 = vmatpush3.msra.mxu0 %v6091_v59  ;;  %v8035_v59 = vld [vmem:[#allocation2 + $0x28] sm:$0xff] }
 0x5b3   : > { %7863 = vmatpush3.msra.mxu1 %v6123_v21  ;;  %7829 = vmatprep.subr.mxu0 %v6106_v22  ;;  %v8036_v22 = vld [vmem:[#allocation2 + $0x60] sm:$0xff] }
 0x5b4   : > { %7864 = vmatprep.subr.mxu1 %v6138_v23  ;;  %7830 = vmatpush3.msra.mxu0 %v6090_v24  ;;  %v8037_v24 = vld [vmem:[#allocation2 + $0x78] sm:$0xff] }
 0x5b5   : > { %7865 = vmatpush3.msra.mxu1 %v6122_v60  ;;  %7831 = vmatprep.subr.mxu0 %v6105_v25 }
 0x5b6   : > { %v8007_v32 = vpop.eup %8006  ;;  %7866 = vmatprep.subr.mxu1 %v6137_v26  ;;  %7832 = vmatpush3.msra.mxu0 %v6089_v27 }
 0x5b7   : > { %v8009_v35 = vpop.eup %8008  ;;  %v5835_v36 = vadd.f32 1.0, %v8007_v32  ;;  %7867 = vmatpush3.msra.mxu1 %v6121_v28  ;;  %7833 = vmatprep.subr.mxu0 %v6104_v29 }
 0x5b8   : > { %v8011_v40 = vpop.eup %8010  ;;  %v5837_v41 = vadd.f32 1.0, %v8009_v35  ;;  %7868 = vmatprep.subr.mxu1 %v6136_v30  ;;  %7834 = vmatpush3.msra.mxu0 %v6088_v31  ;;  %v7326_v30 = vld [vmem:[%s9700_s5] ss:$0 sm:$0xff] }
 0x5b9   : > { %v8013_v44 = vpop.eup %8012  ;;  %8014 = vrcp.f32 %v5835_v36  ;;  %v5836_v45 = vadd.f32 1.0, %v8011_v40  ;;  %7869 = vmatpush3.msra.mxu1 %v6120_v33  ;;  %7835 = vmatprep.subr.mxu0 %v6103_v34 }
 0x5ba   : > { %8016 = vrcp.f32 %v5837_v41  ;;  %v5838_v47 = vadd.f32 1.0, %v8013_v44  ;;  %7870 = vmatprep.subr.mxu1 %v6135_v38  ;;  %7836 = vmatpush3.msra.mxu0 %v6087_v39 }
 0x5bb   : > { %8018 = vrcp.f32 %v5836_v45  ;;  %7871 = vmatpush3.msra.mxu1 %v6119_v42  ;;  %7837 = vmatprep.subr.mxu0 %v6102_v43 }
 0x5bc   : > { %8020 = vrcp.f32 %v5838_v47  ;;  %7872 = vmatprep.subr.mxu1 %v6134_v46  ;;  %7838 = vmatpush3.msra.mxu0 %v6086_v7 }
 0x5bd   : > { %7873 = vmatpush3.msra.mxu1 %v6118_v48  ;;  %7839 = vmatprep.subr.mxu0 %v6101_v37 }
 0x5be   : > { %7874 = vmatprep.subr.mxu1 %v6133_v49  ;;  %7840 = vmatpush3.msra.mxu0 %v6085_v50 }
 0x5bf   : > { %7875 = vmatpush3.msra.mxu1 %v6117_v51  ;;  %7841 = vmatprep.subr.mxu0 %v6100_v52 }
 0x5c0   : > { %7876 = vmatprep.subr.mxu1 %v6132_v53  ;;  %7842 = vmatpush3.msra.mxu0 %v6084_v54 }
 0x5c1   : > { %7877 = vmatpush3.msra.mxu1 %v6116_v55  ;;  %7843 = vmatprep.subr.mxu0 %v6099_v56 }
 0x5c2   : > { %7878 = vmatprep.subr.mxu1 %v6131_v57  ;;  %7844 = vmatpush3.msra.mxu0 %v6083_v58 }
 0x5c3   : > { %7879 = vmatpush3.msra.mxu1 %v6115_v61  ;;  %7845 = vmatprep.subr.mxu0 %v6098_v62 }
 0x5c4   : > { %7880 = vmatprep.subr.mxu1 %v6130_v63  ;;  %7846 = vmatpush3.msra.mxu0 %v6082_v0 }
 0x5c5   : > { %7881 = vmatpush3.msra.mxu1 %v6114_v1  ;;  %7847 = vmatprep.subr.mxu0 %v6097_v2 }
 0x5c6   : > { %v8015_v10 = vpop.eup %8014  ;;  %7882 = vmatprep.subr.mxu1 %v6129_v3  ;;  %7848 = vmatpush3.msra.mxu0 %v6081_v4 }
 0x5c7   : > { %v8017_v17 = vpop.eup %8016  ;;  %7883 = vmatpush3.msra.mxu1 %v6113_v5  ;;  %7849 = vmatprep.subr.mxu0 %v6096_v6  ;;  %v5883_v23 = vmul.f32 %v8036_v22, %v8015_v10 }
 0x5c8   : > { %v8019_v15 = vpop.eup %8018  ;;  %7884 = vmatprep.subr.mxu1 %v6128_v8  ;;  %7850 = vmatpush3.msra.mxu0 %v6080_v9  ;;  %v5885_v60 = vmul.f32 %v8037_v24, %v8017_v17 }
 0x5c9   : > { %v8021_v16 = vpop.eup %8020  ;;  %7885 = vmatpush3.msra.mxu1 %v6112_v11  ;;  %7851 = vmatprep.subr.mxu0 %v6095_v12  ;;  %v5884_v19 = vmul.f32 %v8034_v18, %v8019_v15 }
 0x5ca   : > { %7886 = vmatprep.subr.mxu1 %v6127_v13  ;;  %7852 = vmatpush3.msra.mxu0 %v6079_v14  ;;  %v5886_v21 = vmul.f32 %v8035_v59, %v8021_v16 }
 0x5cb   : > { %6634 = vmatprep.mubr.f32.mxu0 %v5884_v19  ;;  %7887 = vmatpush3.msra.mxu1 %v6111_v20 }
 0x5cc   : > { %6704 = vmatprep.mubr.f32.mxu1 %v5886_v21  ;;  %6635 = vmatmul.mubr.f32.vlgmr.msra.gmra.mxu0 %v5883_v23 }
 0x5cd   : > { %6705 = vmatmul.mubr.f32.vlgmr.msra.gmra.mxu1 %v5885_v60 }
 0x627   : > { %v7643_v25 = vpop.f32.mrf.mxu0 }
 0x628   : > { %v7678_v27 = vpop.f32.mrf.mxu1 }
 0x629   : > { %v7644_v26 = vpop.f32.mrf.mxu0 }
 0x62a   : > { %v7645_v29 = vadd.f32 %v7644_v26, %v7643_v25  ;;  %v7679_v31 = vpop.f32.mrf.mxu1 }
 0x62b   : > { %v7680_v36 = vadd.f32 %v7679_v31, %v7678_v27 }
 0x62c   : > { %v6217_v33 = vadd.f32 %v7645_v29, %v7326_v30 }
 0x62e   : > { %v6287_v39 = vadd.f32 %v7680_v36, %v6217_v33 }
 0x648   : > { %v7713_v28 = vpop.f32.mrf.mxu0 }
 0x649   : > { %v7748_v34 = vpop.f32.mrf.mxu1 }
 0x64a   : > { %v7714_v32 = vpop.f32.mrf.mxu0 }
 0x64b   : > { %v7715_v38 = vadd.f32 %v7714_v32, %v7713_v28  ;;  %v7749_v40 = vpop.f32.mrf.mxu1 }
 0x64c   : > { %v7750_v44 = vadd.f32 %v7749_v40, %v7748_v34 }
 0x64d   : > { %v6357_v42 = vadd.f32 %v7715_v38, %v6287_v39 }
 0x64f   : > { %v6427_v46 = vadd.f32 %v7750_v44, %v6357_v42 }
 0x66a   : > { %v7783_v35 = vpop.f32.mrf.mxu0 }
 0x66b   : > { %v7818_v43 = vpop.f32.mrf.mxu1 }
 0x66c   : > { %v7784_v41 = vpop.f32.mrf.mxu0 }
 0x66d   : > { %v7785_v45 = vadd.f32 %v7784_v41, %v7783_v35  ;;  %v7819_v7 = vpop.f32.mrf.mxu1 }
 0x66e   : > { %v7820_v37 = vadd.f32 %v7819_v7, %v7818_v43 }
 0x66f   : > { %v6497_v47 = vadd.f32 %v7785_v45, %v6427_v46 }
 0x671   : > { %v6567_v51 = vadd.f32 %v7820_v37, %v6497_v47 }
 0x68c   : > { %v7853_v48 = vpop.f32.mrf.mxu0 }
 0x68d   : > { %v7888_v49 = vpop.f32.mrf.mxu1 }
 0x68e   : > { %v7854_v50 = vpop.f32.mrf.mxu0 }
 0x68f   : > { %v7855_v52 = vadd.f32 %v7854_v50, %v7853_v48  ;;  %v7889_v53 = vpop.f32.mrf.mxu1 }
 0x690   : > { %v7890_v55 = vadd.f32 %v7889_v53, %v7888_v49 }
 0x691   : > { %v6637_v54 = vadd.f32 %v7855_v52, %v6567_v51 }
 0x693   : > { %v6707_v56 = vadd.f32 %v7890_v55, %v6637_v54 }
 0x695   : > { %6710 = vst [vmem:[%s9701_s6] sm:$0xff] %v6707_v56 }
 0x696 PF: > { %s9714_s11 = smov %s8276_s21  ;;  %p17_p1 = scmp.ge.s32.totalorder %s8266_s18, 9  }
 0x697   : > { %s9715_s21 = smov %s8148_s22  ;;  %s9716_s22 = smov %s8152_s23 }
 0x698   : > { %s9717_s23 = smov %s9714_s11  ;;  %s9718_s24 = smov %s8266_s18 }
 0x699   :  { %19 = sbr.rel (!%p17_p1) target bundleno = 4 (0x4), region = 99 }
 0x69e   :  { %6722 = vsyncpa [#allocation4], 1 }
 0x69f   :  { %6724 = vsyncpa [#allocation4 + $0x1], 1 }
 0x6a0   :  { %6725 = vsyncpa [#allocation6], 1 }

</bundles_post_ra>
